<compile_context>
chip_gen: v5e
topology: v5e:2x2
jax: 0.10.0
libtpu: 0.0.40
codegen_flags: <defaults>
</compile_context>

<pallas_src>
import functools

import jax
import jax.numpy as jnp
import numpy as np
from jax import lax
from jax.experimental import pallas as pl
from jax.experimental.pallas import tpu as pltpu


# --------------------------- shared gate nonlinearity ------------------------


def _sigmoid(x):
    # Mathematically identical to sigmoid; lowers to a single EUP tanh instead
    # of exp + reciprocal (the mul/add are free VALU filler).
    return 0.5 * jnp.tanh(0.5 * x) + 0.5


# --------------------------------- kernel -----------------------------------


def _mann_lstm_kernel(x_ref, wih1_ref, whh1_ref, b1_ref, w2_ref, b2_ref,
                      o_ref,
                      xw1_ref, h1_ref, c1_ref, h2_ref, c2_ref,
                      *, tc, hp, npad, unroll):
    """One grid step == one chunk of `tc` timesteps of the stacked LSTMs.

    Grid = (batch_tiles [parallel], time_chunks [arbitrary/sequential]).
    Hidden/cell state persists across time chunks in VMEM scratch; within a
    chunk it is carried through a fori_loop as plain values (h in the matmul
    dtype, c in f32).
    """
    t_chunk = pl.program_id(1)

    @pl.when(t_chunk == 0)
    def _():
        h1_ref[...] = jnp.zeros_like(h1_ref)
        c1_ref[...] = jnp.zeros_like(c1_ref)
        h2_ref[...] = jnp.zeros_like(h2_ref)
        c2_ref[...] = jnp.zeros_like(c2_ref)

    bt = o_ref.shape[1]
    d = x_ref.shape[2]
    mm_dtype = whh1_ref.dtype

    # ---- hoisted input projection: ONE large-M matmul per chunk ------------
    # xw1[t] = x[t] @ wih1 + b1   (b1 folded here, once per chunk)
    x_all = x_ref[...].reshape(tc * bt, d)                         # mm_dtype
    xw = jnp.dot(x_all, wih1_ref[...], preferred_element_type=jnp.float32)
    xw1_ref[...] = (xw + b1_ref[...]).reshape(tc, bt, 4 * hp)

    # Hoisted once per chunk (NOT per timestep).
    whh1 = whh1_ref[...]
    w2 = w2_ref[...]                                               # [Hp+Np, 4Np]
    b2 = b2_ref[...]                                               # [1, 4Np] f32

    def gates_to_state(g, c, gd):
        # Gate order (i, f, g, o) == PyTorch; all elementwise math in f32.
        i = _sigmoid(g[:, 0 * gd:1 * gd])
        f = _sigmoid(g[:, 1 * gd:2 * gd])
        gg = jnp.tanh(g[:, 2 * gd:3 * gd])
        o = _sigmoid(g[:, 3 * gd:4 * gd])
        c_new = f * c + i * gg
        h_new = o * jnp.tanh(c_new)
        return h_new, c_new

    def step(i, carry):
        h1, c1, h2, c2 = carry                     # h in mm_dtype, c in f32
        # Layer 1: hoisted x-projection + recurrent matmul only.
        g1 = xw1_ref[i] + jnp.dot(h1, whh1, preferred_element_type=jnp.float32)
        h1f, c1 = gates_to_state(g1, c1, hp)
        h1 = h1f.astype(mm_dtype)
        # Layer 2: fused [h1, h2] @ [wih2; whh2]  (single K = Hp+Np contraction).
        hcat = jnp.concatenate([h1, h2], axis=-1)
        g2 = jnp.dot(hcat, w2, preferred_element_type=jnp.float32) + b2
        h2f, c2 = gates_to_state(g2, c2, npad)
        o_ref[i] = h2f                             # lane-dense f32 [BT, Np]
        h2 = h2f.astype(mm_dtype)
        return (h1, c1, h2, c2)

    carry0 = (h1_ref[...], c1_ref[...], h2_ref[...], c2_ref[...])
    h1, c1, h2, c2 = lax.fori_loop(0, tc, step, carry0, unroll=unroll)

    h1_ref[...] = h1
    c1_ref[...] = c1
    h2_ref[...] = h2
    c2_ref[...] = c2


# --------------------------------- wrapper ----------------------------------


def _round_up(x, m):
    return (x + m - 1) // m * m


def _pad_gate_cols(w, h, hp):
    """[..., 4*h] -> [..., 4*hp]; each of the 4 gate blocks zero-padded to hp."""
    if hp == h:
        return w
    lead = w.shape[:-1]
    w4 = w.reshape(*lead, 4, h)
    w4 = jnp.pad(w4, [(0, 0)] * len(lead) + [(0, 0), (0, hp - h)])
    return w4.reshape(*lead, 4 * hp)


def _pad_rows(w, r, rp):
    if rp == r:
        return w
    return jnp.pad(w, ((0, rp - r),) + ((0, 0),) * (w.ndim - 1))


def _pick_time_chunk(T, requested):
    """Prefer a chunk that divides T so no padded timesteps are computed."""
    tc = max(1, min(requested, T))
    if T % tc == 0:
        return tc
    best = 1
    for d in range(tc, 0, -1):
        if T % d == 0:
            best = d
            break
    if best >= max(4, tc // 4):
        return best
    return tc   # fall back to padding T up to a multiple of tc


def mann_forward(params, input_images, input_labels, hidden_dim, *,
                 matmul_dtype=jnp.bfloat16, time_chunk=16):
    """input_images: [B, K+1, N, 784] f32, input_labels: [B, K+1, N, N] f32."""
    B, K1, N, d_img = input_images.shape
    D = d_img + N
    T = K1 * N
    H = hidden_dim

    LANE, SUBLANE = 128, 8
    Hp = _round_up(H, LANE)          # padded hidden dim (gate slices lane-aligned)
    Np = _round_up(N, LANE)          # padded num_classes for layer 2

    # Batch is the MXU M-dimension; keep >=2 tiles when possible so both v7x
    # TensorCores get work via the "parallel" axis.
    if B >= 256:
        BT = 128
    elif B > 8:
        BT = min(128, _round_up(-(-B // 2), SUBLANE))
    else:
        BT = _round_up(max(B, 1), SUBLANE)
    Bp = _round_up(B, BT)
    nb = Bp // BT

    Tc = _pick_time_chunk(T, time_chunk)
    Tp = _round_up(T, Tc)
    nt = Tp // Tc
    unroll = True if Tc <= 8 else 4   # bound live ranges / spills at larger chunks

    # ---- build the time-major input sequence --------------------------------
    labels = input_labels.at[:, -1, :, :].set(0.0)       # zero the query-step labels
    # Cast to the matmul dtype BEFORE transpose/pad (halves wrapper HBM traffic).
    x = jnp.concatenate([input_images, labels], axis=-1).astype(matmul_dtype)
    x = x.reshape(B, T, D).transpose(1, 0, 2)             # [T, B, D] time-major
    x = jnp.pad(x, ((0, Tp - T), (0, Bp - B), (0, 0)))

    # ---- pad weights so every gate block lands on a 128-lane boundary -------
    wih1 = _pad_gate_cols(params["wih1"], H, Hp).astype(matmul_dtype)               # [D,  4Hp]
    whh1 = _pad_rows(_pad_gate_cols(params["whh1"], H, Hp), H, Hp).astype(matmul_dtype)   # [Hp, 4Hp]
    b1 = _pad_gate_cols(params["b1"], H, Hp).astype(jnp.float32)                    # [1,  4Hp]
    wih2p = _pad_rows(_pad_gate_cols(params["wih2"], N, Np), H, Hp)                 # [Hp, 4Np]
    whh2p = _pad_rows(_pad_gate_cols(params["whh2"], N, Np), N, Np)                 # [Np, 4Np]
    w2 = jnp.concatenate([wih2p, whh2p], axis=0).astype(matmul_dtype)               # [Hp+Np, 4Np]
    b2 = _pad_gate_cols(params["b2"], N, Np).astype(jnp.float32)                    # [1,  4Np]

    # Weights/biases: whole-array, non-pipelined, single-buffered VMEM operands.
    vmem_whole = pl.BlockSpec(memory_space=pltpu.MemorySpace.VMEM)

    out = pl.pallas_call(
        functools.partial(_mann_lstm_kernel, tc=Tc, hp=Hp, npad=Np, unroll=unroll),
        out_shape=jax.ShapeDtypeStruct((Tp, Bp, Np), jnp.float32),
        grid_spec=pltpu.PrefetchScalarGridSpec(
            num_scalar_prefetch=0,
            grid=(nb, nt),
            in_specs=[
                pl.BlockSpec((Tc, BT, D), lambda b, t: (t, b, 0)),   # x chunk (pipelined)
                vmem_whole, vmem_whole, vmem_whole,                  # wih1, whh1, b1
                vmem_whole, vmem_whole,                              # W2, b2
            ],
            out_specs=pl.BlockSpec((Tc, BT, Np), lambda b, t: (t, b, 0)),
            scratch_shapes=[
                pltpu.VMEM((Tc, BT, 4 * Hp), jnp.float32),   # hoisted x-projection
                pltpu.VMEM((BT, Hp), matmul_dtype),          # h1 (across time chunks)
                pltpu.VMEM((BT, Hp), jnp.float32),           # c1
                pltpu.VMEM((BT, Np), matmul_dtype),          # h2
                pltpu.VMEM((BT, Np), jnp.float32),           # c2
            ],
        ),
        compiler_params=pltpu.CompilerParams(
            dimension_semantics=("parallel", "arbitrary"),
            vmem_limit_bytes=48 * 1024 * 1024,   # <= v7x 64 MiB; ample on v5e/v6e
        ),
    )(x, wih1, whh1, b1, w2, b2)

    out = out[:T, :B, :N]                                 # drop time/batch/lane padding
    return out.transpose(1, 0, 2).reshape(B, K1, N, N)


# ---------------- deterministic parameter init (matches module __init__) ----


def _xavier_uniform(key, shape):
    fan_out, fan_in = shape
    limit = float(np.sqrt(6.0 / (fan_in + fan_out)))
    return jax.random.uniform(key, shape, jnp.float32, -limit, limit)


def _orthogonal(key, shape):
    rows, cols = shape
    a = jax.random.normal(key, (rows, cols), jnp.float32)
    q, r = jnp.linalg.qr(a)
    d = jnp.diagonal(r)
    q = q * jnp.where(d == 0, 1.0, jnp.sign(d))
    return q


def init_mann_params(key, num_classes, hidden_dim, img_dim=784):
    D = img_dim + num_classes
    k1, k2, k3, k4 = jax.random.split(key, 4)
    # layer1: LSTM(num_classes + 784 -> hidden_dim)
    wih1 = _xavier_uniform(k1, (4 * hidden_dim, D)).T               # [D, 4H]
    whh1 = _orthogonal(k2, (4 * hidden_dim, hidden_dim)).T          # [H, 4H]
    b1 = jnp.zeros((1, 4 * hidden_dim), jnp.float32)                # b_ih + b_hh = 0
    # layer2: LSTM(hidden_dim -> num_classes)
    wih2 = _xavier_uniform(k3, (4 * num_classes, hidden_dim)).T     # [H, 4N]
    whh2 = _orthogonal(k4, (4 * num_classes, num_classes)).T        # [N, 4N]
    b2 = jnp.zeros((1, 4 * num_classes), jnp.float32)
    return dict(wih1=wih1, whh1=whh1, b1=b1, wih2=wih2, whh2=whh2, b2=b2)


# ---------------- pure-JAX reference (for correctness check) ----------------


def _lstm_ref(x_tbd, wih, whh, b, H, matmul_dtype=jnp.float32):
    B = x_tbd.shape[1]
    wih_c = wih.astype(matmul_dtype)
    whh_c = whh.astype(matmul_dtype)

    def step(carry, x_t):
        h, c = carry
        gates = (jnp.dot(x_t.astype(matmul_dtype), wih_c,
                         preferred_element_type=jnp.float32)
                 + jnp.dot(h.astype(matmul_dtype), whh_c,
                           preferred_element_type=jnp.float32)
                 + b)
        i = _sigmoid(gates[:, 0 * H:1 * H])
        f = _sigmoid(gates[:, 1 * H:2 * H])
        g = jnp.tanh(gates[:, 2 * H:3 * H])
        o = _sigmoid(gates[:, 3 * H:4 * H])
        c = f * c + i * g
        h = o * jnp.tanh(c)
        return (h, c), h

    init = (jnp.zeros((B, H), jnp.float32), jnp.zeros((B, H), jnp.float32))
    _, hs = jax.lax.scan(step, init, x_tbd)
    return hs


def mann_forward_ref(params, input_images, input_labels, hidden_dim,
                     matmul_dtype=jnp.float32):
    B, K1, N, d_img = input_images.shape
    labels = input_labels.at[:, -1, :, :].set(0.0)
    x = jnp.concatenate([input_images, labels], axis=-1)
    x = x.reshape(B, K1 * N, d_img + N).transpose(1, 0, 2)
    h1 = _lstm_ref(x, params["wih1"], params["whh1"], params["b1"],
                   hidden_dim, matmul_dtype)
    h2 = _lstm_ref(h1, params["wih2"], params["whh2"], params["b2"],
                   N, matmul_dtype)
    return h2.transpose(1, 0, 2).reshape(B, K1, N, N)


# TODO(synk): MANN.loss_function is an unimplemented stub in the reference
# module; only the forward pass is implemented here.


if __name__ == "__main__":
    B, K, N, H, IMG = 2, 1, 4, 32, 784          # batch, shots, classes, hidden, img dim
    key = jax.random.PRNGKey(0)
    k_param, k_img, k_lbl = jax.random.split(key, 3)

    params = init_mann_params(k_param, num_classes=N, hidden_dim=H, img_dim=IMG)

    input_images = jax.random.uniform(k_img, (B, K + 1, N, IMG), jnp.float32)
    label_idx = jax.random.randint(k_lbl, (B, K + 1, N), 0, N)
    input_labels = jax.nn.one_hot(label_idx, N, dtype=jnp.float32)   # [B, K+1, N, N]

    # Strict check: f32 matmul path vs. pure-f32 JAX reference.
    preds_f32 = mann_forward(params, input_images, input_labels, hidden_dim=H,
                             matmul_dtype=jnp.float32)
    preds_f32 = jax.block_until_ready(preds_f32)
    assert preds_f32.shape == (B, K + 1, N, N), preds_f32.shape
    ref_f32 = mann_forward_ref(params, input_images, input_labels, hidden_dim=H,
                               matmul_dtype=jnp.float32)
    np.testing.assert_allclose(np.asarray(preds_f32), np.asarray(ref_f32),
                               rtol=1e-5, atol=1e-5)

    # Fast path: bf16 matmul operands (f32 accumulation / gate math) vs. a
    # dtype-mirrored reference.
    preds_bf16 = mann_forward(params, input_images, input_labels, hidden_dim=H,
                              matmul_dtype=jnp.bfloat16)
    preds_bf16 = jax.block_until_ready(preds_bf16)
    ref_bf16 = mann_forward_ref(params, input_images, input_labels, hidden_dim=H,
                                matmul_dtype=jnp.bfloat16)
    np.testing.assert_allclose(np.asarray(preds_bf16), np.asarray(ref_bf16),
                               rtol=1e-3, atol=1e-3)

    print("KERNEL_OK")
</pallas_src>

<mosaic_0001>
module attributes {stable_mosaic.version = 11 : i64} {
  func.func @_mann_lstm_kernel(%arg0: i32, %arg1: i32, %arg2: memref<8x8x788xf32, #tpu.memory_space<vmem>>, %arg3: memref<788x512xf32, #tpu.memory_space<vmem>>, %arg4: memref<128x512xf32, #tpu.memory_space<vmem>>, %arg5: memref<1x512xf32, #tpu.memory_space<vmem>>, %arg6: memref<256x512xf32, #tpu.memory_space<vmem>>, %arg7: memref<1x512xf32, #tpu.memory_space<vmem>>, %arg8: memref<8x8x128xf32, #tpu.memory_space<vmem>>, %arg9: memref<8x8x512xf32, #tpu.memory_space<vmem>>, %arg10: memref<8x128xf32, #tpu.memory_space<vmem>>, %arg11: memref<8x128xf32, #tpu.memory_space<vmem>>, %arg12: memref<8x128xf32, #tpu.memory_space<vmem>>, %arg13: memref<8x128xf32, #tpu.memory_space<vmem>>) attributes {dimension_semantics = [#tpu.dimension_semantics<parallel>, #tpu.dimension_semantics<arbitrary>], iteration_bounds = array<i64: 1, 1>, scalar_prefetch = 0 : i64, scratch_operands = 5 : i64, tpu.core_type = #tpu.core_type<tc>, window_params = [{transform_indices = @transform_0, window_bounds = array<i64: 8, 8, 788>}, {pipeline_mode = #tpu.pipeline_mode<synchronous>, transform_indices = @transform_1, window_bounds = array<i64: 788, 512>}, {pipeline_mode = #tpu.pipeline_mode<synchronous>, transform_indices = @transform_2, window_bounds = array<i64: 128, 512>}, {pipeline_mode = #tpu.pipeline_mode<synchronous>, transform_indices = @transform_3, window_bounds = array<i64: 1, 512>}, {pipeline_mode = #tpu.pipeline_mode<synchronous>, transform_indices = @transform_4, window_bounds = array<i64: 256, 512>}, {pipeline_mode = #tpu.pipeline_mode<synchronous>, transform_indices = @transform_5, window_bounds = array<i64: 1, 512>}, {transform_indices = @transform_6, window_bounds = array<i64: 8, 8, 128>}]} {
    %c0_i32 = arith.constant 0 : i32
    %0 = arith.cmpi eq, %arg1, %c0_i32 : i32
    %1 = arith.extui %0 : i1 to i32
    %c0_i32_0 = arith.constant 0 : i32
    %2 = arith.cmpi ne, %1, %c0_i32_0 : i32
    scf.if %2 {
      %cst_225 = arith.constant 0.000000e+00 : f32
      %623 = vector.broadcast %cst_225 : f32 to vector<8x128xf32>
      %c0_226 = arith.constant 0 : index
      %c0_227 = arith.constant 0 : index
      %624 = vector.load %arg10[%c0_226, %c0_227] : memref<8x128xf32, #tpu.memory_space<vmem>>, vector<8x128xf32>
      tpu.vector_store %arg10[%c0_226, %c0_227], %623 {strides = array<i32>} : memref<8x128xf32, #tpu.memory_space<vmem>>, vector<8x128xf32>,
      %cst_228 = arith.constant 0.000000e+00 : f32
      %625 = vector.broadcast %cst_228 : f32 to vector<8x128xf32>
      %c0_229 = arith.constant 0 : index
      %c0_230 = arith.constant 0 : index
      %626 = vector.load %arg11[%c0_229, %c0_230] : memref<8x128xf32, #tpu.memory_space<vmem>>, vector<8x128xf32>
      tpu.vector_store %arg11[%c0_229, %c0_230], %625 {strides = array<i32>} : memref<8x128xf32, #tpu.memory_space<vmem>>, vector<8x128xf32>,
      %cst_231 = arith.constant 0.000000e+00 : f32
      %627 = vector.broadcast %cst_231 : f32 to vector<8x128xf32>
      %c0_232 = arith.constant 0 : index
      %c0_233 = arith.constant 0 : index
      %628 = vector.load %arg12[%c0_232, %c0_233] : memref<8x128xf32, #tpu.memory_space<vmem>>, vector<8x128xf32>
      tpu.vector_store %arg12[%c0_232, %c0_233], %627 {strides = array<i32>} : memref<8x128xf32, #tpu.memory_space<vmem>>, vector<8x128xf32>,
      %cst_234 = arith.constant 0.000000e+00 : f32
      %629 = vector.broadcast %cst_234 : f32 to vector<8x128xf32>
      %c0_235 = arith.constant 0 : index
      %c0_236 = arith.constant 0 : index
      %630 = vector.load %arg13[%c0_235, %c0_236] : memref<8x128xf32, #tpu.memory_space<vmem>>, vector<8x128xf32>
      tpu.vector_store %arg13[%c0_235, %c0_236], %629 {strides = array<i32>} : memref<8x128xf32, #tpu.memory_space<vmem>>, vector<8x128xf32>,
    } else {
    }
    %c0 = arith.constant 0 : index
    %c0_1 = arith.constant 0 : index
    %c0_2 = arith.constant 0 : index
    %3 = vector.load %arg2[%c0, %c0_1, %c0_2] : memref<8x8x788xf32, #tpu.memory_space<vmem>>, vector<8x8x788xf32>
    %4 = vector.shape_cast %3 : vector<8x8x788xf32> to vector<64x788xf32>
    %c0_3 = arith.constant 0 : index
    %c0_4 = arith.constant 0 : index
    %5 = vector.load %arg3[%c0_3, %c0_4] : memref<788x512xf32, #tpu.memory_space<vmem>>, vector<788x512xf32>
    %cst = arith.constant dense<0.000000e+00> : vector<64x512xf32>
    %6 = tpu.matmul %4, %5, %cst {dimension_numbers = #tpu.dot_dimension_numbers<[1], [0], [0], [1], [0, 0, 1, 1], [], []>} : vector<64x788xf32>, vector<788x512xf32>, vector<64x512xf32> -> vector<64x512xf32>
    %c0_5 = arith.constant 0 : index
    %c0_6 = arith.constant 0 : index
    %7 = vector.load %arg5[%c0_5, %c0_6] : memref<1x512xf32, #tpu.memory_space<vmem>>, vector<1x512xf32>
    %8 = vector.broadcast %7 : vector<1x512xf32> to vector<64x512xf32>
    %9 = arith.addf %6, %8 : vector<64x512xf32>
    %10 = vector.shape_cast %9 : vector<64x512xf32> to vector<8x8x512xf32>
    %c0_7 = arith.constant 0 : index
    %c0_8 = arith.constant 0 : index
    %c0_9 = arith.constant 0 : index
    %11 = vector.load %arg9[%c0_7, %c0_8, %c0_9] : memref<8x8x512xf32, #tpu.memory_space<vmem>>, vector<8x8x512xf32>
    tpu.vector_store %arg9[%c0_7, %c0_8, %c0_9], %10 {strides = array<i32>} : memref<8x8x512xf32, #tpu.memory_space<vmem>>, vector<8x8x512xf32>,
    %c0_10 = arith.constant 0 : index
    %c0_11 = arith.constant 0 : index
    %12 = vector.load %arg4[%c0_10, %c0_11] : memref<128x512xf32, #tpu.memory_space<vmem>>, vector<128x512xf32>
    %c0_12 = arith.constant 0 : index
    %c0_13 = arith.constant 0 : index
    %13 = vector.load %arg6[%c0_12, %c0_13] : memref<256x512xf32, #tpu.memory_space<vmem>>, vector<256x512xf32>
    %c0_14 = arith.constant 0 : index
    %c0_15 = arith.constant 0 : index
    %14 = vector.load %arg7[%c0_14, %c0_15] : memref<1x512xf32, #tpu.memory_space<vmem>>, vector<1x512xf32>
    %c0_16 = arith.constant 0 : index
    %c0_17 = arith.constant 0 : index
    %15 = vector.load %arg10[%c0_16, %c0_17] : memref<8x128xf32, #tpu.memory_space<vmem>>, vector<8x128xf32>
    %c0_18 = arith.constant 0 : index
    %c0_19 = arith.constant 0 : index
    %16 = vector.load %arg11[%c0_18, %c0_19] : memref<8x128xf32, #tpu.memory_space<vmem>>, vector<8x128xf32>
    %c0_20 = arith.constant 0 : index
    %c0_21 = arith.constant 0 : index
    %17 = vector.load %arg12[%c0_20, %c0_21] : memref<8x128xf32, #tpu.memory_space<vmem>>, vector<8x128xf32>
    %c0_22 = arith.constant 0 : index
    %c0_23 = arith.constant 0 : index
    %18 = vector.load %arg13[%c0_22, %c0_23] : memref<8x128xf32, #tpu.memory_space<vmem>>, vector<8x128xf32>
    %c0_i32_24 = arith.constant 0 : i32
    %19 = arith.index_cast %c0_i32_24 : i32 to index
    %c0_25 = arith.constant 0 : index
    %c0_26 = arith.constant 0 : index
    %20 = vector.load %arg9[%19, %c0_25, %c0_26] : memref<8x8x512xf32, #tpu.memory_space<vmem>>, vector<1x8x512xf32>
    %21 = vector.shape_cast %20 : vector<1x8x512xf32> to vector<8x512xf32>
    %cst_27 = arith.constant dense<0.000000e+00> : vector<8x512xf32>
    %22 = tpu.matmul %15, %12, %cst_27 {dimension_numbers = #tpu.dot_dimension_numbers<[1], [0], [0], [1], [0, 0, 1, 1], [], []>} : vector<8x128xf32>, vector<128x512xf32>, vector<8x512xf32> -> vector<8x512xf32>
    %23 = arith.addf %21, %22 : vector<8x512xf32>
    %24 = vector.extract_strided_slice %23 {offsets = [0, 0], sizes = [8, 128], strides = [1, 1]} : vector<8x512xf32> to vector<8x128xf32>
    %cst_28 = arith.constant 5.000000e-01 : f32
    %25 = vector.broadcast %cst_28 : f32 to vector<8x128xf32>
    %26 = arith.mulf %25, %24 : vector<8x128xf32>
    %27 = math.tanh %26 : vector<8x128xf32>
    %cst_29 = arith.constant 5.000000e-01 : f32
    %28 = vector.broadcast %cst_29 : f32 to vector<8x128xf32>
    %29 = arith.mulf %28, %27 : vector<8x128xf32>
    %cst_30 = arith.constant 5.000000e-01 : f32
    %30 = vector.broadcast %cst_30 : f32 to vector<8x128xf32>
    %31 = arith.addf %29, %30 : vector<8x128xf32>
    %32 = vector.extract_strided_slice %23 {offsets = [0, 128], sizes = [8, 128], strides = [1, 1]} : vector<8x512xf32> to vector<8x128xf32>
    %cst_31 = arith.constant 5.000000e-01 : f32
    %33 = vector.broadcast %cst_31 : f32 to vector<8x128xf32>
    %34 = arith.mulf %33, %32 : vector<8x128xf32>
    %35 = math.tanh %34 : vector<8x128xf32>
    %cst_32 = arith.constant 5.000000e-01 : f32
    %36 = vector.broadcast %cst_32 : f32 to vector<8x128xf32>
    %37 = arith.mulf %36, %35 : vector<8x128xf32>
    %cst_33 = arith.constant 5.000000e-01 : f32
    %38 = vector.broadcast %cst_33 : f32 to vector<8x128xf32>
    %39 = arith.addf %37, %38 : vector<8x128xf32>
    %40 = vector.extract_strided_slice %23 {offsets = [0, 256], sizes = [8, 128], strides = [1, 1]} : vector<8x512xf32> to vector<8x128xf32>
    %41 = math.tanh %40 : vector<8x128xf32>
    %42 = vector.extract_strided_slice %23 {offsets = [0, 384], sizes = [8, 128], strides = [1, 1]} : vector<8x512xf32> to vector<8x128xf32>
    %cst_34 = arith.constant 5.000000e-01 : f32
    %43 = vector.broadcast %cst_34 : f32 to vector<8x128xf32>
    %44 = arith.mulf %43, %42 : vector<8x128xf32>
    %45 = math.tanh %44 : vector<8x128xf32>
    %cst_35 = arith.constant 5.000000e-01 : f32
    %46 = vector.broadcast %cst_35 : f32 to vector<8x128xf32>
    %47 = arith.mulf %46, %45 : vector<8x128xf32>
    %cst_36 = arith.constant 5.000000e-01 : f32
    %48 = vector.broadcast %cst_36 : f32 to vector<8x128xf32>
    %49 = arith.addf %47, %48 : vector<8x128xf32>
    %50 = arith.mulf %39, %16 : vector<8x128xf32>
    %51 = arith.mulf %31, %41 : vector<8x128xf32>
    %52 = arith.addf %50, %51 : vector<8x128xf32>
    %53 = math.tanh %52 : vector<8x128xf32>
    %54 = arith.mulf %49, %53 : vector<8x128xf32>
    %55 = tpu.concatenate %54, %17 in 1 : vector<8x128xf32>, vector<8x128xf32> -> vector<8x256xf32>
    %cst_37 = arith.constant dense<0.000000e+00> : vector<8x512xf32>
    %56 = tpu.matmul %55, %13, %cst_37 {dimension_numbers = #tpu.dot_dimension_numbers<[1], [0], [0], [1], [0, 0, 1, 1], [], []>} : vector<8x256xf32>, vector<256x512xf32>, vector<8x512xf32> -> vector<8x512xf32>
    %57 = vector.broadcast %14 : vector<1x512xf32> to vector<8x512xf32>
    %58 = arith.addf %56, %57 : vector<8x512xf32>
    %59 = vector.extract_strided_slice %58 {offsets = [0, 0], sizes = [8, 128], strides = [1, 1]} : vector<8x512xf32> to vector<8x128xf32>
    %cst_38 = arith.constant 5.000000e-01 : f32
    %60 = vector.broadcast %cst_38 : f32 to vector<8x128xf32>
    %61 = arith.mulf %60, %59 : vector<8x128xf32>
    %62 = math.tanh %61 : vector<8x128xf32>
    %cst_39 = arith.constant 5.000000e-01 : f32
    %63 = vector.broadcast %cst_39 : f32 to vector<8x128xf32>
    %64 = arith.mulf %63, %62 : vector<8x128xf32>
    %cst_40 = arith.constant 5.000000e-01 : f32
    %65 = vector.broadcast %cst_40 : f32 to vector<8x128xf32>
    %66 = arith.addf %64, %65 : vector<8x128xf32>
    %67 = vector.extract_strided_slice %58 {offsets = [0, 128], sizes = [8, 128], strides = [1, 1]} : vector<8x512xf32> to vector<8x128xf32>
    %cst_41 = arith.constant 5.000000e-01 : f32
    %68 = vector.broadcast %cst_41 : f32 to vector<8x128xf32>
    %69 = arith.mulf %68, %67 : vector<8x128xf32>
    %70 = math.tanh %69 : vector<8x128xf32>
    %cst_42 = arith.constant 5.000000e-01 : f32
    %71 = vector.broadcast %cst_42 : f32 to vector<8x128xf32>
    %72 = arith.mulf %71, %70 : vector<8x128xf32>
    %cst_43 = arith.constant 5.000000e-01 : f32
    %73 = vector.broadcast %cst_43 : f32 to vector<8x128xf32>
    %74 = arith.addf %72, %73 : vector<8x128xf32>
    %75 = vector.extract_strided_slice %58 {offsets = [0, 256], sizes = [8, 128], strides = [1, 1]} : vector<8x512xf32> to vector<8x128xf32>
    %76 = math.tanh %75 : vector<8x128xf32>
    %77 = vector.extract_strided_slice %58 {offsets = [0, 384], sizes = [8, 128], strides = [1, 1]} : vector<8x512xf32> to vector<8x128xf32>
    %cst_44 = arith.constant 5.000000e-01 : f32
    %78 = vector.broadcast %cst_44 : f32 to vector<8x128xf32>
    %79 = arith.mulf %78, %77 : vector<8x128xf32>
    %80 = math.tanh %79 : vector<8x128xf32>
    %cst_45 = arith.constant 5.000000e-01 : f32
    %81 = vector.broadcast %cst_45 : f32 to vector<8x128xf32>
    %82 = arith.mulf %81, %80 : vector<8x128xf32>
    %cst_46 = arith.constant 5.000000e-01 : f32
    %83 = vector.broadcast %cst_46 : f32 to vector<8x128xf32>
    %84 = arith.addf %82, %83 : vector<8x128xf32>
    %85 = arith.mulf %74, %18 : vector<8x128xf32>
    %86 = arith.mulf %66, %76 : vector<8x128xf32>
    %87 = arith.addf %85, %86 : vector<8x128xf32>
    %88 = math.tanh %87 : vector<8x128xf32>
    %89 = arith.mulf %84, %88 : vector<8x128xf32>
    %90 = arith.index_cast %c0_i32_24 : i32 to index
    %c0_47 = arith.constant 0 : index
    %c0_48 = arith.constant 0 : index
    %91 = vector.load %arg8[%90, %c0_47, %c0_48] : memref<8x8x128xf32, #tpu.memory_space<vmem>>, vector<1x8x128xf32>
    %92 = vector.shape_cast %91 : vector<1x8x128xf32> to vector<8x128xf32>
    %93 = vector.shape_cast %89 : vector<8x128xf32> to vector<1x8x128xf32>
    tpu.vector_store %arg8[%90, %c0_47, %c0_48], %93 {strides = array<i32>} : memref<8x8x128xf32, #tpu.memory_space<vmem>>, vector<1x8x128xf32>,
    %c1_i32 = arith.constant 1 : i32
    %94 = arith.index_cast %c1_i32 : i32 to index
    %c0_49 = arith.constant 0 : index
    %c0_50 = arith.constant 0 : index
    %95 = vector.load %arg9[%94, %c0_49, %c0_50] : memref<8x8x512xf32, #tpu.memory_space<vmem>>, vector<1x8x512xf32>
    %96 = vector.shape_cast %95 : vector<1x8x512xf32> to vector<8x512xf32>
    %cst_51 = arith.constant dense<0.000000e+00> : vector<8x512xf32>
    %97 = tpu.matmul %54, %12, %cst_51 {dimension_numbers = #tpu.dot_dimension_numbers<[1], [0], [0], [1], [0, 0, 1, 1], [], []>} : vector<8x128xf32>, vector<128x512xf32>, vector<8x512xf32> -> vector<8x512xf32>
    %98 = arith.addf %96, %97 : vector<8x512xf32>
    %99 = vector.extract_strided_slice %98 {offsets = [0, 0], sizes = [8, 128], strides = [1, 1]} : vector<8x512xf32> to vector<8x128xf32>
    %cst_52 = arith.constant 5.000000e-01 : f32
    %100 = vector.broadcast %cst_52 : f32 to vector<8x128xf32>
    %101 = arith.mulf %100, %99 : vector<8x128xf32>
    %102 = math.tanh %101 : vector<8x128xf32>
    %cst_53 = arith.constant 5.000000e-01 : f32
    %103 = vector.broadcast %cst_53 : f32 to vector<8x128xf32>
    %104 = arith.mulf %103, %102 : vector<8x128xf32>
    %cst_54 = arith.constant 5.000000e-01 : f32
    %105 = vector.broadcast %cst_54 : f32 to vector<8x128xf32>
    %106 = arith.addf %104, %105 : vector<8x128xf32>
    %107 = vector.extract_strided_slice %98 {offsets = [0, 128], sizes = [8, 128], strides = [1, 1]} : vector<8x512xf32> to vector<8x128xf32>
    %cst_55 = arith.constant 5.000000e-01 : f32
    %108 = vector.broadcast %cst_55 : f32 to vector<8x128xf32>
    %109 = arith.mulf %108, %107 : vector<8x128xf32>
    %110 = math.tanh %109 : vector<8x128xf32>
    %cst_56 = arith.constant 5.000000e-01 : f32
    %111 = vector.broadcast %cst_56 : f32 to vector<8x128xf32>
    %112 = arith.mulf %111, %110 : vector<8x128xf32>
    %cst_57 = arith.constant 5.000000e-01 : f32
    %113 = vector.broadcast %cst_57 : f32 to vector<8x128xf32>
    %114 = arith.addf %112, %113 : vector<8x128xf32>
    %115 = vector.extract_strided_slice %98 {offsets = [0, 256], sizes = [8, 128], strides = [1, 1]} : vector<8x512xf32> to vector<8x128xf32>
    %116 = math.tanh %115 : vector<8x128xf32>
    %117 = vector.extract_strided_slice %98 {offsets = [0, 384], sizes = [8, 128], strides = [1, 1]} : vector<8x512xf32> to vector<8x128xf32>
    %cst_58 = arith.constant 5.000000e-01 : f32
    %118 = vector.broadcast %cst_58 : f32 to vector<8x128xf32>
    %119 = arith.mulf %118, %117 : vector<8x128xf32>
    %120 = math.tanh %119 : vector<8x128xf32>
    %cst_59 = arith.constant 5.000000e-01 : f32
    %121 = vector.broadcast %cst_59 : f32 to vector<8x128xf32>
    %122 = arith.mulf %121, %120 : vector<8x128xf32>
    %cst_60 = arith.constant 5.000000e-01 : f32
    %123 = vector.broadcast %cst_60 : f32 to vector<8x128xf32>
    %124 = arith.addf %122, %123 : vector<8x128xf32>
    %125 = arith.mulf %114, %52 : vector<8x128xf32>
    %126 = arith.mulf %106, %116 : vector<8x128xf32>
    %127 = arith.addf %125, %126 : vector<8x128xf32>
    %128 = math.tanh %127 : vector<8x128xf32>
    %129 = arith.mulf %124, %128 : vector<8x128xf32>
    %130 = tpu.concatenate %129, %89 in 1 : vector<8x128xf32>, vector<8x128xf32> -> vector<8x256xf32>
    %cst_61 = arith.constant dense<0.000000e+00> : vector<8x512xf32>
    %131 = tpu.matmul %130, %13, %cst_61 {dimension_numbers = #tpu.dot_dimension_numbers<[1], [0], [0], [1], [0, 0, 1, 1], [], []>} : vector<8x256xf32>, vector<256x512xf32>, vector<8x512xf32> -> vector<8x512xf32>
    %132 = vector.broadcast %14 : vector<1x512xf32> to vector<8x512xf32>
    %133 = arith.addf %131, %132 : vector<8x512xf32>
    %134 = vector.extract_strided_slice %133 {offsets = [0, 0], sizes = [8, 128], strides = [1, 1]} : vector<8x512xf32> to vector<8x128xf32>
    %cst_62 = arith.constant 5.000000e-01 : f32
    %135 = vector.broadcast %cst_62 : f32 to vector<8x128xf32>
    %136 = arith.mulf %135, %134 : vector<8x128xf32>
    %137 = math.tanh %136 : vector<8x128xf32>
    %cst_63 = arith.constant 5.000000e-01 : f32
    %138 = vector.broadcast %cst_63 : f32 to vector<8x128xf32>
    %139 = arith.mulf %138, %137 : vector<8x128xf32>
    %cst_64 = arith.constant 5.000000e-01 : f32
    %140 = vector.broadcast %cst_64 : f32 to vector<8x128xf32>
    %141 = arith.addf %139, %140 : vector<8x128xf32>
    %142 = vector.extract_strided_slice %133 {offsets = [0, 128], sizes = [8, 128], strides = [1, 1]} : vector<8x512xf32> to vector<8x128xf32>
    %cst_65 = arith.constant 5.000000e-01 : f32
    %143 = vector.broadcast %cst_65 : f32 to vector<8x128xf32>
    %144 = arith.mulf %143, %142 : vector<8x128xf32>
    %145 = math.tanh %144 : vector<8x128xf32>
    %cst_66 = arith.constant 5.000000e-01 : f32
    %146 = vector.broadcast %cst_66 : f32 to vector<8x128xf32>
    %147 = arith.mulf %146, %145 : vector<8x128xf32>
    %cst_67 = arith.constant 5.000000e-01 : f32
    %148 = vector.broadcast %cst_67 : f32 to vector<8x128xf32>
    %149 = arith.addf %147, %148 : vector<8x128xf32>
    %150 = vector.extract_strided_slice %133 {offsets = [0, 256], sizes = [8, 128], strides = [1, 1]} : vector<8x512xf32> to vector<8x128xf32>
    %151 = math.tanh %150 : vector<8x128xf32>
    %152 = vector.extract_strided_slice %133 {offsets = [0, 384], sizes = [8, 128], strides = [1, 1]} : vector<8x512xf32> to vector<8x128xf32>
    %cst_68 = arith.constant 5.000000e-01 : f32
    %153 = vector.broadcast %cst_68 : f32 to vector<8x128xf32>
    %154 = arith.mulf %153, %152 : vector<8x128xf32>
    %155 = math.tanh %154 : vector<8x128xf32>
    %cst_69 = arith.constant 5.000000e-01 : f32
    %156 = vector.broadcast %cst_69 : f32 to vector<8x128xf32>
    %157 = arith.mulf %156, %155 : vector<8x128xf32>
    %cst_70 = arith.constant 5.000000e-01 : f32
    %158 = vector.broadcast %cst_70 : f32 to vector<8x128xf32>
    %159 = arith.addf %157, %158 : vector<8x128xf32>
    %160 = arith.mulf %149, %87 : vector<8x128xf32>
    %161 = arith.mulf %141, %151 : vector<8x128xf32>
    %162 = arith.addf %160, %161 : vector<8x128xf32>
    %163 = math.tanh %162 : vector<8x128xf32>
    %164 = arith.mulf %159, %163 : vector<8x128xf32>
    %165 = arith.index_cast %c1_i32 : i32 to index
    %c0_71 = arith.constant 0 : index
    %c0_72 = arith.constant 0 : index
    %166 = vector.load %arg8[%165, %c0_71, %c0_72] : memref<8x8x128xf32, #tpu.memory_space<vmem>>, vector<1x8x128xf32>
    %167 = vector.shape_cast %166 : vector<1x8x128xf32> to vector<8x128xf32>
    %168 = vector.shape_cast %164 : vector<8x128xf32> to vector<1x8x128xf32>
    tpu.vector_store %arg8[%165, %c0_71, %c0_72], %168 {strides = array<i32>} : memref<8x8x128xf32, #tpu.memory_space<vmem>>, vector<1x8x128xf32>,
    %c2_i32 = arith.constant 2 : i32
    %169 = arith.index_cast %c2_i32 : i32 to index
    %c0_73 = arith.constant 0 : index
    %c0_74 = arith.constant 0 : index
    %170 = vector.load %arg9[%169, %c0_73, %c0_74] : memref<8x8x512xf32, #tpu.memory_space<vmem>>, vector<1x8x512xf32>
    %171 = vector.shape_cast %170 : vector<1x8x512xf32> to vector<8x512xf32>
    %cst_75 = arith.constant dense<0.000000e+00> : vector<8x512xf32>
    %172 = tpu.matmul %129, %12, %cst_75 {dimension_numbers = #tpu.dot_dimension_numbers<[1], [0], [0], [1], [0, 0, 1, 1], [], []>} : vector<8x128xf32>, vector<128x512xf32>, vector<8x512xf32> -> vector<8x512xf32>
    %173 = arith.addf %171, %172 : vector<8x512xf32>
    %174 = vector.extract_strided_slice %173 {offsets = [0, 0], sizes = [8, 128], strides = [1, 1]} : vector<8x512xf32> to vector<8x128xf32>
    %cst_76 = arith.constant 5.000000e-01 : f32
    %175 = vector.broadcast %cst_76 : f32 to vector<8x128xf32>
    %176 = arith.mulf %175, %174 : vector<8x128xf32>
    %177 = math.tanh %176 : vector<8x128xf32>
    %cst_77 = arith.constant 5.000000e-01 : f32
    %178 = vector.broadcast %cst_77 : f32 to vector<8x128xf32>
    %179 = arith.mulf %178, %177 : vector<8x128xf32>
    %cst_78 = arith.constant 5.000000e-01 : f32
    %180 = vector.broadcast %cst_78 : f32 to vector<8x128xf32>
    %181 = arith.addf %179, %180 : vector<8x128xf32>
    %182 = vector.extract_strided_slice %173 {offsets = [0, 128], sizes = [8, 128], strides = [1, 1]} : vector<8x512xf32> to vector<8x128xf32>
    %cst_79 = arith.constant 5.000000e-01 : f32
    %183 = vector.broadcast %cst_79 : f32 to vector<8x128xf32>
    %184 = arith.mulf %183, %182 : vector<8x128xf32>
    %185 = math.tanh %184 : vector<8x128xf32>
    %cst_80 = arith.constant 5.000000e-01 : f32
    %186 = vector.broadcast %cst_80 : f32 to vector<8x128xf32>
    %187 = arith.mulf %186, %185 : vector<8x128xf32>
    %cst_81 = arith.constant 5.000000e-01 : f32
    %188 = vector.broadcast %cst_81 : f32 to vector<8x128xf32>
    %189 = arith.addf %187, %188 : vector<8x128xf32>
    %190 = vector.extract_strided_slice %173 {offsets = [0, 256], sizes = [8, 128], strides = [1, 1]} : vector<8x512xf32> to vector<8x128xf32>
    %191 = math.tanh %190 : vector<8x128xf32>
    %192 = vector.extract_strided_slice %173 {offsets = [0, 384], sizes = [8, 128], strides = [1, 1]} : vector<8x512xf32> to vector<8x128xf32>
    %cst_82 = arith.constant 5.000000e-01 : f32
    %193 = vector.broadcast %cst_82 : f32 to vector<8x128xf32>
    %194 = arith.mulf %193, %192 : vector<8x128xf32>
    %195 = math.tanh %194 : vector<8x128xf32>
    %cst_83 = arith.constant 5.000000e-01 : f32
    %196 = vector.broadcast %cst_83 : f32 to vector<8x128xf32>
    %197 = arith.mulf %196, %195 : vector<8x128xf32>
    %cst_84 = arith.constant 5.000000e-01 : f32
    %198 = vector.broadcast %cst_84 : f32 to vector<8x128xf32>
    %199 = arith.addf %197, %198 : vector<8x128xf32>
    %200 = arith.mulf %189, %127 : vector<8x128xf32>
    %201 = arith.mulf %181, %191 : vector<8x128xf32>
    %202 = arith.addf %200, %201 : vector<8x128xf32>
    %203 = math.tanh %202 : vector<8x128xf32>
    %204 = arith.mulf %199, %203 : vector<8x128xf32>
    %205 = tpu.concatenate %204, %164 in 1 : vector<8x128xf32>, vector<8x128xf32> -> vector<8x256xf32>
    %cst_85 = arith.constant dense<0.000000e+00> : vector<8x512xf32>
    %206 = tpu.matmul %205, %13, %cst_85 {dimension_numbers = #tpu.dot_dimension_numbers<[1], [0], [0], [1], [0, 0, 1, 1], [], []>} : vector<8x256xf32>, vector<256x512xf32>, vector<8x512xf32> -> vector<8x512xf32>
    %207 = vector.broadcast %14 : vector<1x512xf32> to vector<8x512xf32>
    %208 = arith.addf %206, %207 : vector<8x512xf32>
    %209 = vector.extract_strided_slice %208 {offsets = [0, 0], sizes = [8, 128], strides = [1, 1]} : vector<8x512xf32> to vector<8x128xf32>
    %cst_86 = arith.constant 5.000000e-01 : f32
    %210 = vector.broadcast %cst_86 : f32 to vector<8x128xf32>
    %211 = arith.mulf %210, %209 : vector<8x128xf32>
    %212 = math.tanh %211 : vector<8x128xf32>
    %cst_87 = arith.constant 5.000000e-01 : f32
    %213 = vector.broadcast %cst_87 : f32 to vector<8x128xf32>
    %214 = arith.mulf %213, %212 : vector<8x128xf32>
    %cst_88 = arith.constant 5.000000e-01 : f32
    %215 = vector.broadcast %cst_88 : f32 to vector<8x128xf32>
    %216 = arith.addf %214, %215 : vector<8x128xf32>
    %217 = vector.extract_strided_slice %208 {offsets = [0, 128], sizes = [8, 128], strides = [1, 1]} : vector<8x512xf32> to vector<8x128xf32>
    %cst_89 = arith.constant 5.000000e-01 : f32
    %218 = vector.broadcast %cst_89 : f32 to vector<8x128xf32>
    %219 = arith.mulf %218, %217 : vector<8x128xf32>
    %220 = math.tanh %219 : vector<8x128xf32>
    %cst_90 = arith.constant 5.000000e-01 : f32
    %221 = vector.broadcast %cst_90 : f32 to vector<8x128xf32>
    %222 = arith.mulf %221, %220 : vector<8x128xf32>
    %cst_91 = arith.constant 5.000000e-01 : f32
    %223 = vector.broadcast %cst_91 : f32 to vector<8x128xf32>
    %224 = arith.addf %222, %223 : vector<8x128xf32>
    %225 = vector.extract_strided_slice %208 {offsets = [0, 256], sizes = [8, 128], strides = [1, 1]} : vector<8x512xf32> to vector<8x128xf32>
    %226 = math.tanh %225 : vector<8x128xf32>
    %227 = vector.extract_strided_slice %208 {offsets = [0, 384], sizes = [8, 128], strides = [1, 1]} : vector<8x512xf32> to vector<8x128xf32>
    %cst_92 = arith.constant 5.000000e-01 : f32
    %228 = vector.broadcast %cst_92 : f32 to vector<8x128xf32>
    %229 = arith.mulf %228, %227 : vector<8x128xf32>
    %230 = math.tanh %229 : vector<8x128xf32>
    %cst_93 = arith.constant 5.000000e-01 : f32
    %231 = vector.broadcast %cst_93 : f32 to vector<8x128xf32>
    %232 = arith.mulf %231, %230 : vector<8x128xf32>
    %cst_94 = arith.constant 5.000000e-01 : f32
    %233 = vector.broadcast %cst_94 : f32 to vector<8x128xf32>
    %234 = arith.addf %232, %233 : vector<8x128xf32>
    %235 = arith.mulf %224, %162 : vector<8x128xf32>
    %236 = arith.mulf %216, %226 : vector<8x128xf32>
    %237 = arith.addf %235, %236 : vector<8x128xf32>
    %238 = math.tanh %237 : vector<8x128xf32>
    %239 = arith.mulf %234, %238 : vector<8x128xf32>
    %240 = arith.index_cast %c2_i32 : i32 to index
    %c0_95 = arith.constant 0 : index
    %c0_96 = arith.constant 0 : index
    %241 = vector.load %arg8[%240, %c0_95, %c0_96] : memref<8x8x128xf32, #tpu.memory_space<vmem>>, vector<1x8x128xf32>
    %242 = vector.shape_cast %241 : vector<1x8x128xf32> to vector<8x128xf32>
    %243 = vector.shape_cast %239 : vector<8x128xf32> to vector<1x8x128xf32>
    tpu.vector_store %arg8[%240, %c0_95, %c0_96], %243 {strides = array<i32>} : memref<8x8x128xf32, #tpu.memory_space<vmem>>, vector<1x8x128xf32>,
    %c3_i32 = arith.constant 3 : i32
    %244 = arith.index_cast %c3_i32 : i32 to index
    %c0_97 = arith.constant 0 : index
    %c0_98 = arith.constant 0 : index
    %245 = vector.load %arg9[%244, %c0_97, %c0_98] : memref<8x8x512xf32, #tpu.memory_space<vmem>>, vector<1x8x512xf32>
    %246 = vector.shape_cast %245 : vector<1x8x512xf32> to vector<8x512xf32>
    %cst_99 = arith.constant dense<0.000000e+00> : vector<8x512xf32>
    %247 = tpu.matmul %204, %12, %cst_99 {dimension_numbers = #tpu.dot_dimension_numbers<[1], [0], [0], [1], [0, 0, 1, 1], [], []>} : vector<8x128xf32>, vector<128x512xf32>, vector<8x512xf32> -> vector<8x512xf32>
    %248 = arith.addf %246, %247 : vector<8x512xf32>
    %249 = vector.extract_strided_slice %248 {offsets = [0, 0], sizes = [8, 128], strides = [1, 1]} : vector<8x512xf32> to vector<8x128xf32>
    %cst_100 = arith.constant 5.000000e-01 : f32
    %250 = vector.broadcast %cst_100 : f32 to vector<8x128xf32>
    %251 = arith.mulf %250, %249 : vector<8x128xf32>
    %252 = math.tanh %251 : vector<8x128xf32>
    %cst_101 = arith.constant 5.000000e-01 : f32
    %253 = vector.broadcast %cst_101 : f32 to vector<8x128xf32>
    %254 = arith.mulf %253, %252 : vector<8x128xf32>
    %cst_102 = arith.constant 5.000000e-01 : f32
    %255 = vector.broadcast %cst_102 : f32 to vector<8x128xf32>
    %256 = arith.addf %254, %255 : vector<8x128xf32>
    %257 = vector.extract_strided_slice %248 {offsets = [0, 128], sizes = [8, 128], strides = [1, 1]} : vector<8x512xf32> to vector<8x128xf32>
    %cst_103 = arith.constant 5.000000e-01 : f32
    %258 = vector.broadcast %cst_103 : f32 to vector<8x128xf32>
    %259 = arith.mulf %258, %257 : vector<8x128xf32>
    %260 = math.tanh %259 : vector<8x128xf32>
    %cst_104 = arith.constant 5.000000e-01 : f32
    %261 = vector.broadcast %cst_104 : f32 to vector<8x128xf32>
    %262 = arith.mulf %261, %260 : vector<8x128xf32>
    %cst_105 = arith.constant 5.000000e-01 : f32
    %263 = vector.broadcast %cst_105 : f32 to vector<8x128xf32>
    %264 = arith.addf %262, %263 : vector<8x128xf32>
    %265 = vector.extract_strided_slice %248 {offsets = [0, 256], sizes = [8, 128], strides = [1, 1]} : vector<8x512xf32> to vector<8x128xf32>
    %266 = math.tanh %265 : vector<8x128xf32>
    %267 = vector.extract_strided_slice %248 {offsets = [0, 384], sizes = [8, 128], strides = [1, 1]} : vector<8x512xf32> to vector<8x128xf32>
    %cst_106 = arith.constant 5.000000e-01 : f32
    %268 = vector.broadcast %cst_106 : f32 to vector<8x128xf32>
    %269 = arith.mulf %268, %267 : vector<8x128xf32>
    %270 = math.tanh %269 : vector<8x128xf32>
    %cst_107 = arith.constant 5.000000e-01 : f32
    %271 = vector.broadcast %cst_107 : f32 to vector<8x128xf32>
    %272 = arith.mulf %271, %270 : vector<8x128xf32>
    %cst_108 = arith.constant 5.000000e-01 : f32
    %273 = vector.broadcast %cst_108 : f32 to vector<8x128xf32>
    %274 = arith.addf %272, %273 : vector<8x128xf32>
    %275 = arith.mulf %264, %202 : vector<8x128xf32>
    %276 = arith.mulf %256, %266 : vector<8x128xf32>
    %277 = arith.addf %275, %276 : vector<8x128xf32>
    %278 = math.tanh %277 : vector<8x128xf32>
    %279 = arith.mulf %274, %278 : vector<8x128xf32>
    %280 = tpu.concatenate %279, %239 in 1 : vector<8x128xf32>, vector<8x128xf32> -> vector<8x256xf32>
    %cst_109 = arith.constant dense<0.000000e+00> : vector<8x512xf32>
    %281 = tpu.matmul %280, %13, %cst_109 {dimension_numbers = #tpu.dot_dimension_numbers<[1], [0], [0], [1], [0, 0, 1, 1], [], []>} : vector<8x256xf32>, vector<256x512xf32>, vector<8x512xf32> -> vector<8x512xf32>
    %282 = vector.broadcast %14 : vector<1x512xf32> to vector<8x512xf32>
    %283 = arith.addf %281, %282 : vector<8x512xf32>
    %284 = vector.extract_strided_slice %283 {offsets = [0, 0], sizes = [8, 128], strides = [1, 1]} : vector<8x512xf32> to vector<8x128xf32>
    %cst_110 = arith.constant 5.000000e-01 : f32
    %285 = vector.broadcast %cst_110 : f32 to vector<8x128xf32>
    %286 = arith.mulf %285, %284 : vector<8x128xf32>
    %287 = math.tanh %286 : vector<8x128xf32>
    %cst_111 = arith.constant 5.000000e-01 : f32
    %288 = vector.broadcast %cst_111 : f32 to vector<8x128xf32>
    %289 = arith.mulf %288, %287 : vector<8x128xf32>
    %cst_112 = arith.constant 5.000000e-01 : f32
    %290 = vector.broadcast %cst_112 : f32 to vector<8x128xf32>
    %291 = arith.addf %289, %290 : vector<8x128xf32>
    %292 = vector.extract_strided_slice %283 {offsets = [0, 128], sizes = [8, 128], strides = [1, 1]} : vector<8x512xf32> to vector<8x128xf32>
    %cst_113 = arith.constant 5.000000e-01 : f32
    %293 = vector.broadcast %cst_113 : f32 to vector<8x128xf32>
    %294 = arith.mulf %293, %292 : vector<8x128xf32>
    %295 = math.tanh %294 : vector<8x128xf32>
    %cst_114 = arith.constant 5.000000e-01 : f32
    %296 = vector.broadcast %cst_114 : f32 to vector<8x128xf32>
    %297 = arith.mulf %296, %295 : vector<8x128xf32>
    %cst_115 = arith.constant 5.000000e-01 : f32
    %298 = vector.broadcast %cst_115 : f32 to vector<8x128xf32>
    %299 = arith.addf %297, %298 : vector<8x128xf32>
    %300 = vector.extract_strided_slice %283 {offsets = [0, 256], sizes = [8, 128], strides = [1, 1]} : vector<8x512xf32> to vector<8x128xf32>
    %301 = math.tanh %300 : vector<8x128xf32>
    %302 = vector.extract_strided_slice %283 {offsets = [0, 384], sizes = [8, 128], strides = [1, 1]} : vector<8x512xf32> to vector<8x128xf32>
    %cst_116 = arith.constant 5.000000e-01 : f32
    %303 = vector.broadcast %cst_116 : f32 to vector<8x128xf32>
    %304 = arith.mulf %303, %302 : vector<8x128xf32>
    %305 = math.tanh %304 : vector<8x128xf32>
    %cst_117 = arith.constant 5.000000e-01 : f32
    %306 = vector.broadcast %cst_117 : f32 to vector<8x128xf32>
    %307 = arith.mulf %306, %305 : vector<8x128xf32>
    %cst_118 = arith.constant 5.000000e-01 : f32
    %308 = vector.broadcast %cst_118 : f32 to vector<8x128xf32>
    %309 = arith.addf %307, %308 : vector<8x128xf32>
    %310 = arith.mulf %299, %237 : vector<8x128xf32>
    %311 = arith.mulf %291, %301 : vector<8x128xf32>
    %312 = arith.addf %310, %311 : vector<8x128xf32>
    %313 = math.tanh %312 : vector<8x128xf32>
    %314 = arith.mulf %309, %313 : vector<8x128xf32>
    %315 = arith.index_cast %c3_i32 : i32 to index
    %c0_119 = arith.constant 0 : index
    %c0_120 = arith.constant 0 : index
    %316 = vector.load %arg8[%315, %c0_119, %c0_120] : memref<8x8x128xf32, #tpu.memory_space<vmem>>, vector<1x8x128xf32>
    %317 = vector.shape_cast %316 : vector<1x8x128xf32> to vector<8x128xf32>
    %318 = vector.shape_cast %314 : vector<8x128xf32> to vector<1x8x128xf32>
    tpu.vector_store %arg8[%315, %c0_119, %c0_120], %318 {strides = array<i32>} : memref<8x8x128xf32, #tpu.memory_space<vmem>>, vector<1x8x128xf32>,
    %c4_i32 = arith.constant 4 : i32
    %319 = arith.index_cast %c4_i32 : i32 to index
    %c0_121 = arith.constant 0 : index
    %c0_122 = arith.constant 0 : index
    %320 = vector.load %arg9[%319, %c0_121, %c0_122] : memref<8x8x512xf32, #tpu.memory_space<vmem>>, vector<1x8x512xf32>
    %321 = vector.shape_cast %320 : vector<1x8x512xf32> to vector<8x512xf32>
    %cst_123 = arith.constant dense<0.000000e+00> : vector<8x512xf32>
    %322 = tpu.matmul %279, %12, %cst_123 {dimension_numbers = #tpu.dot_dimension_numbers<[1], [0], [0], [1], [0, 0, 1, 1], [], []>} : vector<8x128xf32>, vector<128x512xf32>, vector<8x512xf32> -> vector<8x512xf32>
    %323 = arith.addf %321, %322 : vector<8x512xf32>
    %324 = vector.extract_strided_slice %323 {offsets = [0, 0], sizes = [8, 128], strides = [1, 1]} : vector<8x512xf32> to vector<8x128xf32>
    %cst_124 = arith.constant 5.000000e-01 : f32
    %325 = vector.broadcast %cst_124 : f32 to vector<8x128xf32>
    %326 = arith.mulf %325, %324 : vector<8x128xf32>
    %327 = math.tanh %326 : vector<8x128xf32>
    %cst_125 = arith.constant 5.000000e-01 : f32
    %328 = vector.broadcast %cst_125 : f32 to vector<8x128xf32>
    %329 = arith.mulf %328, %327 : vector<8x128xf32>
    %cst_126 = arith.constant 5.000000e-01 : f32
    %330 = vector.broadcast %cst_126 : f32 to vector<8x128xf32>
    %331 = arith.addf %329, %330 : vector<8x128xf32>
    %332 = vector.extract_strided_slice %323 {offsets = [0, 128], sizes = [8, 128], strides = [1, 1]} : vector<8x512xf32> to vector<8x128xf32>
    %cst_127 = arith.constant 5.000000e-01 : f32
    %333 = vector.broadcast %cst_127 : f32 to vector<8x128xf32>
    %334 = arith.mulf %333, %332 : vector<8x128xf32>
    %335 = math.tanh %334 : vector<8x128xf32>
    %cst_128 = arith.constant 5.000000e-01 : f32
    %336 = vector.broadcast %cst_128 : f32 to vector<8x128xf32>
    %337 = arith.mulf %336, %335 : vector<8x128xf32>
    %cst_129 = arith.constant 5.000000e-01 : f32
    %338 = vector.broadcast %cst_129 : f32 to vector<8x128xf32>
    %339 = arith.addf %337, %338 : vector<8x128xf32>
    %340 = vector.extract_strided_slice %323 {offsets = [0, 256], sizes = [8, 128], strides = [1, 1]} : vector<8x512xf32> to vector<8x128xf32>
    %341 = math.tanh %340 : vector<8x128xf32>
    %342 = vector.extract_strided_slice %323 {offsets = [0, 384], sizes = [8, 128], strides = [1, 1]} : vector<8x512xf32> to vector<8x128xf32>
    %cst_130 = arith.constant 5.000000e-01 : f32
    %343 = vector.broadcast %cst_130 : f32 to vector<8x128xf32>
    %344 = arith.mulf %343, %342 : vector<8x128xf32>
    %345 = math.tanh %344 : vector<8x128xf32>
    %cst_131 = arith.constant 5.000000e-01 : f32
    %346 = vector.broadcast %cst_131 : f32 to vector<8x128xf32>
    %347 = arith.mulf %346, %345 : vector<8x128xf32>
    %cst_132 = arith.constant 5.000000e-01 : f32
    %348 = vector.broadcast %cst_132 : f32 to vector<8x128xf32>
    %349 = arith.addf %347, %348 : vector<8x128xf32>
    %350 = arith.mulf %339, %277 : vector<8x128xf32>
    %351 = arith.mulf %331, %341 : vector<8x128xf32>
    %352 = arith.addf %350, %351 : vector<8x128xf32>
    %353 = math.tanh %352 : vector<8x128xf32>
    %354 = arith.mulf %349, %353 : vector<8x128xf32>
    %355 = tpu.concatenate %354, %314 in 1 : vector<8x128xf32>, vector<8x128xf32> -> vector<8x256xf32>
    %cst_133 = arith.constant dense<0.000000e+00> : vector<8x512xf32>
    %356 = tpu.matmul %355, %13, %cst_133 {dimension_numbers = #tpu.dot_dimension_numbers<[1], [0], [0], [1], [0, 0, 1, 1], [], []>} : vector<8x256xf32>, vector<256x512xf32>, vector<8x512xf32> -> vector<8x512xf32>
    %357 = vector.broadcast %14 : vector<1x512xf32> to vector<8x512xf32>
    %358 = arith.addf %356, %357 : vector<8x512xf32>
    %359 = vector.extract_strided_slice %358 {offsets = [0, 0], sizes = [8, 128], strides = [1, 1]} : vector<8x512xf32> to vector<8x128xf32>
    %cst_134 = arith.constant 5.000000e-01 : f32
    %360 = vector.broadcast %cst_134 : f32 to vector<8x128xf32>
    %361 = arith.mulf %360, %359 : vector<8x128xf32>
    %362 = math.tanh %361 : vector<8x128xf32>
    %cst_135 = arith.constant 5.000000e-01 : f32
    %363 = vector.broadcast %cst_135 : f32 to vector<8x128xf32>
    %364 = arith.mulf %363, %362 : vector<8x128xf32>
    %cst_136 = arith.constant 5.000000e-01 : f32
    %365 = vector.broadcast %cst_136 : f32 to vector<8x128xf32>
    %366 = arith.addf %364, %365 : vector<8x128xf32>
    %367 = vector.extract_strided_slice %358 {offsets = [0, 128], sizes = [8, 128], strides = [1, 1]} : vector<8x512xf32> to vector<8x128xf32>
    %cst_137 = arith.constant 5.000000e-01 : f32
    %368 = vector.broadcast %cst_137 : f32 to vector<8x128xf32>
    %369 = arith.mulf %368, %367 : vector<8x128xf32>
    %370 = math.tanh %369 : vector<8x128xf32>
    %cst_138 = arith.constant 5.000000e-01 : f32
    %371 = vector.broadcast %cst_138 : f32 to vector<8x128xf32>
    %372 = arith.mulf %371, %370 : vector<8x128xf32>
    %cst_139 = arith.constant 5.000000e-01 : f32
    %373 = vector.broadcast %cst_139 : f32 to vector<8x128xf32>
    %374 = arith.addf %372, %373 : vector<8x128xf32>
    %375 = vector.extract_strided_slice %358 {offsets = [0, 256], sizes = [8, 128], strides = [1, 1]} : vector<8x512xf32> to vector<8x128xf32>
    %376 = math.tanh %375 : vector<8x128xf32>
    %377 = vector.extract_strided_slice %358 {offsets = [0, 384], sizes = [8, 128], strides = [1, 1]} : vector<8x512xf32> to vector<8x128xf32>
    %cst_140 = arith.constant 5.000000e-01 : f32
    %378 = vector.broadcast %cst_140 : f32 to vector<8x128xf32>
    %379 = arith.mulf %378, %377 : vector<8x128xf32>
    %380 = math.tanh %379 : vector<8x128xf32>
    %cst_141 = arith.constant 5.000000e-01 : f32
    %381 = vector.broadcast %cst_141 : f32 to vector<8x128xf32>
    %382 = arith.mulf %381, %380 : vector<8x128xf32>
    %cst_142 = arith.constant 5.000000e-01 : f32
    %383 = vector.broadcast %cst_142 : f32 to vector<8x128xf32>
    %384 = arith.addf %382, %383 : vector<8x128xf32>
    %385 = arith.mulf %374, %312 : vector<8x128xf32>
    %386 = arith.mulf %366, %376 : vector<8x128xf32>
    %387 = arith.addf %385, %386 : vector<8x128xf32>
    %388 = math.tanh %387 : vector<8x128xf32>
    %389 = arith.mulf %384, %388 : vector<8x128xf32>
    %390 = arith.index_cast %c4_i32 : i32 to index
    %c0_143 = arith.constant 0 : index
    %c0_144 = arith.constant 0 : index
    %391 = vector.load %arg8[%390, %c0_143, %c0_144] : memref<8x8x128xf32, #tpu.memory_space<vmem>>, vector<1x8x128xf32>
    %392 = vector.shape_cast %391 : vector<1x8x128xf32> to vector<8x128xf32>
    %393 = vector.shape_cast %389 : vector<8x128xf32> to vector<1x8x128xf32>
    tpu.vector_store %arg8[%390, %c0_143, %c0_144], %393 {strides = array<i32>} : memref<8x8x128xf32, #tpu.memory_space<vmem>>, vector<1x8x128xf32>,
    %c5_i32 = arith.constant 5 : i32
    %394 = arith.index_cast %c5_i32 : i32 to index
    %c0_145 = arith.constant 0 : index
    %c0_146 = arith.constant 0 : index
    %395 = vector.load %arg9[%394, %c0_145, %c0_146] : memref<8x8x512xf32, #tpu.memory_space<vmem>>, vector<1x8x512xf32>
    %396 = vector.shape_cast %395 : vector<1x8x512xf32> to vector<8x512xf32>
    %cst_147 = arith.constant dense<0.000000e+00> : vector<8x512xf32>
    %397 = tpu.matmul %354, %12, %cst_147 {dimension_numbers = #tpu.dot_dimension_numbers<[1], [0], [0], [1], [0, 0, 1, 1], [], []>} : vector<8x128xf32>, vector<128x512xf32>, vector<8x512xf32> -> vector<8x512xf32>
    %398 = arith.addf %396, %397 : vector<8x512xf32>
    %399 = vector.extract_strided_slice %398 {offsets = [0, 0], sizes = [8, 128], strides = [1, 1]} : vector<8x512xf32> to vector<8x128xf32>
    %cst_148 = arith.constant 5.000000e-01 : f32
    %400 = vector.broadcast %cst_148 : f32 to vector<8x128xf32>
    %401 = arith.mulf %400, %399 : vector<8x128xf32>
    %402 = math.tanh %401 : vector<8x128xf32>
    %cst_149 = arith.constant 5.000000e-01 : f32
    %403 = vector.broadcast %cst_149 : f32 to vector<8x128xf32>
    %404 = arith.mulf %403, %402 : vector<8x128xf32>
    %cst_150 = arith.constant 5.000000e-01 : f32
    %405 = vector.broadcast %cst_150 : f32 to vector<8x128xf32>
    %406 = arith.addf %404, %405 : vector<8x128xf32>
    %407 = vector.extract_strided_slice %398 {offsets = [0, 128], sizes = [8, 128], strides = [1, 1]} : vector<8x512xf32> to vector<8x128xf32>
    %cst_151 = arith.constant 5.000000e-01 : f32
    %408 = vector.broadcast %cst_151 : f32 to vector<8x128xf32>
    %409 = arith.mulf %408, %407 : vector<8x128xf32>
    %410 = math.tanh %409 : vector<8x128xf32>
    %cst_152 = arith.constant 5.000000e-01 : f32
    %411 = vector.broadcast %cst_152 : f32 to vector<8x128xf32>
    %412 = arith.mulf %411, %410 : vector<8x128xf32>
    %cst_153 = arith.constant 5.000000e-01 : f32
    %413 = vector.broadcast %cst_153 : f32 to vector<8x128xf32>
    %414 = arith.addf %412, %413 : vector<8x128xf32>
    %415 = vector.extract_strided_slice %398 {offsets = [0, 256], sizes = [8, 128], strides = [1, 1]} : vector<8x512xf32> to vector<8x128xf32>
    %416 = math.tanh %415 : vector<8x128xf32>
    %417 = vector.extract_strided_slice %398 {offsets = [0, 384], sizes = [8, 128], strides = [1, 1]} : vector<8x512xf32> to vector<8x128xf32>
    %cst_154 = arith.constant 5.000000e-01 : f32
    %418 = vector.broadcast %cst_154 : f32 to vector<8x128xf32>
    %419 = arith.mulf %418, %417 : vector<8x128xf32>
    %420 = math.tanh %419 : vector<8x128xf32>
    %cst_155 = arith.constant 5.000000e-01 : f32
    %421 = vector.broadcast %cst_155 : f32 to vector<8x128xf32>
    %422 = arith.mulf %421, %420 : vector<8x128xf32>
    %cst_156 = arith.constant 5.000000e-01 : f32
    %423 = vector.broadcast %cst_156 : f32 to vector<8x128xf32>
    %424 = arith.addf %422, %423 : vector<8x128xf32>
    %425 = arith.mulf %414, %352 : vector<8x128xf32>
    %426 = arith.mulf %406, %416 : vector<8x128xf32>
    %427 = arith.addf %425, %426 : vector<8x128xf32>
    %428 = math.tanh %427 : vector<8x128xf32>
    %429 = arith.mulf %424, %428 : vector<8x128xf32>
    %430 = tpu.concatenate %429, %389 in 1 : vector<8x128xf32>, vector<8x128xf32> -> vector<8x256xf32>
    %cst_157 = arith.constant dense<0.000000e+00> : vector<8x512xf32>
    %431 = tpu.matmul %430, %13, %cst_157 {dimension_numbers = #tpu.dot_dimension_numbers<[1], [0], [0], [1], [0, 0, 1, 1], [], []>} : vector<8x256xf32>, vector<256x512xf32>, vector<8x512xf32> -> vector<8x512xf32>
    %432 = vector.broadcast %14 : vector<1x512xf32> to vector<8x512xf32>
    %433 = arith.addf %431, %432 : vector<8x512xf32>
    %434 = vector.extract_strided_slice %433 {offsets = [0, 0], sizes = [8, 128], strides = [1, 1]} : vector<8x512xf32> to vector<8x128xf32>
    %cst_158 = arith.constant 5.000000e-01 : f32
    %435 = vector.broadcast %cst_158 : f32 to vector<8x128xf32>
    %436 = arith.mulf %435, %434 : vector<8x128xf32>
    %437 = math.tanh %436 : vector<8x128xf32>
    %cst_159 = arith.constant 5.000000e-01 : f32
    %438 = vector.broadcast %cst_159 : f32 to vector<8x128xf32>
    %439 = arith.mulf %438, %437 : vector<8x128xf32>
    %cst_160 = arith.constant 5.000000e-01 : f32
    %440 = vector.broadcast %cst_160 : f32 to vector<8x128xf32>
    %441 = arith.addf %439, %440 : vector<8x128xf32>
    %442 = vector.extract_strided_slice %433 {offsets = [0, 128], sizes = [8, 128], strides = [1, 1]} : vector<8x512xf32> to vector<8x128xf32>
    %cst_161 = arith.constant 5.000000e-01 : f32
    %443 = vector.broadcast %cst_161 : f32 to vector<8x128xf32>
    %444 = arith.mulf %443, %442 : vector<8x128xf32>
    %445 = math.tanh %444 : vector<8x128xf32>
    %cst_162 = arith.constant 5.000000e-01 : f32
    %446 = vector.broadcast %cst_162 : f32 to vector<8x128xf32>
    %447 = arith.mulf %446, %445 : vector<8x128xf32>
    %cst_163 = arith.constant 5.000000e-01 : f32
    %448 = vector.broadcast %cst_163 : f32 to vector<8x128xf32>
    %449 = arith.addf %447, %448 : vector<8x128xf32>
    %450 = vector.extract_strided_slice %433 {offsets = [0, 256], sizes = [8, 128], strides = [1, 1]} : vector<8x512xf32> to vector<8x128xf32>
    %451 = math.tanh %450 : vector<8x128xf32>
    %452 = vector.extract_strided_slice %433 {offsets = [0, 384], sizes = [8, 128], strides = [1, 1]} : vector<8x512xf32> to vector<8x128xf32>
    %cst_164 = arith.constant 5.000000e-01 : f32
    %453 = vector.broadcast %cst_164 : f32 to vector<8x128xf32>
    %454 = arith.mulf %453, %452 : vector<8x128xf32>
    %455 = math.tanh %454 : vector<8x128xf32>
    %cst_165 = arith.constant 5.000000e-01 : f32
    %456 = vector.broadcast %cst_165 : f32 to vector<8x128xf32>
    %457 = arith.mulf %456, %455 : vector<8x128xf32>
    %cst_166 = arith.constant 5.000000e-01 : f32
    %458 = vector.broadcast %cst_166 : f32 to vector<8x128xf32>
    %459 = arith.addf %457, %458 : vector<8x128xf32>
    %460 = arith.mulf %449, %387 : vector<8x128xf32>
    %461 = arith.mulf %441, %451 : vector<8x128xf32>
    %462 = arith.addf %460, %461 : vector<8x128xf32>
    %463 = math.tanh %462 : vector<8x128xf32>
    %464 = arith.mulf %459, %463 : vector<8x128xf32>
    %465 = arith.index_cast %c5_i32 : i32 to index
    %c0_167 = arith.constant 0 : index
    %c0_168 = arith.constant 0 : index
    %466 = vector.load %arg8[%465, %c0_167, %c0_168] : memref<8x8x128xf32, #tpu.memory_space<vmem>>, vector<1x8x128xf32>
    %467 = vector.shape_cast %466 : vector<1x8x128xf32> to vector<8x128xf32>
    %468 = vector.shape_cast %464 : vector<8x128xf32> to vector<1x8x128xf32>
    tpu.vector_store %arg8[%465, %c0_167, %c0_168], %468 {strides = array<i32>} : memref<8x8x128xf32, #tpu.memory_space<vmem>>, vector<1x8x128xf32>,
    %c6_i32 = arith.constant 6 : i32
    %469 = arith.index_cast %c6_i32 : i32 to index
    %c0_169 = arith.constant 0 : index
    %c0_170 = arith.constant 0 : index
    %470 = vector.load %arg9[%469, %c0_169, %c0_170] : memref<8x8x512xf32, #tpu.memory_space<vmem>>, vector<1x8x512xf32>
    %471 = vector.shape_cast %470 : vector<1x8x512xf32> to vector<8x512xf32>
    %cst_171 = arith.constant dense<0.000000e+00> : vector<8x512xf32>
    %472 = tpu.matmul %429, %12, %cst_171 {dimension_numbers = #tpu.dot_dimension_numbers<[1], [0], [0], [1], [0, 0, 1, 1], [], []>} : vector<8x128xf32>, vector<128x512xf32>, vector<8x512xf32> -> vector<8x512xf32>
    %473 = arith.addf %471, %472 : vector<8x512xf32>
    %474 = vector.extract_strided_slice %473 {offsets = [0, 0], sizes = [8, 128], strides = [1, 1]} : vector<8x512xf32> to vector<8x128xf32>
    %cst_172 = arith.constant 5.000000e-01 : f32
    %475 = vector.broadcast %cst_172 : f32 to vector<8x128xf32>
    %476 = arith.mulf %475, %474 : vector<8x128xf32>
    %477 = math.tanh %476 : vector<8x128xf32>
    %cst_173 = arith.constant 5.000000e-01 : f32
    %478 = vector.broadcast %cst_173 : f32 to vector<8x128xf32>
    %479 = arith.mulf %478, %477 : vector<8x128xf32>
    %cst_174 = arith.constant 5.000000e-01 : f32
    %480 = vector.broadcast %cst_174 : f32 to vector<8x128xf32>
    %481 = arith.addf %479, %480 : vector<8x128xf32>
    %482 = vector.extract_strided_slice %473 {offsets = [0, 128], sizes = [8, 128], strides = [1, 1]} : vector<8x512xf32> to vector<8x128xf32>
    %cst_175 = arith.constant 5.000000e-01 : f32
    %483 = vector.broadcast %cst_175 : f32 to vector<8x128xf32>
    %484 = arith.mulf %483, %482 : vector<8x128xf32>
    %485 = math.tanh %484 : vector<8x128xf32>
    %cst_176 = arith.constant 5.000000e-01 : f32
    %486 = vector.broadcast %cst_176 : f32 to vector<8x128xf32>
    %487 = arith.mulf %486, %485 : vector<8x128xf32>
    %cst_177 = arith.constant 5.000000e-01 : f32
    %488 = vector.broadcast %cst_177 : f32 to vector<8x128xf32>
    %489 = arith.addf %487, %488 : vector<8x128xf32>
    %490 = vector.extract_strided_slice %473 {offsets = [0, 256], sizes = [8, 128], strides = [1, 1]} : vector<8x512xf32> to vector<8x128xf32>
    %491 = math.tanh %490 : vector<8x128xf32>
    %492 = vector.extract_strided_slice %473 {offsets = [0, 384], sizes = [8, 128], strides = [1, 1]} : vector<8x512xf32> to vector<8x128xf32>
    %cst_178 = arith.constant 5.000000e-01 : f32
    %493 = vector.broadcast %cst_178 : f32 to vector<8x128xf32>
    %494 = arith.mulf %493, %492 : vector<8x128xf32>
    %495 = math.tanh %494 : vector<8x128xf32>
    %cst_179 = arith.constant 5.000000e-01 : f32
    %496 = vector.broadcast %cst_179 : f32 to vector<8x128xf32>
    %497 = arith.mulf %496, %495 : vector<8x128xf32>
    %cst_180 = arith.constant 5.000000e-01 : f32
    %498 = vector.broadcast %cst_180 : f32 to vector<8x128xf32>
    %499 = arith.addf %497, %498 : vector<8x128xf32>
    %500 = arith.mulf %489, %427 : vector<8x128xf32>
    %501 = arith.mulf %481, %491 : vector<8x128xf32>
    %502 = arith.addf %500, %501 : vector<8x128xf32>
    %503 = math.tanh %502 : vector<8x128xf32>
    %504 = arith.mulf %499, %503 : vector<8x128xf32>
    %505 = tpu.concatenate %504, %464 in 1 : vector<8x128xf32>, vector<8x128xf32> -> vector<8x256xf32>
    %cst_181 = arith.constant dense<0.000000e+00> : vector<8x512xf32>
    %506 = tpu.matmul %505, %13, %cst_181 {dimension_numbers = #tpu.dot_dimension_numbers<[1], [0], [0], [1], [0, 0, 1, 1], [], []>} : vector<8x256xf32>, vector<256x512xf32>, vector<8x512xf32> -> vector<8x512xf32>
    %507 = vector.broadcast %14 : vector<1x512xf32> to vector<8x512xf32>
    %508 = arith.addf %506, %507 : vector<8x512xf32>
    %509 = vector.extract_strided_slice %508 {offsets = [0, 0], sizes = [8, 128], strides = [1, 1]} : vector<8x512xf32> to vector<8x128xf32>
    %cst_182 = arith.constant 5.000000e-01 : f32
    %510 = vector.broadcast %cst_182 : f32 to vector<8x128xf32>
    %511 = arith.mulf %510, %509 : vector<8x128xf32>
    %512 = math.tanh %511 : vector<8x128xf32>
    %cst_183 = arith.constant 5.000000e-01 : f32
    %513 = vector.broadcast %cst_183 : f32 to vector<8x128xf32>
    %514 = arith.mulf %513, %512 : vector<8x128xf32>
    %cst_184 = arith.constant 5.000000e-01 : f32
    %515 = vector.broadcast %cst_184 : f32 to vector<8x128xf32>
    %516 = arith.addf %514, %515 : vector<8x128xf32>
    %517 = vector.extract_strided_slice %508 {offsets = [0, 128], sizes = [8, 128], strides = [1, 1]} : vector<8x512xf32> to vector<8x128xf32>
    %cst_185 = arith.constant 5.000000e-01 : f32
    %518 = vector.broadcast %cst_185 : f32 to vector<8x128xf32>
    %519 = arith.mulf %518, %517 : vector<8x128xf32>
    %520 = math.tanh %519 : vector<8x128xf32>
    %cst_186 = arith.constant 5.000000e-01 : f32
    %521 = vector.broadcast %cst_186 : f32 to vector<8x128xf32>
    %522 = arith.mulf %521, %520 : vector<8x128xf32>
    %cst_187 = arith.constant 5.000000e-01 : f32
    %523 = vector.broadcast %cst_187 : f32 to vector<8x128xf32>
    %524 = arith.addf %522, %523 : vector<8x128xf32>
    %525 = vector.extract_strided_slice %508 {offsets = [0, 256], sizes = [8, 128], strides = [1, 1]} : vector<8x512xf32> to vector<8x128xf32>
    %526 = math.tanh %525 : vector<8x128xf32>
    %527 = vector.extract_strided_slice %508 {offsets = [0, 384], sizes = [8, 128], strides = [1, 1]} : vector<8x512xf32> to vector<8x128xf32>
    %cst_188 = arith.constant 5.000000e-01 : f32
    %528 = vector.broadcast %cst_188 : f32 to vector<8x128xf32>
    %529 = arith.mulf %528, %527 : vector<8x128xf32>
    %530 = math.tanh %529 : vector<8x128xf32>
    %cst_189 = arith.constant 5.000000e-01 : f32
    %531 = vector.broadcast %cst_189 : f32 to vector<8x128xf32>
    %532 = arith.mulf %531, %530 : vector<8x128xf32>
    %cst_190 = arith.constant 5.000000e-01 : f32
    %533 = vector.broadcast %cst_190 : f32 to vector<8x128xf32>
    %534 = arith.addf %532, %533 : vector<8x128xf32>
    %535 = arith.mulf %524, %462 : vector<8x128xf32>
    %536 = arith.mulf %516, %526 : vector<8x128xf32>
    %537 = arith.addf %535, %536 : vector<8x128xf32>
    %538 = math.tanh %537 : vector<8x128xf32>
    %539 = arith.mulf %534, %538 : vector<8x128xf32>
    %540 = arith.index_cast %c6_i32 : i32 to index
    %c0_191 = arith.constant 0 : index
    %c0_192 = arith.constant 0 : index
    %541 = vector.load %arg8[%540, %c0_191, %c0_192] : memref<8x8x128xf32, #tpu.memory_space<vmem>>, vector<1x8x128xf32>
    %542 = vector.shape_cast %541 : vector<1x8x128xf32> to vector<8x128xf32>
    %543 = vector.shape_cast %539 : vector<8x128xf32> to vector<1x8x128xf32>
    tpu.vector_store %arg8[%540, %c0_191, %c0_192], %543 {strides = array<i32>} : memref<8x8x128xf32, #tpu.memory_space<vmem>>, vector<1x8x128xf32>,
    %c7_i32 = arith.constant 7 : i32
    %544 = arith.index_cast %c7_i32 : i32 to index
    %c0_193 = arith.constant 0 : index
    %c0_194 = arith.constant 0 : index
    %545 = vector.load %arg9[%544, %c0_193, %c0_194] : memref<8x8x512xf32, #tpu.memory_space<vmem>>, vector<1x8x512xf32>
    %546 = vector.shape_cast %545 : vector<1x8x512xf32> to vector<8x512xf32>
    %cst_195 = arith.constant dense<0.000000e+00> : vector<8x512xf32>
    %547 = tpu.matmul %504, %12, %cst_195 {dimension_numbers = #tpu.dot_dimension_numbers<[1], [0], [0], [1], [0, 0, 1, 1], [], []>} : vector<8x128xf32>, vector<128x512xf32>, vector<8x512xf32> -> vector<8x512xf32>
    %548 = arith.addf %546, %547 : vector<8x512xf32>
    %549 = vector.extract_strided_slice %548 {offsets = [0, 0], sizes = [8, 128], strides = [1, 1]} : vector<8x512xf32> to vector<8x128xf32>
    %cst_196 = arith.constant 5.000000e-01 : f32
    %550 = vector.broadcast %cst_196 : f32 to vector<8x128xf32>
    %551 = arith.mulf %550, %549 : vector<8x128xf32>
    %552 = math.tanh %551 : vector<8x128xf32>
    %cst_197 = arith.constant 5.000000e-01 : f32
    %553 = vector.broadcast %cst_197 : f32 to vector<8x128xf32>
    %554 = arith.mulf %553, %552 : vector<8x128xf32>
    %cst_198 = arith.constant 5.000000e-01 : f32
    %555 = vector.broadcast %cst_198 : f32 to vector<8x128xf32>
    %556 = arith.addf %554, %555 : vector<8x128xf32>
    %557 = vector.extract_strided_slice %548 {offsets = [0, 128], sizes = [8, 128], strides = [1, 1]} : vector<8x512xf32> to vector<8x128xf32>
    %cst_199 = arith.constant 5.000000e-01 : f32
    %558 = vector.broadcast %cst_199 : f32 to vector<8x128xf32>
    %559 = arith.mulf %558, %557 : vector<8x128xf32>
    %560 = math.tanh %559 : vector<8x128xf32>
    %cst_200 = arith.constant 5.000000e-01 : f32
    %561 = vector.broadcast %cst_200 : f32 to vector<8x128xf32>
    %562 = arith.mulf %561, %560 : vector<8x128xf32>
    %cst_201 = arith.constant 5.000000e-01 : f32
    %563 = vector.broadcast %cst_201 : f32 to vector<8x128xf32>
    %564 = arith.addf %562, %563 : vector<8x128xf32>
    %565 = vector.extract_strided_slice %548 {offsets = [0, 256], sizes = [8, 128], strides = [1, 1]} : vector<8x512xf32> to vector<8x128xf32>
    %566 = math.tanh %565 : vector<8x128xf32>
    %567 = vector.extract_strided_slice %548 {offsets = [0, 384], sizes = [8, 128], strides = [1, 1]} : vector<8x512xf32> to vector<8x128xf32>
    %cst_202 = arith.constant 5.000000e-01 : f32
    %568 = vector.broadcast %cst_202 : f32 to vector<8x128xf32>
    %569 = arith.mulf %568, %567 : vector<8x128xf32>
    %570 = math.tanh %569 : vector<8x128xf32>
    %cst_203 = arith.constant 5.000000e-01 : f32
    %571 = vector.broadcast %cst_203 : f32 to vector<8x128xf32>
    %572 = arith.mulf %571, %570 : vector<8x128xf32>
    %cst_204 = arith.constant 5.000000e-01 : f32
    %573 = vector.broadcast %cst_204 : f32 to vector<8x128xf32>
    %574 = arith.addf %572, %573 : vector<8x128xf32>
    %575 = arith.mulf %564, %502 : vector<8x128xf32>
    %576 = arith.mulf %556, %566 : vector<8x128xf32>
    %577 = arith.addf %575, %576 : vector<8x128xf32>
    %578 = math.tanh %577 : vector<8x128xf32>
    %579 = arith.mulf %574, %578 : vector<8x128xf32>
    %580 = tpu.concatenate %579, %539 in 1 : vector<8x128xf32>, vector<8x128xf32> -> vector<8x256xf32>
    %cst_205 = arith.constant dense<0.000000e+00> : vector<8x512xf32>
    %581 = tpu.matmul %580, %13, %cst_205 {dimension_numbers = #tpu.dot_dimension_numbers<[1], [0], [0], [1], [0, 0, 1, 1], [], []>} : vector<8x256xf32>, vector<256x512xf32>, vector<8x512xf32> -> vector<8x512xf32>
    %582 = vector.broadcast %14 : vector<1x512xf32> to vector<8x512xf32>
    %583 = arith.addf %581, %582 : vector<8x512xf32>
    %584 = vector.extract_strided_slice %583 {offsets = [0, 0], sizes = [8, 128], strides = [1, 1]} : vector<8x512xf32> to vector<8x128xf32>
    %cst_206 = arith.constant 5.000000e-01 : f32
    %585 = vector.broadcast %cst_206 : f32 to vector<8x128xf32>
    %586 = arith.mulf %585, %584 : vector<8x128xf32>
    %587 = math.tanh %586 : vector<8x128xf32>
    %cst_207 = arith.constant 5.000000e-01 : f32
    %588 = vector.broadcast %cst_207 : f32 to vector<8x128xf32>
    %589 = arith.mulf %588, %587 : vector<8x128xf32>
    %cst_208 = arith.constant 5.000000e-01 : f32
    %590 = vector.broadcast %cst_208 : f32 to vector<8x128xf32>
    %591 = arith.addf %589, %590 : vector<8x128xf32>
    %592 = vector.extract_strided_slice %583 {offsets = [0, 128], sizes = [8, 128], strides = [1, 1]} : vector<8x512xf32> to vector<8x128xf32>
    %cst_209 = arith.constant 5.000000e-01 : f32
    %593 = vector.broadcast %cst_209 : f32 to vector<8x128xf32>
    %594 = arith.mulf %593, %592 : vector<8x128xf32>
    %595 = math.tanh %594 : vector<8x128xf32>
    %cst_210 = arith.constant 5.000000e-01 : f32
    %596 = vector.broadcast %cst_210 : f32 to vector<8x128xf32>
    %597 = arith.mulf %596, %595 : vector<8x128xf32>
    %cst_211 = arith.constant 5.000000e-01 : f32
    %598 = vector.broadcast %cst_211 : f32 to vector<8x128xf32>
    %599 = arith.addf %597, %598 : vector<8x128xf32>
    %600 = vector.extract_strided_slice %583 {offsets = [0, 256], sizes = [8, 128], strides = [1, 1]} : vector<8x512xf32> to vector<8x128xf32>
    %601 = math.tanh %600 : vector<8x128xf32>
    %602 = vector.extract_strided_slice %583 {offsets = [0, 384], sizes = [8, 128], strides = [1, 1]} : vector<8x512xf32> to vector<8x128xf32>
    %cst_212 = arith.constant 5.000000e-01 : f32
    %603 = vector.broadcast %cst_212 : f32 to vector<8x128xf32>
    %604 = arith.mulf %603, %602 : vector<8x128xf32>
    %605 = math.tanh %604 : vector<8x128xf32>
    %cst_213 = arith.constant 5.000000e-01 : f32
    %606 = vector.broadcast %cst_213 : f32 to vector<8x128xf32>
    %607 = arith.mulf %606, %605 : vector<8x128xf32>
    %cst_214 = arith.constant 5.000000e-01 : f32
    %608 = vector.broadcast %cst_214 : f32 to vector<8x128xf32>
    %609 = arith.addf %607, %608 : vector<8x128xf32>
    %610 = arith.mulf %599, %537 : vector<8x128xf32>
    %611 = arith.mulf %591, %601 : vector<8x128xf32>
    %612 = arith.addf %610, %611 : vector<8x128xf32>
    %613 = math.tanh %612 : vector<8x128xf32>
    %614 = arith.mulf %609, %613 : vector<8x128xf32>
    %615 = arith.index_cast %c7_i32 : i32 to index
    %c0_215 = arith.constant 0 : index
    %c0_216 = arith.constant 0 : index
    %616 = vector.load %arg8[%615, %c0_215, %c0_216] : memref<8x8x128xf32, #tpu.memory_space<vmem>>, vector<1x8x128xf32>
    %617 = vector.shape_cast %616 : vector<1x8x128xf32> to vector<8x128xf32>
    %618 = vector.shape_cast %614 : vector<8x128xf32> to vector<1x8x128xf32>
    tpu.vector_store %arg8[%615, %c0_215, %c0_216], %618 {strides = array<i32>} : memref<8x8x128xf32, #tpu.memory_space<vmem>>, vector<1x8x128xf32>,
    %c8_i32 = arith.constant 8 : i32
    %c0_217 = arith.constant 0 : index
    %c0_218 = arith.constant 0 : index
    %619 = vector.load %arg10[%c0_217, %c0_218] : memref<8x128xf32, #tpu.memory_space<vmem>>, vector<8x128xf32>
    tpu.vector_store %arg10[%c0_217, %c0_218], %579 {strides = array<i32>} : memref<8x128xf32, #tpu.memory_space<vmem>>, vector<8x128xf32>,
    %c0_219 = arith.constant 0 : index
    %c0_220 = arith.constant 0 : index
    %620 = vector.load %arg11[%c0_219, %c0_220] : memref<8x128xf32, #tpu.memory_space<vmem>>, vector<8x128xf32>
    tpu.vector_store %arg11[%c0_219, %c0_220], %577 {strides = array<i32>} : memref<8x128xf32, #tpu.memory_space<vmem>>, vector<8x128xf32>,
    %c0_221 = arith.constant 0 : index
    %c0_222 = arith.constant 0 : index
    %621 = vector.load %arg12[%c0_221, %c0_222] : memref<8x128xf32, #tpu.memory_space<vmem>>, vector<8x128xf32>
    tpu.vector_store %arg12[%c0_221, %c0_222], %614 {strides = array<i32>} : memref<8x128xf32, #tpu.memory_space<vmem>>, vector<8x128xf32>,
    %c0_223 = arith.constant 0 : index
    %c0_224 = arith.constant 0 : index
    %622 = vector.load %arg13[%c0_223, %c0_224] : memref<8x128xf32, #tpu.memory_space<vmem>>, vector<8x128xf32>
    tpu.vector_store %arg13[%c0_223, %c0_224], %612 {strides = array<i32>} : memref<8x128xf32, #tpu.memory_space<vmem>>, vector<8x128xf32>,
    return
  }
  func.func @transform_0(%arg0: i32, %arg1: i32) -> (i32, i32, i32) {
    %c0_i32 = arith.constant 0 : i32
    %c0_i32_0 = arith.constant 0 : i32
    return %arg1, %arg0, %c0_i32 : i32, i32, i32
  }
  func.func @transform_1(%arg0: i32, %arg1: i32) -> (i32, i32) {
    %c0_i32 = arith.constant 0 : i32
    %c0_i32_0 = arith.constant 0 : i32
    %c0_i32_1 = arith.constant 0 : i32
    return %c0_i32, %c0_i32_0 : i32, i32
  }
  func.func @transform_2(%arg0: i32, %arg1: i32) -> (i32, i32) {
    %c0_i32 = arith.constant 0 : i32
    %c0_i32_0 = arith.constant 0 : i32
    %c0_i32_1 = arith.constant 0 : i32
    return %c0_i32, %c0_i32_0 : i32, i32
  }
  func.func @transform_3(%arg0: i32, %arg1: i32) -> (i32, i32) {
    %c0_i32 = arith.constant 0 : i32
    %c0_i32_0 = arith.constant 0 : i32
    %c0_i32_1 = arith.constant 0 : i32
    return %c0_i32, %c0_i32_0 : i32, i32
  }
  func.func @transform_4(%arg0: i32, %arg1: i32) -> (i32, i32) {
    %c0_i32 = arith.constant 0 : i32
    %c0_i32_0 = arith.constant 0 : i32
    %c0_i32_1 = arith.constant 0 : i32
    return %c0_i32, %c0_i32_0 : i32, i32
  }
  func.func @transform_5(%arg0: i32, %arg1: i32) -> (i32, i32) {
    %c0_i32 = arith.constant 0 : i32
    %c0_i32_0 = arith.constant 0 : i32
    %c0_i32_1 = arith.constant 0 : i32
    return %c0_i32, %c0_i32_0 : i32, i32
  }
  func.func @transform_6(%arg0: i32, %arg1: i32) -> (i32, i32, i32) {
    %c0_i32 = arith.constant 0 : i32
    %c0_i32_0 = arith.constant 0 : i32
    return %arg1, %arg0, %c0_i32 : i32, i32, i32
  }
}

</mosaic_0001>

<bundles_post_ra>
// kernel: tpu_custom_call.1
= control target key start
LH: loop header
LB: loop body
LE: loop exit
PB: predicated region body
PF: predicated region fallthrough
CT: control target
= control target key end

     0   :  { %11 = vsyncpa [#allocation8], 0  ;;  %s9518_s0 = inlined_call_operand.hbm [shape: f32[8,8,788], index: 0, kind: input, shape index: {}]   ;;  %s9519_s1 = inlined_call_operand.hbm [shape: f32[788,512], index: 1, kind: input, shape index: {}]   ;;  %s9520_s2 = inlined_call_operand.hbm [shape: f32[128,512], index: 2, kind: input, shape index: {}]   ;;  %s9521_s3 = inlined_call_operand.hbm [shape: f32[1,512], index: 3, kind: input, shape index: {}]   ;;  %s9522_s4 = inlined_call_operand.hbm [shape: f32[256,512], index: 4, kind: input, shape index: {}]   ;;  %s9523_s5 = inlined_call_operand.hbm [shape: f32[1,512], index: 5, kind: input, shape index: {}]   ;;  %s9524_s6 = inlined_call_operand.hbm [shape: f32[8,8,128], index: 6, kind: output, shape index: {}]  }
   0x1   :  { %12 = vsyncpa [#allocation11], 0 }
   0x2   :  { %13 = vsyncpa [#allocation14], 0 }
   0x3   :  { %14 = vsyncpa [#allocation17], 0  ;;  %s33_s23 = sshll.u32 %s9519_s1, 4  ;;  %s34_s23 = int_to_ptr.hbm [resolvable:$true] %s33_s23 }
   0x4   :  { %15 = vsyncpa [#allocation9], 0  ;;  %s5382_s24 = smov [#allocation10]   ;;  %s60_s28 = sshll.u32 %s9521_s3, 4  ;;  %s61_s28 = int_to_ptr.hbm [resolvable:$true] %s60_s28 }
   0x5   :  { %s35_s25 = sshll.u32 %s5382_s24, 4  ;;  %s5383_s29 = smov 512   ;;  %s36_s25 = int_to_ptr.vmem [resolvable:$true] %s35_s25 }
   0x6   :  { %s5384_s30 = smov 32   ;;  %s5385_s7 = smov [#allocation13]  }
   0x7   :  { %41 = dma.hbm_to_vmem [thread:$0]  %s34_s23, 50688, %s36_s25, [#allocation11], %s5383_s29, %s5383_s29, %s5384_s30  }
   0x8   :  { %s62_s8 = sshll.u32 %s5385_s7, 4  ;;  %s20_s10 = sshll.u32 %s9518_s0, 4  ;;  %s63_s8 = int_to_ptr.vmem [resolvable:$true] %s62_s8  ;;  %s21_s10 = int_to_ptr.hbm [resolvable:$true] %s20_s10 }
   0x9   :  { %65 = dma.hbm_to_vmem [thread:$0]  %s61_s28, 64, %s63_s8, [#allocation14]  }
   0xa   :  { %s5386_s11 = smov [#allocation7]   ;;  %s46_s14 = sshll.u32 %s9520_s2, 4  ;;  %s47_s14 = int_to_ptr.hbm [resolvable:$true] %s46_s14 }
   0xb   :  { %s22_s12 = sshll.u32 %s5386_s11, 4  ;;  %s5387_s15 = smov 896   ;;  %s23_s12 = int_to_ptr.vmem [resolvable:$true] %s22_s12 }
   0xc   :  { %s5388_s16 = smov 56   ;;  %s5389_s17 = smov [#allocation12]  }
   0xd   :  { %28 = dma.hbm_to_vmem [thread:$0]  %s21_s10, 7168, %s23_s12, [#allocation8], %s5387_s15, %s5387_s15, %s5388_s16  }
   0xe   :  { %s48_s18 = sshll.u32 %s5389_s17, 4  ;;  %s70_s0 = sshll.u32 %s9522_s4, 4  ;;  %s49_s18 = int_to_ptr.vmem [resolvable:$true] %s48_s18  ;;  %s71_s0 = int_to_ptr.hbm [resolvable:$true] %s70_s0 }
   0xf   :  { %54 = dma.hbm_to_vmem [thread:$0]  %s47_s14, 8192, %s49_s18, [#allocation11], %s5383_s29, %s5383_s29, %s5384_s30  }
  0x10   :  { %s84_s2 = sshll.u32 %s9523_s5, 4  ;;  %s5390_s23 = smov [#allocation15]   ;;  %s85_s2 = int_to_ptr.hbm [resolvable:$true] %s84_s2 }
  0x11   :  { %s72_s24 = sshll.u32 %s5390_s23, 4  ;;  %s5391_s25 = smov [#allocation16]   ;;  %s73_s24 = int_to_ptr.vmem [resolvable:$true] %s72_s24 }
  0x12   :  { %78 = dma.hbm_to_vmem [thread:$0]  %s71_s0, 16384, %s73_s24, [#allocation14], %s5383_s29, %s5383_s29, %s5384_s30  }
  0x13   :  { %s86_s4 = sshll.u32 %s5391_s25, 4  ;;  %s87_s4 = int_to_ptr.vmem [resolvable:$true] %s86_s4 }
  0x14   :  { %89 = dma.hbm_to_vmem [thread:$0]  %s85_s2, 64, %s87_s4, [#allocation17]  }
  0x15   :  { %5372 = dma.done.wait [#allocation8], 7168  }
  0x16   :  { %5373 = vsyncadd [#allocation8], 4294960128 }
  0x17   :  { %5374 = dma.done.wait [#allocation11], 58880  }
  0x18   :  { %5375 = vsyncadd [#allocation11], 4294908416 }
  0x19   :  { %5376 = dma.done.wait [#allocation14], 16448  }
  0x1a   :  { %5377 = vsyncadd [#allocation14], 4294950848 }
  0x1b   :  { %5378 = dma.done.wait [#allocation17], 64  }
  0x1c   :  { %5379 = vsyncadd [#allocation17], 4294967232  ;;  %v238_v0 = vld [vmem:[#allocation10 + $0x1e0] sm:$0xff]  ;;  %vm609_vm0 = vcmask 1043456   ;;  %vm584_vm1 = vcmask 162816   ;;  %s5393_s5 = smov [#allocation18]  }
  0x1d   :  { %v302_v1 = vld [vmem:[#allocation10 + $0x3e0] sm:$0xff]  ;;  %622 = vmatpush.msra.mxu0 %v238_v0  ;;  %s4310_s26 = sshll.u32 %s5393_s5, 4  ;;  %s4312_s29 = sshll.u32 %s9524_s6, 4  ;;  %s4311_s26 = int_to_ptr.vmem [resolvable:$true] %s4310_s26  ;;  %s4313_s29 = int_to_ptr.hbm [resolvable:$true] %s4312_s29 }
  0x1e   :  { %v366_v2 = vld [vmem:[#allocation10 + $0x5e0] sm:$0xff]  ;;  %663 = vmatpush.msra.mxu1 %v302_v1  ;;  %v5460_v1 = vld [vmem:[#allocation7 + $0x8] sm:$0xff]  ;;  %s5394_s30 = smov 128   ;;  %s5395_s7 = smov 8  }
  0x1f   :  { %v430_v3 = vld [vmem:[#allocation10 + $0x7e0] sm:$0xff]  ;;  %704 = vmatpush.msra.mxu2 %v366_v2  ;;  %v5462_v2 = vld [vmem:[#allocation7 + $0x10] sm:$0xff] }
  0x20   :  { %v234_v4 = vld [vmem:[#allocation10 + $0x1c0] sm:$0xff]  ;;  %745 = vmatpush.msra.mxu3 %v430_v3  ;;  %v5464_v3 = vld [vmem:[#allocation7 + $0x18] sm:$0xff] }
  0x21   :  { %v298_v5 = vld [vmem:[#allocation10 + $0x3c0] sm:$0xff]  ;;  %623 = vmatpush.msra.mxu0 %v234_v4 }
  0x22   :  { %v362_v6 = vld [vmem:[#allocation10 + $0x5c0] sm:$0xff]  ;;  %664 = vmatpush.msra.mxu1 %v298_v5 }
  0x23   :  { %v426_v7 = vld [vmem:[#allocation10 + $0x7c0] sm:$0xff]  ;;  %705 = vmatpush.msra.mxu2 %v362_v6 }
  0x24   :  { %v230_v8 = vld [vmem:[#allocation10 + $0x1a0] sm:$0xff]  ;;  %746 = vmatpush.msra.mxu3 %v426_v7  ;;  %v239_v7 = vld [vmem:[#allocation10 + $0x1e8] sm:$0xff] }
  0x25   :  { %v294_v9 = vld [vmem:[#allocation10 + $0x3a0] sm:$0xff]  ;;  %624 = vmatpush.msra.mxu0 %v230_v8 }
  0x26   :  { %v358_v10 = vld [vmem:[#allocation10 + $0x5a0] sm:$0xff]  ;;  %665 = vmatpush.msra.mxu1 %v294_v9 }
  0x27   :  { %v422_v11 = vld [vmem:[#allocation10 + $0x7a0] sm:$0xff]  ;;  %706 = vmatpush.msra.mxu2 %v358_v10  ;;  %v235_v10 = vld [vmem:[#allocation10 + $0x1c8] sm:$0xff] }
  0x28   :  { %v226_v12 = vld [vmem:[#allocation10 + $0x180] sm:$0xff]  ;;  %747 = vmatpush.msra.mxu3 %v422_v11 }
  0x29   :  { %v290_v13 = vld [vmem:[#allocation10 + $0x380] sm:$0xff]  ;;  %625 = vmatpush.msra.mxu0 %v226_v12 }
  0x2a   :  { %v354_v14 = vld [vmem:[#allocation10 + $0x580] sm:$0xff]  ;;  %666 = vmatpush.msra.mxu1 %v290_v13 }
  0x2b   :  { %v418_v15 = vld [vmem:[#allocation10 + $0x780] sm:$0xff]  ;;  %707 = vmatpush.msra.mxu2 %v354_v14  ;;  %v231_v14 = vld [vmem:[#allocation10 + $0x1a8] sm:$0xff] }
  0x2c   :  { %v222_v16 = vld [vmem:[#allocation10 + $0x160] sm:$0xff]  ;;  %748 = vmatpush.msra.mxu3 %v418_v15  ;;  %v5471_v15 = vld [vmem:[#allocation7 + $0x38] sm:$0xff] }
  0x2d   :  { %v286_v17 = vld [vmem:[#allocation10 + $0x360] sm:$0xff]  ;;  %626 = vmatpush.msra.mxu0 %v222_v16 }
  0x2e   :  { %v350_v18 = vld [vmem:[#allocation10 + $0x560] sm:$0xff]  ;;  %667 = vmatpush.msra.mxu1 %v286_v17  ;;  %v5475_v17 = vld [vmem:[#allocation7 + $0x48] sm:$0xff] }
  0x2f   :  { %v414_v19 = vld [vmem:[#allocation10 + $0x760] sm:$0xff]  ;;  %708 = vmatpush.msra.mxu2 %v350_v18  ;;  %v5477_v18 = vld [vmem:[#allocation7 + $0x50] sm:$0xff] }
  0x30   :  { %v218_v20 = vld [vmem:[#allocation10 + $0x140] sm:$0xff]  ;;  %749 = vmatpush.msra.mxu3 %v414_v19 }
  0x31   :  { %v282_v21 = vld [vmem:[#allocation10 + $0x340] sm:$0xff]  ;;  %627 = vmatpush.msra.mxu0 %v218_v20 }
  0x32   :  { %v346_v22 = vld [vmem:[#allocation10 + $0x540] sm:$0xff]  ;;  %668 = vmatpush.msra.mxu1 %v282_v21  ;;  %v227_v21 = vld [vmem:[#allocation10 + $0x188] sm:$0xff] }
  0x33   :  { %v410_v23 = vld [vmem:[#allocation10 + $0x740] sm:$0xff]  ;;  %709 = vmatpush.msra.mxu2 %v346_v22 }
  0x34   :  { %v214_v24 = vld [vmem:[#allocation10 + $0x120] sm:$0xff]  ;;  %750 = vmatpush.msra.mxu3 %v410_v23 }
  0x35   :  { %v278_v25 = vld [vmem:[#allocation10 + $0x320] sm:$0xff]  ;;  %628 = vmatpush.msra.mxu0 %v214_v24  ;;  %v223_v24 = vld [vmem:[#allocation10 + $0x168] sm:$0xff] }
  0x36   :  { %v342_v26 = vld [vmem:[#allocation10 + $0x520] sm:$0xff]  ;;  %669 = vmatpush.msra.mxu1 %v278_v25 }
  0x37   :  { %v406_v27 = vld [vmem:[#allocation10 + $0x720] sm:$0xff]  ;;  %710 = vmatpush.msra.mxu2 %v342_v26 }
  0x38   :  { %v210_v28 = vld [vmem:[#allocation10 + $0x100] sm:$0xff]  ;;  %751 = vmatpush.msra.mxu3 %v406_v27 }
  0x39   :  { %v274_v29 = vld [vmem:[#allocation10 + $0x300] sm:$0xff]  ;;  %629 = vmatpush.msra.mxu0 %v210_v28  ;;  %v219_v28 = vld [vmem:[#allocation10 + $0x148] sm:$0xff] }
  0x3a   :  { %v338_v30 = vld [vmem:[#allocation10 + $0x500] sm:$0xff]  ;;  %670 = vmatpush.msra.mxu1 %v274_v29  ;;  %v5483_v29 = vld [vmem:[#allocation7 + $0x70] sm:$0xff] }
  0x3b   :  { %v402_v31 = vld [vmem:[#allocation10 + $0x700] sm:$0xff]  ;;  %711 = vmatpush.msra.mxu2 %v338_v30  ;;  %v5485_v30 = vld [vmem:[#allocation7 + $0x78] sm:$0xff] }
  0x3c   :  { %v206_v32 = vld [vmem:[#allocation10 + $0xe0] sm:$0xff]  ;;  %752 = vmatpush.msra.mxu3 %v402_v31 }
  0x3d   :  { %v270_v33 = vld [vmem:[#allocation10 + $0x2e0] sm:$0xff]  ;;  %630 = vmatpush.msra.mxu0 %v206_v32  ;;  %v5489_v32 = vld [vmem:[#allocation7 + $0x88] sm:$0xff] }
  0x3e   :  { %v334_v34 = vld [vmem:[#allocation10 + $0x4e0] sm:$0xff]  ;;  %671 = vmatpush.msra.mxu1 %v270_v33 }
  0x3f   :  { %v398_v35 = vld [vmem:[#allocation10 + $0x6e0] sm:$0xff]  ;;  %712 = vmatpush.msra.mxu2 %v334_v34 }
  0x40   :  { %v202_v36 = vld [vmem:[#allocation10 + $0xc0] sm:$0xff]  ;;  %753 = vmatpush.msra.mxu3 %v398_v35  ;;  %v215_v35 = vld [vmem:[#allocation10 + $0x128] sm:$0xff] }
  0x41   :  { %v266_v37 = vld [vmem:[#allocation10 + $0x2c0] sm:$0xff]  ;;  %631 = vmatpush.msra.mxu0 %v202_v36 }
  0x42   :  { %v330_v38 = vld [vmem:[#allocation10 + $0x4c0] sm:$0xff]  ;;  %672 = vmatpush.msra.mxu1 %v266_v37 }
  0x43   :  { %v394_v39 = vld [vmem:[#allocation10 + $0x6c0] sm:$0xff]  ;;  %713 = vmatpush.msra.mxu2 %v330_v38  ;;  %v211_v38 = vld [vmem:[#allocation10 + $0x108] sm:$0xff] }
  0x44   :  { %v198_v40 = vld [vmem:[#allocation10 + $0xa0] sm:$0xff]  ;;  %754 = vmatpush.msra.mxu3 %v394_v39 }
  0x45   :  { %v262_v41 = vld [vmem:[#allocation10 + $0x2a0] sm:$0xff]  ;;  %632 = vmatpush.msra.mxu0 %v198_v40 }
  0x46   :  { %v326_v42 = vld [vmem:[#allocation10 + $0x4a0] sm:$0xff]  ;;  %673 = vmatpush.msra.mxu1 %v262_v41  ;;  %v207_v41 = vld [vmem:[#allocation10 + $0xe8] sm:$0xff] }
  0x47   :  { %v390_v43 = vld [vmem:[#allocation10 + $0x6a0] sm:$0xff]  ;;  %714 = vmatpush.msra.mxu2 %v326_v42  ;;  %v5495_v42 = vld [vmem:[#allocation7 + $0xa8] sm:$0xff] }
  0x48   :  { %v194_v44 = vld [vmem:[#allocation10 + $0x80] sm:$0xff]  ;;  %755 = vmatpush.msra.mxu3 %v390_v43  ;;  %v5497_v43 = vld [vmem:[#allocation7 + $0xb0] sm:$0xff] }
  0x49   :  { %v258_v45 = vld [vmem:[#allocation10 + $0x280] sm:$0xff]  ;;  %633 = vmatpush.msra.mxu0 %v194_v44  ;;  %v5499_v44 = vld [vmem:[#allocation7 + $0xb8] sm:$0xff] }
  0x4a   :  { %v322_v46 = vld [vmem:[#allocation10 + $0x480] sm:$0xff]  ;;  %674 = vmatpush.msra.mxu1 %v258_v45 }
  0x4b   :  { %v386_v47 = vld [vmem:[#allocation10 + $0x680] sm:$0xff]  ;;  %715 = vmatpush.msra.mxu2 %v322_v46 }
  0x4c   :  { %v190_v48 = vld [vmem:[#allocation10 + $0x60] sm:$0xff]  ;;  %756 = vmatpush.msra.mxu3 %v386_v47 }
  0x4d   :  { %v254_v49 = vld [vmem:[#allocation10 + $0x260] sm:$0xff]  ;;  %634 = vmatpush.msra.mxu0 %v190_v48  ;;  %v203_v48 = vld [vmem:[#allocation10 + $0xc8] sm:$0xff] }
  0x4e   :  { %v318_v50 = vld [vmem:[#allocation10 + $0x460] sm:$0xff]  ;;  %675 = vmatpush.msra.mxu1 %v254_v49 }
  0x4f   :  { %v382_v51 = vld [vmem:[#allocation10 + $0x660] sm:$0xff]  ;;  %716 = vmatpush.msra.mxu2 %v318_v50 }
  0x50   :  { %v186_v52 = vld [vmem:[#allocation10 + $0x40] sm:$0xff]  ;;  %757 = vmatpush.msra.mxu3 %v382_v51  ;;  %v199_v51 = vld [vmem:[#allocation10 + $0xa8] sm:$0xff] }
  0x51   :  { %v250_v53 = vld [vmem:[#allocation10 + $0x240] sm:$0xff]  ;;  %635 = vmatpush.msra.mxu0 %v186_v52 }
  0x52   :  { %v314_v54 = vld [vmem:[#allocation10 + $0x440] sm:$0xff]  ;;  %676 = vmatpush.msra.mxu1 %v250_v53 }
  0x53   :  { %v378_v55 = vld [vmem:[#allocation10 + $0x640] sm:$0xff]  ;;  %717 = vmatpush.msra.mxu2 %v314_v54  ;;  %v195_v54 = vld [vmem:[#allocation10 + $0x88] sm:$0xff] }
  0x54   :  { %v182_v56 = vld [vmem:[#allocation10 + $0x20] sm:$0xff]  ;;  %758 = vmatpush.msra.mxu3 %v378_v55 }
  0x55   :  { %v246_v57 = vld [vmem:[#allocation10 + $0x220] sm:$0xff]  ;;  %636 = vmatpush.msra.mxu0 %v182_v56  ;;  %v5509_v56 = vld [vmem:[#allocation7 + $0xe8] sm:$0xff] }
  0x56   :  { %v310_v58 = vld [vmem:[#allocation10 + $0x420] sm:$0xff]  ;;  %677 = vmatpush.msra.mxu1 %v246_v57  ;;  %v5511_v57 = vld [vmem:[#allocation7 + $0xf0] sm:$0xff] }
  0x57   :  { %v374_v59 = vld [vmem:[#allocation10 + $0x620] sm:$0xff]  ;;  %718 = vmatpush.msra.mxu2 %v310_v58  ;;  %v5513_v58 = vld [vmem:[#allocation7 + $0xf8] sm:$0xff] }
  0x58   :  { %v178_v60 = vld [vmem:[#allocation10] sm:$0xff]  ;;  %759 = vmatpush.msra.mxu3 %v374_v59 }
  0x59   :  { %v242_v61 = vld [vmem:[#allocation10 + $0x200] sm:$0xff]  ;;  %637 = vmatpush.msra.mxu0 %v178_v60 }
  0x5a   :  { %v306_v62 = vld [vmem:[#allocation10 + $0x400] sm:$0xff]  ;;  %678 = vmatpush.msra.mxu1 %v242_v61  ;;  %v191_v61 = vld [vmem:[#allocation10 + $0x68] sm:$0xff] }
  0x5b   :  { %v370_v63 = vld [vmem:[#allocation10 + $0x600] sm:$0xff]  ;;  %719 = vmatpush.msra.mxu2 %v306_v62  ;;  %679 = vmatmul.f32.vlgmr.msra.gmra.mxu1 %v5460_v1 }
  0x5c   :  { %v5458_v0 = vld [vmem:[#allocation7] sm:$0xff]  ;;  %760 = vmatpush.msra.mxu3 %v370_v63  ;;  %720 = vmatmul.f32.vlgmr.msra.gmra.mxu2 %v5462_v2 }
  0x5d   :  { %v494_v4 = vld [vmem:[#allocation10 + $0x9e0] sm:$0xff]  ;;  %638 = vmatmul.f32.vlgmr.msra.gmra.mxu0 %v5458_v0  ;;  %761 = vmatmul.f32.vlgmr.msra.gmra.mxu3 %v5464_v3 }
  0x5e   :  { %v558_v5 = vld [vmem:[#allocation10 + $0xbe0] sm:$0xff]  ;;  %786 = vmatpush.msrb.mxu0 %v494_v4  ;;  %909 = vmatpush.msrb.mxu3 %v239_v7  ;;  %v431_v4 = vld [vmem:[#allocation10 + $0x7e8] sm:$0xff] }
  0x5f   :  { %v570_v6 = vld [vmem:[#allocation10 + $0xc40] sm:$0xf]  ;;  %827 = vmatpush.msrb.mxu1 %v558_v5  ;;  %v187_v5 = vld [vmem:[#allocation10 + $0x48] sm:$0xff] }
  0x60   :  { %v490_v8 = vld [vmem:[#allocation10 + $0x9c0] sm:$0xff]  ;;  %4328 = vmatpush.msk.msrb.mxu2 %vm609_vm0, %v570_v6  ;;  %910 = vmatpush.msrb.mxu3 %v235_v10  ;;  %v427_v6 = vld [vmem:[#allocation10 + $0x7c8] sm:$0xff]  ;;  %v5519_v10 = vld [vmem:[#allocation7 + $0x118] sm:$0xff] }
  0x61   :  { %v554_v9 = vld [vmem:[#allocation10 + $0xbc0] sm:$0xff]  ;;  %787 = vmatpush.msrb.mxu0 %v490_v8 }
  0x62   :  { %v566_v11 = vld [vmem:[#allocation10 + $0xc20] sm:$0xff]  ;;  %828 = vmatpush.msrb.mxu1 %v554_v9  ;;  %911 = vmatpush.msrb.mxu3 %v231_v14  ;;  %v183_v9 = vld [vmem:[#allocation10 + $0x28] sm:$0xff] }
  0x63   :  { %v486_v12 = vld [vmem:[#allocation10 + $0x9a0] sm:$0xff]  ;;  %882 = vmatpush.msrb.mxu2 %v566_v11 }
  0x64   :  { %v550_v13 = vld [vmem:[#allocation10 + $0xba0] sm:$0xff]  ;;  %788 = vmatpush.msrb.mxu0 %v486_v12  ;;  %723 = vmatmul.f32.gmra.mxu2 %v5475_v17  ;;  %v5523_v12 = vld [vmem:[#allocation7 + $0x128] sm:$0xff] }
  0x65   :  { %v5473_v16 = vld [vmem:[#allocation7 + $0x40] sm:$0xff]  ;;  %829 = vmatpush.msrb.mxu1 %v550_v13  ;;  %641 = vmatmul.f32.gmra.mxu0 %v5471_v15  ;;  %v5525_v13 = vld [vmem:[#allocation7 + $0x130] sm:$0xff] }
  0x66   :  { %v482_v19 = vld [vmem:[#allocation10 + $0x980] sm:$0xff]  ;;  %682 = vmatmul.f32.gmra.mxu1 %v5473_v16  ;;  %764 = vmatmul.f32.gmra.mxu3 %v5477_v18 }
  0x67   :  { %v546_v20 = vld [vmem:[#allocation10 + $0xb80] sm:$0xff]  ;;  %789 = vmatpush.msrb.mxu0 %v482_v19  ;;  %912 = vmatpush.msrb.mxu3 %v227_v21  ;;  %v303_v21 = vld [vmem:[#allocation10 + $0x3e8] sm:$0xff] }
  0x68   :  { %v478_v22 = vld [vmem:[#allocation10 + $0x960] sm:$0xff]  ;;  %830 = vmatpush.msrb.mxu1 %v546_v20  ;;  %v179_v20 = vld [vmem:[#allocation10 + $0x8] sm:$0xff] }
  0x69   :  { %v542_v23 = vld [vmem:[#allocation10 + $0xb60] sm:$0xff]  ;;  %790 = vmatpush.msrb.mxu0 %v478_v22  ;;  %913 = vmatpush.msrb.mxu3 %v223_v24  ;;  %v367_v22 = vld [vmem:[#allocation10 + $0x5e8] sm:$0xff] }
  0x6a   :  { %v562_v25 = vld [vmem:[#allocation10 + $0xc00] sm:$0xff]  ;;  %831 = vmatpush.msrb.mxu1 %v542_v23  ;;  %v495_v23 = vld [vmem:[#allocation10 + $0x9e8] sm:$0xff] }
  0x6b   :  { %v474_v26 = vld [vmem:[#allocation10 + $0x940] sm:$0xff]  ;;  %883 = vmatpush.msrb.mxu2 %v562_v25  ;;  %914 = vmatpush.msrb.mxu3 %v219_v28  ;;  %v299_v24 = vld [vmem:[#allocation10 + $0x3c8] sm:$0xff] }
  0x6c   :  { %v538_v27 = vld [vmem:[#allocation10 + $0xb40] sm:$0xff]  ;;  %791 = vmatpush.msrb.mxu0 %v474_v26  ;;  %v423_v25 = vld [vmem:[#allocation10 + $0x7a8] sm:$0xff] }
  0x6d   :  { %v5487_v31 = vld [vmem:[#allocation7 + $0x80] sm:$0xff]  ;;  %832 = vmatpush.msrb.mxu1 %v538_v27  ;;  %644 = vmatmul.f32.gmra.mxu0 %v5483_v29  ;;  %v363_v26 = vld [vmem:[#allocation10 + $0x5c8] sm:$0xff] }
  0x6e   :  { %v470_v33 = vld [vmem:[#allocation10 + $0x920] sm:$0xff]  ;;  %685 = vmatmul.f32.gmra.mxu1 %v5485_v30  ;;  %726 = vmatmul.f32.gmra.mxu2 %v5487_v31  ;;  %v491_v27 = vld [vmem:[#allocation10 + $0x9c8] sm:$0xff] }
  0x6f   :  { %v534_v34 = vld [vmem:[#allocation10 + $0xb20] sm:$0xff]  ;;  %767 = vmatmul.f32.gmra.mxu3 %v5489_v32  ;;  %792 = vmatpush.msrb.mxu0 %v470_v33  ;;  %v295_v28 = vld [vmem:[#allocation10 + $0x3a8] sm:$0xff] }
  0x70   :  { %v466_v36 = vld [vmem:[#allocation10 + $0x900] sm:$0xff]  ;;  %833 = vmatpush.msrb.mxu1 %v534_v34  ;;  %915 = vmatpush.msrb.mxu3 %v215_v35  ;;  %v419_v33 = vld [vmem:[#allocation10 + $0x788] sm:$0xff]  ;;  %v5531_v34 = vld [vmem:[#allocation7 + $0x150] sm:$0xff] }
  0x71   :  { %v530_v37 = vld [vmem:[#allocation10 + $0xb00] sm:$0xff]  ;;  %793 = vmatpush.msrb.mxu0 %v466_v36  ;;  %1032 = vmatpush.msra.mxu2 %v431_v4  ;;  %v5533_v35 = vld [vmem:[#allocation7 + $0x158] sm:$0xff]  ;;  %v407_v4 = vld [vmem:[#allocation10 + $0x728] sm:$0xff] }
  0x72   :  { %v462_v39 = vld [vmem:[#allocation10 + $0x8e0] sm:$0xff]  ;;  %834 = vmatpush.msrb.mxu1 %v530_v37  ;;  %916 = vmatpush.msrb.mxu3 %v211_v38  ;;  %v5537_v37 = vld [vmem:[#allocation7 + $0x168] sm:$0xff] }
  0x73   :  { %v526_v40 = vld [vmem:[#allocation10 + $0xae0] sm:$0xff]  ;;  %794 = vmatpush.msrb.mxu0 %v462_v39  ;;  %1033 = vmatpush.msra.mxu2 %v427_v6  ;;  %v359_v38 = vld [vmem:[#allocation10 + $0x5a8] sm:$0xff] }
  0x74   :  { %v5501_v45 = vld [vmem:[#allocation7 + $0xc0] sm:$0xff]  ;;  %835 = vmatpush.msrb.mxu1 %v526_v40  ;;  %917 = vmatpush.msrb.mxu3 %v207_v41  ;;  %v291_v39 = vld [vmem:[#allocation10 + $0x388] sm:$0xff] }
  0x75   :  { %v458_v46 = vld [vmem:[#allocation10 + $0x8c0] sm:$0xff]  ;;  %647 = vmatmul.f32.gmra.mxu0 %v5495_v42  ;;  %1034 = vmatpush.msra.mxu2 %v423_v25  ;;  %v487_v40 = vld [vmem:[#allocation10 + $0x9a8] sm:$0xff] }
  0x76   :  { %v522_v47 = vld [vmem:[#allocation10 + $0xac0] sm:$0xff]  ;;  %688 = vmatmul.f32.gmra.mxu1 %v5497_v43  ;;  %729 = vmatmul.f32.gmra.mxu2 %v5499_v44  ;;  %v355_v41 = vld [vmem:[#allocation10 + $0x588] sm:$0xff] }
  0x77   :  { %770 = vmatmul.f32.gmra.mxu3 %v5501_v45  ;;  %v454_v49 = vld [vmem:[#allocation10 + $0x8a0] sm:$0xff]  ;;  %795 = vmatpush.msrb.mxu0 %v458_v46  ;;  %v287_v46 = vld [vmem:[#allocation10 + $0x368] sm:$0xff] }
  0x78   :  { %v518_v50 = vld [vmem:[#allocation10 + $0xaa0] sm:$0xff]  ;;  %836 = vmatpush.msrb.mxu1 %v522_v47  ;;  %918 = vmatpush.msrb.mxu3 %v203_v48  ;;  %v415_v47 = vld [vmem:[#allocation10 + $0x768] sm:$0xff] }
  0x79   :  { %v450_v52 = vld [vmem:[#allocation10 + $0x880] sm:$0xff]  ;;  %796 = vmatpush.msrb.mxu0 %v454_v49  ;;  %1035 = vmatpush.msra.mxu2 %v419_v33  ;;  %v483_v48 = vld [vmem:[#allocation10 + $0x988] sm:$0xff]  ;;  %v5566_v33 = vld [vmem:[#allocation7 + $0x58] sm:$0xff] }
  0x7a   :  { %v514_v53 = vld [vmem:[#allocation10 + $0xa80] sm:$0xff]  ;;  %837 = vmatpush.msrb.mxu1 %v518_v50  ;;  %919 = vmatpush.msrb.mxu3 %v199_v51  ;;  %v351_v49 = vld [vmem:[#allocation10 + $0x568] sm:$0xff] }
  0x7b   :  { %v5507_v55 = vld [vmem:[#allocation7 + $0xe0] sm:$0xff]  ;;  %797 = vmatpush.msrb.mxu0 %v450_v52  ;;  %1036 = vmatpush.msra.mxu2 %v415_v47  ;;  %v283_v50 = vld [vmem:[#allocation10 + $0x348] sm:$0xff] }
  0x7c   :  { %838 = vmatpush.msrb.mxu1 %v514_v53  ;;  %v446_v59 = vld [vmem:[#allocation10 + $0x860] sm:$0xff]  ;;  %920 = vmatpush.msrb.mxu3 %v195_v54  ;;  %v411_v51 = vld [vmem:[#allocation10 + $0x748] sm:$0xff]  ;;  %v5545_v54 = vld [vmem:[#allocation7 + $0x190] sm:$0xff] }
  0x7d   :  { %v510_v60 = vld [vmem:[#allocation10 + $0xa60] sm:$0xff]  ;;  %650 = vmatmul.f32.gmra.mxu0 %v5507_v55  ;;  %v479_v52 = vld [vmem:[#allocation10 + $0x968] sm:$0xff]  ;;  %1037 = vmatpush.msra.mxu2 %v411_v51  ;;  %v5577_v51 = vld [vmem:[#allocation7 + $0x90] sm:$0xff] }
  0x7e   :  { %691 = vmatmul.f32.gmra.mxu1 %v5509_v56  ;;  %732 = vmatmul.f32.gmra.mxu2 %v5511_v57  ;;  %v442_v62 = vld [vmem:[#allocation10 + $0x840] sm:$0xff]  ;;  %v5543_v53 = vld [vmem:[#allocation7 + $0x188] sm:$0xff] }
  0x7f   :  { %773 = vmatmul.f32.gmra.mxu3 %v5513_v58  ;;  %v506_v63 = vld [vmem:[#allocation10 + $0xa40] sm:$0xff]  ;;  %798 = vmatpush.msrb.mxu0 %v446_v59  ;;  %v5547_v59 = vld [vmem:[#allocation7 + $0x198] sm:$0xff]  ;;  %v275_v6 = vld [vmem:[#allocation10 + $0x308] sm:$0xff] }
  0x80   :  { %839 = vmatpush.msrb.mxu1 %v510_v60  ;;  %921 = vmatpush.msrb.mxu3 %v191_v61  ;;  %v438_v7 = vld [vmem:[#allocation10 + $0x820] sm:$0xff]  ;;  %v347_v61 = vld [vmem:[#allocation10 + $0x548] sm:$0xff] }
  0x81   :  { %v502_v8 = vld [vmem:[#allocation10 + $0xa20] sm:$0xff]  ;;  %799 = vmatpush.msrb.mxu0 %v442_v62  ;;  %v279_v62 = vld [vmem:[#allocation10 + $0x328] sm:$0xff]  ;;  %1038 = vmatpush.msra.mxu2 %v407_v4 }
  0x82   :  { %840 = vmatpush.msrb.mxu1 %v506_v63  ;;  %v5521_v11 = vld [vmem:[#allocation7 + $0x120] sm:$0xff]  ;;  %922 = vmatpush.msrb.mxu3 %v187_v5  ;;  %v343_v63 = vld [vmem:[#allocation10 + $0x528] sm:$0xff] }
  0x83   :  { %800 = vmatpush.msrb.mxu0 %v438_v7  ;;  %v434_v14 = vld [vmem:[#allocation10 + $0x800] sm:$0xff]  ;;  %v475_v5 = vld [vmem:[#allocation10 + $0x948] sm:$0xff] }
  0x84   :  { %841 = vmatpush.msrb.mxu1 %v502_v8  ;;  %v498_v19 = vld [vmem:[#allocation10 + $0xa00] sm:$0xff]  ;;  %923 = vmatpush.msrb.mxu3 %v183_v9  ;;  %v339_v7 = vld [vmem:[#allocation10 + $0x508] sm:$0xff] }
  0x85   :  { %653 = vmatmul.f32.gmra.mxu0 %v5519_v10  ;;  %v5535_v36 = vld [vmem:[#allocation7 + $0x160] sm:$0xff]  ;;  %v403_v8 = vld [vmem:[#allocation10 + $0x708] sm:$0xff] }
  0x86   :  { %694 = vmatmul.f32.gmra.mxu1 %v5521_v11  ;;  %735 = vmatmul.f32.gmra.mxu2 %v5523_v12  ;;  %v5549_v60 = vld [vmem:[#allocation7 + $0x1a0] sm:$0xff]  ;;  %v471_v9 = vld [vmem:[#allocation10 + $0x928] sm:$0xff] }
  0x87   :  { %776 = vmatmul.f32.gmra.mxu3 %v5525_v13  ;;  %801 = vmatpush.msrb.mxu0 %v434_v14  ;;  %v5555_v14 = vld [vmem:[#allocation7 + $0x20] sm:$0xff]  ;;  %v267_v25 = vld [vmem:[#allocation10 + $0x2c8] sm:$0xff] }
  0x88   :  { %842 = vmatpush.msrb.mxu1 %v498_v19  ;;  %924 = vmatpush.msrb.mxu3 %v179_v20  ;;  %v5557_v19 = vld [vmem:[#allocation7 + $0x28] sm:$0xff]  ;;  %v5559_v20 = vld [vmem:[#allocation7 + $0x30] sm:$0xff] }
  0x89   :  { %950 = vmatpush.msra.mxu0 %v303_v21  ;;  %1039 = vmatpush.msra.mxu2 %v403_v8  ;;  %v271_v21 = vld [vmem:[#allocation10 + $0x2e8] sm:$0xff] }
  0x8a   :  { %991 = vmatpush.msra.mxu1 %v367_v22  ;;  %1073 = vmatpush.msra.mxu3 %v495_v23  ;;  %v335_v22 = vld [vmem:[#allocation10 + $0x4e8] sm:$0xff] }
  0x8b   :  { %951 = vmatpush.msra.mxu0 %v299_v24  ;;  %v399_v23 = vld [vmem:[#allocation10 + $0x6e8] sm:$0xff] }
  0x8c   :  { %992 = vmatpush.msra.mxu1 %v363_v26  ;;  %1074 = vmatpush.msra.mxu3 %v491_v27  ;;  %v467_v24 = vld [vmem:[#allocation10 + $0x908] sm:$0xff] }
  0x8d   :  { %952 = vmatpush.msra.mxu0 %v295_v28  ;;  %v331_v26 = vld [vmem:[#allocation10 + $0x4c8] sm:$0xff]  ;;  %1040 = vmatpush.msra.mxu2 %v399_v23 }
  0x8e   :  { %656 = vmatmul.f32.gmra.mxu0 %v5531_v34  ;;  %697 = vmatmul.f32.gmra.mxu1 %v5533_v35  ;;  %v395_v27 = vld [vmem:[#allocation10 + $0x6c8] sm:$0xff] }
  0x8f   :  { %738 = vmatmul.f32.gmra.mxu2 %v5535_v36  ;;  %779 = vmatmul.f32.gmra.mxu3 %v5537_v37  ;;  %v463_v28 = vld [vmem:[#allocation10 + $0x8e8] sm:$0xff] }
  0x90   :  { %993 = vmatpush.msra.mxu1 %v359_v38  ;;  %953 = vmatpush.msra.mxu0 %v291_v39  ;;  %v5568_v38 = vld [vmem:[#allocation7 + $0x60] sm:$0xff]  ;;  %v263_v39 = vld [vmem:[#allocation10 + $0x2a8] sm:$0xff] }
  0x91   :  { %1075 = vmatpush.msra.mxu3 %v487_v40  ;;  %1041 = vmatpush.msra.mxu2 %v395_v27  ;;  %v327_v40 = vld [vmem:[#allocation10 + $0x4a8] sm:$0xff] }
  0x92   :  { %994 = vmatpush.msra.mxu1 %v355_v41  ;;  %954 = vmatpush.msra.mxu0 %v287_v46  ;;  %v391_v41 = vld [vmem:[#allocation10 + $0x6a8] sm:$0xff] }
  0x93   :  { %1076 = vmatpush.msra.mxu3 %v483_v48  ;;  %v459_v46 = vld [vmem:[#allocation10 + $0x8c8] sm:$0xff]  ;;  %1042 = vmatpush.msra.mxu2 %v391_v41 }
  0x94   :  { %995 = vmatpush.msra.mxu1 %v351_v49  ;;  %955 = vmatpush.msra.mxu0 %v283_v50  ;;  %v259_v47 = vld [vmem:[#allocation10 + $0x288] sm:$0xff] }
  0x95   :  { %1077 = vmatpush.msra.mxu3 %v479_v52  ;;  %v323_v48 = vld [vmem:[#allocation10 + $0x488] sm:$0xff]  ;;  %v5579_v52 = vld [vmem:[#allocation7 + $0x98] sm:$0xff] }
  0x96   :  { %659 = vmatmul.f32.gmra.mxu0 %v5543_v53  ;;  %700 = vmatmul.f32.gmra.mxu1 %v5545_v54  ;;  %v387_v49 = vld [vmem:[#allocation10 + $0x688] sm:$0xff] }
  0x97   :  { %741 = vmatmul.f32.gmra.mxu2 %v5547_v59  ;;  %782 = vmatmul.f32.gmra.mxu3 %v5549_v60  ;;  %v455_v50 = vld [vmem:[#allocation10 + $0x8a8] sm:$0xff] }
  0x98   :  { %996 = vmatpush.msra.mxu1 %v347_v61  ;;  %956 = vmatpush.msra.mxu0 %v279_v62  ;;  %v255_v61 = vld [vmem:[#allocation10 + $0x268] sm:$0xff] }
  0x99   :  { %1078 = vmatpush.msra.mxu3 %v475_v5  ;;  %1043 = vmatpush.msra.mxu2 %v387_v49  ;;  %v319_v62 = vld [vmem:[#allocation10 + $0x468] sm:$0xff]  ;;  %v240_v49 = vld [vmem:[#allocation10 + $0x1f0] sm:$0xff] }
  0x9a   :  { %997 = vmatpush.msra.mxu1 %v343_v63  ;;  %957 = vmatpush.msra.mxu0 %v275_v6  ;;  %v383_v63 = vld [vmem:[#allocation10 + $0x668] sm:$0xff] }
  0x9b   :  { %1079 = vmatpush.msra.mxu3 %v471_v9  ;;  %v451_v4 = vld [vmem:[#allocation10 + $0x888] sm:$0xff]  ;;  %1044 = vmatpush.msra.mxu2 %v383_v63 }
  0x9c   :  { %998 = vmatpush.msra.mxu1 %v339_v7  ;;  %958 = vmatpush.msra.mxu0 %v271_v21  ;;  %v251_v5 = vld [vmem:[#allocation10 + $0x248] sm:$0xff]  ;;  %v5590_v21 = vld [vmem:[#allocation7 + $0xd0] sm:$0xff] }
  0x9d   :  { %1080 = vmatpush.msra.mxu3 %v467_v24  ;;  %v315_v6 = vld [vmem:[#allocation10 + $0x448] sm:$0xff] }
  0x9e   :  { %802 = vmatmul.f32.vlgmr.msrb.gmra.mxu0 %v5555_v14  ;;  %843 = vmatmul.f32.vlgmr.msrb.gmra.mxu1 %v5557_v19  ;;  %v379_v7 = vld [vmem:[#allocation10 + $0x648] sm:$0xff] }
  0x9f   :  { %4329 = vmatmul.msk.f32.vlgmr.msrb.gmra.mxu2 %vm584_vm1, %v5559_v20  ;;  %925 = vmatmul.f32.vlgmr.msrb.gmra.mxu3 %v5458_v0  ;;  %v5570_v0 = vld [vmem:[#allocation7 + $0x68] sm:$0xff] }
  0xa0   :  { %999 = vmatpush.msra.mxu1 %v335_v22  ;;  %959 = vmatpush.msra.mxu0 %v267_v25  ;;  %v447_v8 = vld [vmem:[#allocation10 + $0x868] sm:$0xff] }
  0xa1   :  { %1081 = vmatpush.msra.mxu3 %v463_v28  ;;  %v5588_v9 = vld [vmem:[#allocation7 + $0xc8] sm:$0xff]  ;;  %1045 = vmatpush.msra.mxu2 %v379_v7  ;;  %v300_v7 = vld [vmem:[#allocation10 + $0x3d0] sm:$0xff] }
  0xa2   :  { %1000 = vmatpush.msra.mxu1 %v331_v26  ;;  %960 = vmatpush.msra.mxu0 %v263_v39  ;;  %v247_v22 = vld [vmem:[#allocation10 + $0x228] sm:$0xff]  ;;  %v5599_v39 = vld [vmem:[#allocation7 + $0x100] sm:$0xff] }
  0xa3   :  { %1082 = vmatpush.msra.mxu3 %v459_v46  ;;  %v311_v23 = vld [vmem:[#allocation10 + $0x428] sm:$0xff] }
  0xa4   :  { %1001 = vmatpush.msra.mxu1 %v327_v40  ;;  %961 = vmatpush.msra.mxu0 %v259_v47  ;;  %v375_v24 = vld [vmem:[#allocation10 + $0x628] sm:$0xff] }
  0xa5   :  { %1083 = vmatpush.msra.mxu3 %v455_v50  ;;  %v443_v25 = vld [vmem:[#allocation10 + $0x848] sm:$0xff]  ;;  %1046 = vmatpush.msra.mxu2 %v375_v24  ;;  %v5611_v50 = vld [vmem:[#allocation7 + $0x138] sm:$0xff] }
  0xa6   :  { %805 = vmatmul.f32.gmra.mxu0 %v5566_v33  ;;  %846 = vmatmul.f32.gmra.mxu1 %v5568_v38  ;;  %v243_v26 = vld [vmem:[#allocation10 + $0x208] sm:$0xff] }
  0xa7   :  { %4330 = vmatmul.msk.f32.gmra.mxu2 %vm584_vm1, %v5570_v0  ;;  %928 = vmatmul.f32.gmra.mxu3 %v5471_v15  ;;  %v5581_v15 = vld [vmem:[#allocation7 + $0xa0] sm:$0xff]  ;;  %v307_v27 = vld [vmem:[#allocation10 + $0x408] sm:$0xff] }
  0xa8   :  { %1002 = vmatpush.msra.mxu1 %v323_v48  ;;  %962 = vmatpush.msra.mxu0 %v255_v61  ;;  %v371_v28 = vld [vmem:[#allocation10 + $0x608] sm:$0xff]  ;;  %v5613_v61 = vld [vmem:[#allocation7 + $0x140] sm:$0xff] }
  0xa9   :  { %1084 = vmatpush.msra.mxu3 %v451_v4  ;;  %v5601_v40 = vld [vmem:[#allocation7 + $0x108] sm:$0xff]  ;;  %1047 = vmatpush.msra.mxu2 %v371_v28  ;;  %v236_v4 = vld [vmem:[#allocation10 + $0x1d0] sm:$0xff] }
  0xaa   :  { %1003 = vmatpush.msra.mxu1 %v319_v62  ;;  %963 = vmatpush.msra.mxu0 %v251_v5  ;;  %v439_v41 = vld [vmem:[#allocation10 + $0x828] sm:$0xff]  ;;  %v292_v28 = vld [vmem:[#allocation10 + $0x390] sm:$0xff] }
  0xab   :  { %1085 = vmatpush.msra.mxu3 %v447_v8  ;;  %v435_v46 = vld [vmem:[#allocation10 + $0x808] sm:$0xff]  ;;  %1196 = vmatpush.msrb.mxu2 %v240_v49  ;;  %v5622_v8 = vld [vmem:[#allocation7 + $0x170] sm:$0xff] }
  0xac   :  { %1004 = vmatpush.msra.mxu1 %v315_v6  ;;  %964 = vmatpush.msra.mxu0 %v247_v22  ;;  %v559_v47 = vld [vmem:[#allocation10 + $0xbe8] sm:$0xff]  ;;  %v232_v6 = vld [vmem:[#allocation10 + $0x1b0] sm:$0xff]  ;;  %v5624_v22 = vld [vmem:[#allocation7 + $0x178] sm:$0xff] }
  0xad   :  { %1086 = vmatpush.msra.mxu3 %v443_v25  ;;  %v571_v48 = vld [vmem:[#allocation10 + $0xc48] sm:$0xf]  ;;  %1197 = vmatpush.msrb.mxu2 %v236_v4  ;;  %v228_v25 = vld [vmem:[#allocation10 + $0x190] sm:$0xff] }
  0xae   :  { %808 = vmatmul.f32.gmra.mxu0 %v5577_v51  ;;  %849 = vmatmul.f32.gmra.mxu1 %v5579_v52  ;;  %v5615_v62 = vld [vmem:[#allocation7 + $0x148] sm:$0xff]  ;;  %v220_v49 = vld [vmem:[#allocation10 + $0x150] sm:$0xff] }
  0xaf   :  { %4331 = vmatmul.msk.f32.gmra.mxu2 %vm584_vm1, %v5581_v15  ;;  %931 = vmatmul.f32.gmra.mxu3 %v5483_v29  ;;  %v5592_v29 = vld [vmem:[#allocation7 + $0xd8] sm:$0xff]  ;;  %v555_v63 = vld [vmem:[#allocation10 + $0xbc8] sm:$0xff] }
  0xb0   :  { %1005 = vmatpush.msra.mxu1 %v311_v23  ;;  %965 = vmatpush.msra.mxu0 %v243_v26  ;;  %v551_v5 = vld [vmem:[#allocation10 + $0xba8] sm:$0xff]  ;;  %v5626_v23 = vld [vmem:[#allocation7 + $0x180] sm:$0xff] }
  0xb1   :  { %1087 = vmatpush.msra.mxu3 %v439_v41  ;;  %1198 = vmatpush.msrb.mxu2 %v232_v6  ;;  %v547_v24 = vld [vmem:[#allocation10 + $0xb88] sm:$0xff]  ;;  %v284_v6 = vld [vmem:[#allocation10 + $0x350] sm:$0xff] }
  0xb2   :  { %1006 = vmatpush.msra.mxu1 %v307_v27  ;;  %1114 = vmatpush.msrb.mxu0 %v559_v47  ;;  %v543_v26 = vld [vmem:[#allocation10 + $0xb68] sm:$0xff]  ;;  %v224_v27 = vld [vmem:[#allocation10 + $0x170] sm:$0xff]  ;;  %v5637_v47 = vld [vmem:[#allocation7 + $0x1b8] sm:$0xff] }
  0xb3   :  { %1088 = vmatpush.msra.mxu3 %v435_v46  ;;  %1199 = vmatpush.msrb.mxu2 %v228_v25  ;;  %v5633_v41 = vld [vmem:[#allocation7 + $0x1a8] sm:$0xff]  ;;  %v5635_v46 = vld [vmem:[#allocation7 + $0x1b0] sm:$0xff]  ;;  %10006 = vst [vmem:[#allocation24_spill] sm:$0xff] %v5637_v47 }
  0xb4   :  { %4337 = vmatpush.msk.msrb.mxu1 %vm609_vm0, %v571_v48  ;;  %1115 = vmatpush.msrb.mxu0 %v555_v63  ;;  %v539_v48 = vld [vmem:[#allocation10 + $0xb48] sm:$0xff]  ;;  %v288_v63 = vld [vmem:[#allocation10 + $0x370] sm:$0xff] }
  0xb5   :  { %1200 = vmatpush.msrb.mxu2 %v224_v27  ;;  %v567_v4 = vld [vmem:[#allocation10 + $0xc28] sm:$0xff]  ;;  %v212_v27 = vld [vmem:[#allocation10 + $0x110] sm:$0xff] }
  0xb6   :  { %811 = vmatmul.f32.gmra.mxu0 %v5588_v9  ;;  %852 = vmatmul.f32.gmra.mxu1 %v5590_v21 }
  0xb7   :  { %4332 = vmatmul.msk.f32.gmra.mxu2 %vm584_vm1, %v5592_v29  ;;  %934 = vmatmul.f32.gmra.mxu3 %v5495_v42  ;;  %v5603_v42 = vld [vmem:[#allocation7 + $0x110] sm:$0xff] }
  0xb8   :  { %1116 = vmatpush.msrb.mxu0 %v551_v5  ;;  %v216_v5 = vld [vmem:[#allocation10 + $0x130] sm:$0xff]  ;;  %1201 = vmatpush.msrb.mxu2 %v220_v49 }
  0xb9   :  { %1169 = vmatpush.msrb.mxu1 %v567_v4  ;;  %v276_v49 = vld [vmem:[#allocation10 + $0x310] sm:$0xff] }
  0xba   :  { %1117 = vmatpush.msrb.mxu0 %v547_v24  ;;  %1202 = vmatpush.msrb.mxu2 %v216_v5 }
  0xbc   :  { %1118 = vmatpush.msrb.mxu0 %v543_v26  ;;  %v531_v26 = vld [vmem:[#allocation10 + $0xb08] sm:$0xff]  ;;  %1203 = vmatpush.msrb.mxu2 %v212_v27  ;;  %v268_v27 = vld [vmem:[#allocation10 + $0x2d0] sm:$0xff] }
  0xbe   :  { %814 = vmatmul.f32.gmra.mxu0 %v5599_v39  ;;  %855 = vmatmul.f32.gmra.mxu1 %v5601_v40 }
  0xbf   :  { %4333 = vmatmul.msk.f32.gmra.mxu2 %vm584_vm1, %v5603_v42  ;;  %937 = vmatmul.f32.gmra.mxu3 %v5507_v55  ;;  %v304_v55 = vld [vmem:[#allocation10 + $0x3f0] sm:$0xff] }
  0xc0   :  { %1237 = vmatpush.msrb.mxu3 %v304_v55  ;;  %v535_v55 = vld [vmem:[#allocation10 + $0xb28] sm:$0xff]  ;;  %1119 = vmatpush.msrb.mxu0 %v539_v48  ;;  %v208_v48 = vld [vmem:[#allocation10 + $0xf0] sm:$0xff] }
  0xc1   :  { %1204 = vmatpush.msrb.mxu2 %v208_v48 }
  0xc2   :  { %1238 = vmatpush.msrb.mxu3 %v300_v7  ;;  %1120 = vmatpush.msrb.mxu0 %v535_v55 }
  0xc4   :  { %1121 = vmatpush.msrb.mxu0 %v531_v26  ;;  %v200_v26 = vld [vmem:[#allocation10 + $0xb0] sm:$0xff] }
  0xc6   :  { %817 = vmatmul.f32.gmra.mxu0 %v5611_v50  ;;  %858 = vmatmul.f32.gmra.mxu1 %v5613_v61 }
  0xc7   :  { %4334 = vmatmul.msk.f32.gmra.mxu2 %vm584_vm1, %v5615_v62  ;;  %940 = vmatmul.f32.gmra.mxu3 %v5519_v10  ;;  %v296_v10 = vld [vmem:[#allocation10 + $0x3b0] sm:$0xff] }
  0xc8   :  { %1239 = vmatpush.msrb.mxu3 %v296_v10 }
  0xca   :  { %1240 = vmatpush.msrb.mxu3 %v292_v28  ;;  %v527_v28 = vld [vmem:[#allocation10 + $0xae8] sm:$0xff] }
  0xcb   :  { %1122 = vmatpush.msrb.mxu0 %v527_v28 }
  0xcc   :  { %1241 = vmatpush.msrb.mxu3 %v288_v63 }
  0xce   :  { %820 = vmatmul.f32.gmra.mxu0 %v5622_v8  ;;  %861 = vmatmul.f32.gmra.mxu1 %v5624_v22 }
  0xcf   :  { %4335 = vmatmul.msk.f32.gmra.mxu2 %vm584_vm1, %v5626_v23  ;;  %943 = vmatmul.f32.gmra.mxu3 %v5531_v34  ;;  %v5641_v34 = vld [vmem:[#allocation13] sm:$0xf] }
  0xd0   :  { %v5647_v7 = vperm.slane %v5641_v34, 0  ;;  %1242 = vmatpush.msrb.mxu3 %v284_v6 }
  0xd6   :  { %823 = vmatmul.f32.gmra.mxu0 %v5633_v41  ;;  %864 = vmatmul.f32.gmra.mxu1 %v5635_v46 }
  0xd7   :  { %4336 = vmatmul.msk.f32.gmra.mxu2 %vm584_vm1, %v5637_v47  ;;  %946 = vmatmul.f32.gmra.mxu3 %v5543_v53  ;;  %v280_v53 = vld [vmem:[#allocation10 + $0x330] sm:$0xff] }
  0xd8   :  { %v680_v25 = vpop.f32.mrf.mxu1  ;;  %1243 = vmatpush.msrb.mxu3 %v280_v53 }
  0xda   :  { %v639_v24 = vpop.f32.mrf.mxu0  ;;  %1244 = vmatpush.msrb.mxu3 %v276_v49 }
  0xdb   :  { %v640_v10 = vadd.f32 %v639_v24, %v5647_v7  ;;  %v204_v24 = vld [vmem:[#allocation10 + $0xd0] sm:$0xff] }
  0xdc   :  { %1205 = vmatpush.msrb.mxu2 %v204_v24 }
  0xdd   :  { %v681_v63 = vadd.f32 %v680_v25, %v640_v10  ;;  %v272_v25 = vld [vmem:[#allocation10 + $0x2f0] sm:$0xff]  ;;  %v519_v10 = vld [vmem:[#allocation10 + $0xaa8] sm:$0xff] }
  0xde   :  { %966 = vmatmul.f32.vlgmr.msra.gmra.mxu0 %v5460_v1  ;;  %1007 = vmatmul.f32.vlgmr.msra.gmra.mxu1 %v5462_v2 }
  0xdf   :  { %1048 = vmatmul.f32.vlgmr.msra.gmra.mxu2 %v5464_v3  ;;  %1089 = vmatmul.f32.vlgmr.msra.gmra.mxu3 %v5555_v14  ;;  %v721_v4 = vpop.f32.mrf.mxu2  ;;  %v523_v14 = vld [vmem:[#allocation10 + $0xac8] sm:$0xff] }
  0xe0   :  { %v762_v55 = vpop.f32.mrf.mxu3  ;;  %v722_v5 = vadd.f32 %v721_v4, %v681_v63  ;;  %1123 = vmatpush.msrb.mxu0 %v523_v14  ;;  %1245 = vmatpush.msrb.mxu3 %v272_v25 }
  0xe1   :  { %1206 = vmatpush.msrb.mxu2 %v200_v26 }
  0xe2   :  { %v642_v1 = vpop.f32.mrf.mxu0  ;;  %v5655_v3 = vadd.f32 %v762_v55, %v722_v5  ;;  %1124 = vmatpush.msrb.mxu0 %v519_v10  ;;  %1246 = vmatpush.msrb.mxu3 %v268_v27  ;;  %v196_v55 = vld [vmem:[#allocation10 + $0x90] sm:$0xff] }
  0xe3   :  { %v683_v6 = vpop.f32.mrf.mxu1  ;;  %v643_v2 = vadd.f32 %v642_v1, %v5647_v7  ;;  %v264_v5 = vld [vmem:[#allocation10 + $0x2b0] sm:$0xff]  ;;  %1207 = vmatpush.msrb.mxu2 %v196_v55 }
  0xe4   :  { %v192_v1 = vld [vmem:[#allocation10 + $0x70] sm:$0xff]  ;;  %1247 = vmatpush.msrb.mxu3 %v264_v5 }
  0xe5   :  { %v684_v47 = vadd.f32 %v683_v6, %v643_v2  ;;  %v260_v6 = vld [vmem:[#allocation10 + $0x290] sm:$0xff]  ;;  %1208 = vmatpush.msrb.mxu2 %v192_v1 }
  0xe6   :  { %969 = vmatmul.f32.gmra.mxu0 %v5473_v16  ;;  %1010 = vmatmul.f32.gmra.mxu1 %v5475_v17  ;;  %v188_v10 = vld [vmem:[#allocation10 + $0x50] sm:$0xff] }
  0xe7   :  { %1051 = vmatmul.f32.gmra.mxu2 %v5477_v18  ;;  %1092 = vmatmul.f32.gmra.mxu3 %v5566_v33  ;;  %v724_v53 = vpop.f32.mrf.mxu2  ;;  %v563_v18 = vld [vmem:[#allocation10 + $0xc08] sm:$0xff]  ;;  %v256_v27 = vld [vmem:[#allocation10 + $0x270] sm:$0xff] }
  0xe8   :  { %v725_v48 = vadd.f32 %v724_v53, %v684_v47  ;;  %v515_v33 = vld [vmem:[#allocation10 + $0xa88] sm:$0xff]  ;;  %1170 = vmatpush.msrb.mxu1 %v563_v18  ;;  %1248 = vmatpush.msrb.mxu3 %v260_v6  ;;  %v244_v5 = vld [vmem:[#allocation10 + $0x210] sm:$0xff] }
  0xe9   :  { %v765_v28 = vpop.f32.mrf.mxu3  ;;  %v511_v47 = vld [vmem:[#allocation10 + $0xa68] sm:$0xff]  ;;  %1125 = vmatpush.msrb.mxu0 %v515_v33  ;;  %1209 = vmatpush.msrb.mxu2 %v188_v10  ;;  %v432_v1 = vld [vmem:[#allocation10 + $0x7f0] sm:$0xff] }
  0xea   :  { %v645_v49 = vpop.f32.mrf.mxu0  ;;  %v5662_v63 = vadd.f32 %v765_v28, %v725_v48  ;;  %v503_v53 = vld [vmem:[#allocation10 + $0xa28] sm:$0xff]  ;;  %v184_v28 = vld [vmem:[#allocation10 + $0x30] sm:$0xff]  ;;  %1249 = vmatpush.msrb.mxu3 %v256_v27  ;;  %1319 = vmatpush.msra.mxu1 %v432_v1 }
  0xeb   :  { %v686_v16 = vpop.f32.mrf.mxu1  ;;  %v646_v17 = vadd.f32 %v645_v49, %v5647_v7  ;;  %1126 = vmatpush.msrb.mxu0 %v511_v47  ;;  %v252_v48 = vld [vmem:[#allocation10 + $0x250] sm:$0xff]  ;;  %1210 = vmatpush.msrb.mxu2 %v184_v28 }
  0xec   :  { %1250 = vmatpush.msrb.mxu3 %v252_v48  ;;  %v368_v47 = vld [vmem:[#allocation10 + $0x5f0] sm:$0xff] }
  0xed   :  { %v687_v4 = vadd.f32 %v686_v16, %v646_v17  ;;  %v496_v6 = vld [vmem:[#allocation10 + $0x9f0] sm:$0xff] }
  0xee   :  { %972 = vmatmul.f32.gmra.mxu0 %v5485_v30  ;;  %1013 = vmatmul.f32.gmra.mxu1 %v5487_v31  ;;  %v560_v10 = vld [vmem:[#allocation10 + $0xbf0] sm:$0xff] }
  0xef   :  { %1054 = vmatmul.f32.gmra.mxu2 %v5489_v32  ;;  %1095 = vmatmul.f32.gmra.mxu3 %v5577_v51  ;;  %v507_v51 = vld [vmem:[#allocation10 + $0xa48] sm:$0xff]  ;;  %v424_v27 = vld [vmem:[#allocation10 + $0x7b0] sm:$0xff] }
  0xf0   :  { %1127 = vmatpush.msrb.mxu0 %v507_v51  ;;  %v556_v28 = vld [vmem:[#allocation10 + $0xbd0] sm:$0xff] }
  0xf1   :  { %v727_v2 = vpop.f32.mrf.mxu2 }
  0xf2   :  { %v768_v14 = vpop.f32.mrf.mxu3  ;;  %v728_v24 = vadd.f32 %v727_v2, %v687_v4  ;;  %v648_v30 = vpop.f32.mrf.mxu0  ;;  %1128 = vmatpush.msrb.mxu0 %v503_v53  ;;  %v180_v4 = vld [vmem:[#allocation10 + $0x10] sm:$0xff] }
  0xf3   :  { %v689_v25 = vpop.f32.mrf.mxu1  ;;  %v649_v31 = vadd.f32 %v648_v30, %v5647_v7  ;;  %1211 = vmatpush.msrb.mxu2 %v180_v4  ;;  %v488_v53 = vld [vmem:[#allocation10 + $0x9b0] sm:$0xff] }
  0xf4   :  { %v5669_v32 = vadd.f32 %v768_v14, %v728_v24  ;;  %v416_v4 = vld [vmem:[#allocation10 + $0x770] sm:$0xff] }
  0xf5   :  { %v690_v26 = vadd.f32 %v689_v25, %v649_v31  ;;  %1360 = vmatpush.msra.mxu2 %v496_v6  ;;  %v428_v25 = vld [vmem:[#allocation10 + $0x7d0] sm:$0xff] }
  0xf6   :  { %975 = vmatmul.f32.gmra.mxu0 %v5497_v43  ;;  %1016 = vmatmul.f32.gmra.mxu1 %v5499_v44  ;;  %v248_v44 = vld [vmem:[#allocation10 + $0x230] sm:$0xff] }
  0xf7   :  { %1057 = vmatmul.f32.gmra.mxu2 %v5501_v45  ;;  %1098 = vmatmul.f32.gmra.mxu3 %v5588_v9  ;;  %v499_v9 = vld [vmem:[#allocation10 + $0xa08] sm:$0xff]  ;;  %v492_v31 = vld [vmem:[#allocation10 + $0x9d0] sm:$0xff] }
  0xf8   :  { %1251 = vmatpush.msrb.mxu3 %v248_v44  ;;  %1129 = vmatpush.msrb.mxu0 %v499_v9  ;;  %v352_v9 = vld [vmem:[#allocation10 + $0x570] sm:$0xff] }
  0xf9   :  { %v730_v49 = vpop.f32.mrf.mxu2  ;;  %1320 = vmatpush.msra.mxu1 %v428_v25  ;;  %1361 = vmatpush.msra.mxu2 %v492_v31  ;;  %v408_v25 = vld [vmem:[#allocation10 + $0x730] sm:$0xff] }
  0xfa   :  { %v771_v16 = vpop.f32.mrf.mxu3  ;;  %v731_v17 = vadd.f32 %v730_v49, %v690_v26  ;;  %v651_v18 = vpop.f32.mrf.mxu0  ;;  %1252 = vmatpush.msrb.mxu3 %v244_v5  ;;  %1278 = vmatpush.msra.mxu0 %v368_v47  ;;  %v360_v26 = vld [vmem:[#allocation10 + $0x5b0] sm:$0xff] }
  0xfb   :  { %v692_v43 = vpop.f32.mrf.mxu1  ;;  %v652_v33 = vadd.f32 %v651_v18, %v5647_v7  ;;  %1321 = vmatpush.msra.mxu1 %v424_v27  ;;  %1362 = vmatpush.msra.mxu2 %v488_v53  ;;  %v420_v18 = vld [vmem:[#allocation10 + $0x790] sm:$0xff] }
  0xfc   :  { %v5676_v45 = vadd.f32 %v771_v16, %v731_v17  ;;  %1401 = vmatpush.msra.mxu3 %v560_v10  ;;  %v548_v5 = vld [vmem:[#allocation10 + $0xb90] sm:$0xff] }
  0xfd   :  { %v693_v55 = vadd.f32 %v692_v43, %v652_v33  ;;  %v484_v43 = vld [vmem:[#allocation10 + $0x990] sm:$0xff]  ;;  %1322 = vmatpush.msra.mxu1 %v420_v18 }
  0xfe   :  { %978 = vmatmul.f32.gmra.mxu0 %v5509_v56  ;;  %1019 = vmatmul.f32.gmra.mxu1 %v5511_v57  ;;  %v364_v57 = vld [vmem:[#allocation10 + $0x5d0] sm:$0xff] }
  0xff   :  { %1060 = vmatmul.f32.gmra.mxu2 %v5513_v58  ;;  %1101 = vmatmul.f32.gmra.mxu3 %v5599_v39  ;;  %v552_v33 = vld [vmem:[#allocation10 + $0xbb0] sm:$0xff] }
 0x100   :  { %1279 = vmatpush.msra.mxu0 %v364_v57  ;;  %1402 = vmatpush.msra.mxu3 %v556_v28  ;;  %v344_v57 = vld [vmem:[#allocation10 + $0x530] sm:$0xff] }
 0x101   :  { %v733_v2 = vpop.f32.mrf.mxu2  ;;  %1363 = vmatpush.msra.mxu2 %v484_v43  ;;  %1323 = vmatpush.msra.mxu1 %v416_v4  ;;  %v472_v31 = vld [vmem:[#allocation10 + $0x930] sm:$0xff] }
 0x102   :  { %v774_v14 = vpop.f32.mrf.mxu3  ;;  %v734_v24 = vadd.f32 %v733_v2, %v693_v55  ;;  %v654_v56 = vpop.f32.mrf.mxu0  ;;  %1280 = vmatpush.msra.mxu0 %v360_v26  ;;  %v480_v55 = vld [vmem:[#allocation10 + $0x970] sm:$0xff]  ;;  %1403 = vmatpush.msra.mxu3 %v552_v33 }
 0x103   :  { %v695_v30 = vpop.f32.mrf.mxu1  ;;  %v655_v58 = vadd.f32 %v654_v56, %v5647_v7  ;;  %1364 = vmatpush.msra.mxu2 %v480_v55  ;;  %v404_v27 = vld [vmem:[#allocation10 + $0x710] sm:$0xff] }
 0x104   :  { %v5683_v39 = vadd.f32 %v774_v14, %v734_v24  ;;  %1404 = vmatpush.msra.mxu3 %v548_v5  ;;  %v412_v14 = vld [vmem:[#allocation10 + $0x750] sm:$0xff] }
 0x105   :  { %v696_v51 = vadd.f32 %v695_v30, %v655_v58  ;;  %v476_v24 = vld [vmem:[#allocation10 + $0x950] sm:$0xff]  ;;  %1324 = vmatpush.msra.mxu1 %v412_v14 }
 0x106   :  { %981 = vmatmul.f32.gmra.mxu0 %v5521_v11  ;;  %1022 = vmatmul.f32.gmra.mxu1 %v5523_v12  ;;  %v356_v12 = vld [vmem:[#allocation10 + $0x590] sm:$0xff] }
 0x107   :  { %1063 = vmatmul.f32.gmra.mxu2 %v5525_v13  ;;  %1104 = vmatmul.f32.gmra.mxu3 %v5611_v50  ;;  %v544_v30 = vld [vmem:[#allocation10 + $0xb70] sm:$0xff] }
 0x108   :  { %1281 = vmatpush.msra.mxu0 %v356_v12  ;;  %1365 = vmatpush.msra.mxu2 %v476_v24  ;;  %v468_v53 = vld [vmem:[#allocation10 + $0x910] sm:$0xff] }
 0x109   :  { %v736_v48 = vpop.f32.mrf.mxu2  ;;  %1405 = vmatpush.msra.mxu3 %v544_v30  ;;  %1325 = vmatpush.msra.mxu1 %v408_v25  ;;  %v532_v12 = vld [vmem:[#allocation10 + $0xb10] sm:$0xff] }
 0x10a   :  { %v777_v49 = vpop.f32.mrf.mxu3  ;;  %v737_v16 = vadd.f32 %v736_v48, %v696_v51  ;;  %1282 = vmatpush.msra.mxu0 %v352_v9  ;;  %1366 = vmatpush.msra.mxu2 %v472_v31  ;;  %v536_v48 = vld [vmem:[#allocation10 + $0xb30] sm:$0xff] }
 0x10b   :  { %v657_v11 = vpop.f32.mrf.mxu0  ;;  %v698_v17 = vpop.f32.mrf.mxu1  ;;  %1326 = vmatpush.msra.mxu1 %v404_v27  ;;  %v396_v33 = vld [vmem:[#allocation10 + $0x6d0] sm:$0xff] }
 0x10c   :  { %v658_v13 = vadd.f32 %v657_v11, %v5647_v7  ;;  %v5690_v50 = vadd.f32 %v777_v49, %v737_v16  ;;  %1367 = vmatpush.msra.mxu2 %v468_v53  ;;  %v5709_v49 = vld [vmem:[#allocation7] sm:$0xff]  ;;  %v5712_v16 = vld [vmem:[#allocation7 + $0x8] sm:$0xff]  ;;  %v400_v11 = vld [vmem:[#allocation10 + $0x6f0] sm:$0xff] }
 0x10d   :  { %1327 = vmatpush.msra.mxu1 %v400_v11  ;;  %v460_v9 = vld [vmem:[#allocation10 + $0x8d0] sm:$0xff] }
 0x10e   :  { %v699_v44 = vadd.f32 %v698_v17, %v658_v13  ;;  %984 = vmatmul.f32.gmra.mxu0 %v5533_v35  ;;  %1025 = vmatmul.f32.gmra.mxu1 %v5535_v36  ;;  %v348_v36 = vld [vmem:[#allocation10 + $0x550] sm:$0xff] }
 0x10f   :  { %1066 = vmatmul.f32.gmra.mxu2 %v5537_v37  ;;  %1107 = vmatmul.f32.gmra.mxu3 %v5622_v8  ;;  %v464_v17 = vld [vmem:[#allocation10 + $0x8f0] sm:$0xff] }
 0x110   :  { %1283 = vmatpush.msra.mxu0 %v348_v36  ;;  %1368 = vmatpush.msra.mxu2 %v464_v17  ;;  %v528_v5 = vld [vmem:[#allocation10 + $0xaf0] sm:$0xff] }
 0x111   :  { %1328 = vmatpush.msra.mxu1 %v396_v33  ;;  %v324_v30 = vld [vmem:[#allocation10 + $0x490] sm:$0xff] }
 0x112   :  { %v739_v47 = vpop.f32.mrf.mxu2  ;;  %v780_v1 = vpop.f32.mrf.mxu3  ;;  %1284 = vmatpush.msra.mxu0 %v344_v57  ;;  %1369 = vmatpush.msra.mxu2 %v460_v9  ;;  %v388_v57 = vld [vmem:[#allocation10 + $0x690] sm:$0xff] }
 0x113   :  { %v740_v6 = vadd.f32 %v739_v47, %v699_v44  ;;  %v660_v35 = vpop.f32.mrf.mxu0  ;;  %v701_v2 = vpop.f32.mrf.mxu1  ;;  %v332_v44 = vld [vmem:[#allocation10 + $0x4d0] sm:$0xff]  ;;  %v5723_v47 = vld [vmem:[#allocation7 + $0x38] sm:$0xff] }
 0x114   :  { %v661_v37 = vadd.f32 %v660_v35, %v5647_v7  ;;  %v540_v7 = vld [vmem:[#allocation10 + $0xb50] sm:$0xff] }
 0x115   :  { %v5697_v8 = vadd.f32 %v780_v1, %v740_v6  ;;  %1406 = vmatpush.msra.mxu3 %v540_v7  ;;  %v5726_v1 = vld [vmem:[#allocation7 + $0x40] sm:$0xff]  ;;  %v328_v6 = vld [vmem:[#allocation10 + $0x4b0] sm:$0xff] }
 0x116   :  { %v702_v56 = vadd.f32 %v701_v2, %v661_v37  ;;  %987 = vmatmul.f32.gmra.mxu0 %v5545_v54  ;;  %1028 = vmatmul.f32.gmra.mxu1 %v5547_v59  ;;  %v340_v59 = vld [vmem:[#allocation10 + $0x510] sm:$0xff] }
 0x117   :  { %1069 = vmatmul.f32.gmra.mxu2 %v5549_v60  ;;  %1110 = vmatmul.f32.gmra.mxu3 %v5633_v41  ;;  %v456_v35 = vld [vmem:[#allocation10 + $0x8b0] sm:$0xff] }
 0x118   :  { %1285 = vmatpush.msra.mxu0 %v340_v59  ;;  %1407 = vmatpush.msra.mxu3 %v536_v48  ;;  %v524_v2 = vld [vmem:[#allocation10 + $0xad0] sm:$0xff] }
 0x119   :  { %1370 = vmatpush.msra.mxu2 %v456_v35  ;;  %v452_v25 = vld [vmem:[#allocation10 + $0x890] sm:$0xff] }
 0x11a   :  { %v742_v58 = vpop.f32.mrf.mxu2  ;;  %v783_v51 = vpop.f32.mrf.mxu3  ;;  %1408 = vmatpush.msra.mxu3 %v532_v12  ;;  %v520_v7 = vld [vmem:[#allocation10 + $0xab0] sm:$0xff] }
 0x11b   :  { %v743_v10 = vadd.f32 %v742_v58, %v702_v56  ;;  %v803_v54 = vpop.f32.mrf.mxu0  ;;  %v844_v26 = vpop.f32.mrf.mxu1  ;;  %1371 = vmatpush.msra.mxu2 %v452_v25  ;;  %v5741_v58 = vld [vmem:[#allocation7 + $0x70] sm:$0xff]  ;;  %v305_v25 = vld [vmem:[#allocation10 + $0x3f8] sm:$0xff] }
 0x11c   :  { %v804_v60 = vadd.f32 %v803_v54, %v5655_v3  ;;  %v336_v3 = vld [vmem:[#allocation10 + $0x4f0] sm:$0xff]  ;;  %1409 = vmatpush.msra.mxu3 %v528_v5 }
 0x11d   :  { %v5704_v41 = vadd.f32 %v783_v51, %v743_v10  ;;  %1286 = vmatpush.msra.mxu0 %v336_v3  ;;  %v5744_v51 = vld [vmem:[#allocation7 + $0x78] sm:$0xff]  ;;  %v320_v10 = vld [vmem:[#allocation10 + $0x470] sm:$0xff] }
 0x11e   :  { %v845_v28 = vadd.f32 %v844_v26, %v804_v60  ;;  %1130 = vmatmul.f32.vlgmr.msrb.gmra.mxu0 %v5557_v19  ;;  %4338 = vmatmul.msk.f32.vlgmr.msrb.gmra.mxu1 %vm584_vm1, %v5559_v20  ;;  %v448_v54 = vld [vmem:[#allocation10 + $0x870] sm:$0xff] }
 0x11f   :  { %1212 = vmatmul.f32.vlgmr.msrb.gmra.mxu2 %v5709_v49  ;;  %1253 = vmatmul.f32.vlgmr.msrb.gmra.mxu3 %v5712_v16  ;;  %v516_v26 = vld [vmem:[#allocation10 + $0xa90] sm:$0xff] }
 0x120   :  { %1287 = vmatpush.msra.mxu0 %v332_v44  ;;  %1410 = vmatpush.msra.mxu3 %v524_v2  ;;  %v380_v48 = vld [vmem:[#allocation10 + $0x650] sm:$0xff] }
 0x121   :  { %1372 = vmatpush.msra.mxu2 %v448_v54  ;;  %v444_v3 = vld [vmem:[#allocation10 + $0x850] sm:$0xff]  ;;  %v237_v54 = vld [vmem:[#allocation10 + $0x1d8] sm:$0xff] }
 0x122   :  { %v885_v19 = vpop.f32.mrf.mxu2  ;;  %v5715_v18 = vpop.f32.mrf.mxu3  ;;  %1288 = vmatpush.msra.mxu0 %v328_v6  ;;  %1411 = vmatpush.msra.mxu3 %v520_v7  ;;  %v512_v12 = vld [vmem:[#allocation10 + $0xa70] sm:$0xff] }
 0x123   :  { %v5717_v20 = vadd.f32 %v885_v19, %v845_v28  ;;  %v806_v43 = vpop.f32.mrf.mxu0  ;;  %v847_v13 = vpop.f32.mrf.mxu1  ;;  %v316_v28 = vld [vmem:[#allocation10 + $0x450] sm:$0xff]  ;;  %1373 = vmatpush.msra.mxu2 %v444_v3  ;;  %v5756_v19 = vld [vmem:[#allocation7 + $0xa8] sm:$0xff] }
 0x124   :  { %v807_v4 = vadd.f32 %v806_v43, %v5662_v63  ;;  %v392_v63 = vld [vmem:[#allocation10 + $0x6b0] sm:$0xff]  ;;  %1289 = vmatpush.msra.mxu0 %v324_v30  ;;  %1412 = vmatpush.msra.mxu3 %v516_v26  ;;  %v5774_v30 = vld [vmem:[#allocation7 + $0xe8] sm:$0xff]  ;;  %v301_v26 = vld [vmem:[#allocation10 + $0x3d8] sm:$0xff] }
 0x125   :  { %10007 = vst [vmem:[#allocation25_spill] sm:$0xff] %v5717_v20  ;;  %1329 = vmatpush.msra.mxu1 %v392_v63  ;;  %v5759_v43 = vld [vmem:[#allocation7 + $0xb0] sm:$0xff]  ;;  %v485_v20 = vld [vmem:[#allocation10 + $0x998] sm:$0xff] }
 0x126   :  { %v848_v55 = vadd.f32 %v847_v13, %v807_v4  ;;  %1133 = vmatmul.f32.gmra.mxu0 %v5568_v38  ;;  %4339 = vmatmul.msk.f32.gmra.mxu1 %vm584_vm1, %v5570_v0  ;;  %v5730_v38 = vperm.slane %v5641_v34, 1  ;;  %v312_v13 = vld [vmem:[#allocation10 + $0x430] sm:$0xff] }
 0x127   :  { %1215 = vmatmul.f32.gmra.mxu2 %v5723_v47  ;;  %1256 = vmatmul.f32.gmra.mxu3 %v5726_v1  ;;  %v440_v44 = vld [vmem:[#allocation10 + $0x830] sm:$0xff] }
 0x128   :  { %1330 = vmatpush.msra.mxu1 %v388_v57  ;;  %1290 = vmatpush.msra.mxu0 %v320_v10  ;;  %v508_v33 = vld [vmem:[#allocation10 + $0xa50] sm:$0xff]  ;;  %v241_v57 = vld [vmem:[#allocation10 + $0x1f8] sm:$0xff] }
 0x129   :  { %1413 = vmatpush.msra.mxu3 %v512_v12  ;;  %1374 = vmatpush.msra.mxu2 %v440_v44  ;;  %v308_v6 = vld [vmem:[#allocation10 + $0x410] sm:$0xff]  ;;  %v293_v44 = vld [vmem:[#allocation10 + $0x398] sm:$0xff] }
 0x12a   :  { %v888_v0 = vpop.f32.mrf.mxu2  ;;  %v929_v36 = vpop.f32.mrf.mxu3  ;;  %1291 = vmatpush.msra.mxu0 %v316_v28  ;;  %v372_v63 = vld [vmem:[#allocation10 + $0x610] sm:$0xff]  ;;  %v233_v28 = vld [vmem:[#allocation10 + $0x1b8] sm:$0xff] }
 0x12b   :  { %v5732_v14 = vadd.f32 %v888_v0, %v848_v55  ;;  %v5735_v24 = vadd.f32 %v929_v36, %v5730_v38  ;;  %v809_v37 = vpop.f32.mrf.mxu0  ;;  %v850_v56 = vpop.f32.mrf.mxu1  ;;  %1414 = vmatpush.msra.mxu3 %v508_v33  ;;  %v436_v35 = vld [vmem:[#allocation10 + $0x810] sm:$0xff] }
 0x12c   :  { %v810_v31 = vadd.f32 %v809_v37, %v5669_v32  ;;  %v384_v32 = vld [vmem:[#allocation10 + $0x670] sm:$0xff]  ;;  %1292 = vmatpush.msra.mxu0 %v312_v13  ;;  %1375 = vmatpush.msra.mxu2 %v436_v35 }
 0x12d   :  { %10008 = vst [vmem:[#allocation26_spill] sm:$0xff] %v5732_v14  ;;  %1331 = vmatpush.msra.mxu1 %v384_v32  ;;  %v504_v0 = vld [vmem:[#allocation10 + $0xa30] sm:$0xff]  ;;  %v421_v14 = vld [vmem:[#allocation10 + $0x798] sm:$0xff] }
 0x12e   :  { %v851_v34 = vadd.f32 %v850_v56, %v810_v31  ;;  %1136 = vmatmul.f32.gmra.mxu0 %v5579_v52  ;;  %4340 = vmatmul.msk.f32.gmra.mxu1 %vm584_vm1, %v5581_v15  ;;  %v500_v36 = vld [vmem:[#allocation10 + $0xa10] sm:$0xff]  ;;  %v5771_v56 = vld [vmem:[#allocation7 + $0xe0] sm:$0xff] }
 0x12f   :  { %1218 = vmatmul.f32.gmra.mxu2 %v5741_v58  ;;  %1259 = vmatmul.f32.gmra.mxu3 %v5744_v51 }
 0x130   :  { %1332 = vmatpush.msra.mxu1 %v380_v48  ;;  %1293 = vmatpush.msra.mxu0 %v308_v6  ;;  %v297_v48 = vld [vmem:[#allocation10 + $0x3b8] sm:$0xff] }
 0x131   :  { %1415 = vmatpush.msra.mxu3 %v504_v0  ;;  %1524 = vmatpush.msrb.mxu2 %v305_v25  ;;  %v289_v6 = vld [vmem:[#allocation10 + $0x378] sm:$0xff]  ;;  %v10014_v25 = vld [vmem:[#allocation24_spill] sm:$0xff] }
 0x132   :  { %v891_v52 = vpop.f32.mrf.mxu2  ;;  %v932_v59 = vpop.f32.mrf.mxu3 }
 0x133   :  { %v5747_v15 = vadd.f32 %v891_v52, %v851_v34  ;;  %v5750_v27 = vadd.f32 %v932_v59, %v5730_v38  ;;  %v812_v53 = vpop.f32.mrf.mxu0  ;;  %v853_v60 = vpop.f32.mrf.mxu1  ;;  %1416 = vmatpush.msra.mxu3 %v500_v36  ;;  %v369_v59 = vld [vmem:[#allocation10 + $0x5f8] sm:$0xff]  ;;  %1525 = vmatpush.msrb.mxu2 %v301_v26 }
 0x134   :  { %v813_v11 = vadd.f32 %v812_v53, %v5676_v45  ;;  %v376_v45 = vld [vmem:[#allocation10 + $0x630] sm:$0xff]  ;;  %v5787_v53 = vld [vmem:[#allocation7 + $0x118] sm:$0xff] }
 0x135   :  { %10009 = vst [vmem:[#allocation27_spill] sm:$0xff] %v5747_v15  ;;  %1333 = vmatpush.msra.mxu1 %v376_v45  ;;  %1565 = vmatpush.msrb.mxu3 %v369_v59  ;;  %v229_v45 = vld [vmem:[#allocation10 + $0x198] sm:$0xff] }
 0x136   :  { %v854_v17 = vadd.f32 %v853_v60, %v813_v11  ;;  %1139 = vmatmul.f32.gmra.mxu0 %v5590_v21  ;;  %4341 = vmatmul.msk.f32.gmra.mxu1 %vm584_vm1, %v5592_v29  ;;  %v5790_v60 = vld [vmem:[#allocation7 + $0x120] sm:$0xff] }
 0x137   :  { %1221 = vmatmul.f32.gmra.mxu2 %v5756_v19  ;;  %1262 = vmatmul.f32.gmra.mxu3 %v5759_v43 }
 0x138   :  { %1334 = vmatpush.msra.mxu1 %v372_v63  ;;  %1526 = vmatpush.msrb.mxu2 %v297_v48 }
 0x13a   :  { %v894_v21 = vpop.f32.mrf.mxu2  ;;  %v935_v9 = vpop.f32.mrf.mxu3  ;;  %1483 = vmatpush.msrb.mxu1 %v241_v57  ;;  %1527 = vmatpush.msrb.mxu2 %v293_v44  ;;  %v5836_v44 = vld [vmem:[#allocation7 + $0x20] sm:$0xff] }
 0x13b   :  { %v5762_v29 = vadd.f32 %v894_v21, %v854_v17  ;;  %v5765_v4 = vadd.f32 %v935_v9, %v5730_v38  ;;  %v815_v55 = vpop.f32.mrf.mxu0  ;;  %v856_v5 = vpop.f32.mrf.mxu1  ;;  %v361_v21 = vld [vmem:[#allocation10 + $0x5b8] sm:$0xff]  ;;  %v5802_v9 = vld [vmem:[#allocation7 + $0x150] sm:$0xff] }
 0x13c   :  { %v816_v2 = vadd.f32 %v815_v55, %v5683_v39  ;;  %v572_v39 = vld [vmem:[#allocation10 + $0xc50] sm:$0xf]  ;;  %1484 = vmatpush.msrb.mxu1 %v237_v54  ;;  %v5805_v55 = vld [vmem:[#allocation7 + $0x158] sm:$0xff]  ;;  %1528 = vmatpush.msrb.mxu2 %v289_v6 }
 0x13d   :  { %10010 = vst [vmem:[#allocation28_spill] sm:$0xff] %v5762_v29  ;;  %4346 = vmatpush.msk.msrb.mxu0 %vm609_vm0, %v572_v39  ;;  %v285_v39 = vld [vmem:[#allocation10 + $0x358] sm:$0xff]  ;;  %v5905_v29 = vld [vmem:[#allocation7 + $0x128] sm:$0xff] }
 0x13e   :  { %v857_v37 = vadd.f32 %v856_v5, %v816_v2  ;;  %1142 = vmatmul.f32.gmra.mxu0 %v5601_v40  ;;  %4342 = vmatmul.msk.f32.gmra.mxu1 %vm584_vm1, %v5603_v42  ;;  %v225_v5 = vld [vmem:[#allocation10 + $0x178] sm:$0xff] }
 0x13f   :  { %1224 = vmatmul.f32.gmra.mxu2 %v5771_v56  ;;  %1265 = vmatmul.f32.gmra.mxu3 %v5774_v30  ;;  %v349_v54 = vld [vmem:[#allocation10 + $0x558] sm:$0xff] }
 0x140   :  { %1485 = vmatpush.msrb.mxu1 %v233_v28  ;;  %1529 = vmatpush.msrb.mxu2 %v285_v39  ;;  %v269_v39 = vld [vmem:[#allocation10 + $0x2d8] sm:$0xff] }
 0x142   :  { %v897_v40 = vpop.f32.mrf.mxu2  ;;  %v938_v31 = vpop.f32.mrf.mxu3  ;;  %1486 = vmatpush.msrb.mxu1 %v229_v45  ;;  %v345_v45 = vld [vmem:[#allocation10 + $0x538] sm:$0xff] }
 0x143   :  { %v5778_v34 = vadd.f32 %v897_v40, %v857_v37  ;;  %v5781_v42 = vadd.f32 %v938_v31, %v5730_v38  ;;  %v818_v7 = vpop.f32.mrf.mxu0  ;;  %v859_v10 = vpop.f32.mrf.mxu1  ;;  %v221_v37 = vld [vmem:[#allocation10 + $0x158] sm:$0xff]  ;;  %v568_v31 = vld [vmem:[#allocation10 + $0xc30] sm:$0xff] }
 0x144   :  { %v819_v32 = vadd.f32 %v818_v7, %v5690_v50  ;;  %v365_v50 = vld [vmem:[#allocation10 + $0x5d8] sm:$0xff]  ;;  %1487 = vmatpush.msrb.mxu1 %v225_v5  ;;  %v5817_v7 = vld [vmem:[#allocation7 + $0x188] sm:$0xff]  ;;  %1456 = vmatpush.msrb.mxu0 %v568_v31 }
 0x145   :  { %10011 = vst [vmem:[#allocation29_spill] sm:$0xff] %v5778_v34  ;;  %1566 = vmatpush.msrb.mxu3 %v365_v50  ;;  %v353_v40 = vld [vmem:[#allocation10 + $0x578] sm:$0xff] }
 0x146   :  { %v860_v52 = vadd.f32 %v859_v10, %v819_v32  ;;  %1145 = vmatmul.f32.gmra.mxu0 %v5613_v61  ;;  %4343 = vmatmul.msk.f32.gmra.mxu1 %vm584_vm1, %v5615_v62  ;;  %v5820_v10 = vld [vmem:[#allocation7 + $0x190] sm:$0xff]  ;;  %v217_v32 = vld [vmem:[#allocation10 + $0x138] sm:$0xff] }
 0x147   :  { %1227 = vmatmul.f32.gmra.mxu2 %v5787_v53  ;;  %1268 = vmatmul.f32.gmra.mxu3 %v5790_v60  ;;  %v341_v5 = vld [vmem:[#allocation10 + $0x518] sm:$0xff] }
 0x148   :  { %1567 = vmatpush.msrb.mxu3 %v361_v21  ;;  %1488 = vmatpush.msrb.mxu1 %v221_v37  ;;  %v273_v21 = vld [vmem:[#allocation10 + $0x2f8] sm:$0xff] }
 0x149   :  { %v205_v37 = vld [vmem:[#allocation10 + $0xd8] sm:$0xff] }
 0x14a   :  { %v900_v3 = vpop.f32.mrf.mxu2  ;;  %v941_v61 = vpop.f32.mrf.mxu3  ;;  %1489 = vmatpush.msrb.mxu1 %v217_v32  ;;  %v337_v31 = vld [vmem:[#allocation10 + $0x4f8] sm:$0xff] }
 0x14b   :  { %v5793_v62 = vadd.f32 %v900_v3, %v860_v52  ;;  %v5796_v11 = vadd.f32 %v941_v61, %v5730_v38  ;;  %v821_v17 = vpop.f32.mrf.mxu0  ;;  %v862_v12 = vpop.f32.mrf.mxu1  ;;  %v213_v61 = vld [vmem:[#allocation10 + $0x118] sm:$0xff] }
 0x14c   :  { %v822_v13 = vadd.f32 %v821_v17, %v5697_v8  ;;  %v357_v8 = vld [vmem:[#allocation10 + $0x598] sm:$0xff]  ;;  %1490 = vmatpush.msrb.mxu1 %v213_v61 }
 0x14d   :  { %10012 = vst [vmem:[#allocation30_spill] sm:$0xff] %v5793_v62  ;;  %1568 = vmatpush.msrb.mxu3 %v357_v8  ;;  %v277_v17 = vld [vmem:[#allocation10 + $0x318] sm:$0xff] }
 0x14e   :  { %v863_v33 = vadd.f32 %v862_v12, %v822_v13  ;;  %1148 = vmatmul.f32.gmra.mxu0 %v5624_v22  ;;  %4344 = vmatmul.msk.f32.gmra.mxu1 %vm584_vm1, %v5626_v23  ;;  %v5830_v13 = vld [vmem:[#allocation7 + $0x10] sm:$0xff]  ;;  %v5851_v32 = vld [vmem:[#allocation7 + $0x58] sm:$0xff] }
 0x14f   :  { %1230 = vmatmul.f32.gmra.mxu2 %v5802_v9  ;;  %1271 = vmatmul.f32.gmra.mxu3 %v5805_v55  ;;  %v493_v62 = vld [vmem:[#allocation10 + $0x9d8] sm:$0xff] }
 0x150   :  { %1569 = vmatpush.msrb.mxu3 %v353_v40  ;;  %v5848_v40 = vld [vmem:[#allocation7 + $0x50] sm:$0xff] }
 0x152   :  { %v903_v63 = vpop.f32.mrf.mxu2  ;;  %v944_v22 = vpop.f32.mrf.mxu3  ;;  %1570 = vmatpush.msrb.mxu3 %v349_v54  ;;  %v265_v54 = vld [vmem:[#allocation10 + $0x2b8] sm:$0xff] }
 0x153   :  { %v5808_v23 = vadd.f32 %v903_v63, %v863_v33  ;;  %v5811_v35 = vadd.f32 %v944_v22, %v5730_v38  ;;  %v824_v2 = vpop.f32.mrf.mxu0  ;;  %v865_v0 = vpop.f32.mrf.mxu1  ;;  %v209_v33 = vld [vmem:[#allocation10 + $0xf8] sm:$0xff] }
 0x154   :  { %v825_v36 = vadd.f32 %v824_v2, %v5704_v41  ;;  %v281_v41 = vld [vmem:[#allocation10 + $0x338] sm:$0xff]  ;;  %1571 = vmatpush.msrb.mxu3 %v345_v45  ;;  %1491 = vmatpush.msrb.mxu1 %v209_v33 }
 0x155   :  { %10013 = vst [vmem:[#allocation31_spill] sm:$0xff] %v5808_v23  ;;  %1530 = vmatpush.msrb.mxu2 %v281_v41  ;;  %v5854_v41 = vld [vmem:[#allocation7 + $0x60] sm:$0xff]  ;;  %v197_v45 = vld [vmem:[#allocation10 + $0x98] sm:$0xff] }
 0x156   :  { %v866_v57 = vadd.f32 %v865_v0, %v825_v36  ;;  %1151 = vmatmul.f32.gmra.mxu0 %v5635_v46  ;;  %4345 = vmatmul.msk.f32.gmra.mxu1 %vm584_vm1, %v10014_v25  ;;  %v927_v46 = vadd.f32 %v5715_v18, %v5730_v38  ;;  %v5833_v18 = vld [vmem:[#allocation7 + $0x18] sm:$0xff]  ;;  %v5845_v25 = vld [vmem:[#allocation7 + $0x48] sm:$0xff] }
 0x157   :  { %1233 = vmatmul.f32.gmra.mxu2 %v5817_v7  ;;  %1274 = vmatmul.f32.gmra.mxu3 %v5820_v10  ;;  %v429_v23 = vld [vmem:[#allocation10 + $0x7d8] sm:$0xff] }
 0x158   :  { %1531 = vmatpush.msrb.mxu2 %v277_v17  ;;  %1572 = vmatpush.msrb.mxu3 %v341_v5  ;;  %v5863_v5 = vld [vmem:[#allocation7 + $0x88] sm:$0xff] }
 0x159   :  { %1492 = vmatpush.msrb.mxu1 %v205_v37 }
 0x15a   :  { %v906_v26 = vpop.f32.mrf.mxu2  ;;  %v947_v52 = vpop.f32.mrf.mxu3  ;;  %1532 = vmatpush.msrb.mxu2 %v273_v21  ;;  %1573 = vmatpush.msrb.mxu3 %v337_v31  ;;  %v5860_v21 = vld [vmem:[#allocation7 + $0x80] sm:$0xff] }
 0x15b   :  { %v5825_v59 = vadd.f32 %v906_v26, %v866_v57  ;;  %v5828_v28 = vadd.f32 %v947_v52, %v5730_v38  ;;  %v967_v48 = vpop.f32.mrf.mxu0  ;;  %v1008_v50 = vpop.f32.mrf.mxu1  ;;  %v5839_v38 = vld [vmem:[#allocation7 + $0x28] sm:$0xff] }
 0x15c   :  { %v968_v3 = vadd.f32 %v967_v48, %v927_v46  ;;  %1533 = vmatpush.msrb.mxu2 %v269_v39  ;;  %v333_v46 = vld [vmem:[#allocation10 + $0x4d8] sm:$0xff] }
 0x15d   :  { %10015 = vst [vmem:[#allocation24_spill] sm:$0xff] %v5825_v59  ;;  %1574 = vmatpush.msrb.mxu3 %v333_v46 }
 0x15e   :  { %v1009_v12 = vadd.f32 %v1008_v50, %v968_v3  ;;  %1294 = vmatmul.f32.vlgmr.msra.gmra.mxu0 %v5830_v13  ;;  %1335 = vmatmul.f32.vlgmr.msra.gmra.mxu1 %v5833_v18 }
 0x15f   :  { %1376 = vmatmul.f32.vlgmr.msra.gmra.mxu2 %v5836_v44  ;;  %1417 = vmatmul.f32.vlgmr.msra.gmra.mxu3 %v5839_v38 }
 0x160   :  { %1534 = vmatpush.msrb.mxu2 %v265_v54 }
 0x162   :  { %v1049_v6 = vpop.f32.mrf.mxu2  ;;  %v1090_v8 = vpop.f32.mrf.mxu3 }
 0x163   :  { %v1050_v63 = vadd.f32 %v1049_v6, %v1009_v12  ;;  %v970_v22 = vpop.f32.mrf.mxu0  ;;  %v1011_v2 = vpop.f32.mrf.mxu1  ;;  %v564_v12 = vld [vmem:[#allocation10 + $0xc10] sm:$0xff]  ;;  %v261_v6 = vld [vmem:[#allocation10 + $0x298] sm:$0xff] }
 0x164   :  { %v971_v0 = vadd.f32 %v970_v22, %v5735_v24  ;;  %v201_v24 = vld [vmem:[#allocation10 + $0xb8] sm:$0xff]  ;;  %1457 = vmatpush.msrb.mxu0 %v564_v12  ;;  %1535 = vmatpush.msrb.mxu2 %v261_v6  ;;  %v5881_v12 = vld [vmem:[#allocation7 + $0xc8] sm:$0xff] }
 0x165   :  { %v5843_v36 = vadd.f32 %v1090_v8, %v1050_v63  ;;  %1493 = vmatpush.msrb.mxu1 %v201_v24  ;;  %v329_v8 = vld [vmem:[#allocation10 + $0x4b8] sm:$0xff]  ;;  %v5866_v63 = vld [vmem:[#allocation7 + $0x90] sm:$0xff] }
 0x166   :  { %v1012_v57 = vadd.f32 %v1011_v2, %v971_v0  ;;  %1297 = vmatmul.f32.gmra.mxu0 %v5845_v25  ;;  %1338 = vmatmul.f32.gmra.mxu1 %v5848_v40  ;;  %v193_v22 = vld [vmem:[#allocation10 + $0x78] sm:$0xff] }
 0x167   :  { %1379 = vmatmul.f32.gmra.mxu2 %v5851_v32  ;;  %1420 = vmatmul.f32.gmra.mxu3 %v5854_v41  ;;  %v257_v2 = vld [vmem:[#allocation10 + $0x278] sm:$0xff] }
 0x168   :  { %1494 = vmatpush.msrb.mxu1 %v197_v45  ;;  %v325_v0 = vld [vmem:[#allocation10 + $0x498] sm:$0xff]  ;;  %1575 = vmatpush.msrb.mxu3 %v329_v8  ;;  %v5884_v45 = vld [vmem:[#allocation7 + $0xd0] sm:$0xff] }
 0x169   :  { %1536 = vmatpush.msrb.mxu2 %v257_v2  ;;  %v317_v6 = vld [vmem:[#allocation10 + $0x458] sm:$0xff] }
 0x16a   :  { %v1052_v26 = vpop.f32.mrf.mxu2  ;;  %v1093_v52 = vpop.f32.mrf.mxu3  ;;  %1495 = vmatpush.msrb.mxu1 %v193_v22  ;;  %1576 = vmatpush.msrb.mxu3 %v325_v0 }
 0x16b   :  { %v1053_v48 = vadd.f32 %v1052_v26, %v1012_v57  ;;  %v973_v50 = vpop.f32.mrf.mxu0  ;;  %v1014_v3 = vpop.f32.mrf.mxu1  ;;  %v189_v26 = vld [vmem:[#allocation10 + $0x58] sm:$0xff] }
 0x16c   :  { %v974_v61 = vadd.f32 %v973_v50, %v5750_v27  ;;  %v5869_v27 = vld [vmem:[#allocation7 + $0x98] sm:$0xff]  ;;  %1496 = vmatpush.msrb.mxu1 %v189_v26 }
 0x16d   :  { %v5858_v17 = vadd.f32 %v1093_v52, %v1053_v48  ;;  %v253_v52 = vld [vmem:[#allocation10 + $0x258] sm:$0xff] }
 0x16e   :  { %v1015_v33 = vadd.f32 %v1014_v3, %v974_v61  ;;  %1300 = vmatmul.f32.gmra.mxu0 %v5860_v21  ;;  %1341 = vmatmul.f32.gmra.mxu1 %v5863_v5  ;;  %v5875_v50 = vld [vmem:[#allocation7 + $0xb8] sm:$0xff]  ;;  %v5878_v3 = vld [vmem:[#allocation7 + $0xc0] sm:$0xff] }
 0x16f   :  { %1382 = vmatmul.f32.gmra.mxu2 %v5866_v63  ;;  %1423 = vmatmul.f32.gmra.mxu3 %v5869_v27  ;;  %v321_v61 = vld [vmem:[#allocation10 + $0x478] sm:$0xff] }
 0x170   :  { %1537 = vmatpush.msrb.mxu2 %v253_v52  ;;  %1577 = vmatpush.msrb.mxu3 %v321_v61  ;;  %v5890_v52 = vld [vmem:[#allocation7 + $0xf0] sm:$0xff]  ;;  %v5893_v61 = vld [vmem:[#allocation7 + $0xf8] sm:$0xff] }
 0x172   :  { %v1055_v37 = vpop.f32.mrf.mxu2  ;;  %v1096_v39 = vpop.f32.mrf.mxu3  ;;  %1578 = vmatpush.msrb.mxu3 %v317_v6  ;;  %v497_v6 = vld [vmem:[#allocation10 + $0x9f8] sm:$0xff] }
 0x173   :  { %v1056_v57 = vadd.f32 %v1055_v37, %v1015_v33  ;;  %v976_v31 = vpop.f32.mrf.mxu0  ;;  %v1017_v24 = vpop.f32.mrf.mxu1  ;;  %v249_v33 = vld [vmem:[#allocation10 + $0x238] sm:$0xff] }
 0x174   :  { %v977_v54 = vadd.f32 %v976_v31, %v5765_v4  ;;  %v185_v4 = vld [vmem:[#allocation10 + $0x38] sm:$0xff]  ;;  %1538 = vmatpush.msrb.mxu2 %v249_v33 }
 0x175   :  { %v5873_v46 = vadd.f32 %v1096_v39, %v1056_v57  ;;  %1497 = vmatpush.msrb.mxu1 %v185_v4  ;;  %v313_v39 = vld [vmem:[#allocation10 + $0x438] sm:$0xff]  ;;  %v5896_v4 = vld [vmem:[#allocation7 + $0x100] sm:$0xff] }
 0x176   :  { %v1018_v48 = vadd.f32 %v1017_v24, %v977_v54  ;;  %1303 = vmatmul.f32.gmra.mxu0 %v5875_v50  ;;  %1344 = vmatmul.f32.gmra.mxu1 %v5878_v3  ;;  %v181_v24 = vld [vmem:[#allocation10 + $0x18] sm:$0xff] }
 0x177   :  { %1385 = vmatmul.f32.gmra.mxu2 %v5881_v12  ;;  %1426 = vmatmul.f32.gmra.mxu3 %v5884_v45  ;;  %v245_v54 = vld [vmem:[#allocation10 + $0x218] sm:$0xff] }
 0x178   :  { %1579 = vmatpush.msrb.mxu3 %v313_v39  ;;  %v433_v33 = vld [vmem:[#allocation10 + $0x7f8] sm:$0xff]  ;;  %1498 = vmatpush.msrb.mxu1 %v181_v24  ;;  %v5908_v24 = vld [vmem:[#allocation7 + $0x130] sm:$0xff] }
 0x179   :  { %1539 = vmatpush.msrb.mxu2 %v245_v54  ;;  %1606 = vmatpush.msra.mxu0 %v433_v33  ;;  %v557_v54 = vld [vmem:[#allocation10 + $0xbd8] sm:$0xff] }
 0x17a   :  { %v1058_v8 = vpop.f32.mrf.mxu2  ;;  %v1099_v22 = vpop.f32.mrf.mxu3  ;;  %1647 = vmatpush.msra.mxu1 %v497_v6  ;;  %v425_v33 = vld [vmem:[#allocation10 + $0x7b8] sm:$0xff] }
 0x17b   :  { %v1059_v2 = vadd.f32 %v1058_v8, %v1018_v48  ;;  %v979_v0 = vpop.f32.mrf.mxu0  ;;  %v1020_v37 = vpop.f32.mrf.mxu1  ;;  %v309_v48 = vld [vmem:[#allocation10 + $0x418] sm:$0xff]  ;;  %1607 = vmatpush.msra.mxu0 %v429_v23 }
 0x17c   :  { %v980_v57 = vadd.f32 %v979_v0, %v5781_v42  ;;  %v5899_v42 = vld [vmem:[#allocation7 + $0x108] sm:$0xff]  ;;  %v561_v8 = vld [vmem:[#allocation10 + $0xbf8] sm:$0xff]  ;;  %1580 = vmatpush.msrb.mxu3 %v309_v48  ;;  %1648 = vmatpush.msra.mxu1 %v493_v62  ;;  %v5921_v62 = vld [vmem:[#allocation7 + $0x160] sm:$0xff] }
 0x17d   :  { %v5888_v31 = vadd.f32 %v1099_v22, %v1059_v2  ;;  %1688 = vmatpush.msra.mxu2 %v561_v8  ;;  %v573_v48 = vld [vmem:[#allocation10 + $0xc58] sm:$0xf]  ;;  %1608 = vmatpush.msra.mxu0 %v425_v33 }
 0x17e   :  { %v1021_v26 = vadd.f32 %v1020_v37, %v980_v57  ;;  %1306 = vmatmul.f32.gmra.mxu0 %v5890_v52  ;;  %1347 = vmatmul.f32.gmra.mxu1 %v5893_v61  ;;  %v489_v6 = vld [vmem:[#allocation10 + $0x9b8] sm:$0xff] }
 0x17f   :  { %1388 = vmatmul.f32.gmra.mxu2 %v5896_v4  ;;  %1429 = vmatmul.f32.gmra.mxu3 %v5899_v42  ;;  %v553_v8 = vld [vmem:[#allocation10 + $0xbb8] sm:$0xff] }
 0x180   :  { %1689 = vmatpush.msra.mxu2 %v557_v54  ;;  %4355 = vmatpush.msk.msra.mxu3 %vm609_vm0, %v573_v48  ;;  %v5924_v54 = vld [vmem:[#allocation7 + $0x168] sm:$0xff]  ;;  %v549_v48 = vld [vmem:[#allocation10 + $0xb98] sm:$0xff] }
 0x181   :  { %1649 = vmatpush.msra.mxu1 %v489_v6  ;;  %10018 = vst [vmem:[#allocation34_spill] sm:$0xff] %v5924_v54  ;;  %v5930_v33 = vld [vmem:[#allocation7 + $0x178] sm:$0xff]  ;;  %1609 = vmatpush.msra.mxu0 %v421_v14 }
 0x182   :  { %v1061_v22 = vpop.f32.mrf.mxu2  ;;  %v1102_v2 = vpop.f32.mrf.mxu3  ;;  %1690 = vmatpush.msra.mxu2 %v553_v8  ;;  %10020 = vst [vmem:[#allocation36_spill] sm:$0xff] %v5930_v33  ;;  %v481_v6 = vld [vmem:[#allocation10 + $0x978] sm:$0xff] }
 0x183   :  { %v1062_v0 = vadd.f32 %v1061_v22, %v1021_v26  ;;  %v982_v37 = vpop.f32.mrf.mxu0  ;;  %v1023_v39 = vpop.f32.mrf.mxu1  ;;  %v5911_v26 = vld [vmem:[#allocation7 + $0x138] sm:$0xff]  ;;  %1650 = vmatpush.msra.mxu1 %v485_v20  ;;  %v5939_v20 = vld [vmem:[#allocation7 + $0x1a0] sm:$0xff] }
 0x184   :  { %v983_v57 = vadd.f32 %v982_v37, %v5796_v11  ;;  %10016 = vst [vmem:[#allocation32_spill] sm:$0xff] %v5911_v26  ;;  %v5914_v11 = vld [vmem:[#allocation7 + $0x140] sm:$0xff]  ;;  %v545_v8 = vld [vmem:[#allocation10 + $0xb78] sm:$0xff]  ;;  %1691 = vmatpush.msra.mxu2 %v549_v48  ;;  %v5945_v48 = vld [vmem:[#allocation7 + $0x1b0] sm:$0xff] }
 0x185   :  { %v5903_v59 = vadd.f32 %v1102_v2, %v1062_v0  ;;  %10017 = vst [vmem:[#allocation33_spill] sm:$0xff] %v5914_v11  ;;  %1651 = vmatpush.msra.mxu1 %v481_v6  ;;  %v541_v14 = vld [vmem:[#allocation10 + $0xb58] sm:$0xff] }
 0x186   :  { %v1024_v34 = vadd.f32 %v1023_v39, %v983_v57  ;;  %1309 = vmatmul.f32.gmra.mxu0 %v5905_v29  ;;  %1350 = vmatmul.f32.gmra.mxu1 %v5908_v24  ;;  %10021 = vst [vmem:[#allocation37_spill] sm:$0xff] %v5939_v20  ;;  %v537_v6 = vld [vmem:[#allocation10 + $0xb38] sm:$0xff] }
 0x187   :  { %1391 = vmatmul.f32.gmra.mxu2 %v5911_v26  ;;  %1432 = vmatmul.f32.gmra.mxu3 %v5914_v11  ;;  %v5936_v26 = vld [vmem:[#allocation7 + $0x198] sm:$0xff]  ;;  %10023 = vst [vmem:[#allocation39_spill] sm:$0xff] %v5945_v48 }
 0x188   :  { %1692 = vmatpush.msra.mxu2 %v545_v8 }
 0x18a   :  { %v1064_v22 = vpop.f32.mrf.mxu2  ;;  %v1105_v2 = vpop.f32.mrf.mxu3  ;;  %1693 = vmatpush.msra.mxu2 %v541_v14 }
 0x18b   :  { %v1065_v0 = vadd.f32 %v1064_v22, %v1024_v34  ;;  %v985_v37 = vpop.f32.mrf.mxu0  ;;  %v1026_v39 = vpop.f32.mrf.mxu1  ;;  %v5927_v34 = vld [vmem:[#allocation7 + $0x170] sm:$0xff] }
 0x18c   :  { %v986_v57 = vadd.f32 %v985_v37, %v5811_v35  ;;  %10019 = vst [vmem:[#allocation35_spill] sm:$0xff] %v5927_v34  ;;  %v417_v35 = vld [vmem:[#allocation10 + $0x778] sm:$0xff]  ;;  %1694 = vmatpush.msra.mxu2 %v537_v6 }
 0x18d   :  { %v5919_v15 = vadd.f32 %v1105_v2, %v1065_v0  ;;  %1610 = vmatpush.msra.mxu0 %v417_v35  ;;  %v473_v35 = vld [vmem:[#allocation10 + $0x938] sm:$0xff] }
 0x18e   :  { %v1027_v23 = vadd.f32 %v1026_v39, %v986_v57  ;;  %1312 = vmatmul.f32.gmra.mxu0 %v5921_v62  ;;  %1353 = vmatmul.f32.gmra.mxu1 %v5924_v54  ;;  %v413_v54 = vld [vmem:[#allocation10 + $0x758] sm:$0xff] }
 0x18f   :  { %1394 = vmatmul.f32.gmra.mxu2 %v5927_v34  ;;  %1435 = vmatmul.f32.gmra.mxu3 %v5930_v33  ;;  %v477_v33 = vld [vmem:[#allocation10 + $0x958] sm:$0xff] }
 0x190   :  { %1611 = vmatpush.msra.mxu0 %v413_v54  ;;  %1652 = vmatpush.msra.mxu1 %v477_v33  ;;  %v5953_v54 = vld [vmem:[#allocation7 + $0x30] sm:$0xff]  ;;  %v469_v33 = vld [vmem:[#allocation10 + $0x918] sm:$0xff] }
 0x191   :  { %v529_v6 = vld [vmem:[#allocation10 + $0xaf8] sm:$0xff] }
 0x192   :  { %v1067_v22 = vpop.f32.mrf.mxu2  ;;  %v1108_v2 = vpop.f32.mrf.mxu3  ;;  %1653 = vmatpush.msra.mxu1 %v473_v35  ;;  %v465_v35 = vld [vmem:[#allocation10 + $0x8f8] sm:$0xff] }
 0x193   :  { %v1068_v0 = vadd.f32 %v1067_v22, %v1027_v23  ;;  %v988_v37 = vpop.f32.mrf.mxu0  ;;  %v1029_v39 = vpop.f32.mrf.mxu1  ;;  %v5942_v23 = vld [vmem:[#allocation7 + $0x1a8] sm:$0xff] }
 0x194   :  { %v989_v57 = vadd.f32 %v988_v37, %v5828_v28  ;;  %10022 = vst [vmem:[#allocation38_spill] sm:$0xff] %v5942_v23  ;;  %v409_v28 = vld [vmem:[#allocation10 + $0x738] sm:$0xff]  ;;  %1654 = vmatpush.msra.mxu1 %v469_v33 }
 0x195   :  { %v5934_v34 = vadd.f32 %v1108_v2, %v1068_v0  ;;  %1612 = vmatpush.msra.mxu0 %v409_v28  ;;  %v401_v28 = vld [vmem:[#allocation10 + $0x6f8] sm:$0xff] }
 0x196   :  { %v1030_v11 = vadd.f32 %v1029_v39, %v989_v57  ;;  %1315 = vmatmul.f32.gmra.mxu0 %v5936_v26  ;;  %1356 = vmatmul.f32.gmra.mxu1 %v5939_v20  ;;  %v525_v33 = vld [vmem:[#allocation10 + $0xad8] sm:$0xff] }
 0x197   :  { %1397 = vmatmul.f32.gmra.mxu2 %v5942_v23  ;;  %1438 = vmatmul.f32.gmra.mxu3 %v5945_v48  ;;  %v569_v23 = vld [vmem:[#allocation10 + $0xc38] sm:$0xff] }
 0x198   :  { %v405_v48 = vld [vmem:[#allocation10 + $0x718] sm:$0xff]  ;;  %1743 = vmatpush.msra.mxu3 %v569_v23  ;;  %1655 = vmatpush.msra.mxu1 %v465_v35 }
 0x199   :  { %1613 = vmatpush.msra.mxu0 %v405_v48  ;;  %v461_v23 = vld [vmem:[#allocation10 + $0x8d8] sm:$0xff] }
 0x19a   :  { %v1070_v8 = vpop.f32.mrf.mxu2  ;;  %v1111_v22 = vpop.f32.mrf.mxu3  ;;  %1656 = vmatpush.msra.mxu1 %v461_v23  ;;  %v513_v23 = vld [vmem:[#allocation10 + $0xa78] sm:$0xff] }
 0x19b   :  { %v1071_v2 = vadd.f32 %v1070_v8, %v1030_v11  ;;  %v1131_v0 = vpop.f32.mrf.mxu0  ;;  %v1172_v37 = vpop.f32.mrf.mxu1  ;;  %v533_v11 = vld [vmem:[#allocation10 + $0xb18] sm:$0xff]  ;;  %1614 = vmatpush.msra.mxu0 %v401_v28 }
 0x19c   :  { %v1132_v39 = vadd.f32 %v1131_v0, %v5843_v36  ;;  %v4587_v36 = vld [vmem:[#allocation13] sm:$0xf]  ;;  %1695 = vmatpush.msra.mxu2 %v533_v11  ;;  %v393_v11 = vld [vmem:[#allocation10 + $0x6b8] sm:$0xff] }
 0x19d   :  { %v5949_v57 = vadd.f32 %v1111_v22, %v1071_v2  ;;  %v5960_v14 = vperm.slane %v4587_v36, 2  ;;  %v521_v36 = vld [vmem:[#allocation10 + $0xab8] sm:$0xff] }
 0x19e   :  { %v5951_v20 = vadd.f32 %v1172_v37, %v1132_v39  ;;  %4347 = vmatmul.msk.f32.vlgmr.msrb.gmra.mxu0 %vm584_vm1, %v5953_v54  ;;  %1499 = vmatmul.f32.vlgmr.msrb.gmra.mxu1 %v5709_v49  ;;  %v397_v37 = vld [vmem:[#allocation10 + $0x6d8] sm:$0xff]  ;;  %v5968_v39 = vld [vmem:[#allocation7 + $0x68] sm:$0xff] }
 0x19f   :  { %1540 = vmatmul.f32.vlgmr.msrb.gmra.mxu2 %v5712_v16  ;;  %1581 = vmatmul.f32.vlgmr.msrb.gmra.mxu3 %v5830_v13 }
 0x1a0   :  { %1696 = vmatpush.msra.mxu2 %v529_v6  ;;  %1615 = vmatpush.msra.mxu0 %v397_v37  ;;  %v385_v37 = vld [vmem:[#allocation10 + $0x678] sm:$0xff] }
 0x1a2   :  { %v1213_v8 = vpop.f32.mrf.mxu2  ;;  %v1254_v22 = vpop.f32.mrf.mxu3  ;;  %1697 = vmatpush.msra.mxu2 %v525_v33  ;;  %1616 = vmatpush.msra.mxu0 %v393_v11  ;;  %v565_v33 = vld [vmem:[#allocation10 + $0xc18] sm:$0xff] }
 0x1a3   :  { %v1214_v49 = vadd.f32 %v1213_v8, %v5960_v14  ;;  %v1134_v2 = vpop.f32.mrf.mxu0  ;;  %v1175_v0 = vpop.f32.mrf.mxu1  ;;  %1744 = vmatpush.msra.mxu3 %v565_v33 }
 0x1a4   :  { %v1135_v16 = vadd.f32 %v1134_v2, %v5858_v17  ;;  %v457_v17 = vld [vmem:[#allocation10 + $0x8b8] sm:$0xff]  ;;  %1698 = vmatpush.msra.mxu2 %v521_v36 }
 0x1a5   :  { %v5964_v13 = vadd.f32 %v1254_v22, %v1214_v49  ;;  %1657 = vmatpush.msra.mxu1 %v457_v17  ;;  %v453_v49 = vld [vmem:[#allocation10 + $0x898] sm:$0xff] }
 0x1a6   :  { %v5966_v48 = vadd.f32 %v1175_v0, %v1135_v16  ;;  %4348 = vmatmul.msk.f32.gmra.mxu0 %vm584_vm1, %v5968_v39  ;;  %1502 = vmatmul.f32.gmra.mxu1 %v5723_v47  ;;  %v5981_v0 = vld [vmem:[#allocation7 + $0xa0] sm:$0xff]  ;;  %v517_v16 = vld [vmem:[#allocation10 + $0xa98] sm:$0xff] }
 0x1a7   :  { %1543 = vmatmul.f32.gmra.mxu2 %v5726_v1  ;;  %1584 = vmatmul.f32.gmra.mxu3 %v5845_v25  ;;  %v389_v25 = vld [vmem:[#allocation10 + $0x698] sm:$0xff] }
 0x1a8   :  { %10024 = vst [vmem:[#allocation40_spill] sm:$0xff] %v5966_v48  ;;  %1617 = vmatpush.msra.mxu0 %v389_v25  ;;  %1658 = vmatpush.msra.mxu1 %v453_v49  ;;  %v377_v25 = vld [vmem:[#allocation10 + $0x638] sm:$0xff]  ;;  %v6361_v48 = vld [vmem:[#allocation15 + $0x2c0] sm:$0xff] }
 0x1a9   :  { %1699 = vmatpush.msra.mxu2 %v517_v16  ;;  %v505_v49 = vld [vmem:[#allocation10 + $0xa38] sm:$0xff]  ;;  %10103 = vst [vmem:[#allocation103_spill] sm:$0xff] %v6361_v48 }
 0x1aa   :  { %v1216_v28 = vpop.f32.mrf.mxu2  ;;  %v1257_v35 = vpop.f32.mrf.mxu3  ;;  %1618 = vmatpush.msra.mxu0 %v385_v37 }
 0x1ab   :  { %v1217_v6 = vadd.f32 %v1216_v28, %v5960_v14  ;;  %v1137_v8 = vpop.f32.mrf.mxu0  ;;  %v1178_v22 = vpop.f32.mrf.mxu1  ;;  %1700 = vmatpush.msra.mxu2 %v513_v23 }
 0x1ac   :  { %v1138_v47 = vadd.f32 %v1137_v8, %v5873_v46  ;;  %v449_v46 = vld [vmem:[#allocation10 + $0x878] sm:$0xff] }
 0x1ad   :  { %v5977_v1 = vadd.f32 %v1257_v35, %v1217_v6  ;;  %1659 = vmatpush.msra.mxu1 %v449_v46  ;;  %v381_v35 = vld [vmem:[#allocation10 + $0x658] sm:$0xff] }
 0x1ae   :  { %v5979_v2 = vadd.f32 %v1178_v22, %v1138_v47  ;;  %4349 = vmatmul.msk.f32.gmra.mxu0 %vm584_vm1, %v5981_v0  ;;  %1505 = vmatmul.f32.gmra.mxu1 %v5741_v58  ;;  %v445_v6 = vld [vmem:[#allocation10 + $0x858] sm:$0xff] }
 0x1af   :  { %10025 = vst [vmem:[#allocation41_spill] sm:$0xff] %v5977_v1  ;;  %1546 = vmatmul.f32.gmra.mxu2 %v5744_v51  ;;  %1587 = vmatmul.f32.gmra.mxu3 %v5860_v21  ;;  %v5994_v22 = vld [vmem:[#allocation7 + $0xd8] sm:$0xff]  ;;  %v6357_v1 = vld [vmem:[#allocation15 + $0x2e8] sm:$0xff] }
 0x1b0   :  { %10026 = vst [vmem:[#allocation42_spill] sm:$0xff] %v5979_v2  ;;  %v509_v47 = vld [vmem:[#allocation10 + $0xa58] sm:$0xff]  ;;  %1619 = vmatpush.msra.mxu0 %v381_v35  ;;  %1660 = vmatpush.msra.mxu1 %v445_v6  ;;  %v6323_v2 = vld [vmem:[#allocation15 + $0x360] sm:$0xff] }
 0x1b1   :  { %1701 = vmatpush.msra.mxu2 %v509_v47  ;;  %10102 = vst [vmem:[#allocation102_spill] sm:$0xff] %v6357_v1 }
 0x1b2   :  { %v1219_v11 = vpop.f32.mrf.mxu2  ;;  %v1260_v17 = vpop.f32.mrf.mxu3  ;;  %1620 = vmatpush.msra.mxu0 %v377_v25 }
 0x1b3   :  { %v1220_v36 = vadd.f32 %v1219_v11, %v5960_v14  ;;  %v1140_v58 = vpop.f32.mrf.mxu0  ;;  %v1181_v28 = vpop.f32.mrf.mxu1  ;;  %1702 = vmatpush.msra.mxu2 %v505_v49  ;;  %v437_v11 = vld [vmem:[#allocation10 + $0x818] sm:$0xff]  ;;  %v6021_v49 = vld [vmem:[#allocation12 + $0x1c8] sm:$0xff] }
 0x1b4   :  { %v1141_v51 = vadd.f32 %v1140_v58, %v5888_v31  ;;  %v441_v31 = vld [vmem:[#allocation10 + $0x838] sm:$0xff] }
 0x1b5   :  { %v5990_v21 = vadd.f32 %v1260_v17, %v1220_v36  ;;  %1661 = vmatpush.msra.mxu1 %v441_v31  ;;  %v6007_v36 = vld [vmem:[#allocation7 + $0x110] sm:$0xff]  ;;  %v501_v58 = vld [vmem:[#allocation10 + $0xa18] sm:$0xff]  ;;  %v1858_v31 = vld [vmem:[#allocation12 + $0x1c0] sm:$0xff] }
 0x1b6   :  { %v5992_v8 = vadd.f32 %v1181_v28, %v1141_v51  ;;  %4350 = vmatmul.msk.f32.gmra.mxu0 %vm584_vm1, %v5994_v22  ;;  %1508 = vmatmul.f32.gmra.mxu1 %v5756_v19  ;;  %v1862_v28 = vld [vmem:[#allocation12 + $0x1e0] sm:$0xff]  ;;  %v1864_v51 = vld [vmem:[#allocation12 + $0x1f0] sm:$0xff] }
 0x1b7   :  { %10027 = vst [vmem:[#allocation43_spill] sm:$0xff] %v5990_v21  ;;  %1549 = vmatmul.f32.gmra.mxu2 %v5759_v43  ;;  %1590 = vmatmul.f32.gmra.mxu3 %v5875_v50  ;;  %v373_v50 = vld [vmem:[#allocation10 + $0x618] sm:$0xff] }
 0x1b8   :  { %10028 = vst [vmem:[#allocation44_spill] sm:$0xff] %v5992_v8  ;;  %1621 = vmatpush.msra.mxu0 %v373_v50  ;;  %1662 = vmatpush.msra.mxu1 %v437_v11  ;;  %v6037_v50 = vld [vmem:[#allocation12 + $0x1d8] sm:$0xff] }
 0x1b9   :  { %1703 = vmatpush.msra.mxu2 %v501_v58 }
 0x1ba   :  { %v1222_v16 = vpop.f32.mrf.mxu2  ;;  %v1263_v37 = vpop.f32.mrf.mxu3  ;;  %2003 = vmatpush.msrb.mxu0 %v1862_v28 }
 0x1bb   :  { %v1223_v46 = vadd.f32 %v1222_v16, %v5960_v14  ;;  %v1143_v23 = vpop.f32.mrf.mxu0  ;;  %v1184_v33 = vpop.f32.mrf.mxu1  ;;  %2043 = vmatpush.msrb.mxu2 %v1864_v51 }
 0x1bc   :  { %v1144_v19 = vadd.f32 %v1143_v23, %v5903_v59  ;;  %v6014_v59 = vld [vmem:[#allocation12 + $0x1e8] sm:$0xff]  ;;  %v6030_v23 = vld [vmem:[#allocation12 + $0x1f8] sm:$0xff]  ;;  %2004 = vmatpush.msrb.mxu0 %v1858_v31 }
 0x1bd   :  { %v6003_v43 = vadd.f32 %v1263_v37, %v1223_v46  ;;  %2023 = vmatpush.msrb.mxu1 %v6014_v59  ;;  %v6025_v37 = vld [vmem:[#allocation7 + $0x148] sm:$0xff]  ;;  %v1860_v46 = vld [vmem:[#allocation12 + $0x1d0] sm:$0xff]  ;;  %2063 = vmatpush.msrb.mxu3 %v6030_v23 }
 0x1be   :  { %v6005_v17 = vadd.f32 %v1184_v33, %v1144_v19  ;;  %4351 = vmatmul.msk.f32.gmra.mxu0 %vm584_vm1, %v6007_v36  ;;  %1511 = vmatmul.f32.gmra.mxu1 %v5771_v56  ;;  %v6034_v33 = vld [vmem:[#allocation12 + $0x1a8] sm:$0xff]  ;;  %v1856_v19 = vld [vmem:[#allocation12 + $0x1b0] sm:$0xff] }
 0x1bf   :  { %10029 = vst [vmem:[#allocation45_spill] sm:$0xff] %v6003_v43  ;;  %1552 = vmatmul.f32.gmra.mxu2 %v5774_v30  ;;  %1593 = vmatmul.f32.gmra.mxu3 %v5890_v52  ;;  %v6059_v31 = vld [vmem:[#allocation12 + $0x168] sm:$0xff] }
 0x1c0   :  { %10030 = vst [vmem:[#allocation46_spill] sm:$0xff] %v6005_v17  ;;  %2024 = vmatpush.msrb.mxu1 %v6021_v49  ;;  %2044 = vmatpush.msrb.mxu2 %v1860_v46  ;;  %v1848_v46 = vld [vmem:[#allocation12 + $0x170] sm:$0xff]  ;;  %v1802_v17 = vld [vmem:[#allocation12] sm:$0xff] }
 0x1c1   :  { %2064 = vmatpush.msrb.mxu3 %v6037_v50 }
 0x1c2   :  { %v1225_v35 = vpop.f32.mrf.mxu2  ;;  %v1266_v6 = vpop.f32.mrf.mxu3  ;;  %2025 = vmatpush.msrb.mxu1 %v6034_v33  ;;  %2045 = vmatpush.msrb.mxu2 %v1856_v19 }
 0x1c3   :  { %v1226_v56 = vadd.f32 %v1225_v35, %v5960_v14  ;;  %v1146_v47 = vpop.f32.mrf.mxu0  ;;  %v1187_v25 = vpop.f32.mrf.mxu1  ;;  %v1850_v35 = vld [vmem:[#allocation12 + $0x180] sm:$0xff] }
 0x1c4   :  { %v1147_v30 = vadd.f32 %v1146_v47, %v5919_v15  ;;  %v1854_v15 = vld [vmem:[#allocation12 + $0x1a0] sm:$0xff] }
 0x1c5   :  { %v6019_v52 = vadd.f32 %v1266_v6, %v1226_v56  ;;  %2005 = vmatpush.msrb.mxu0 %v1854_v15  ;;  %v6046_v6 = vld [vmem:[#allocation12 + $0x188] sm:$0xff]  ;;  %v6050_v47 = vld [vmem:[#allocation7 + $0x180] sm:$0xff]  ;;  %v6062_v15 = vld [vmem:[#allocation12 + $0x198] sm:$0xff] }
 0x1c6   :  { %v6023_v16 = vadd.f32 %v1187_v25, %v1147_v30  ;;  %4352 = vmatmul.msk.f32.gmra.mxu0 %vm584_vm1, %v6025_v37  ;;  %1514 = vmatmul.f32.gmra.mxu1 %v5787_v53  ;;  %v1852_v25 = vld [vmem:[#allocation12 + $0x190] sm:$0xff]  ;;  %v6055_v30 = vld [vmem:[#allocation12 + $0x1b8] sm:$0xff] }
 0x1c7   :  { %10031 = vst [vmem:[#allocation47_spill] sm:$0xff] %v6019_v52  ;;  %1555 = vmatmul.f32.gmra.mxu2 %v5790_v60  ;;  %1596 = vmatmul.f32.gmra.mxu3 %v5905_v29  ;;  %v6181_v52 = vld [vmem:[#allocation12 + $0x58] sm:$0xff] }
 0x1c8   :  { %10032 = vst [vmem:[#allocation48_spill] sm:$0xff] %v6023_v16  ;;  %2006 = vmatpush.msrb.mxu0 %v1850_v35  ;;  %2026 = vmatpush.msrb.mxu1 %v6046_v6  ;;  %v6075_v35 = vld [vmem:[#allocation7 + $0x1b8] sm:$0xff]  ;;  %v6178_v16 = vld [vmem:[#allocation12 + $0x28] sm:$0xff] }
 0x1c9   :  { %2046 = vmatpush.msrb.mxu2 %v1852_v25  ;;  %2065 = vmatpush.msrb.mxu3 %v6055_v30  ;;  %v1844_v25 = vld [vmem:[#allocation12 + $0x150] sm:$0xff] }
 0x1ca   :  { %v1228_v53 = vpop.f32.mrf.mxu2  ;;  %v1269_v11 = vpop.f32.mrf.mxu3  ;;  %2027 = vmatpush.msrb.mxu1 %v6059_v31 }
 0x1cb   :  { %v1229_v60 = vadd.f32 %v1228_v53, %v5960_v14  ;;  %v1149_v29 = vpop.f32.mrf.mxu0  ;;  %v1190_v58 = vpop.f32.mrf.mxu1  ;;  %2047 = vmatpush.msrb.mxu2 %v1848_v46  ;;  %2066 = vmatpush.msrb.mxu3 %v6062_v15  ;;  %v6084_v46 = vld [vmem:[#allocation12 + $0x128] sm:$0xff] }
 0x1cc   :  { %v1150_v28 = vadd.f32 %v1149_v29, %v5934_v34  ;;  %v1846_v34 = vld [vmem:[#allocation12 + $0x160] sm:$0xff] }
 0x1cd   :  { %v6044_v51 = vadd.f32 %v1269_v11, %v1229_v60  ;;  %2007 = vmatpush.msrb.mxu0 %v1846_v34  ;;  %v1842_v29 = vld [vmem:[#allocation12 + $0x140] sm:$0xff]  ;;  %v6080_v34 = vld [vmem:[#allocation12 + $0x178] sm:$0xff]  ;;  %2048 = vmatpush.msrb.mxu2 %v1844_v25  ;;  %v6096_v25 = vld [vmem:[#allocation12 + $0x108] sm:$0xff] }
 0x1ce   :  { %v6048_v56 = vadd.f32 %v1190_v58, %v1150_v28  ;;  %4353 = vmatmul.msk.f32.gmra.mxu0 %vm584_vm1, %v6050_v47  ;;  %1517 = vmatmul.f32.gmra.mxu1 %v5802_v9  ;;  %v6071_v58 = vld [vmem:[#allocation12 + $0x148] sm:$0xff] }
 0x1cf   :  { %10033 = vst [vmem:[#allocation49_spill] sm:$0xff] %v6044_v51  ;;  %1558 = vmatmul.f32.gmra.mxu2 %v5805_v55  ;;  %1599 = vmatmul.f32.gmra.mxu3 %v5921_v62  ;;  %v6173_v51 = vld [vmem:[#allocation12 + $0x78] sm:$0xff] }
 0x1d0   :  { %10034 = vst [vmem:[#allocation50_spill] sm:$0xff] %v6048_v56  ;;  %2008 = vmatpush.msrb.mxu0 %v1842_v29  ;;  %2028 = vmatpush.msrb.mxu1 %v6071_v58  ;;  %v1834_v29 = vld [vmem:[#allocation12 + $0x100] sm:$0xff]  ;;  %v6169_v56 = vld [vmem:[#allocation12 + $0x48] sm:$0xff] }
 0x1d1   :  { %2067 = vmatpush.msrb.mxu3 %v6080_v34 }
 0x1d2   :  { %v1231_v9 = vpop.f32.mrf.mxu2  ;;  %v1272_v19 = vpop.f32.mrf.mxu3  ;;  %2029 = vmatpush.msrb.mxu1 %v6084_v46 }
 0x1d3   :  { %v1232_v55 = vadd.f32 %v1231_v9, %v5960_v14  ;;  %v1152_v62 = vpop.f32.mrf.mxu0  ;;  %v1193_v53 = vpop.f32.mrf.mxu1  ;;  %v1840_v9 = vld [vmem:[#allocation12 + $0x130] sm:$0xff] }
 0x1d4   :  { %v1153_v11 = vadd.f32 %v1152_v62, %v5949_v57  ;;  %v1838_v57 = vld [vmem:[#allocation12 + $0x120] sm:$0xff]  ;;  %2049 = vmatpush.msrb.mxu2 %v1840_v9  ;;  %2030 = vmatpush.msrb.mxu1 %v6096_v25  ;;  %v1832_v9 = vld [vmem:[#allocation12 + $0xf0] sm:$0xff] }
 0x1d5   :  { %v6069_v60 = vadd.f32 %v1272_v19, %v1232_v55  ;;  %v6087_v19 = vld [vmem:[#allocation12 + $0x158] sm:$0xff]  ;;  %2009 = vmatpush.msrb.mxu0 %v1838_v57  ;;  %v1836_v57 = vld [vmem:[#allocation12 + $0x110] sm:$0xff] }
 0x1d6   :  { %v6073_v28 = vadd.f32 %v1193_v53, %v1153_v11  ;;  %4354 = vmatmul.msk.f32.gmra.mxu0 %vm584_vm1, %v6075_v35  ;;  %1520 = vmatmul.f32.gmra.mxu1 %v5817_v7 }
 0x1d7   :  { %10035 = vst [vmem:[#allocation51_spill] sm:$0xff] %v6069_v60  ;;  %1561 = vmatmul.f32.gmra.mxu2 %v5820_v10  ;;  %1602 = vmatmul.f32.gmra.mxu3 %v5936_v26  ;;  %v6100_v60 = vld [vmem:[#allocation12 + $0x138] sm:$0xff] }
 0x1d8   :  { %10036 = vst [vmem:[#allocation52_spill] sm:$0xff] %v6073_v28  ;;  %2068 = vmatpush.msrb.mxu3 %v6087_v19  ;;  %2010 = vmatpush.msrb.mxu0 %v1834_v29  ;;  %v6123_v29 = vld [vmem:[#allocation12 + $0xf8] sm:$0xff] }
 0x1d9   :  { %2050 = vmatpush.msrb.mxu2 %v1836_v57  ;;  %v6128_v57 = vld [vmem:[#allocation12 + $0xa8] sm:$0xff] }
 0x1da   :  { %v1234_v7 = vpop.f32.mrf.mxu2  ;;  %v1275_v55 = vpop.f32.mrf.mxu3  ;;  %2069 = vmatpush.msrb.mxu3 %v6100_v60 }
 0x1db   :  { %v1235_v10 = vadd.f32 %v1234_v7, %v5960_v14  ;;  %v1295_v26 = vpop.f32.mrf.mxu0  ;;  %v1336_v62 = vpop.f32.mrf.mxu1  ;;  %v1830_v14 = vld [vmem:[#allocation12 + $0xe0] sm:$0xff]  ;;  %v6108_v7 = vld [vmem:[#allocation12 + $0x118] sm:$0xff]  ;;  %2051 = vmatpush.msrb.mxu2 %v1832_v9 }
 0x1dc   :  { %v1296_v53 = vadd.f32 %v1295_v26, %v5964_v13  ;;  %v6105_v13 = vld [vmem:[#allocation12 + $0xe8] sm:$0xff]  ;;  %2011 = vmatpush.msrb.mxu0 %v1830_v14  ;;  %2070 = vmatpush.msrb.mxu3 %v6108_v7  ;;  %v1826_v26 = vld [vmem:[#allocation12 + $0xc0] sm:$0xff]  ;;  %v1824_v14 = vld [vmem:[#allocation12 + $0xb0] sm:$0xff] }
 0x1dd   :  { %v6094_v11 = vadd.f32 %v1275_v55, %v1235_v10  ;;  %2031 = vmatpush.msrb.mxu1 %v6105_v13  ;;  %v6131_v9 = vld [vmem:[#allocation12 + $0xd8] sm:$0xff] }
 0x1de   :  { %v1337_v28 = vadd.f32 %v1336_v62, %v1296_v53  ;;  %1622 = vmatmul.f32.vlgmr.msra.gmra.mxu0 %v5833_v18  ;;  %1663 = vmatmul.f32.vlgmr.msra.gmra.mxu1 %v5836_v44  ;;  %v6119_v62 = vld [vmem:[#allocation12 + $0xc8] sm:$0xff]  ;;  %v1828_v53 = vld [vmem:[#allocation12 + $0xd0] sm:$0xff] }
 0x1df   :  { %10037 = vst [vmem:[#allocation53_spill] sm:$0xff] %v6094_v11  ;;  %1704 = vmatmul.f32.vlgmr.msra.gmra.mxu2 %v5839_v38  ;;  %4356 = vmatmul.msk.f32.vlgmr.msra.gmra.mxu3 %vm584_vm1, %v5953_v54  ;;  %v6156_v11 = vld [vmem:[#allocation12 + $0x98] sm:$0xff] }
 0x1e0   :  { %2012 = vmatpush.msrb.mxu0 %v1826_v26  ;;  %2032 = vmatpush.msrb.mxu1 %v6119_v62  ;;  %v6148_v26 = vld [vmem:[#allocation12 + $0xb8] sm:$0xff] }
 0x1e1   :  { %2052 = vmatpush.msrb.mxu2 %v1828_v53  ;;  %2071 = vmatpush.msrb.mxu3 %v6123_v29  ;;  %v1814_v53 = vld [vmem:[#allocation12 + $0x60] sm:$0xff] }
 0x1e2   :  { %v1377_v18 = vpop.f32.mrf.mxu2  ;;  %v1418_v44 = vpop.f32.mrf.mxu3  ;;  %2033 = vmatpush.msrb.mxu1 %v6128_v57 }
 0x1e3   :  { %v1378_v38 = vadd.f32 %v1377_v18, %v1337_v28  ;;  %v6112_v55 = vpop.f32.mrf.mxu0  ;;  %v6114_v54 = vpop.f32.mrf.mxu1  ;;  %v1822_v28 = vld [vmem:[#allocation12 + $0xa0] sm:$0xff]  ;;  %2053 = vmatpush.msrb.mxu2 %v1824_v14  ;;  %2072 = vmatpush.msrb.mxu3 %v6131_v9  ;;  %v1816_v14 = vld [vmem:[#allocation12 + $0x70] sm:$0xff] }
 0x1e4   :  { %10038 = vst [vmem:[#allocation54_spill] sm:$0xff] %v6112_v55  ;;  %2013 = vmatpush.msrb.mxu0 %v1822_v28  ;;  %v1818_v18 = vld [vmem:[#allocation12 + $0x80] sm:$0xff]  ;;  %v6153_v28 = vld [vmem:[#allocation12 + $0x68] sm:$0xff] }
 0x1e5   :  { %10039 = vst [vmem:[#allocation55_spill] sm:$0xff] %v6114_v54  ;;  %v6117_v10 = vadd.f32 %v1418_v44, %v1378_v38  ;;  %v6144_v44 = vld [vmem:[#allocation12 + $0x88] sm:$0xff]  ;;  %v1820_v38 = vld [vmem:[#allocation12 + $0x90] sm:$0xff]  ;;  %2073 = vmatpush.msrb.mxu3 %v6148_v26 }
 0x1e6   :  { %1625 = vmatmul.f32.gmra.mxu0 %v5848_v40  ;;  %1666 = vmatmul.f32.gmra.mxu1 %v5851_v32  ;;  %v6355_v55 = vld [vmem:[#allocation15 + $0x2e0] sm:$0xff] }
 0x1e7   :  { %1707 = vmatmul.f32.gmra.mxu2 %v5854_v41  ;;  %4357 = vmatmul.msk.f32.gmra.mxu3 %vm584_vm1, %v5968_v39  ;;  %10101 = vst [vmem:[#allocation101_spill] sm:$0xff] %v6355_v55 }
 0x1e8   :  { %2014 = vmatpush.msrb.mxu0 %v1818_v18  ;;  %2034 = vmatpush.msrb.mxu1 %v6144_v44  ;;  %v1810_v18 = vld [vmem:[#allocation12 + $0x40] sm:$0xff] }
 0x1e9   :  { %2054 = vmatpush.msrb.mxu2 %v1820_v38  ;;  %2074 = vmatpush.msrb.mxu3 %v6156_v11  ;;  %v1812_v38 = vld [vmem:[#allocation12 + $0x50] sm:$0xff] }
 0x1ea   :  { %v6134_v40 = vpop.f32.mrf.mxu2  ;;  %v6136_v32 = vpop.f32.mrf.mxu3  ;;  %2015 = vmatpush.msrb.mxu0 %v1814_v53  ;;  %2035 = vmatpush.msrb.mxu1 %v6153_v28  ;;  %v1806_v53 = vld [vmem:[#allocation12 + $0x20] sm:$0xff] }
 0x1eb   :  { %10040 = vst [vmem:[#allocation56_spill] sm:$0xff] %v6134_v40  ;;  %v6139_v41 = vpop.f32.mrf.mxu0  ;;  %v6141_v39 = vpop.f32.mrf.mxu1  ;;  %2055 = vmatpush.msrb.mxu2 %v1816_v14  ;;  %v1808_v14 = vld [vmem:[#allocation12 + $0x30] sm:$0xff]  ;;  %2075 = vmatpush.msrb.mxu3 %v6173_v51 }
 0x1ec   :  { %10041 = vst [vmem:[#allocation57_spill] sm:$0xff] %v6136_v32  ;;  %2016 = vmatpush.msrb.mxu0 %v1810_v18  ;;  %2036 = vmatpush.msrb.mxu1 %v6169_v56  ;;  %v6194_v18 = vld [vmem:[#allocation12 + $0x38] sm:$0xff] }
 0x1ed   :  { %10042 = vst [vmem:[#allocation58_spill] sm:$0xff] %v6139_v41  ;;  %2056 = vmatpush.msrb.mxu2 %v1812_v38  ;;  %2076 = vmatpush.msrb.mxu3 %v6181_v52  ;;  %v6196_v38 = vld [vmem:[#allocation12 + $0x8] sm:$0xff] }
 0x1ee   :  { %10043 = vst [vmem:[#allocation59_spill] sm:$0xff] %v6141_v39  ;;  %1628 = vmatmul.f32.gmra.mxu0 %v5863_v5  ;;  %1669 = vmatmul.f32.gmra.mxu1 %v5866_v63 }
 0x1ef   :  { %1710 = vmatmul.f32.gmra.mxu2 %v5869_v27  ;;  %4358 = vmatmul.msk.f32.gmra.mxu3 %vm584_vm1, %v5981_v0 }
 0x1f0   :  { %2017 = vmatpush.msrb.mxu0 %v1806_v53  ;;  %2037 = vmatpush.msrb.mxu1 %v6178_v16  ;;  %v1804_v53 = vld [vmem:[#allocation12 + $0x10] sm:$0xff] }
 0x1f1   :  { %2057 = vmatpush.msrb.mxu2 %v1808_v14  ;;  %2077 = vmatpush.msrb.mxu3 %v6194_v18 }
 0x1f2   :  { %v6159_v5 = vpop.f32.mrf.mxu2  ;;  %v6161_v63 = vpop.f32.mrf.mxu3  ;;  %2018 = vmatpush.msrb.mxu0 %v1802_v17  ;;  %2038 = vmatpush.msrb.mxu1 %v6196_v38 }
 0x1f3   :  { %10044 = vst [vmem:[#allocation60_spill] sm:$0xff] %v6159_v5  ;;  %v6164_v27 = vpop.f32.mrf.mxu0  ;;  %v6166_v0 = vpop.f32.mrf.mxu1  ;;  %2058 = vmatpush.msrb.mxu2 %v1804_v53  ;;  %v6297_v5 = vld [vmem:[#allocation15 + $0x3c0] sm:$0xff] }
 0x1f4   :  { %10045 = vst [vmem:[#allocation61_spill] sm:$0xff] %v6161_v63  ;;  %v6291_v63 = vld [vmem:[#allocation15 + $0x3e0] sm:$0xff] }
 0x1f5   :  { %10046 = vst [vmem:[#allocation62_spill] sm:$0xff] %v6164_v27  ;;  %2134 = vmatpush.msra.mxu1 %v6291_v63 }
 0x1f6   :  { %10047 = vst [vmem:[#allocation63_spill] sm:$0xff] %v6166_v0  ;;  %1631 = vmatmul.f32.gmra.mxu0 %v5878_v3  ;;  %1672 = vmatmul.f32.gmra.mxu1 %v5881_v12 }
 0x1f7   :  { %1713 = vmatmul.f32.gmra.mxu2 %v5884_v45  ;;  %4359 = vmatmul.msk.f32.gmra.mxu3 %vm584_vm1, %v5994_v22 }
 0x1f8   :  { %2135 = vmatpush.msra.mxu1 %v6297_v5 }
 0x1fa   :  { %v6184_v3 = vpop.f32.mrf.mxu2  ;;  %v6186_v12 = vpop.f32.mrf.mxu3 }
 0x1fb   :  { %10048 = vst [vmem:[#allocation64_spill] sm:$0xff] %v6184_v3  ;;  %v6189_v45 = vpop.f32.mrf.mxu0  ;;  %v6191_v22 = vpop.f32.mrf.mxu1 }
 0x1fc   :  { %10049 = vst [vmem:[#allocation65_spill] sm:$0xff] %v6186_v12  ;;  %v6201_v12 = vld [vmem:[#allocation12 + $0x18] sm:$0xff] }
 0x1fd   :  { %10050 = vst [vmem:[#allocation66_spill] sm:$0xff] %v6189_v45  ;;  %2078 = vmatpush.msrb.mxu3 %v6201_v12  ;;  %v10057_v45 = vld [vmem:[#allocation33_spill] sm:$0xff] }
 0x1fe   :  { %10051 = vst [vmem:[#allocation67_spill] sm:$0xff] %v6191_v22  ;;  %1634 = vmatmul.f32.gmra.mxu0 %v5893_v61  ;;  %1675 = vmatmul.f32.gmra.mxu1 %v5896_v4 }
 0x1ff   :  { %1716 = vmatmul.f32.gmra.mxu2 %v5899_v42  ;;  %4360 = vmatmul.msk.f32.gmra.mxu3 %vm584_vm1, %v6007_v36  ;;  %v10056_v42 = vld [vmem:[#allocation32_spill] sm:$0xff] }
 0x202   :  { %v6208_v14 = vpop.f32.mrf.mxu2  ;;  %v6210_v22 = vpop.f32.mrf.mxu3 }
 0x203   :  { %10052 = vst [vmem:[#allocation68_spill] sm:$0xff] %v6208_v14  ;;  %v6212_v61 = vpop.f32.mrf.mxu0  ;;  %v6214_v4 = vpop.f32.mrf.mxu1 }
 0x204   :  { %10053 = vst [vmem:[#allocation69_spill] sm:$0xff] %v6210_v22 }
 0x205   :  { %10054 = vst [vmem:[#allocation70_spill] sm:$0xff] %v6212_v61  ;;  %v10062_v61 = vld [vmem:[#allocation34_spill] sm:$0xff] }
 0x206   :  { %10055 = vst [vmem:[#allocation71_spill] sm:$0xff] %v6214_v4  ;;  %1637 = vmatmul.f32.gmra.mxu0 %v5908_v24  ;;  %1678 = vmatmul.f32.gmra.mxu1 %v10056_v42  ;;  %v10063_v4 = vld [vmem:[#allocation35_spill] sm:$0xff]  ;;  %v10064_v24 = vld [vmem:[#allocation36_spill] sm:$0xff] }
 0x207   :  { %1719 = vmatmul.f32.gmra.mxu2 %v10057_v45  ;;  %4361 = vmatmul.msk.f32.gmra.mxu3 %vm584_vm1, %v6025_v37 }
 0x20a   :  { %v6221_v17 = vpop.f32.mrf.mxu2  ;;  %v6223_v36 = vpop.f32.mrf.mxu3 }
 0x20b   :  { %10058 = vst [vmem:[#allocation32_spill] sm:$0xff] %v6221_v17  ;;  %v6225_v53 = vpop.f32.mrf.mxu0  ;;  %v6227_v22 = vpop.f32.mrf.mxu1 }
 0x20c   :  { %10059 = vst [vmem:[#allocation33_spill] sm:$0xff] %v6223_v36 }
 0x20d   :  { %10060 = vst [vmem:[#allocation72_spill] sm:$0xff] %v6225_v53  ;;  %v10069_v53 = vld [vmem:[#allocation37_spill] sm:$0xff] }
 0x20e   :  { %10061 = vst [vmem:[#allocation73_spill] sm:$0xff] %v6227_v22  ;;  %1640 = vmatmul.f32.gmra.mxu0 %v10062_v61  ;;  %1681 = vmatmul.f32.gmra.mxu1 %v10063_v4  ;;  %v10070_v22 = vld [vmem:[#allocation38_spill] sm:$0xff]  ;;  %v10071_v61 = vld [vmem:[#allocation39_spill] sm:$0xff] }
 0x20f   :  { %1722 = vmatmul.f32.gmra.mxu2 %v10064_v24  ;;  %4362 = vmatmul.msk.f32.gmra.mxu3 %vm584_vm1, %v6050_v47 }
 0x212   :  { %v6234_v45 = vpop.f32.mrf.mxu2  ;;  %v6236_v37 = vpop.f32.mrf.mxu3 }
 0x213   :  { %10065 = vst [vmem:[#allocation34_spill] sm:$0xff] %v6234_v45  ;;  %v6238_v42 = vpop.f32.mrf.mxu0  ;;  %v6240_v36 = vpop.f32.mrf.mxu1 }
 0x214   :  { %10066 = vst [vmem:[#allocation35_spill] sm:$0xff] %v6236_v37 }
 0x215   :  { %10067 = vst [vmem:[#allocation36_spill] sm:$0xff] %v6238_v42  ;;  %v9534_v42 = vmov 0.0  }
 0x216   :  { %10068 = vst [vmem:[#allocation74_spill] sm:$0xff] %v6240_v36  ;;  %1643 = vmatmul.f32.gmra.mxu0 %v10069_v53  ;;  %1684 = vmatmul.f32.gmra.mxu1 %v10070_v22 }
 0x217   :  { %1725 = vmatmul.f32.gmra.mxu2 %v10071_v61  ;;  %4363 = vmatmul.msk.f32.gmra.mxu3 %vm584_vm1, %v6075_v35 }
 0x21a   :  { %v6247_v4 = vpop.f32.mrf.mxu2  ;;  %v6249_v47 = vpop.f32.mrf.mxu3 }
 0x21b   :  { %10072 = vst [vmem:[#allocation37_spill] sm:$0xff] %v6247_v4  ;;  %v6251_v24 = vpop.f32.mrf.mxu0  ;;  %v6253_v37 = vpop.f32.mrf.mxu1 }
 0x21c   :  { %10073 = vst [vmem:[#allocation38_spill] sm:$0xff] %v6249_v47 }
 0x21e   :  { %2019 = vmatmul.f32.vlgmr.msrb.gmra.mxu0 %v9534_v42  ;;  %2039 = vmatmul.f32.vlgmr.msrb.gmra.mxu1 %v9534_v42 }
 0x21f   :  { %2059 = vmatmul.f32.vlgmr.msrb.gmra.mxu2 %v9534_v42  ;;  %2079 = vmatmul.f32.vlgmr.msrb.gmra.mxu3 %v9534_v42 }
 0x222   :  { %v6259_v22 = vpop.f32.mrf.mxu2  ;;  %v6261_v35 = vpop.f32.mrf.mxu3 }
 0x223   :  { %v6263_v53 = vpop.f32.mrf.mxu0  ;;  %v6265_v61 = vpop.f32.mrf.mxu1 }
 0x224   :  { %10074 = vst [vmem:[#allocation39_spill] sm:$0xff] %v6263_v53 }
 0x225   :  { %10075 = vst [vmem:[#allocation75_spill] sm:$0xff] %v6265_v61 }
 0x22a   :  { %v6267_v47 = vpop.f32.mrf.mxu2  ;;  %v6269_v4 = vpop.f32.mrf.mxu3 }
 0x22b   :  { %10076 = vst [vmem:[#allocation76_spill] sm:$0xff] %v6267_v47  ;;  %v6271_v36 = vpop.f32.mrf.mxu0  ;;  %v6273_v45 = vpop.f32.mrf.mxu1 }
 0x22c   :  { %10077 = vst [vmem:[#allocation77_spill] sm:$0xff] %v6269_v4  ;;  %v6375_v4 = vld [vmem:[#allocation15 + $0x288] sm:$0xff] }
 0x22d   :  { %10078 = vst [vmem:[#allocation78_spill] sm:$0xff] %v6271_v36  ;;  %v6293_v36 = vld [vmem:[#allocation15 + $0x3e8] sm:$0xff] }
 0x22e   :  { %10079 = vst [vmem:[#allocation79_spill] sm:$0xff] %v6273_v45  ;;  %2174 = vmatpush.msra.mxu3 %v6293_v36  ;;  %v6343_v45 = vld [vmem:[#allocation15 + $0x308] sm:$0xff] }
 0x22f   :  { %10096 = vst [vmem:[#allocation96_spill] sm:$0xff] %v6343_v45 }
 0x230   :  { %10108 = vst [vmem:[#allocation108_spill] sm:$0xff] %v6375_v4 }
 0x232   :  { %v6275_v17 = vpop.f32.mrf.mxu2  ;;  %v6277_v14 = vpop.f32.mrf.mxu3 }
 0x233   :  { %10080 = vst [vmem:[#allocation80_spill] sm:$0xff] %v6275_v17  ;;  %v6279_v42 = vpop.f32.mrf.mxu0  ;;  %v6281_v3 = vpop.f32.mrf.mxu1  ;;  %v6329_v17 = vld [vmem:[#allocation15 + $0x340] sm:$0xff] }
 0x234   :  { %10081 = vst [vmem:[#allocation81_spill] sm:$0xff] %v6277_v14  ;;  %v6325_v14 = vld [vmem:[#allocation15 + $0x368] sm:$0xff] }
 0x235   :  { %10082 = vst [vmem:[#allocation82_spill] sm:$0xff] %v6279_v42  ;;  %v6299_v42 = vld [vmem:[#allocation15 + $0x3c8] sm:$0xff] }
 0x236   :  { %10083 = vst [vmem:[#allocation83_spill] sm:$0xff] %v6281_v3  ;;  %2175 = vmatpush.msra.mxu3 %v6299_v42 }
 0x23a   :  { %v6283_v0 = vpop.f32.mrf.mxu2  ;;  %v6285_v27 = vpop.f32.mrf.mxu3 }
 0x23b   :  { %10084 = vst [vmem:[#allocation84_spill] sm:$0xff] %v6283_v0  ;;  %v6287_v43 = vpop.f32.mrf.mxu0  ;;  %v6289_v8 = vpop.f32.mrf.mxu1  ;;  %v6311_v0 = vld [vmem:[#allocation15 + $0x388] sm:$0xff] }
 0x23c   :  { %10085 = vst [vmem:[#allocation85_spill] sm:$0xff] %v6285_v27  ;;  %v6303_v27 = vld [vmem:[#allocation15 + $0x3a0] sm:$0xff] }
 0x23d   :  { %10086 = vst [vmem:[#allocation86_spill] sm:$0xff] %v6287_v43  ;;  %v6305_v43 = vld [vmem:[#allocation15 + $0x3a8] sm:$0xff]  ;;  %2136 = vmatpush.msra.mxu1 %v6303_v27 }
 0x23e   :  { %10087 = vst [vmem:[#allocation87_spill] sm:$0xff] %v6289_v8  ;;  %2176 = vmatpush.msra.mxu3 %v6305_v43  ;;  %v6309_v8 = vld [vmem:[#allocation15 + $0x380] sm:$0xff] }
 0x23f   :  { %2137 = vmatpush.msra.mxu1 %v6309_v8 }
 0x240   :  { %2177 = vmatpush.msra.mxu3 %v6311_v0 }
 0x241   :  { %2138 = vmatpush.msra.mxu1 %v6323_v2 }
 0x242   :  { %v6313_v3 = vpop.f32.mrf.mxu2  ;;  %v6315_v39 = vpop.f32.mrf.mxu3  ;;  %2178 = vmatpush.msra.mxu3 %v6325_v14 }
 0x243   :  { %10088 = vst [vmem:[#allocation88_spill] sm:$0xff] %v6313_v3  ;;  %v6319_v41 = vpop.f32.mrf.mxu0  ;;  %v6321_v21 = vpop.f32.mrf.mxu1  ;;  %v6331_v3 = vld [vmem:[#allocation15 + $0x348] sm:$0xff]  ;;  %2139 = vmatpush.msra.mxu1 %v6329_v17 }
 0x244   :  { %10089 = vst [vmem:[#allocation89_spill] sm:$0xff] %v6315_v39  ;;  %2179 = vmatpush.msra.mxu3 %v6331_v3  ;;  %v6335_v39 = vld [vmem:[#allocation15 + $0x320] sm:$0xff] }
 0x245   :  { %10090 = vst [vmem:[#allocation90_spill] sm:$0xff] %v6319_v41  ;;  %v6337_v41 = vld [vmem:[#allocation15 + $0x328] sm:$0xff]  ;;  %2140 = vmatpush.msra.mxu1 %v6335_v39 }
 0x246   :  { %10091 = vst [vmem:[#allocation91_spill] sm:$0xff] %v6321_v21  ;;  %2180 = vmatpush.msra.mxu3 %v6337_v41  ;;  %v6341_v21 = vld [vmem:[#allocation15 + $0x300] sm:$0xff] }
 0x247   :  { %10092 = vst [vmem:[#allocation92_spill] sm:$0xff] %v6331_v3  ;;  %2141 = vmatpush.msra.mxu1 %v6341_v21 }
 0x248   :  { %10093 = vst [vmem:[#allocation93_spill] sm:$0xff] %v6335_v39  ;;  %2181 = vmatpush.msra.mxu3 %v6343_v45  ;;  %v6471_v45 = vld [vmem:[#allocation15 + $0x160] sm:$0xff] }
 0x249   :  { %10094 = vst [vmem:[#allocation94_spill] sm:$0xff] %v6337_v41  ;;  %2142 = vmatpush.msra.mxu1 %v6355_v55  ;;  %v6439_v55 = vld [vmem:[#allocation15 + $0x3d8] sm:$0xff] }
 0x24a   :  { %10095 = vst [vmem:[#allocation95_spill] sm:$0xff] %v6341_v21  ;;  %v6345_v53 = vpop.f32.mrf.mxu2  ;;  %v6347_v32 = vpop.f32.mrf.mxu3  ;;  %2182 = vmatpush.msra.mxu3 %v6357_v1  ;;  %v6387_v1 = vld [vmem:[#allocation15 + $0x260] sm:$0xff] }
 0x24b   :  { %10097 = vst [vmem:[#allocation97_spill] sm:$0xff] %v6345_v53  ;;  %v6351_v40 = vpop.f32.mrf.mxu0  ;;  %v6353_v54 = vpop.f32.mrf.mxu1  ;;  %v6363_v53 = vld [vmem:[#allocation15 + $0x2c8] sm:$0xff]  ;;  %2143 = vmatpush.msra.mxu1 %v6361_v48 }
 0x24c   :  { %10098 = vst [vmem:[#allocation98_spill] sm:$0xff] %v6347_v32  ;;  %2183 = vmatpush.msra.mxu3 %v6363_v53  ;;  %v6367_v32 = vld [vmem:[#allocation15 + $0x2a0] sm:$0xff] }
 0x24d   :  { %10099 = vst [vmem:[#allocation99_spill] sm:$0xff] %v6351_v40  ;;  %v6369_v40 = vld [vmem:[#allocation15 + $0x2a8] sm:$0xff]  ;;  %2144 = vmatpush.msra.mxu1 %v6367_v32 }
 0x24e   :  { %10100 = vst [vmem:[#allocation100_spill] sm:$0xff] %v6353_v54  ;;  %2184 = vmatpush.msra.mxu3 %v6369_v40  ;;  %v6373_v54 = vld [vmem:[#allocation15 + $0x280] sm:$0xff] }
 0x24f   :  { %10104 = vst [vmem:[#allocation104_spill] sm:$0xff] %v6363_v53  ;;  %2145 = vmatpush.msra.mxu1 %v6373_v54 }
 0x250   :  { %10105 = vst [vmem:[#allocation105_spill] sm:$0xff] %v6367_v32  ;;  %2185 = vmatpush.msra.mxu3 %v6375_v4  ;;  %v6389_v32 = vld [vmem:[#allocation15 + $0x268] sm:$0xff] }
 0x251   :  { %10106 = vst [vmem:[#allocation106_spill] sm:$0xff] %v6369_v40  ;;  %2146 = vmatpush.msra.mxu1 %v6387_v1  ;;  %v6393_v40 = vld [vmem:[#allocation15 + $0x240] sm:$0xff] }
 0x252   :  { %10107 = vst [vmem:[#allocation107_spill] sm:$0xff] %v6373_v54  ;;  %v6377_v47 = vpop.f32.mrf.mxu2  ;;  %v6379_v61 = vpop.f32.mrf.mxu3  ;;  %2186 = vmatpush.msra.mxu3 %v6389_v32  ;;  %v6419_v54 = vld [vmem:[#allocation15 + $0x3f0] sm:$0xff] }
 0x253   :  { %10109 = vst [vmem:[#allocation109_spill] sm:$0xff] %v6377_v47  ;;  %v6383_v53 = vpop.f32.mrf.mxu0  ;;  %v6385_v48 = vpop.f32.mrf.mxu1  ;;  %v6395_v47 = vld [vmem:[#allocation15 + $0x248] sm:$0xff]  ;;  %2147 = vmatpush.msra.mxu1 %v6393_v40 }
 0x254   :  { %10110 = vst [vmem:[#allocation110_spill] sm:$0xff] %v6379_v61  ;;  %2187 = vmatpush.msra.mxu3 %v6395_v47  ;;  %v6399_v61 = vld [vmem:[#allocation15 + $0x220] sm:$0xff] }
 0x255   :  { %10111 = vst [vmem:[#allocation111_spill] sm:$0xff] %v6383_v53  ;;  %v6401_v53 = vld [vmem:[#allocation15 + $0x228] sm:$0xff]  ;;  %2148 = vmatpush.msra.mxu1 %v6399_v61 }
 0x256   :  { %10112 = vst [vmem:[#allocation112_spill] sm:$0xff] %v6385_v48  ;;  %2188 = vmatpush.msra.mxu3 %v6401_v53  ;;  %v6405_v48 = vld [vmem:[#allocation15 + $0x200] sm:$0xff] }
 0x257   :  { %10113 = vst [vmem:[#allocation113_spill] sm:$0xff] %v6387_v1  ;;  %v6407_v1 = vld [vmem:[#allocation15 + $0x208] sm:$0xff]  ;;  %2149 = vmatpush.msra.mxu1 %v6405_v48 }
 0x258   :  { %10114 = vst [vmem:[#allocation114_spill] sm:$0xff] %v6389_v32  ;;  %2189 = vmatpush.msra.mxu3 %v6407_v1 }
 0x259   :  { %10115 = vst [vmem:[#allocation115_spill] sm:$0xff] %v6393_v40  ;;  %v6417_v40 = vld [vmem:[#allocation15 + $0x1e8] sm:$0xff]  ;;  %2214 = vmatpush.msrb.mxu1 %v6419_v54 }
 0x25a   :  { %10116 = vst [vmem:[#allocation116_spill] sm:$0xff] %v6395_v47  ;;  %v6409_v32 = vpop.f32.mrf.mxu2  ;;  %v6411_v4 = vpop.f32.mrf.mxu3  ;;  %v6415_v47 = vld [vmem:[#allocation15 + $0x1e0] sm:$0xff]  ;;  %2154 = vmatpush.msra.mxu2 %v6417_v40 }
 0x25b   :  { %10117 = vst [vmem:[#allocation117_spill] sm:$0xff] %v6399_v61  ;;  %v6421_v61 = vpop.f32.mrf.mxu0  ;;  %2114 = vmatpush.msra.mxu0 %v6415_v47 }
 0x25c   :  { %10118 = vst [vmem:[#allocation118_spill] sm:$0xff] %v6401_v53  ;;  %v6423_v53 = vpop.f32.mrf.mxu1 }
 0x25d   :  { %10119 = vst [vmem:[#allocation119_spill] sm:$0xff] %v6405_v48  ;;  %v6435_v48 = vld [vmem:[#allocation15 + $0x3d0] sm:$0xff] }
 0x25e   :  { %10120 = vst [vmem:[#allocation120_spill] sm:$0xff] %v6407_v1  ;;  %v6433_v1 = vld [vmem:[#allocation15 + $0x1c8] sm:$0xff]  ;;  %2215 = vmatpush.msrb.mxu1 %v6435_v48 }
 0x25f   :  { %10121 = vst [vmem:[#allocation121_spill] sm:$0xff] %v6409_v32  ;;  %v6427_v32 = vld [vmem:[#allocation15 + $0x3f8] sm:$0xff]  ;;  %2155 = vmatpush.msra.mxu2 %v6433_v1 }
 0x260   :  { %10122 = vst [vmem:[#allocation122_spill] sm:$0xff] %v6411_v4  ;;  %2254 = vmatpush.msrb.mxu3 %v6427_v32  ;;  %v6431_v4 = vld [vmem:[#allocation15 + $0x1c0] sm:$0xff] }
 0x261   :  { %10123 = vst [vmem:[#allocation123_spill] sm:$0xff] %v6415_v47  ;;  %2115 = vmatpush.msra.mxu0 %v6431_v4  ;;  %v6445_v47 = vld [vmem:[#allocation15 + $0x1a8] sm:$0xff] }
 0x262   :  { %10124 = vst [vmem:[#allocation124_spill] sm:$0xff] %v6417_v40  ;;  %2255 = vmatpush.msrb.mxu3 %v6439_v55  ;;  %v6443_v40 = vld [vmem:[#allocation15 + $0x1a0] sm:$0xff]  ;;  %2156 = vmatpush.msra.mxu2 %v6445_v47 }
 0x263   :  { %10125 = vst [vmem:[#allocation125_spill] sm:$0xff] %v6419_v54  ;;  %2116 = vmatpush.msra.mxu0 %v6443_v40  ;;  %v6451_v54 = vld [vmem:[#allocation15 + $0x3b8] sm:$0xff]  ;;  %v6477_v21 = vpop.f32.mrf.mxu0 }
 0x264   :  { %10126 = vst [vmem:[#allocation126_spill] sm:$0xff] %v6427_v32  ;;  %v6447_v32 = vld [vmem:[#allocation15 + $0x3b0] sm:$0xff]  ;;  %2256 = vmatpush.msrb.mxu3 %v6451_v54  ;;  %v6479_v41 = vpop.f32.mrf.mxu1 }
 0x265   :  { %10127 = vst [vmem:[#allocation127_spill] sm:$0xff] %v6431_v4  ;;  %v6453_v4 = vld [vmem:[#allocation15 + $0x180] sm:$0xff]  ;;  %2216 = vmatpush.msrb.mxu1 %v6447_v32 }
 0x266   :  { %10128 = vst [vmem:[#allocation128_spill] sm:$0xff] %v6433_v1  ;;  %v6455_v1 = vld [vmem:[#allocation15 + $0x188] sm:$0xff]  ;;  %2117 = vmatpush.msra.mxu0 %v6453_v4 }
 0x267   :  { %10129 = vst [vmem:[#allocation129_spill] sm:$0xff] %v6435_v48  ;;  %v6461_v48 = vld [vmem:[#allocation15 + $0x398] sm:$0xff]  ;;  %2157 = vmatpush.msra.mxu2 %v6455_v1 }
 0x268   :  { %10130 = vst [vmem:[#allocation130_spill] sm:$0xff] %v6439_v55  ;;  %v6459_v55 = vld [vmem:[#allocation15 + $0x390] sm:$0xff]  ;;  %2257 = vmatpush.msrb.mxu3 %v6461_v48  ;;  %2118 = vmatpush.msra.mxu0 %v6471_v45 }
 0x269   :  { %10131 = vst [vmem:[#allocation131_spill] sm:$0xff] %v6443_v40  ;;  %v6465_v40 = vpop.f32.mrf.mxu2  ;;  %2217 = vmatpush.msrb.mxu1 %v6459_v55 }
 0x26a   :  { %10132 = vst [vmem:[#allocation132_spill] sm:$0xff] %v6445_v47  ;;  %v6467_v47 = vpop.f32.mrf.mxu3 }
 0x26b   :  { %10133 = vst [vmem:[#allocation133_spill] sm:$0xff] %v6447_v32  ;;  %v6473_v32 = vld [vmem:[#allocation15 + $0x168] sm:$0xff]  ;;  %v6533_v39 = vpop.f32.mrf.mxu0 }
 0x26c   :  { %10134 = vst [vmem:[#allocation134_spill] sm:$0xff] %v6451_v54  ;;  %v6475_v54 = vld [vmem:[#allocation15 + $0x370] sm:$0xff]  ;;  %2158 = vmatpush.msra.mxu2 %v6473_v32  ;;  %v6535_v3 = vpop.f32.mrf.mxu1 }
 0x26d   :  { %10135 = vst [vmem:[#allocation135_spill] sm:$0xff] %v6453_v4  ;;  %2218 = vmatpush.msrb.mxu1 %v6475_v54  ;;  %v6487_v4 = vld [vmem:[#allocation15 + $0x140] sm:$0xff] }
 0x26e   :  { %10136 = vst [vmem:[#allocation136_spill] sm:$0xff] %v6455_v1  ;;  %v6483_v1 = vld [vmem:[#allocation15 + $0x378] sm:$0xff]  ;;  %2119 = vmatpush.msra.mxu0 %v6487_v4 }
 0x26f   :  { %10137 = vst [vmem:[#allocation137_spill] sm:$0xff] %v6459_v55  ;;  %2258 = vmatpush.msrb.mxu3 %v6483_v1  ;;  %v6491_v55 = vld [vmem:[#allocation15 + $0x350] sm:$0xff] }
 0x270   :  { %10138 = vst [vmem:[#allocation138_spill] sm:$0xff] %v6461_v48  ;;  %v6489_v48 = vld [vmem:[#allocation15 + $0x148] sm:$0xff]  ;;  %2219 = vmatpush.msrb.mxu1 %v6491_v55 }
 0x271   :  { %10139 = vst [vmem:[#allocation139_spill] sm:$0xff] %v6471_v45  ;;  %2159 = vmatpush.msra.mxu2 %v6489_v48  ;;  %v6503_v45 = vld [vmem:[#allocation15 + $0x330] sm:$0xff] }
 0x272   :  { %10140 = vst [vmem:[#allocation140_spill] sm:$0xff] %v6473_v32  ;;  %v6501_v32 = vld [vmem:[#allocation15 + $0x128] sm:$0xff]  ;;  %2220 = vmatpush.msrb.mxu1 %v6503_v45 }
 0x273   :  { %10141 = vst [vmem:[#allocation141_spill] sm:$0xff] %v6475_v54  ;;  %2160 = vmatpush.msra.mxu2 %v6501_v32  ;;  %v6527_v54 = vld [vmem:[#allocation15 + $0xe0] sm:$0xff] }
 0x274   :  { %10142 = vst [vmem:[#allocation142_spill] sm:$0xff] %v6477_v21  ;;  %v6499_v21 = vld [vmem:[#allocation15 + $0x120] sm:$0xff] }
 0x275   :  { %10143 = vst [vmem:[#allocation143_spill] sm:$0xff] %v6479_v41  ;;  %v6495_v41 = vld [vmem:[#allocation15 + $0x358] sm:$0xff]  ;;  %2120 = vmatpush.msra.mxu0 %v6499_v21 }
 0x276   :  { %10144 = vst [vmem:[#allocation144_spill] sm:$0xff] %v6483_v1  ;;  %2259 = vmatpush.msrb.mxu3 %v6495_v41  ;;  %v6507_v1 = vld [vmem:[#allocation15 + $0x338] sm:$0xff] }
 0x277   :  { %10145 = vst [vmem:[#allocation145_spill] sm:$0xff] %v6487_v4  ;;  %v6509_v4 = vld [vmem:[#allocation15 + $0x100] sm:$0xff] }
 0x278   :  { %10146 = vst [vmem:[#allocation146_spill] sm:$0xff] %v6489_v48  ;;  %v6511_v48 = vld [vmem:[#allocation15 + $0x108] sm:$0xff]  ;;  %2260 = vmatpush.msrb.mxu3 %v6507_v1  ;;  %2121 = vmatpush.msra.mxu0 %v6509_v4 }
 0x279   :  { %10147 = vst [vmem:[#allocation147_spill] sm:$0xff] %v6491_v55  ;;  %v6517_v55 = vld [vmem:[#allocation15 + $0x318] sm:$0xff]  ;;  %2161 = vmatpush.msra.mxu2 %v6511_v48 }
 0x27a   :  { %10148 = vst [vmem:[#allocation148_spill] sm:$0xff] %v6495_v41  ;;  %v6515_v41 = vld [vmem:[#allocation15 + $0x310] sm:$0xff]  ;;  %2261 = vmatpush.msrb.mxu3 %v6517_v55  ;;  %2122 = vmatpush.msra.mxu0 %v6527_v54 }
 0x27b   :  { %10149 = vst [vmem:[#allocation149_spill] sm:$0xff] %v6499_v21  ;;  %v6521_v21 = vpop.f32.mrf.mxu2  ;;  %2221 = vmatpush.msrb.mxu1 %v6515_v41 }
 0x27c   :  { %10150 = vst [vmem:[#allocation150_spill] sm:$0xff] %v6501_v32  ;;  %v6523_v32 = vpop.f32.mrf.mxu3 }
 0x27d   :  { %10151 = vst [vmem:[#allocation151_spill] sm:$0xff] %v6503_v45  ;;  %v6529_v45 = vld [vmem:[#allocation15 + $0xe8] sm:$0xff] }
 0x27e   :  { %10152 = vst [vmem:[#allocation152_spill] sm:$0xff] %v6507_v1  ;;  %v6531_v1 = vld [vmem:[#allocation15 + $0x2f0] sm:$0xff]  ;;  %2162 = vmatpush.msra.mxu2 %v6529_v45 }
 0x27f   :  { %10153 = vst [vmem:[#allocation153_spill] sm:$0xff] %v6509_v4  ;;  %2222 = vmatpush.msrb.mxu1 %v6531_v1  ;;  %v6547_v4 = vld [vmem:[#allocation15 + $0x2d0] sm:$0xff] }
 0x280   :  { %10154 = vst [vmem:[#allocation154_spill] sm:$0xff] %v6511_v48  ;;  %v6545_v48 = vld [vmem:[#allocation15 + $0xc8] sm:$0xff] }
 0x281   :  { %10155 = vst [vmem:[#allocation155_spill] sm:$0xff] %v6515_v41  ;;  %2163 = vmatpush.msra.mxu2 %v6545_v48  ;;  %2223 = vmatpush.msrb.mxu1 %v6547_v4  ;;  %v6591_v41 = vpop.f32.mrf.mxu1 }
 0x282   :  { %10156 = vst [vmem:[#allocation156_spill] sm:$0xff] %v6517_v55  ;;  %v6589_v55 = vpop.f32.mrf.mxu0 }
 0x283   :  { %10157 = vst [vmem:[#allocation157_spill] sm:$0xff] %v6521_v21  ;;  %v6539_v21 = vld [vmem:[#allocation15 + $0x2f8] sm:$0xff] }
 0x284   :  { %10158 = vst [vmem:[#allocation158_spill] sm:$0xff] %v6523_v32  ;;  %2262 = vmatpush.msrb.mxu3 %v6539_v21  ;;  %v6543_v32 = vld [vmem:[#allocation15 + $0xc0] sm:$0xff] }
 0x285   :  { %10159 = vst [vmem:[#allocation159_spill] sm:$0xff] %v6527_v54  ;;  %2123 = vmatpush.msra.mxu0 %v6543_v32  ;;  %v6559_v54 = vld [vmem:[#allocation15 + $0x2b0] sm:$0xff] }
 0x286   :  { %10160 = vst [vmem:[#allocation160_spill] sm:$0xff] %v6529_v45  ;;  %v6557_v45 = vld [vmem:[#allocation15 + $0xa8] sm:$0xff]  ;;  %2224 = vmatpush.msrb.mxu1 %v6559_v54 }
 0x287   :  { %10161 = vst [vmem:[#allocation161_spill] sm:$0xff] %v6531_v1  ;;  %2164 = vmatpush.msra.mxu2 %v6557_v45  ;;  %v6583_v1 = vld [vmem:[#allocation15 + $0x60] sm:$0xff] }
 0x288   :  { %10162 = vst [vmem:[#allocation162_spill] sm:$0xff] %v6533_v39  ;;  %v6555_v39 = vld [vmem:[#allocation15 + $0xa0] sm:$0xff] }
 0x289   :  { %10163 = vst [vmem:[#allocation163_spill] sm:$0xff] %v6535_v3  ;;  %v6551_v3 = vld [vmem:[#allocation15 + $0x2d8] sm:$0xff]  ;;  %2124 = vmatpush.msra.mxu0 %v6555_v39 }
 0x28a   :  { %10164 = vst [vmem:[#allocation164_spill] sm:$0xff] %v6539_v21  ;;  %2263 = vmatpush.msrb.mxu3 %v6551_v3  ;;  %v6563_v21 = vld [vmem:[#allocation15 + $0x2b8] sm:$0xff] }
 0x28b   :  { %10165 = vst [vmem:[#allocation165_spill] sm:$0xff] %v6543_v32  ;;  %v6565_v32 = vld [vmem:[#allocation15 + $0x80] sm:$0xff] }
 0x28c   :  { %10166 = vst [vmem:[#allocation166_spill] sm:$0xff] %v6545_v48  ;;  %v6567_v48 = vld [vmem:[#allocation15 + $0x88] sm:$0xff]  ;;  %2264 = vmatpush.msrb.mxu3 %v6563_v21  ;;  %2125 = vmatpush.msra.mxu0 %v6565_v32 }
 0x28d   :  { %10167 = vst [vmem:[#allocation167_spill] sm:$0xff] %v6547_v4  ;;  %v6573_v4 = vld [vmem:[#allocation15 + $0x298] sm:$0xff]  ;;  %2165 = vmatpush.msra.mxu2 %v6567_v48 }
 0x28e   :  { %10168 = vst [vmem:[#allocation168_spill] sm:$0xff] %v6551_v3  ;;  %v6571_v3 = vld [vmem:[#allocation15 + $0x290] sm:$0xff]  ;;  %2265 = vmatpush.msrb.mxu3 %v6573_v4  ;;  %2126 = vmatpush.msra.mxu0 %v6583_v1 }
 0x28f   :  { %10169 = vst [vmem:[#allocation169_spill] sm:$0xff] %v6555_v39  ;;  %v6577_v39 = vpop.f32.mrf.mxu2  ;;  %2225 = vmatpush.msrb.mxu1 %v6571_v3 }
 0x290   :  { %10170 = vst [vmem:[#allocation170_spill] sm:$0xff] %v6557_v45  ;;  %v6579_v45 = vpop.f32.mrf.mxu3 }
 0x291   :  { %10171 = vst [vmem:[#allocation171_spill] sm:$0xff] %v6559_v54  ;;  %v6585_v54 = vld [vmem:[#allocation15 + $0x68] sm:$0xff] }
 0x292   :  { %10172 = vst [vmem:[#allocation172_spill] sm:$0xff] %v6563_v21  ;;  %v6587_v21 = vld [vmem:[#allocation15 + $0x270] sm:$0xff]  ;;  %2166 = vmatpush.msra.mxu2 %v6585_v54 }
 0x293   :  { %10173 = vst [vmem:[#allocation173_spill] sm:$0xff] %v6565_v32  ;;  %2226 = vmatpush.msrb.mxu1 %v6587_v21  ;;  %v6603_v32 = vld [vmem:[#allocation15 + $0x250] sm:$0xff] }
 0x294   :  { %10174 = vst [vmem:[#allocation174_spill] sm:$0xff] %v6567_v48  ;;  %v6601_v48 = vld [vmem:[#allocation15 + $0x48] sm:$0xff] }
 0x295   :  { %10175 = vst [vmem:[#allocation175_spill] sm:$0xff] %v6571_v3  ;;  %2167 = vmatpush.msra.mxu2 %v6601_v48  ;;  %2227 = vmatpush.msrb.mxu1 %v6603_v32  ;;  %v10199_v3 = vmov 0.0  }
 0x296   :  { %10176 = vst [vmem:[#allocation176_spill] sm:$0xff] %v6573_v4  ;;  %2150 = vmatmul.f32.vlgmr.msra.gmra.mxu1 %v10199_v3  ;;  %2190 = vmatmul.f32.vlgmr.msra.gmra.mxu3 %v10199_v3 }
 0x297   :  { %10177 = vst [vmem:[#allocation177_spill] sm:$0xff] %v6577_v39  ;;  %v6595_v39 = vld [vmem:[#allocation15 + $0x278] sm:$0xff] }
 0x298   :  { %10178 = vst [vmem:[#allocation178_spill] sm:$0xff] %v6579_v45  ;;  %2266 = vmatpush.msrb.mxu3 %v6595_v39  ;;  %v6599_v45 = vld [vmem:[#allocation15 + $0x40] sm:$0xff]  ;;  %v6639_v4 = vpop.f32.mrf.mxu3 }
 0x299   :  { %10179 = vst [vmem:[#allocation179_spill] sm:$0xff] %v6583_v1  ;;  %2127 = vmatpush.msra.mxu0 %v6599_v45  ;;  %v6615_v1 = vld [vmem:[#allocation15 + $0x230] sm:$0xff] }
 0x29a   :  { %10180 = vst [vmem:[#allocation180_spill] sm:$0xff] %v6585_v54  ;;  %v6613_v54 = vld [vmem:[#allocation15 + $0x28] sm:$0xff]  ;;  %2228 = vmatpush.msrb.mxu1 %v6615_v1 }
 0x29b   :  { %10181 = vst [vmem:[#allocation181_spill] sm:$0xff] %v6587_v21  ;;  %2168 = vmatpush.msra.mxu2 %v6613_v54  ;;  %v6637_v21 = vpop.f32.mrf.mxu2 }
 0x29c   :  { %10182 = vst [vmem:[#allocation182_spill] sm:$0xff] %v6589_v55  ;;  %v6611_v55 = vld [vmem:[#allocation15 + $0x20] sm:$0xff] }
 0x29d   :  { %10183 = vst [vmem:[#allocation183_spill] sm:$0xff] %v6591_v41  ;;  %v6607_v41 = vld [vmem:[#allocation15 + $0x258] sm:$0xff]  ;;  %2128 = vmatpush.msra.mxu0 %v6611_v55 }
 0x29e   :  { %10184 = vst [vmem:[#allocation184_spill] sm:$0xff] %v6595_v39  ;;  %2267 = vmatpush.msrb.mxu3 %v6607_v41  ;;  %v6619_v39 = vld [vmem:[#allocation15 + $0x238] sm:$0xff] }
 0x29f   :  { %10185 = vst [vmem:[#allocation185_spill] sm:$0xff] %v6599_v45  ;;  %v6621_v45 = vld [vmem:[#allocation15] sm:$0xff] }
 0x2a0   :  { %10186 = vst [vmem:[#allocation186_spill] sm:$0xff] %v6601_v48  ;;  %v6623_v48 = vld [vmem:[#allocation15 + $0x8] sm:$0xff]  ;;  %2268 = vmatpush.msrb.mxu3 %v6619_v39  ;;  %2129 = vmatpush.msra.mxu0 %v6621_v45 }
 0x2a1   :  { %10187 = vst [vmem:[#allocation187_spill] sm:$0xff] %v6603_v32  ;;  %v6629_v32 = vld [vmem:[#allocation15 + $0x218] sm:$0xff]  ;;  %2169 = vmatpush.msra.mxu2 %v6623_v48 }
 0x2a2   :  { %10188 = vst [vmem:[#allocation188_spill] sm:$0xff] %v6607_v41  ;;  %v6627_v41 = vld [vmem:[#allocation15 + $0x210] sm:$0xff]  ;;  %2269 = vmatpush.msrb.mxu3 %v6629_v32 }
 0x2a3   :  { %10189 = vst [vmem:[#allocation189_spill] sm:$0xff] %v6611_v55  ;;  %v6633_v55 = vld [vmem:[#allocation15 + $0x1f0] sm:$0xff]  ;;  %2229 = vmatpush.msrb.mxu1 %v6627_v41  ;;  %2270 = vmatmul.f32.vlgmr.msrb.gmra.mxu3 %v10199_v3 }
 0x2a4   :  { %10190 = vst [vmem:[#allocation190_spill] sm:$0xff] %v6613_v54  ;;  %v6635_v54 = vld [vmem:[#allocation15 + $0x1f8] sm:$0xff]  ;;  %2194 = vmatpush.msrb.mxu0 %v6633_v55  ;;  %2358 = vmatpush.msra.mxu3 %v6030_v23 }
 0x2a5   :  { %10191 = vst [vmem:[#allocation191_spill] sm:$0xff] %v6615_v1  ;;  %v6645_v1 = vpop.f32.mrf.mxu1  ;;  %2234 = vmatpush.msrb.mxu2 %v6635_v54  ;;  %2318 = vmatpush.msra.mxu1 %v6014_v59  ;;  %v6673_v59 = vld [vmem:[#allocation15 + $0x170] sm:$0xff]  ;;  %v6675_v23 = vld [vmem:[#allocation15 + $0x178] sm:$0xff] }
 0x2a6   :  { %10192 = vst [vmem:[#allocation192_spill] sm:$0xff] %v6619_v39  ;;  %v6643_v39 = vpop.f32.mrf.mxu0  ;;  %2359 = vmatpush.msra.mxu3 %v6037_v50  ;;  %2230 = vmatmul.f32.vlgmr.msrb.gmra.mxu1 %v10199_v3 }
 0x2a7   :  { %10193 = vst [vmem:[#allocation193_spill] sm:$0xff] %v6621_v45  ;;  %v6651_v45 = vld [vmem:[#allocation15 + $0x1d8] sm:$0xff]  ;;  %2319 = vmatpush.msra.mxu1 %v6021_v49  ;;  %v6679_v49 = vpop.f32.mrf.mxu3 }
 0x2a8   :  { %10194 = vst [vmem:[#allocation194_spill] sm:$0xff] %v6623_v48  ;;  %v6649_v48 = vld [vmem:[#allocation15 + $0x1d0] sm:$0xff]  ;;  %2235 = vmatpush.msrb.mxu2 %v6651_v45  ;;  %2360 = vmatpush.msra.mxu3 %v6055_v30  ;;  %v6691_v30 = vld [vmem:[#allocation15 + $0x158] sm:$0xff] }
 0x2a9   :  { %10195 = vst [vmem:[#allocation195_spill] sm:$0xff] %v6637_v21  ;;  %2195 = vmatpush.msrb.mxu0 %v6649_v48  ;;  %v6667_v21 = vld [vmem:[#allocation15 + $0x198] sm:$0xff]  ;;  %2320 = vmatpush.msra.mxu1 %v6034_v33  ;;  %v6689_v33 = vld [vmem:[#allocation15 + $0x150] sm:$0xff] }
 0x2aa   :  { %10196 = vst [vmem:[#allocation196_spill] sm:$0xff] %v6639_v4  ;;  %v6657_v4 = vld [vmem:[#allocation15 + $0x1b0] sm:$0xff]  ;;  %2361 = vmatpush.msra.mxu3 %v6062_v15  ;;  %v6707_v15 = vld [vmem:[#allocation15 + $0x118] sm:$0xff] }
 0x2ab   :  { %10197 = vst [vmem:[#allocation197_spill] sm:$0xff] %v6643_v39  ;;  %v6659_v39 = vld [vmem:[#allocation15 + $0x1b8] sm:$0xff]  ;;  %2196 = vmatpush.msrb.mxu0 %v6657_v4  ;;  %2321 = vmatpush.msra.mxu1 %v6046_v6  ;;  %v6705_v6 = vld [vmem:[#allocation15 + $0x110] sm:$0xff] }
 0x2ac   :  { %10198 = vst [vmem:[#allocation198_spill] sm:$0xff] %v6645_v1  ;;  %v6665_v1 = vld [vmem:[#allocation15 + $0x190] sm:$0xff]  ;;  %2236 = vmatpush.msrb.mxu2 %v6659_v39  ;;  %2362 = vmatpush.msra.mxu3 %v6080_v34  ;;  %v6715_v34 = vld [vmem:[#allocation15 + $0xf8] sm:$0xff] }
 0x2ad   :  { %10200 = vst [vmem:[#allocation199_spill] sm:$0xff] %v6651_v45  ;;  %v6677_v45 = vpop.f32.mrf.mxu2  ;;  %2197 = vmatpush.msrb.mxu0 %v6665_v1  ;;  %2322 = vmatpush.msra.mxu1 %v6059_v31  ;;  %v6713_v31 = vld [vmem:[#allocation15 + $0xf0] sm:$0xff] }
 0x2ae   :  { %10201 = vst [vmem:[#allocation200_spill] sm:$0xff] %v6657_v4  ;;  %2237 = vmatpush.msrb.mxu2 %v6667_v21  ;;  %v6683_v50 = vpop.f32.mrf.mxu0  ;;  %v6685_v4 = vpop.f32.mrf.mxu1  ;;  %2363 = vmatpush.msra.mxu3 %v6087_v19  ;;  %v4595_v19 = vld [vmem:[#allocation13] sm:$0xf] }
 0x2af   :  { %10202 = vst [vmem:[#allocation201_spill] sm:$0xff] %v6677_v45  ;;  %2198 = vmatpush.msrb.mxu0 %v6673_v59  ;;  %2323 = vmatpush.msra.mxu1 %v6071_v58  ;;  %v6719_v58 = vpop.f32.mrf.mxu3  ;;  %v6723_v45 = vperm.slane %v4595_v19, 3  ;;  %v6739_v19 = vld [vmem:[#allocation15 + $0xb0] sm:$0xff] }
 0x2b0   :  { %10203 = vst [vmem:[#allocation202_spill] sm:$0xff] %v6679_v49  ;;  %2238 = vmatpush.msrb.mxu2 %v6675_v23  ;;  %v6697_v49 = vld [vmem:[#allocation15 + $0x130] sm:$0xff]  ;;  %2364 = vmatpush.msra.mxu3 %v6100_v60 }
 0x2b1   :  { %10204 = vst [vmem:[#allocation203_spill] sm:$0xff] %v6683_v50  ;;  %v6699_v50 = vld [vmem:[#allocation15 + $0x138] sm:$0xff]  ;;  %2199 = vmatpush.msrb.mxu0 %v6689_v33  ;;  %2324 = vmatpush.msra.mxu1 %v6084_v46  ;;  %v6731_v60 = vld [vmem:[#allocation15 + $0xd0] sm:$0xff] }
 0x2b2   :  { %10205 = vst [vmem:[#allocation204_spill] sm:$0xff] %v6685_v4  ;;  %2239 = vmatpush.msrb.mxu2 %v6691_v30  ;;  %2365 = vmatpush.msra.mxu3 %v6108_v7  ;;  %v6749_v7 = vld [vmem:[#allocation15 + $0x90] sm:$0xff] }
 0x2b3   :  { %10206 = vst [vmem:[#allocation205_spill] sm:$0xff] %v6699_v50  ;;  %2200 = vmatpush.msrb.mxu0 %v6697_v49  ;;  %2325 = vmatpush.msra.mxu1 %v6096_v25  ;;  %v1501_v25 = vadd.f32 %v6253_v37, %v6723_v45 }
 0x2b4   :  { %2240 = vmatpush.msrb.mxu2 %v6699_v50  ;;  %10208 = vst [vmem:[#allocation207_spill] sm:$0xff] %v6719_v58  ;;  %2366 = vmatpush.msra.mxu3 %v6123_v29 }
 0x2b5   :  { %v6717_v4 = vpop.f32.mrf.mxu2  ;;  %2201 = vmatpush.msrb.mxu0 %v6705_v6  ;;  %10209 = vst [vmem:[#allocation208_spill] sm:$0xff] %v6723_v45  ;;  %2326 = vmatpush.msra.mxu1 %v6105_v13  ;;  %v6751_v13 = vld [vmem:[#allocation15 + $0x98] sm:$0xff]  ;;  %v1542_v29 = vadd.f32 %v6259_v22, %v1501_v25 }
 0x2b6   :  { %10207 = vst [vmem:[#allocation206_spill] sm:$0xff] %v6717_v4  ;;  %2241 = vmatpush.msrb.mxu2 %v6707_v15  ;;  %v6725_v50 = vpop.f32.mrf.mxu0  ;;  %v6727_v46 = vpop.f32.mrf.mxu1  ;;  %v6733_v4 = vld [vmem:[#allocation15 + $0xd8] sm:$0xff]  ;;  %2367 = vmatpush.msra.mxu3 %v6131_v9 }
 0x2b7   :  { %10210 = vst [vmem:[#allocation209_spill] sm:$0xff] %v6725_v50  ;;  %2202 = vmatpush.msrb.mxu0 %v6713_v31  ;;  %v6741_v50 = vld [vmem:[#allocation15 + $0xb8] sm:$0xff]  ;;  %2327 = vmatpush.msra.mxu1 %v6119_v62  ;;  %v6760_v37 = vpop.f32.mrf.mxu3  ;;  %v6764_v62 = vld [vmem:[#allocation15 + $0x70] sm:$0xff]  ;;  %v1583_v22 = vadd.f32 %v6261_v35, %v1542_v29 }
 0x2b8   :  { %10211 = vst [vmem:[#allocation210_spill] sm:$0xff] %v6727_v46  ;;  %2242 = vmatpush.msrb.mxu2 %v6715_v34  ;;  %2368 = vmatpush.msra.mxu3 %v6148_v26  ;;  %v6766_v9 = vld [vmem:[#allocation15 + $0x78] sm:$0xff]  ;;  %v6794_v35 = vld [vmem:[#allocation15 + $0x10] sm:$0xff] }
 0x2b9   :  { %2203 = vmatpush.msrb.mxu0 %v6731_v60  ;;  %2328 = vmatpush.msra.mxu1 %v6128_v57  ;;  %10213 = vst [vmem:[#allocation212_spill] sm:$0xff] %v6760_v37  ;;  %v6776_v57 = vld [vmem:[#allocation15 + $0x50] sm:$0xff]  ;;  %v6778_v26 = vld [vmem:[#allocation15 + $0x58] sm:$0xff]  ;;  %v1624_v3 = vadd.f32 %v6421_v61, %v1583_v22 }
 0x2ba   :  { %2243 = vmatpush.msrb.mxu2 %v6733_v4  ;;  %2369 = vmatpush.msra.mxu3 %v6156_v11  ;;  %v6787_v11 = vld [vmem:[#allocation15 + $0x38] sm:$0xff]  ;;  %v10218_v29 = vld [vmem:[#allocation25_spill] sm:$0xff] }
 0x2bb   :  { %2204 = vmatpush.msrb.mxu0 %v6739_v19  ;;  %2329 = vmatpush.msra.mxu1 %v6144_v44  ;;  %v6785_v44 = vld [vmem:[#allocation15 + $0x30] sm:$0xff]  ;;  %v6796_v25 = vld [vmem:[#allocation15 + $0x18] sm:$0xff] }
 0x2bc   :  { %2244 = vmatpush.msrb.mxu2 %v6741_v50  ;;  %2370 = vmatpush.msra.mxu3 %v6173_v51  ;;  %v6952_v37 = vld [vmem:[#allocation12 + $0x70] sm:$0xff] }
 0x2bd   :  { %v6758_v46 = vpop.f32.mrf.mxu2  ;;  %2205 = vmatpush.msrb.mxu0 %v6749_v7  ;;  %2330 = vmatpush.msra.mxu1 %v6153_v28 }
 0x2be   :  { %10212 = vst [vmem:[#allocation211_spill] sm:$0xff] %v6758_v46  ;;  %2245 = vmatpush.msrb.mxu2 %v6751_v13  ;;  %v6768_v58 = vpop.f32.mrf.mxu0  ;;  %v6770_v45 = vpop.f32.mrf.mxu1  ;;  %2371 = vmatpush.msra.mxu3 %v6181_v52  ;;  %v6956_v46 = vld [vmem:[#allocation12 + $0x40] sm:$0xff] }
 0x2bf   :  { %10214 = vst [vmem:[#allocation213_spill] sm:$0xff] %v6768_v58  ;;  %2206 = vmatpush.msrb.mxu0 %v6764_v62  ;;  %2331 = vmatpush.msra.mxu1 %v6169_v56  ;;  %v6802_v28 = vpop.f32.mrf.mxu3  ;;  %v1665_v56 = vadd.f32 %v6423_v53, %v1624_v3  ;;  %v6948_v58 = vld [vmem:[#allocation12 + $0x60] sm:$0xff] }
 0x2c0   :  { %10215 = vst [vmem:[#allocation214_spill] sm:$0xff] %v6770_v45  ;;  %2246 = vmatpush.msrb.mxu2 %v6766_v9  ;;  %2372 = vmatpush.msra.mxu3 %v6194_v18 }
 0x2c1   :  { %2207 = vmatpush.msrb.mxu0 %v6776_v57  ;;  %10217 = vst [vmem:[#allocation216_spill] sm:$0xff] %v6802_v28  ;;  %2332 = vmatpush.msra.mxu1 %v6178_v16  ;;  %v1706_v16 = vadd.f32 %v6465_v40, %v1665_v56  ;;  %v10222_v56 = vld [vmem:[#allocation95_spill] sm:$0xff] }
 0x2c2   :  { %2247 = vmatpush.msrb.mxu2 %v6778_v26  ;;  %2373 = vmatpush.msra.mxu3 %v6201_v12  ;;  %v6940_v28 = vld [vmem:[#allocation12 + $0x80] sm:$0xff]  ;;  %10261 = vst [vmem:[#allocation95_spill] sm:$0xff] %v6952_v37 }
 0x2c3   :  { %2208 = vmatpush.msrb.mxu0 %v6785_v44  ;;  %2333 = vmatpush.msra.mxu1 %v6196_v38  ;;  %v1747_v38 = vadd.f32 %v6467_v47, %v1706_v16  ;;  %v10226_v16 = vld [vmem:[#allocation103_spill] sm:$0xff] }
 0x2c4   :  { %2248 = vmatpush.msrb.mxu2 %v6787_v11  ;;  %2460 = vmatpush.msrb.mxu3 %v6293_v36 }
 0x2c5   :  { %v6800_v51 = vpop.f32.mrf.mxu2  ;;  %2209 = vmatpush.msrb.mxu0 %v6794_v35  ;;  %2420 = vmatpush.msrb.mxu1 %v6291_v63 }
 0x2c6   :  { %10216 = vst [vmem:[#allocation215_spill] sm:$0xff] %v6800_v51  ;;  %v2020_v61 = vpop.f32.mrf.mxu0  ;;  %v2040_v52 = vpop.f32.mrf.mxu1  ;;  %2249 = vmatpush.msrb.mxu2 %v6796_v25  ;;  %2461 = vmatpush.msrb.mxu3 %v6299_v42  ;;  %v6944_v51 = vld [vmem:[#allocation12 + $0x90] sm:$0xff] }
 0x2c7   :  { %v2083_v22 = vadd.f32 %v2020_v61, %v10218_v29  ;;  %v2084_v45 = vadd.f32 %v2040_v52, %v5951_v20  ;;  %2421 = vmatpush.msrb.mxu1 %v6297_v5  ;;  %v1460_v20 = vadd.f32 %v6251_v24, %v6117_v10  ;;  %v2080_v63 = vpop.f32.mrf.mxu3  ;;  %v10220_v24 = vld [vmem:[#allocation93_spill] sm:$0xff] }
 0x2c8   :  { %2462 = vmatpush.msrb.mxu3 %v6305_v43  ;;  %v2086_v36 = vadd.f32 %v2080_v63, %v1747_v38  ;;  %v10219_v43 = vld [vmem:[#allocation92_spill] sm:$0xff]  ;;  %v10224_v52 = vld [vmem:[#allocation101_spill] sm:$0xff]  ;;  %v10229_v38 = vld [vmem:[#allocation106_spill] sm:$0xff]  ;;  %10257 = vst [vmem:[#allocation93_spill] sm:$0xff] %v6944_v51 }
 0x2c9   :  { %v2087_v18 = vmul.f32 0.5, %v2083_v22  ;;  %v2091_v53 = vmul.f32 0.5, %v2084_v45  ;;  %2422 = vmatpush.msrb.mxu1 %v6303_v27  ;;  %v10231_v63 = vld [vmem:[#allocation108_spill] sm:$0xff]  ;;  %10255 = vst [vmem:[#allocation92_spill] sm:$0xff] %v6940_v28 }
 0x2ca   :  { %2463 = vmatpush.msrb.mxu3 %v6311_v0  ;;  %v2096_v5 = vmul.f32 0.5, %v2086_v36  ;;  %v10232_v36 = vld [vmem:[#allocation113_spill] sm:$0xff] }
 0x2cb   :  { %4378 = vtanh.f32 %v2087_v18  ;;  %2423 = vmatpush.msrb.mxu1 %v6309_v8  ;;  %v10221_v8 = vld [vmem:[#allocation94_spill] sm:$0xff]  ;;  %v10227_v18 = vld [vmem:[#allocation104_spill] sm:$0xff] }
 0x2cc   :  { %4380 = vtanh.f32 %v2091_v53  ;;  %2464 = vmatpush.msrb.mxu3 %v6325_v14  ;;  %10259 = vst [vmem:[#allocation94_spill] sm:$0xff] %v6948_v58 }
 0x2cd   :  { %v2060_v40 = vpop.f32.mrf.mxu2  ;;  %2424 = vmatpush.msrb.mxu1 %v6323_v2  ;;  %v10223_v2 = vld [vmem:[#allocation96_spill] sm:$0xff] }
 0x2ce   :  { %v2085_v12 = vadd.f32 %v2060_v40, %v1460_v20  ;;  %2465 = vmatpush.msrb.mxu3 %v10219_v43  ;;  %v10228_v20 = vld [vmem:[#allocation105_spill] sm:$0xff]  ;;  %v10230_v40 = vld [vmem:[#allocation107_spill] sm:$0xff]  ;;  %v10235_v43 = vld [vmem:[#allocation116_spill] sm:$0xff]  ;;  %10263 = vst [vmem:[#allocation96_spill] sm:$0xff] %v6956_v46 }
 0x2cf   :  { %2425 = vmatpush.msrb.mxu1 %v6329_v17  ;;  %v10225_v17 = vld [vmem:[#allocation102_spill] sm:$0xff] }
 0x2d0   :  { %4382 = vtanh.f32 %v2085_v12  ;;  %2466 = vmatpush.msrb.mxu3 %v10221_v8  ;;  %v10236_v8 = vld [vmem:[#allocation117_spill] sm:$0xff] }
 0x2d1   :  { %v4379_v10 = vpop.eup %4378  ;;  %4384 = vtanh.f32 %v2096_v5  ;;  %2426 = vmatpush.msrb.mxu1 %v10220_v24  ;;  %v10233_v5 = vld [vmem:[#allocation114_spill] sm:$0xff]  ;;  %v6860_v24 = vld [vmem:[#allocation12 + $0x1c0] sm:$0xff] }
 0x2d2   :  { %v4381_v45 = vpop.eup %4380  ;;  %v2089_v42 = vmul.f32 0.5, %v4379_v10  ;;  %2467 = vmatpush.msrb.mxu3 %v10223_v2  ;;  %v10238_v2 = vld [vmem:[#allocation119_spill] sm:$0xff] }
 0x2d3   :  { %v2093_v27 = vmul.f32 0.5, %v4381_v45  ;;  %2427 = vmatpush.msrb.mxu1 %v10222_v56  ;;  %v6868_v56 = vld [vmem:[#allocation12 + $0x1a0] sm:$0xff] }
 0x2d4   :  { %v2090_v47 = vadd.f32 0.5, %v2089_v42  ;;  %2468 = vmatpush.msrb.mxu3 %v10225_v17  ;;  %v10234_v42 = vld [vmem:[#allocation115_spill] sm:$0xff]  ;;  %v10240_v17 = vld [vmem:[#allocation125_spill] sm:$0xff] }
 0x2d5   :  { %v2094_v0 = vadd.f32 0.5, %v2093_v27  ;;  %2428 = vmatpush.msrb.mxu1 %v10224_v52  ;;  %v6852_v27 = vld [vmem:[#allocation12 + $0x1e0] sm:$0xff] }
 0x2d6   :  { %v4383_v3 = vpop.eup %4382  ;;  %2469 = vmatpush.msrb.mxu3 %v10227_v18  ;;  %v6876_v52 = vld [vmem:[#allocation12 + $0x180] sm:$0xff]  ;;  %v6888_v18 = vld [vmem:[#allocation12 + $0x170] sm:$0xff] }
 0x2d7   :  { %v2100_v14 = vmul.f32 0.0, %v2094_v0  ;;  %v2101_v61 = vmul.f32 %v4383_v3, %v2090_v47  ;;  %v4385_v29 = vpop.eup %4384  ;;  %2429 = vmatpush.msrb.mxu1 %v10226_v16  ;;  %v6856_v47 = vld [vmem:[#allocation12 + $0x1f0] sm:$0xff]  ;;  %v10237_v3 = vld [vmem:[#allocation118_spill] sm:$0xff]  ;;  %v6885_v16 = vld [vmem:[#allocation12 + $0x160] sm:$0xff] }
 0x2d8   :  { %v2098_v53 = vmul.f32 0.5, %v4385_v29  ;;  %2470 = vmatpush.msrb.mxu3 %v10229_v38  ;;  %v6864_v0 = vld [vmem:[#allocation12 + $0x1d0] sm:$0xff] }
 0x2d9   :  { %v6835_v22 = vadd.f32 %v2101_v61, %v2100_v14  ;;  %2430 = vmatpush.msrb.mxu1 %v10228_v20  ;;  %v6872_v14 = vld [vmem:[#allocation12 + $0x1b0] sm:$0xff]  ;;  %v10239_v61 = vld [vmem:[#allocation120_spill] sm:$0xff]  ;;  %v6892_v20 = vld [vmem:[#allocation12 + $0x140] sm:$0xff] }
 0x2da   :  { %2471 = vmatpush.msrb.mxu3 %v10231_v63  ;;  %v2099_v12 = vadd.f32 0.5, %v2098_v53  ;;  %v6880_v29 = vld [vmem:[#allocation12 + $0x190] sm:$0xff]  ;;  %v10241_v53 = vld [vmem:[#allocation126_spill] sm:$0xff] }
 0x2db   :  { %4386 = vtanh.f32 %v6835_v22  ;;  %2431 = vmatpush.msrb.mxu1 %v10230_v40  ;;  %v10242_v38 = vld [vmem:[#allocation129_spill] sm:$0xff]  ;;  %v10243_v63 = vld [vmem:[#allocation130_spill] sm:$0xff] }
 0x2dc   :  { %2472 = vmatpush.msrb.mxu3 %v10233_v5  ;;  %v6896_v40 = vld [vmem:[#allocation12 + $0x150] sm:$0xff] }
 0x2dd   :  { %2432 = vmatpush.msrb.mxu1 %v10232_v36  ;;  %v10244_v36 = vld [vmem:[#allocation133_spill] sm:$0xff] }
 0x2de   :  { %2473 = vmatpush.msrb.mxu3 %v10235_v43  ;;  %v6904_v5 = vld [vmem:[#allocation12 + $0x130] sm:$0xff] }
 0x2df   :  { %2433 = vmatpush.msrb.mxu1 %v10234_v42  ;;  %v6908_v42 = vld [vmem:[#allocation12 + $0x100] sm:$0xff]  ;;  %v10246_v43 = vld [vmem:[#allocation137_spill] sm:$0xff] }
 0x2e0   :  { %2474 = vmatpush.msrb.mxu3 %v10237_v3  ;;  %v10247_v3 = vld [vmem:[#allocation138_spill] sm:$0xff] }
 0x2e1   :  { %v4387_v10 = vpop.eup %4386  ;;  %2434 = vmatpush.msrb.mxu1 %v10236_v8  ;;  %v6912_v8 = vld [vmem:[#allocation12 + $0x110] sm:$0xff] }
 0x2e2   :  { %v6846_v45 = vmul.f32 %v4387_v10, %v2099_v12  ;;  %2475 = vmatpush.msrb.mxu3 %v10239_v61  ;;  %v6900_v12 = vld [vmem:[#allocation12 + $0x120] sm:$0xff]  ;;  %v10245_v10 = vld [vmem:[#allocation134_spill] sm:$0xff]  ;;  %v10248_v61 = vld [vmem:[#allocation141_spill] sm:$0xff] }
 0x2e3   :  { %2435 = vmatpush.msrb.mxu1 %v10238_v2  ;;  %v6916_v2 = vld [vmem:[#allocation12 + $0xe0] sm:$0xff] }
 0x2e4   :  { %2130 = vmatmul.f32.vlgmr.msra.gmra.mxu0 %v6846_v45  ;;  %2170 = vmatmul.f32.vlgmr.msra.gmra.mxu2 %v6846_v45 }
 0x2e5   :  { %2298 = vmatpush.msra.mxu0 %v6852_v27  ;;  %2334 = vmatmul.f32.vlgmr.msra.gmra.mxu1 %v6846_v45 }
 0x2e6   :  { %2338 = vmatpush.msra.mxu2 %v6856_v47  ;;  %2374 = vmatmul.f32.vlgmr.msra.gmra.mxu3 %v6846_v45 }
 0x2e7   :  { %2299 = vmatpush.msra.mxu0 %v6860_v24  ;;  %2500 = vmatpush.msra.mxu1 %v10240_v17  ;;  %v6920_v17 = vld [vmem:[#allocation12 + $0xf0] sm:$0xff] }
 0x2e8   :  { %2339 = vmatpush.msra.mxu2 %v6864_v0  ;;  %2540 = vmatpush.msra.mxu3 %v10241_v53  ;;  %v10249_v53 = vld [vmem:[#allocation144_spill] sm:$0xff] }
 0x2e9   :  { %2300 = vmatpush.msra.mxu0 %v6868_v56  ;;  %2501 = vmatpush.msra.mxu1 %v10242_v38  ;;  %v6924_v38 = vld [vmem:[#allocation12 + $0xc0] sm:$0xff] }
 0x2ea   :  { %2340 = vmatpush.msra.mxu2 %v6872_v14  ;;  %2541 = vmatpush.msra.mxu3 %v10243_v63  ;;  %v10250_v63 = vld [vmem:[#allocation147_spill] sm:$0xff] }
 0x2eb   :  { %2301 = vmatpush.msra.mxu0 %v6876_v52  ;;  %2502 = vmatpush.msra.mxu1 %v10244_v36  ;;  %v6928_v36 = vld [vmem:[#allocation12 + $0xd0] sm:$0xff] }
 0x2ec   :  { %2341 = vmatpush.msra.mxu2 %v6880_v29  ;;  %2210 = vmatmul.f32.vlgmr.msrb.gmra.mxu0 %v6846_v45 }
 0x2ed   :  { %2250 = vmatmul.f32.vlgmr.msrb.gmra.mxu2 %v6846_v45  ;;  %2302 = vmatpush.msra.mxu0 %v6885_v16 }
 0x2ee   :  { %2342 = vmatpush.msra.mxu2 %v6888_v18  ;;  %2542 = vmatpush.msra.mxu3 %v10245_v10  ;;  %v10251_v10 = vld [vmem:[#allocation148_spill] sm:$0xff] }
 0x2ef   :  { %2303 = vmatpush.msra.mxu0 %v6892_v20  ;;  %2503 = vmatpush.msra.mxu1 %v10246_v43  ;;  %v6932_v43 = vld [vmem:[#allocation12 + $0xa0] sm:$0xff] }
 0x2f0   :  { %2343 = vmatpush.msra.mxu2 %v6896_v40  ;;  %2543 = vmatpush.msra.mxu3 %v10247_v3  ;;  %v10252_v3 = vld [vmem:[#allocation151_spill] sm:$0xff] }
 0x2f1   :  { %2304 = vmatpush.msra.mxu0 %v6900_v12  ;;  %2504 = vmatpush.msra.mxu1 %v10248_v61  ;;  %v6936_v61 = vld [vmem:[#allocation12 + $0xb0] sm:$0xff] }
 0x2f2   :  { %2344 = vmatpush.msra.mxu2 %v6904_v5  ;;  %2544 = vmatpush.msra.mxu3 %v10249_v53  ;;  %10253 = vst [vmem:[#allocation25_spill] sm:$0xff] %v6936_v61  ;;  %v10254_v53 = vld [vmem:[#allocation152_spill] sm:$0xff] }
 0x2f3   :  { %2305 = vmatpush.msra.mxu0 %v6908_v42  ;;  %2505 = vmatpush.msra.mxu1 %v10250_v63  ;;  %v10256_v63 = vld [vmem:[#allocation155_spill] sm:$0xff] }
 0x2f4   :  { %2345 = vmatpush.msra.mxu2 %v6912_v8  ;;  %2545 = vmatpush.msra.mxu3 %v10251_v10  ;;  %v10258_v10 = vld [vmem:[#allocation156_spill] sm:$0xff] }
 0x2f5   :  { %2306 = vmatpush.msra.mxu0 %v6916_v2  ;;  %2506 = vmatpush.msra.mxu1 %v10252_v3  ;;  %v10260_v3 = vld [vmem:[#allocation161_spill] sm:$0xff] }
 0x2f6   :  { %2346 = vmatpush.msra.mxu2 %v6920_v17  ;;  %2546 = vmatpush.msra.mxu3 %v10254_v53  ;;  %v10262_v53 = vld [vmem:[#allocation164_spill] sm:$0xff] }
 0x2f7   :  { %2307 = vmatpush.msra.mxu0 %v6924_v38  ;;  %2507 = vmatpush.msra.mxu1 %v10256_v63  ;;  %v10264_v63 = vld [vmem:[#allocation167_spill] sm:$0xff] }
 0x2f8   :  { %2347 = vmatpush.msra.mxu2 %v6928_v36  ;;  %2547 = vmatpush.msra.mxu3 %v10258_v10  ;;  %v10266_v10 = vld [vmem:[#allocation168_spill] sm:$0xff] }
 0x2f9   :  { %2308 = vmatpush.msra.mxu0 %v6932_v43  ;;  %2508 = vmatpush.msra.mxu1 %v10260_v3  ;;  %v10268_v3 = vld [vmem:[#allocation171_spill] sm:$0xff] }
 0x2fa   :  { %2348 = vmatpush.msra.mxu2 %v6936_v61  ;;  %2548 = vmatpush.msra.mxu3 %v10262_v53  ;;  %v10270_v53 = vld [vmem:[#allocation172_spill] sm:$0xff] }
 0x2fb   :  { %2309 = vmatpush.msra.mxu0 %v6940_v28  ;;  %2509 = vmatpush.msra.mxu1 %v10264_v63  ;;  %v10272_v63 = vld [vmem:[#allocation175_spill] sm:$0xff]  ;;  %v10283_v61 = vld [vmem:[#allocation132_spill] sm:$0xff] }
 0x2fc   :  { %2349 = vmatpush.msra.mxu2 %v6944_v51  ;;  %v6960_v51 = vld [vmem:[#allocation12 + $0x50] sm:$0xff]  ;;  %2549 = vmatpush.msra.mxu3 %v10266_v10  ;;  %v10274_v10 = vld [vmem:[#allocation123_spill] sm:$0xff] }
 0x2fd   :  { %2310 = vmatpush.msra.mxu0 %v6948_v58  ;;  %10265 = vst [vmem:[#allocation101_spill] sm:$0xff] %v6960_v51  ;;  %v6964_v58 = vld [vmem:[#allocation12 + $0x20] sm:$0xff]  ;;  %2510 = vmatpush.msra.mxu1 %v10268_v3  ;;  %v10275_v3 = vld [vmem:[#allocation124_spill] sm:$0xff] }
 0x2fe   :  { %2350 = vmatpush.msra.mxu2 %v6952_v37  ;;  %10267 = vst [vmem:[#allocation102_spill] sm:$0xff] %v6964_v58  ;;  %v6968_v37 = vld [vmem:[#allocation12 + $0x30] sm:$0xff]  ;;  %2550 = vmatpush.msra.mxu3 %v10270_v53  ;;  %v10277_v53 = vld [vmem:[#allocation127_spill] sm:$0xff] }
 0x2ff   :  { %2311 = vmatpush.msra.mxu0 %v6956_v46  ;;  %10269 = vst [vmem:[#allocation103_spill] sm:$0xff] %v6968_v37  ;;  %v6972_v46 = vld [vmem:[#allocation12] sm:$0xff]  ;;  %2511 = vmatpush.msra.mxu1 %v10272_v63  ;;  %v10280_v63 = vld [vmem:[#allocation184_spill] sm:$0xff] }
 0x300   :  { %2351 = vmatpush.msra.mxu2 %v6960_v51  ;;  %10271 = vst [vmem:[#allocation104_spill] sm:$0xff] %v6972_v46  ;;  %v6976_v51 = vld [vmem:[#allocation12 + $0x10] sm:$0xff]  ;;  %v10281_v28 = vld [vmem:[#allocation131_spill] sm:$0xff] }
 0x301   :  { %2312 = vmatpush.msra.mxu0 %v6964_v58  ;;  %10273 = vst [vmem:[#allocation105_spill] sm:$0xff] %v6976_v51  ;;  %v10278_v58 = vld [vmem:[#allocation181_spill] sm:$0xff] }
 0x302   :  { %2352 = vmatpush.msra.mxu2 %v6968_v37  ;;  %v10276_v37 = vld [vmem:[#allocation176_spill] sm:$0xff]  ;;  %2512 = vmatpush.msra.mxu1 %v10278_v58  ;;  %v10289_v58 = vld [vmem:[#allocation139_spill] sm:$0xff] }
 0x303   :  { %2313 = vmatpush.msra.mxu0 %v6972_v46  ;;  %2551 = vmatpush.msra.mxu3 %v10276_v37  ;;  %v10279_v46 = vld [vmem:[#allocation128_spill] sm:$0xff] }
 0x304   :  { %2353 = vmatpush.msra.mxu2 %v6976_v51  ;;  %2314 = vmatmul.f32.vlgmr.msra.gmra.mxu0 %v6846_v45  ;;  %v10282_v51 = vld [vmem:[#allocation187_spill] sm:$0xff]  ;;  %v10287_v37 = vld [vmem:[#allocation136_spill] sm:$0xff] }
 0x305   :  { %2354 = vmatmul.f32.vlgmr.msra.gmra.mxu2 %v6846_v45  ;;  %2400 = vmatpush.msrb.mxu0 %v10274_v10  ;;  %v10284_v45 = vld [vmem:[#allocation188_spill] sm:$0xff]  ;;  %v10285_v10 = vld [vmem:[#allocation135_spill] sm:$0xff] }
 0x306   :  { %2440 = vmatpush.msrb.mxu2 %v10275_v3  ;;  %2552 = vmatpush.msra.mxu3 %v10280_v63  ;;  %v10286_v3 = vld [vmem:[#allocation191_spill] sm:$0xff]  ;;  %v10294_v63 = vld [vmem:[#allocation150_spill] sm:$0xff] }
 0x307   :  { %2401 = vmatpush.msrb.mxu0 %v10277_v53  ;;  %2513 = vmatpush.msra.mxu1 %v10282_v51  ;;  %v10288_v53 = vld [vmem:[#allocation192_spill] sm:$0xff]  ;;  %v10291_v51 = vld [vmem:[#allocation145_spill] sm:$0xff] }
 0x308   :  { %2441 = vmatpush.msrb.mxu2 %v10279_v46  ;;  %2553 = vmatpush.msra.mxu3 %v10284_v45  ;;  %v10290_v46 = vld [vmem:[#allocation140_spill] sm:$0xff]  ;;  %v10295_v45 = vld [vmem:[#allocation153_spill] sm:$0xff] }
 0x309   :  { %2402 = vmatpush.msrb.mxu0 %v10281_v28  ;;  %2514 = vmatpush.msra.mxu1 %v10286_v3  ;;  %v10292_v28 = vld [vmem:[#allocation146_spill] sm:$0xff]  ;;  %v10297_v3 = vld [vmem:[#allocation159_spill] sm:$0xff] }
 0x30a   :  { %2442 = vmatpush.msrb.mxu2 %v10283_v61  ;;  %2554 = vmatpush.msra.mxu3 %v10288_v53  ;;  %v10293_v61 = vld [vmem:[#allocation149_spill] sm:$0xff]  ;;  %v10300_v53 = vld [vmem:[#allocation166_spill] sm:$0xff] }
 0x30b   :  { %2403 = vmatpush.msrb.mxu0 %v10285_v10  ;;  %2515 = vmatpush.msra.mxu1 %v6627_v41  ;;  %v10296_v10 = vld [vmem:[#allocation154_spill] sm:$0xff]  ;;  %v10299_v41 = vld [vmem:[#allocation165_spill] sm:$0xff] }
 0x30c   :  { %2443 = vmatpush.msrb.mxu2 %v10287_v37  ;;  %2555 = vmatpush.msra.mxu3 %v6629_v32  ;;  %v10298_v37 = vld [vmem:[#allocation160_spill] sm:$0xff]  ;;  %v10301_v32 = vld [vmem:[#allocation169_spill] sm:$0xff] }
 0x30d   :  { %2404 = vmatpush.msrb.mxu0 %v10289_v58  ;;  %v10302_v58 = vld [vmem:[#allocation170_spill] sm:$0xff] }
 0x30e   :  { %2444 = vmatpush.msrb.mxu2 %v10290_v46  ;;  %v10303_v46 = vld [vmem:[#allocation173_spill] sm:$0xff] }
 0x30f   :  { %2405 = vmatpush.msrb.mxu0 %v10291_v51  ;;  %v10304_v51 = vld [vmem:[#allocation174_spill] sm:$0xff] }
 0x310   :  { %2445 = vmatpush.msrb.mxu2 %v10292_v28  ;;  %v10305_v28 = vld [vmem:[#allocation179_spill] sm:$0xff] }
 0x311   :  { %2406 = vmatpush.msrb.mxu0 %v10293_v61  ;;  %v10306_v61 = vld [vmem:[#allocation180_spill] sm:$0xff] }
 0x312   :  { %2446 = vmatpush.msrb.mxu2 %v10294_v63  ;;  %v10307_v63 = vld [vmem:[#allocation185_spill] sm:$0xff] }
 0x313   :  { %2407 = vmatpush.msrb.mxu0 %v10295_v45  ;;  %v10308_v45 = vld [vmem:[#allocation186_spill] sm:$0xff] }
 0x314   :  { %2447 = vmatpush.msrb.mxu2 %v10296_v10  ;;  %v10309_v10 = vld [vmem:[#allocation189_spill] sm:$0xff] }
 0x315   :  { %2408 = vmatpush.msrb.mxu0 %v10297_v3  ;;  %v10310_v3 = vld [vmem:[#allocation190_spill] sm:$0xff] }
 0x316   :  { %2448 = vmatpush.msrb.mxu2 %v10298_v37  ;;  %v10311_v37 = vld [vmem:[#allocation193_spill] sm:$0xff] }
 0x317   :  { %2409 = vmatpush.msrb.mxu0 %v10299_v41  ;;  %v10312_v41 = vld [vmem:[#allocation194_spill] sm:$0xff] }
 0x318   :  { %2449 = vmatpush.msrb.mxu2 %v10300_v53  ;;  %v10313_v53 = vld [vmem:[#allocation199_spill] sm:$0xff] }
 0x319   :  { %2410 = vmatpush.msrb.mxu0 %v10301_v32  ;;  %v10314_v32 = vld [vmem:[#allocation200_spill] sm:$0xff] }
 0x31a   :  { %2450 = vmatpush.msrb.mxu2 %v10302_v58 }
 0x31b   :  { %2411 = vmatpush.msrb.mxu0 %v10303_v46 }
 0x31c   :  { %2451 = vmatpush.msrb.mxu2 %v10304_v51 }
 0x31d   :  { %2412 = vmatpush.msrb.mxu0 %v10305_v28 }
 0x31e   :  { %2452 = vmatpush.msrb.mxu2 %v10306_v61 }
 0x31f   :  { %2413 = vmatpush.msrb.mxu0 %v10307_v63  ;;  %v10322_v63 = vld [vmem:[#allocation76_spill] sm:$0xff] }
 0x320   :  { %2453 = vmatpush.msrb.mxu2 %v10308_v45 }
 0x321   :  { %2414 = vmatpush.msrb.mxu0 %v10309_v10 }
 0x322   :  { %2454 = vmatpush.msrb.mxu2 %v10310_v3 }
 0x323   :  { %2415 = vmatpush.msrb.mxu0 %v10311_v37 }
 0x324   :  { %2455 = vmatpush.msrb.mxu2 %v10312_v41 }
 0x325   :  { %2480 = vmatpush.msra.mxu0 %v6633_v55  ;;  %v2151_v55 = vpop.f32.mrf.mxu1 }
 0x326   :  { %2520 = vmatpush.msra.mxu2 %v6635_v54 }
 0x327   :  { %2481 = vmatpush.msra.mxu0 %v6649_v48  ;;  %v10315_v48 = vld [vmem:[#allocation205_spill] sm:$0xff] }
 0x328   :  { %2521 = vmatpush.msra.mxu2 %v10313_v53 }
 0x329   :  { %2482 = vmatpush.msra.mxu0 %v10314_v32 }
 0x32a   :  { %2522 = vmatpush.msra.mxu2 %v6659_v39 }
 0x32b   :  { %2483 = vmatpush.msra.mxu0 %v6665_v1  ;;  %v1994_v1 = vld [vmem:[#allocation16] sm:$0xf] }
 0x32c   :  { %2523 = vmatpush.msra.mxu2 %v6667_v21  ;;  %v7054_v21 = vperm.slane %v1994_v1, 0 }
 0x32d   :  { %2484 = vmatpush.msra.mxu0 %v6673_v59  ;;  %v7057_v59 = vperm.slane %v1994_v1, 1 }
 0x32e   :  { %2524 = vmatpush.msra.mxu2 %v6675_v23  ;;  %10316 = vst [vmem:[#allocation106_spill] sm:$0xff] %v7054_v21 }
 0x32f   :  { %2485 = vmatpush.msra.mxu0 %v6689_v33  ;;  %10317 = vst [vmem:[#allocation107_spill] sm:$0xff] %v7057_v59  ;;  %v2191_v33 = vpop.f32.mrf.mxu3 }
 0x330   :  { %2525 = vmatpush.msra.mxu2 %v6691_v30 }
 0x331   :  { %2486 = vmatpush.msra.mxu0 %v6697_v49  ;;  %v7059_v49 = vperm.slane %v1994_v1, 2 }
 0x332   :  { %2526 = vmatpush.msra.mxu2 %v10315_v48  ;;  %v10323_v48 = vld [vmem:[#allocation77_spill] sm:$0xff] }
 0x333   :  { %2487 = vmatpush.msra.mxu0 %v6705_v6  ;;  %10318 = vst [vmem:[#allocation108_spill] sm:$0xff] %v7059_v49 }
 0x334   :  { %2527 = vmatpush.msra.mxu2 %v6707_v15 }
 0x335   :  { %2488 = vmatpush.msra.mxu0 %v6713_v31 }
 0x336   :  { %2528 = vmatpush.msra.mxu2 %v6715_v34  ;;  %v2231_v34 = vpop.f32.mrf.mxu1 }
 0x337   :  { %2489 = vmatpush.msra.mxu0 %v6731_v60  ;;  %v2271_v46 = vpop.f32.mrf.mxu3 }
 0x338   :  { %2529 = vmatpush.msra.mxu2 %v6733_v4 }
 0x339   :  { %2490 = vmatpush.msra.mxu0 %v6739_v19 }
 0x33a   :  { %2530 = vmatpush.msra.mxu2 %v6741_v50 }
 0x33b   :  { %2491 = vmatpush.msra.mxu0 %v6749_v7  ;;  %v7063_v7 = vperm.slane %v1994_v1, 3 }
 0x33c   :  { %2531 = vmatpush.msra.mxu2 %v6751_v13 }
 0x33d   :  { %2492 = vmatpush.msra.mxu0 %v6764_v62  ;;  %10319 = vst [vmem:[#allocation113_spill] sm:$0xff] %v7063_v7 }
 0x33e   :  { %2532 = vmatpush.msra.mxu2 %v6766_v9 }
 0x33f   :  { %2493 = vmatpush.msra.mxu0 %v6776_v57  ;;  %v10320_v57 = vld [vmem:[#allocation208_spill] sm:$0xff] }
 0x340   :  { %2533 = vmatpush.msra.mxu2 %v6778_v26  ;;  %v10321_v26 = vld [vmem:[#allocation75_spill] sm:$0xff] }
 0x341   :  { %2494 = vmatpush.msra.mxu0 %v6785_v44  ;;  %v1504_v58 = vadd.f32 %v10321_v26, %v10320_v57  ;;  %v10330_v26 = vld [vmem:[#allocation157_spill] sm:$0xff] }
 0x342   :  { %2534 = vmatpush.msra.mxu2 %v6787_v11 }
 0x343   :  { %2495 = vmatpush.msra.mxu0 %v6794_v35  ;;  %v1545_v45 = vadd.f32 %v10322_v63, %v1504_v58  ;;  %v10332_v63 = vld [vmem:[#allocation26_spill] sm:$0xff] }
 0x344   :  { %2535 = vmatpush.msra.mxu2 %v6796_v25 }
 0x345   :  { %v1586_v1 = vadd.f32 %v10323_v48, %v1545_v45  ;;  %v10334_v48 = vld [vmem:[#allocation57_spill] sm:$0xff] }
 0x361   :  { %v2131_v54 = vpop.f32.mrf.mxu0 }
 0x362   :  { %v2132_v39 = vadd.f32 %v2131_v54, %v7054_v21  ;;  %v2335_v41 = vpop.f32.mrf.mxu1 }
 0x364   :  { %v2152_v4 = vadd.f32 %v2151_v55, %v2132_v39  ;;  %v10324_v55 = vld [vmem:[#allocation40_spill] sm:$0xff] }
 0x365   :  { %v2379_v54 = vadd.f32 %v2335_v41, %v10324_v55 }
 0x366   :  { %v2274_v23 = vmul.f32 0.5, %v2152_v4 }
 0x367   :  { %v2171_v50 = vpop.f32.mrf.mxu2 }
 0x368   :  { %v2172_v30 = vadd.f32 %v2171_v50, %v7057_v59  ;;  %4388 = vtanh.f32 %v2274_v23  ;;  %v10325_v23 = vld [vmem:[#allocation142_spill] sm:$0xff] }
 0x369   :  { %v2211_v6 = vpop.f32.mrf.mxu0  ;;  %v1627_v50 = vadd.f32 %v10325_v23, %v1586_v1  ;;  %v7085_v23 = vld [vmem:[#allocation12 + $0x1e8] sm:$0xff] }
 0x36a   :  { %v2192_v15 = vadd.f32 %v2191_v33, %v2172_v30  ;;  %v2212_v31 = vadd.f32 %v2211_v6, %v7059_v49  ;;  %v10326_v33 = vld [vmem:[#allocation41_spill] sm:$0xff]  ;;  %v10327_v30 = vld [vmem:[#allocation54_spill] sm:$0xff] }
 0x36b   :  { %v1299_v6 = vadd.f32 %v10327_v30, %v10326_v33 }
 0x36c   :  { %v2278_v60 = vmul.f32 0.5, %v2192_v15  ;;  %v2232_v19 = vadd.f32 %v2231_v34, %v2212_v31  ;;  %v2386_v34 = vmul.f32 0.5, %v2379_v54 }
 0x36e   :  { %4390 = vtanh.f32 %v2278_v60  ;;  %v4389_v13 = vpop.eup %4388  ;;  %v10328_v60 = vld [vmem:[#allocation143_spill] sm:$0xff] }
 0x36f   :  { %4392 = vtanh.f32 %v2232_v19  ;;  %v2276_v51 = vmul.f32 0.5, %v4389_v13  ;;  %v1668_v19 = vadd.f32 %v10328_v60, %v1627_v50  ;;  %v7088_v50 = vld [vmem:[#allocation12 + $0x1f8] sm:$0xff] }
 0x370   :  { %v2251_v62 = vpop.f32.mrf.mxu2 }
 0x371   :  { %v2252_v9 = vadd.f32 %v2251_v62, %v7063_v7  ;;  %v2277_v53 = vadd.f32 0.5, %v2276_v51  ;;  %v10329_v62 = vld [vmem:[#allocation55_spill] sm:$0xff]  ;;  %v1709_v58 = vadd.f32 %v10330_v26, %v1668_v19  ;;  %v7097_v19 = vld [vmem:[#allocation12 + $0x1a8] sm:$0xff] }
 0x372   :  { %v7103_v26 = vld [vmem:[#allocation12 + $0x188] sm:$0xff] }
 0x373   :  { %v2272_v28 = vadd.f32 %v2271_v46, %v2252_v9  ;;  %v1340_v9 = vadd.f32 %v10329_v62, %v1299_v6  ;;  %v10331_v46 = vld [vmem:[#allocation56_spill] sm:$0xff] }
 0x374   :  { %v4391_v61 = vpop.eup %4390  ;;  %v7091_v6 = vld [vmem:[#allocation12 + $0x1c8] sm:$0xff] }
 0x375   :  { %v2280_v10 = vmul.f32 0.5, %v4391_v61  ;;  %v2283_v3 = vmul.f32 0.5, %v2272_v28  ;;  %v4393_v37 = vpop.eup %4392  ;;  %v1381_v51 = vadd.f32 %v10331_v46, %v1340_v9 }
 0x376   :  { %v2288_v4 = vmul.f32 %v4393_v37, %v2277_v53  ;;  %v10333_v37 = vld [vmem:[#allocation158_spill] sm:$0xff] }
 0x377   :  { %v2281_v32 = vadd.f32 0.5, %v2280_v10  ;;  %4394 = vtanh.f32 %v2283_v3  ;;  %v2375_v3 = vpop.f32.mrf.mxu3  ;;  %v1750_v41 = vadd.f32 %v10333_v37, %v1709_v58  ;;  %v1422_v1 = vadd.f32 %v10334_v48, %v1381_v51  ;;  %v7106_v58 = vld [vmem:[#allocation12 + $0x198] sm:$0xff] }
 0x379   :  { %v2287_v39 = vmul.f32 0.0, %v2281_v32  ;;  %v2381_v55 = vadd.f32 %v2375_v3, %v1750_v41  ;;  %v7122_v41 = vld [vmem:[#allocation12 + $0x128] sm:$0xff] }
 0x37b   :  { %v7074_v15 = vadd.f32 %v2288_v4, %v2287_v39  ;;  %v10335_v39 = vld [vmem:[#allocation39_spill] sm:$0xff]  ;;  %v2391_v60 = vmul.f32 0.5, %v2381_v55  ;;  %v7133_v55 = vld [vmem:[#allocation12 + $0x118] sm:$0xff] }
 0x37c   :  { %v1463_v4 = vadd.f32 %v10335_v39, %v1422_v1  ;;  %v7130_v1 = vld [vmem:[#allocation12 + $0x108] sm:$0xff]  ;;  %v7140_v39 = vld [vmem:[#allocation12 + $0xf8] sm:$0xff] }
 0x37d   :  { %v4395_v31 = vpop.eup %4394  ;;  %4396 = vtanh.f32 %v7074_v15 }
 0x37e   :  { %v2285_v13 = vmul.f32 0.5, %v4395_v31  ;;  %4398 = vtanh.f32 %v2386_v34  ;;  %v7094_v31 = vld [vmem:[#allocation12 + $0x1d8] sm:$0xff] }
 0x380   :  { %v2286_v61 = vadd.f32 0.5, %v2285_v13  ;;  %v7100_v13 = vld [vmem:[#allocation12 + $0x1b8] sm:$0xff] }
 0x381   :  { %v2315_v28 = vpop.f32.mrf.mxu0 }
 0x382   :  { %v2378_v45 = vadd.f32 %v2315_v28, %v10332_v63  ;;  %v7109_v28 = vld [vmem:[#allocation12 + $0x168] sm:$0xff] }
 0x383   :  { %v4397_v10 = vpop.eup %4396 }
 0x384   :  { %v2291_v53 = vmul.f32 %v4397_v10, %v2286_v61  ;;  %v2382_v32 = vmul.f32 0.5, %v2378_v45  ;;  %v4399_v54 = vpop.eup %4398  ;;  %v7112_v61 = vld [vmem:[#allocation12 + $0x178] sm:$0xff]  ;;  %v7115_v45 = vld [vmem:[#allocation12 + $0x148] sm:$0xff] }
 0x385   :  { %v2388_v34 = vmul.f32 0.5, %v4399_v54  ;;  %v7118_v10 = vld [vmem:[#allocation12 + $0x158] sm:$0xff]  ;;  %v7137_v54 = vld [vmem:[#allocation12 + $0xe8] sm:$0xff] }
 0x386   :  { %2292 = vst [vmem:[#allocation18] sm:$0xff] %v2291_v53  ;;  %4400 = vtanh.f32 %v2382_v32  ;;  %2436 = vmatmul.f32.vlgmr.msrb.gmra.mxu1 %v2291_v53  ;;  %2476 = vmatmul.f32.vlgmr.msrb.gmra.mxu3 %v2291_v53 }
 0x387   :  { %2605 = vmatpush.msrb.mxu1 %v7085_v23  ;;  %2645 = vmatpush.msrb.mxu3 %v7088_v50  ;;  %v2389_v46 = vadd.f32 0.5, %v2388_v34  ;;  %v7149_v34 = vld [vmem:[#allocation12 + $0xa8] sm:$0xff] }
 0x388   :  { %v2355_v33 = vpop.f32.mrf.mxu2 }
 0x389   :  { %v2380_v30 = vadd.f32 %v2355_v33, %v1463_v4  ;;  %2606 = vmatpush.msrb.mxu1 %v7091_v6  ;;  %2646 = vmatpush.msrb.mxu3 %v7094_v31  ;;  %v2395_v3 = vmul.f32 %v2389_v46, %v6835_v22  ;;  %v7143_v4 = vld [vmem:[#allocation12 + $0xc8] sm:$0xff]  ;;  %v7146_v33 = vld [vmem:[#allocation12 + $0xd8] sm:$0xff] }
 0x38a   :  { %v7157_v46 = vld [vmem:[#allocation12 + $0x88] sm:$0xff] }
 0x38b   :  { %4402 = vtanh.f32 %v2380_v30  ;;  %2607 = vmatpush.msrb.mxu1 %v7097_v19  ;;  %2647 = vmatpush.msrb.mxu3 %v7100_v13 }
 0x38c   :  { %v4401_v62 = vpop.eup %4400  ;;  %4404 = vtanh.f32 %v2391_v60  ;;  %v7152_v60 = vld [vmem:[#allocation12 + $0xb8] sm:$0xff] }
 0x38d   :  { %v2384_v9 = vmul.f32 0.5, %v4401_v62  ;;  %2608 = vmatpush.msrb.mxu1 %v7103_v26  ;;  %2648 = vmatpush.msrb.mxu3 %v7106_v58 }
 0x38e   :  { %2516 = vmatmul.f32.vlgmr.msra.gmra.mxu1 %v2291_v53  ;;  %2556 = vmatmul.f32.vlgmr.msra.gmra.mxu3 %v2291_v53  ;;  %v7125_v53 = vld [vmem:[#allocation12 + $0x138] sm:$0xff] }
 0x38f   :  { %v2385_v51 = vadd.f32 0.5, %v2384_v9  ;;  %2609 = vmatpush.msrb.mxu1 %v7109_v28  ;;  %2649 = vmatpush.msrb.mxu3 %v7112_v61 }
 0x391   :  { %v4403_v63 = vpop.eup %4402  ;;  %2610 = vmatpush.msrb.mxu1 %v7115_v45  ;;  %2650 = vmatpush.msrb.mxu3 %v7118_v10 }
 0x392   :  { %v2396_v37 = vmul.f32 %v4403_v63, %v2385_v51  ;;  %v4405_v32 = vpop.eup %4404  ;;  %v7160_v51 = vld [vmem:[#allocation12 + $0x98] sm:$0xff]  ;;  %v7167_v63 = vld [vmem:[#allocation12 + $0x68] sm:$0xff] }
 0x393   :  { %2611 = vmatpush.msrb.mxu1 %v7122_v41  ;;  %2651 = vmatpush.msrb.mxu3 %v7125_v53  ;;  %v2393_v22 = vmul.f32 0.5, %v4405_v32  ;;  %v7178_v32 = vld [vmem:[#allocation12 + $0x58] sm:$0xff] }
 0x394   :  { %v7128_v48 = vadd.f32 %v2396_v37, %v2395_v3  ;;  %v7170_v3 = vld [vmem:[#allocation12 + $0x78] sm:$0xff]  ;;  %v7175_v37 = vld [vmem:[#allocation12 + $0x48] sm:$0xff] }
 0x395   :  { %2612 = vmatpush.msrb.mxu1 %v7130_v1  ;;  %2652 = vmatpush.msrb.mxu3 %v7133_v55  ;;  %v2394_v30 = vadd.f32 0.5, %v2393_v22  ;;  %v7256_v22 = vld [vmem:[#allocation15 + $0x328] sm:$0xff] }
 0x396   :  { %4406 = vtanh.f32 %v7128_v48  ;;  %10345 = vst [vmem:[#allocation120_spill] sm:$0xff] %v7256_v22 }
 0x397   :  { %2613 = vmatpush.msrb.mxu1 %v7137_v54  ;;  %2653 = vmatpush.msrb.mxu3 %v7140_v39 }
 0x399   :  { %2614 = vmatpush.msrb.mxu1 %v7143_v4  ;;  %2654 = vmatpush.msrb.mxu3 %v7146_v33 }
 0x39b   :  { %2615 = vmatpush.msrb.mxu1 %v7149_v34  ;;  %2655 = vmatpush.msrb.mxu3 %v7152_v60 }
 0x39c   :  { %v4407_v62 = vpop.eup %4406 }
 0x39d   :  { %v7155_v9 = vmul.f32 %v4407_v62, %v2394_v30  ;;  %2616 = vmatpush.msrb.mxu1 %v7157_v46  ;;  %2656 = vmatpush.msrb.mxu3 %v7160_v51  ;;  %v7260_v30 = vld [vmem:[#allocation15 + $0x300] sm:$0xff] }
 0x39e   :  { %10347 = vst [vmem:[#allocation125_spill] sm:$0xff] %v7260_v30  ;;  %v10348_v62 = vld [vmem:[#allocation95_spill] sm:$0xff] }
 0x39f   :  { %2416 = vmatmul.f32.vlgmr.msrb.gmra.mxu0 %v7155_v9  ;;  %2456 = vmatmul.f32.vlgmr.msrb.gmra.mxu2 %v7155_v9 }
 0x3a0   :  { %2585 = vmatpush.msrb.mxu0 %v6852_v27  ;;  %2625 = vmatpush.msrb.mxu2 %v6856_v47  ;;  %v7183_v27 = vld [vmem:[#allocation12 + $0x28] sm:$0xff]  ;;  %v7186_v47 = vld [vmem:[#allocation12 + $0x38] sm:$0xff] }
 0x3a1   :  { %2617 = vmatpush.msrb.mxu1 %v7167_v63  ;;  %2657 = vmatpush.msrb.mxu3 %v7170_v3 }
 0x3a2   :  { %2586 = vmatpush.msrb.mxu0 %v6860_v24  ;;  %2626 = vmatpush.msrb.mxu2 %v6864_v0  ;;  %v7191_v24 = vld [vmem:[#allocation12 + $0x8] sm:$0xff]  ;;  %v7194_v0 = vld [vmem:[#allocation12 + $0x18] sm:$0xff] }
 0x3a3   :  { %2618 = vmatpush.msrb.mxu1 %v7175_v37  ;;  %2658 = vmatpush.msrb.mxu3 %v7178_v32 }
 0x3a4   :  { %2587 = vmatpush.msrb.mxu0 %v6868_v56  ;;  %2627 = vmatpush.msrb.mxu2 %v6872_v14  ;;  %v7204_v56 = vld [vmem:[#allocation15 + $0x3e0] sm:$0xff]  ;;  %v7208_v14 = vld [vmem:[#allocation15 + $0x3e8] sm:$0xff] }
 0x3a5   :  { %2619 = vmatpush.msrb.mxu1 %v7183_v27  ;;  %2659 = vmatpush.msrb.mxu3 %v7186_v47 }
 0x3a6   :  { %2588 = vmatpush.msrb.mxu0 %v6876_v52  ;;  %2628 = vmatpush.msrb.mxu2 %v6880_v29  ;;  %v7212_v52 = vld [vmem:[#allocation15 + $0x3c0] sm:$0xff]  ;;  %v7216_v29 = vld [vmem:[#allocation15 + $0x3c8] sm:$0xff] }
 0x3a7   :  { %2620 = vmatpush.msrb.mxu1 %v7191_v24  ;;  %2660 = vmatpush.msrb.mxu3 %v7194_v0 }
 0x3a8   :  { %2496 = vmatmul.f32.vlgmr.msra.gmra.mxu0 %v7155_v9  ;;  %2536 = vmatmul.f32.vlgmr.msra.gmra.mxu2 %v7155_v9 }
 0x3a9   :  { %2589 = vmatpush.msrb.mxu0 %v6885_v16  ;;  %2621 = vmatmul.f32.vlgmr.msrb.gmra.mxu1 %v7155_v9  ;;  %v7220_v16 = vld [vmem:[#allocation15 + $0x3a0] sm:$0xff] }
 0x3aa   :  { %2629 = vmatpush.msrb.mxu2 %v6888_v18  ;;  %2661 = vmatmul.f32.vlgmr.msrb.gmra.mxu3 %v7155_v9  ;;  %v7224_v18 = vld [vmem:[#allocation15 + $0x3a8] sm:$0xff] }
 0x3ab   :  { %2590 = vmatpush.msrb.mxu0 %v6892_v20  ;;  %2707 = vmatpush.msra.mxu1 %v7204_v56  ;;  %v7228_v20 = vld [vmem:[#allocation15 + $0x380] sm:$0xff] }
 0x3ac   :  { %2630 = vmatpush.msrb.mxu2 %v6896_v40  ;;  %2747 = vmatpush.msra.mxu3 %v7208_v14  ;;  %v7232_v40 = vld [vmem:[#allocation15 + $0x388] sm:$0xff] }
 0x3ad   :  { %2591 = vmatpush.msrb.mxu0 %v6900_v12  ;;  %2708 = vmatpush.msra.mxu1 %v7212_v52  ;;  %10336 = vst [vmem:[#allocation114_spill] sm:$0xff] %v7232_v40  ;;  %v7236_v12 = vld [vmem:[#allocation15 + $0x360] sm:$0xff] }
 0x3ae   :  { %2631 = vmatpush.msrb.mxu2 %v6904_v5  ;;  %2748 = vmatpush.msra.mxu3 %v7216_v29  ;;  %10337 = vst [vmem:[#allocation115_spill] sm:$0xff] %v7236_v12  ;;  %v7240_v5 = vld [vmem:[#allocation15 + $0x368] sm:$0xff] }
 0x3af   :  { %2592 = vmatpush.msrb.mxu0 %v6908_v42  ;;  %2709 = vmatpush.msra.mxu1 %v7220_v16  ;;  %10338 = vst [vmem:[#allocation116_spill] sm:$0xff] %v7240_v5  ;;  %v7244_v42 = vld [vmem:[#allocation15 + $0x340] sm:$0xff] }
 0x3b0   :  { %2632 = vmatpush.msrb.mxu2 %v6912_v8  ;;  %2749 = vmatpush.msra.mxu3 %v7224_v18  ;;  %10339 = vst [vmem:[#allocation117_spill] sm:$0xff] %v7244_v42  ;;  %v10340_v8 = vld [vmem:[#allocation25_spill] sm:$0xff] }
 0x3b1   :  { %2593 = vmatpush.msrb.mxu0 %v6916_v2  ;;  %2710 = vmatpush.msra.mxu1 %v7228_v20  ;;  %v7248_v2 = vld [vmem:[#allocation15 + $0x348] sm:$0xff] }
 0x3b2   :  { %2633 = vmatpush.msrb.mxu2 %v6920_v17  ;;  %2750 = vmatpush.msra.mxu3 %v7232_v40  ;;  %10341 = vst [vmem:[#allocation118_spill] sm:$0xff] %v7248_v2  ;;  %v10342_v17 = vld [vmem:[#allocation92_spill] sm:$0xff] }
 0x3b3   :  { %2594 = vmatpush.msrb.mxu0 %v6924_v38  ;;  %2711 = vmatpush.msra.mxu1 %v7236_v12  ;;  %v7252_v38 = vld [vmem:[#allocation15 + $0x320] sm:$0xff]  ;;  %v10467_v12 = vld [vmem:[#allocation42_spill] sm:$0xff] }
 0x3b4   :  { %2634 = vmatpush.msrb.mxu2 %v6928_v36  ;;  %2751 = vmatpush.msra.mxu3 %v7240_v5  ;;  %10343 = vst [vmem:[#allocation119_spill] sm:$0xff] %v7252_v38  ;;  %v10344_v36 = vld [vmem:[#allocation93_spill] sm:$0xff] }
 0x3b5   :  { %2595 = vmatpush.msrb.mxu0 %v6932_v43  ;;  %2712 = vmatpush.msra.mxu1 %v7244_v42  ;;  %v10346_v43 = vld [vmem:[#allocation94_spill] sm:$0xff] }
 0x3b6   :  { %2635 = vmatpush.msrb.mxu2 %v10340_v8  ;;  %2752 = vmatpush.msra.mxu3 %v7248_v2  ;;  %v7264_v8 = vld [vmem:[#allocation15 + $0x308] sm:$0xff] }
 0x3b7   :  { %2596 = vmatpush.msrb.mxu0 %v10342_v17  ;;  %2713 = vmatpush.msra.mxu1 %v7252_v38  ;;  %10349 = vst [vmem:[#allocation126_spill] sm:$0xff] %v7264_v8  ;;  %v10350_v17 = vld [vmem:[#allocation96_spill] sm:$0xff] }
 0x3b8   :  { %2636 = vmatpush.msrb.mxu2 %v10344_v36  ;;  %2753 = vmatpush.msra.mxu3 %v7256_v22  ;;  %v7268_v38 = vld [vmem:[#allocation15 + $0x2e0] sm:$0xff]  ;;  %v10352_v36 = vld [vmem:[#allocation101_spill] sm:$0xff] }
 0x3b9   :  { %2597 = vmatpush.msrb.mxu0 %v10346_v43  ;;  %2714 = vmatpush.msra.mxu1 %v7260_v30  ;;  %10351 = vst [vmem:[#allocation129_spill] sm:$0xff] %v7268_v38  ;;  %v7272_v22 = vld [vmem:[#allocation15 + $0x2e8] sm:$0xff]  ;;  %v10354_v43 = vld [vmem:[#allocation102_spill] sm:$0xff]  ;;  %v7276_v30 = vld [vmem:[#allocation15 + $0x2c0] sm:$0xff] }
 0x3ba   :  { %2637 = vmatpush.msrb.mxu2 %v10348_v62  ;;  %2754 = vmatpush.msra.mxu3 %v7264_v8  ;;  %10353 = vst [vmem:[#allocation130_spill] sm:$0xff] %v7272_v22  ;;  %v10356_v62 = vld [vmem:[#allocation103_spill] sm:$0xff]  ;;  %v7280_v8 = vld [vmem:[#allocation15 + $0x2c8] sm:$0xff] }
 0x3bb   :  { %2598 = vmatpush.msrb.mxu0 %v10350_v17  ;;  %2715 = vmatpush.msra.mxu1 %v7268_v38  ;;  %10355 = vst [vmem:[#allocation133_spill] sm:$0xff] %v7276_v30  ;;  %v10358_v17 = vld [vmem:[#allocation104_spill] sm:$0xff] }
 0x3bc   :  { %2638 = vmatpush.msrb.mxu2 %v10352_v36  ;;  %2755 = vmatpush.msra.mxu3 %v7272_v22  ;;  %10357 = vst [vmem:[#allocation134_spill] sm:$0xff] %v7280_v8  ;;  %v7284_v38 = vld [vmem:[#allocation15 + $0x2a0] sm:$0xff]  ;;  %v10360_v36 = vld [vmem:[#allocation105_spill] sm:$0xff] }
 0x3bd   :  { %2599 = vmatpush.msrb.mxu0 %v10354_v43  ;;  %2716 = vmatpush.msra.mxu1 %v7276_v30  ;;  %10359 = vst [vmem:[#allocation137_spill] sm:$0xff] %v7284_v38  ;;  %v7290_v43 = vld [vmem:[#allocation15 + $0x2a8] sm:$0xff] }
 0x3be   :  { %2639 = vmatpush.msrb.mxu2 %v10356_v62  ;;  %2756 = vmatpush.msra.mxu3 %v7280_v8  ;;  %10361 = vst [vmem:[#allocation138_spill] sm:$0xff] %v7290_v43  ;;  %v7293_v62 = vld [vmem:[#allocation15 + $0x280] sm:$0xff] }
 0x3bf   :  { %2600 = vmatpush.msrb.mxu0 %v10358_v17  ;;  %2717 = vmatpush.msra.mxu1 %v7284_v38  ;;  %10362 = vst [vmem:[#allocation141_spill] sm:$0xff] %v7293_v62  ;;  %v7296_v8 = vld [vmem:[#allocation15 + $0x1e0] sm:$0xff]  ;;  %v7299_v17 = vld [vmem:[#allocation15 + $0x288] sm:$0xff] }
 0x3c0   :  { %2640 = vmatpush.msrb.mxu2 %v10360_v36  ;;  %2601 = vmatmul.f32.vlgmr.msrb.gmra.mxu0 %v7155_v9  ;;  %10363 = vst [vmem:[#allocation144_spill] sm:$0xff] %v7296_v8  ;;  %v7302_v36 = vld [vmem:[#allocation15 + $0x1e8] sm:$0xff] }
 0x3c1   :  { %2641 = vmatmul.f32.vlgmr.msrb.gmra.mxu2 %v7155_v9  ;;  %2757 = vmatpush.msra.mxu3 %v7290_v43  ;;  %10364 = vst [vmem:[#allocation147_spill] sm:$0xff] %v7299_v17  ;;  %v7305_v9 = vld [vmem:[#allocation15 + $0x260] sm:$0xff] }
 0x3c2   :  { %2718 = vmatpush.msra.mxu1 %v7293_v62  ;;  %2687 = vmatpush.msra.mxu0 %v7296_v8  ;;  %10365 = vst [vmem:[#allocation148_spill] sm:$0xff] %v7302_v36  ;;  %v7308_v43 = vld [vmem:[#allocation15 + $0x1c0] sm:$0xff]  ;;  %v7311_v62 = vld [vmem:[#allocation15 + $0x268] sm:$0xff] }
 0x3c3   :  { %2758 = vmatpush.msra.mxu3 %v7299_v17  ;;  %2727 = vmatpush.msra.mxu2 %v7302_v36  ;;  %10366 = vst [vmem:[#allocation151_spill] sm:$0xff] %v7305_v9  ;;  %v7314_v8 = vld [vmem:[#allocation15 + $0x1c8] sm:$0xff]  ;;  %v7317_v17 = vld [vmem:[#allocation15 + $0x240] sm:$0xff] }
 0x3c4   :  { %2719 = vmatpush.msra.mxu1 %v7305_v9  ;;  %10367 = vst [vmem:[#allocation152_spill] sm:$0xff] %v7308_v43  ;;  %2688 = vmatpush.msra.mxu0 %v7308_v43  ;;  %v7320_v36 = vld [vmem:[#allocation15 + $0x1a0] sm:$0xff]  ;;  %v7323_v9 = vld [vmem:[#allocation15 + $0x248] sm:$0xff] }
 0x3c5   :  { %10368 = vst [vmem:[#allocation155_spill] sm:$0xff] %v7311_v62  ;;  %2759 = vmatpush.msra.mxu3 %v7311_v62  ;;  %2728 = vmatpush.msra.mxu2 %v7314_v8  ;;  %v7326_v43 = vld [vmem:[#allocation15 + $0x1a8] sm:$0xff]  ;;  %v7329_v62 = vld [vmem:[#allocation15 + $0x220] sm:$0xff] }
 0x3c6   :  { %10369 = vst [vmem:[#allocation156_spill] sm:$0xff] %v7314_v8  ;;  %2720 = vmatpush.msra.mxu1 %v7317_v17  ;;  %2689 = vmatpush.msra.mxu0 %v7320_v36  ;;  %v7332_v8 = vld [vmem:[#allocation15 + $0x180] sm:$0xff] }
 0x3c7   :  { %10370 = vst [vmem:[#allocation161_spill] sm:$0xff] %v7317_v17  ;;  %2760 = vmatpush.msra.mxu3 %v7323_v9  ;;  %2729 = vmatpush.msra.mxu2 %v7326_v43  ;;  %v7335_v17 = vld [vmem:[#allocation15 + $0x228] sm:$0xff] }
 0x3c8   :  { %10371 = vst [vmem:[#allocation164_spill] sm:$0xff] %v7320_v36  ;;  %2721 = vmatpush.msra.mxu1 %v7329_v62  ;;  %2690 = vmatpush.msra.mxu0 %v7332_v8  ;;  %v7338_v36 = vld [vmem:[#allocation15 + $0x188] sm:$0xff] }
 0x3c9   :  { %10372 = vst [vmem:[#allocation167_spill] sm:$0xff] %v7323_v9  ;;  %2761 = vmatpush.msra.mxu3 %v7335_v17  ;;  %2730 = vmatpush.msra.mxu2 %v7338_v36  ;;  %v7341_v9 = vld [vmem:[#allocation15 + $0x200] sm:$0xff] }
 0x3ca   :  { %10373 = vst [vmem:[#allocation168_spill] sm:$0xff] %v7326_v43  ;;  %2722 = vmatpush.msra.mxu1 %v7341_v9  ;;  %v7344_v43 = vld [vmem:[#allocation15 + $0x160] sm:$0xff] }
 0x3cb   :  { %10374 = vst [vmem:[#allocation171_spill] sm:$0xff] %v7329_v62  ;;  %2691 = vmatpush.msra.mxu0 %v7344_v43  ;;  %v7347_v62 = vld [vmem:[#allocation15 + $0x208] sm:$0xff] }
 0x3cc   :  { %10375 = vst [vmem:[#allocation172_spill] sm:$0xff] %v7332_v8  ;;  %2762 = vmatpush.msra.mxu3 %v7347_v62  ;;  %v7350_v8 = vld [vmem:[#allocation15 + $0x168] sm:$0xff] }
 0x3cd   :  { %10376 = vst [vmem:[#allocation175_spill] sm:$0xff] %v7335_v17  ;;  %2731 = vmatpush.msra.mxu2 %v7350_v8  ;;  %v7353_v17 = vld [vmem:[#allocation15 + $0x3f0] sm:$0xff] }
 0x3ce   :  { %10377 = vst [vmem:[#allocation123_spill] sm:$0xff] %v7338_v36  ;;  %2787 = vmatpush.msrb.mxu1 %v7353_v17  ;;  %v7356_v36 = vld [vmem:[#allocation15 + $0x3f8] sm:$0xff] }
 0x3cf   :  { %10378 = vst [vmem:[#allocation124_spill] sm:$0xff] %v7341_v9  ;;  %2827 = vmatpush.msrb.mxu3 %v7356_v36  ;;  %v7359_v9 = vld [vmem:[#allocation15 + $0x140] sm:$0xff] }
 0x3d0   :  { %10379 = vst [vmem:[#allocation176_spill] sm:$0xff] %v7344_v43  ;;  %2692 = vmatpush.msra.mxu0 %v7359_v9  ;;  %v7362_v43 = vld [vmem:[#allocation15 + $0x148] sm:$0xff] }
 0x3d1   :  { %10380 = vst [vmem:[#allocation127_spill] sm:$0xff] %v7347_v62  ;;  %2732 = vmatpush.msra.mxu2 %v7362_v43  ;;  %v7365_v62 = vld [vmem:[#allocation15 + $0x3d0] sm:$0xff] }
 0x3d2   :  { %10381 = vst [vmem:[#allocation181_spill] sm:$0xff] %v7350_v8  ;;  %2788 = vmatpush.msrb.mxu1 %v7365_v62  ;;  %v7368_v8 = vld [vmem:[#allocation15 + $0x3d8] sm:$0xff] }
 0x3d3   :  { %10382 = vst [vmem:[#allocation128_spill] sm:$0xff] %v7353_v17  ;;  %2828 = vmatpush.msrb.mxu3 %v7368_v8  ;;  %v7371_v17 = vld [vmem:[#allocation15 + $0x120] sm:$0xff] }
 0x3d4   :  { %10383 = vst [vmem:[#allocation184_spill] sm:$0xff] %v7356_v36  ;;  %2693 = vmatpush.msra.mxu0 %v7371_v17  ;;  %v7374_v36 = vld [vmem:[#allocation15 + $0x128] sm:$0xff] }
 0x3d5   :  { %10384 = vst [vmem:[#allocation131_spill] sm:$0xff] %v7359_v9  ;;  %2733 = vmatpush.msra.mxu2 %v7374_v36  ;;  %v7377_v9 = vld [vmem:[#allocation15 + $0x3b0] sm:$0xff] }
 0x3d6   :  { %10385 = vst [vmem:[#allocation187_spill] sm:$0xff] %v7362_v43  ;;  %2789 = vmatpush.msrb.mxu1 %v7377_v9  ;;  %v7380_v43 = vld [vmem:[#allocation15 + $0x3b8] sm:$0xff] }
 0x3d7   :  { %10386 = vst [vmem:[#allocation132_spill] sm:$0xff] %v7365_v62  ;;  %2829 = vmatpush.msrb.mxu3 %v7380_v43  ;;  %v7383_v62 = vld [vmem:[#allocation15 + $0x100] sm:$0xff] }
 0x3d8   :  { %10387 = vst [vmem:[#allocation188_spill] sm:$0xff] %v7368_v8  ;;  %2694 = vmatpush.msra.mxu0 %v7383_v62  ;;  %v7386_v8 = vld [vmem:[#allocation15 + $0x108] sm:$0xff] }
 0x3d9   :  { %10388 = vst [vmem:[#allocation135_spill] sm:$0xff] %v7371_v17  ;;  %2734 = vmatpush.msra.mxu2 %v7386_v8  ;;  %v7389_v17 = vld [vmem:[#allocation15 + $0x390] sm:$0xff] }
 0x3da   :  { %10389 = vst [vmem:[#allocation191_spill] sm:$0xff] %v7374_v36  ;;  %2790 = vmatpush.msrb.mxu1 %v7389_v17  ;;  %v7392_v36 = vld [vmem:[#allocation15 + $0x398] sm:$0xff] }
 0x3db   :  { %10390 = vst [vmem:[#allocation136_spill] sm:$0xff] %v7377_v9  ;;  %2830 = vmatpush.msrb.mxu3 %v7392_v36  ;;  %v7395_v9 = vld [vmem:[#allocation15 + $0xe0] sm:$0xff] }
 0x3dc   :  { %10391 = vst [vmem:[#allocation192_spill] sm:$0xff] %v7380_v43  ;;  %2695 = vmatpush.msra.mxu0 %v7395_v9  ;;  %v7398_v43 = vld [vmem:[#allocation15 + $0xe8] sm:$0xff] }
 0x3dd   :  { %10392 = vst [vmem:[#allocation139_spill] sm:$0xff] %v7383_v62  ;;  %2735 = vmatpush.msra.mxu2 %v7398_v43  ;;  %v7401_v62 = vld [vmem:[#allocation15 + $0x370] sm:$0xff] }
 0x3de   :  { %10393 = vst [vmem:[#allocation140_spill] sm:$0xff] %v7386_v8  ;;  %2791 = vmatpush.msrb.mxu1 %v7401_v62  ;;  %v7404_v8 = vld [vmem:[#allocation15 + $0x378] sm:$0xff] }
 0x3df   :  { %10394 = vst [vmem:[#allocation145_spill] sm:$0xff] %v7389_v17  ;;  %2831 = vmatpush.msrb.mxu3 %v7404_v8  ;;  %v7407_v17 = vld [vmem:[#allocation15 + $0xc0] sm:$0xff] }
 0x3e0   :  { %10395 = vst [vmem:[#allocation146_spill] sm:$0xff] %v7392_v36  ;;  %2696 = vmatpush.msra.mxu0 %v7407_v17  ;;  %v7410_v36 = vld [vmem:[#allocation15 + $0xc8] sm:$0xff] }
 0x3e1   :  { %10396 = vst [vmem:[#allocation149_spill] sm:$0xff] %v7395_v9  ;;  %2736 = vmatpush.msra.mxu2 %v7410_v36  ;;  %v7413_v9 = vld [vmem:[#allocation15 + $0x350] sm:$0xff] }
 0x3e2   :  { %10397 = vst [vmem:[#allocation150_spill] sm:$0xff] %v7398_v43  ;;  %2792 = vmatpush.msrb.mxu1 %v7413_v9  ;;  %v7416_v43 = vld [vmem:[#allocation15 + $0x358] sm:$0xff] }
 0x3e3   :  { %10398 = vst [vmem:[#allocation153_spill] sm:$0xff] %v7401_v62  ;;  %2832 = vmatpush.msrb.mxu3 %v7416_v43  ;;  %v7419_v62 = vld [vmem:[#allocation15 + $0xa0] sm:$0xff] }
 0x3e4   :  { %10399 = vst [vmem:[#allocation154_spill] sm:$0xff] %v7404_v8  ;;  %2697 = vmatpush.msra.mxu0 %v7419_v62  ;;  %v7422_v8 = vld [vmem:[#allocation15 + $0xa8] sm:$0xff] }
 0x3e5   :  { %10400 = vst [vmem:[#allocation159_spill] sm:$0xff] %v7407_v17  ;;  %2737 = vmatpush.msra.mxu2 %v7422_v8  ;;  %v7425_v17 = vld [vmem:[#allocation15 + $0x330] sm:$0xff] }
 0x3e6   :  { %10401 = vst [vmem:[#allocation160_spill] sm:$0xff] %v7410_v36  ;;  %2793 = vmatpush.msrb.mxu1 %v7425_v17  ;;  %v7428_v36 = vld [vmem:[#allocation15 + $0x338] sm:$0xff] }
 0x3e7   :  { %10402 = vst [vmem:[#allocation165_spill] sm:$0xff] %v7413_v9  ;;  %2833 = vmatpush.msrb.mxu3 %v7428_v36  ;;  %v7431_v9 = vld [vmem:[#allocation15 + $0x80] sm:$0xff] }
 0x3e8   :  { %10403 = vst [vmem:[#allocation166_spill] sm:$0xff] %v7416_v43  ;;  %2698 = vmatpush.msra.mxu0 %v7431_v9  ;;  %v7434_v43 = vld [vmem:[#allocation15 + $0x88] sm:$0xff] }
 0x3e9   :  { %10404 = vst [vmem:[#allocation169_spill] sm:$0xff] %v7419_v62  ;;  %2738 = vmatpush.msra.mxu2 %v7434_v43  ;;  %v7437_v62 = vld [vmem:[#allocation15 + $0x310] sm:$0xff] }
 0x3ea   :  { %10405 = vst [vmem:[#allocation170_spill] sm:$0xff] %v7422_v8  ;;  %2794 = vmatpush.msrb.mxu1 %v7437_v62  ;;  %v7440_v8 = vld [vmem:[#allocation15 + $0x318] sm:$0xff] }
 0x3eb   :  { %10406 = vst [vmem:[#allocation173_spill] sm:$0xff] %v7425_v17  ;;  %2834 = vmatpush.msrb.mxu3 %v7440_v8  ;;  %v7443_v17 = vld [vmem:[#allocation15 + $0x60] sm:$0xff] }
 0x3ec   :  { %10407 = vst [vmem:[#allocation174_spill] sm:$0xff] %v7428_v36  ;;  %2699 = vmatpush.msra.mxu0 %v7443_v17  ;;  %v7446_v36 = vld [vmem:[#allocation15 + $0x68] sm:$0xff] }
 0x3ed   :  { %10408 = vst [vmem:[#allocation179_spill] sm:$0xff] %v7431_v9  ;;  %2739 = vmatpush.msra.mxu2 %v7446_v36  ;;  %v7449_v9 = vld [vmem:[#allocation15 + $0x2f0] sm:$0xff] }
 0x3ee   :  { %10409 = vst [vmem:[#allocation180_spill] sm:$0xff] %v7434_v43  ;;  %2795 = vmatpush.msrb.mxu1 %v7449_v9  ;;  %v7452_v43 = vld [vmem:[#allocation15 + $0x2f8] sm:$0xff] }
 0x3ef   :  { %10410 = vst [vmem:[#allocation185_spill] sm:$0xff] %v7437_v62  ;;  %2835 = vmatpush.msrb.mxu3 %v7452_v43  ;;  %v7455_v62 = vld [vmem:[#allocation15 + $0x40] sm:$0xff] }
 0x3f0   :  { %10411 = vst [vmem:[#allocation186_spill] sm:$0xff] %v7440_v8  ;;  %2700 = vmatpush.msra.mxu0 %v7455_v62  ;;  %v7458_v8 = vld [vmem:[#allocation15 + $0x48] sm:$0xff] }
 0x3f1   :  { %10412 = vst [vmem:[#allocation189_spill] sm:$0xff] %v7443_v17  ;;  %2740 = vmatpush.msra.mxu2 %v7458_v8  ;;  %v7461_v17 = vld [vmem:[#allocation15 + $0x2d0] sm:$0xff] }
 0x3f2   :  { %10413 = vst [vmem:[#allocation190_spill] sm:$0xff] %v7446_v36  ;;  %2796 = vmatpush.msrb.mxu1 %v7461_v17  ;;  %v7464_v36 = vld [vmem:[#allocation15 + $0x2d8] sm:$0xff] }
 0x3f3   :  { %10414 = vst [vmem:[#allocation193_spill] sm:$0xff] %v7449_v9  ;;  %2836 = vmatpush.msrb.mxu3 %v7464_v36  ;;  %v7467_v9 = vld [vmem:[#allocation15 + $0x20] sm:$0xff] }
 0x3f4   :  { %10415 = vst [vmem:[#allocation194_spill] sm:$0xff] %v7452_v43  ;;  %2701 = vmatpush.msra.mxu0 %v7467_v9  ;;  %v7470_v43 = vld [vmem:[#allocation15 + $0x28] sm:$0xff] }
 0x3f5   :  { %10416 = vst [vmem:[#allocation199_spill] sm:$0xff] %v7455_v62  ;;  %2741 = vmatpush.msra.mxu2 %v7470_v43  ;;  %v7473_v62 = vld [vmem:[#allocation15 + $0x2b0] sm:$0xff] }
 0x3f6   :  { %10417 = vst [vmem:[#allocation200_spill] sm:$0xff] %v7458_v8  ;;  %2797 = vmatpush.msrb.mxu1 %v7473_v62  ;;  %v7476_v8 = vld [vmem:[#allocation15 + $0x2b8] sm:$0xff] }
 0x3f7   :  { %10418 = vst [vmem:[#allocation205_spill] sm:$0xff] %v7461_v17  ;;  %2837 = vmatpush.msrb.mxu3 %v7476_v8  ;;  %v7479_v17 = vld [vmem:[#allocation15] sm:$0xff] }
 0x3f8   :  { %10419 = vst [vmem:[#allocation75_spill] sm:$0xff] %v7464_v36  ;;  %2702 = vmatpush.msra.mxu0 %v7479_v17  ;;  %v7482_v36 = vld [vmem:[#allocation15 + $0x8] sm:$0xff] }
 0x3f9   :  { %10420 = vst [vmem:[#allocation76_spill] sm:$0xff] %v7467_v9  ;;  %2742 = vmatpush.msra.mxu2 %v7482_v36  ;;  %v7485_v9 = vld [vmem:[#allocation15 + $0x290] sm:$0xff] }
 0x3fa   :  { %10421 = vst [vmem:[#allocation77_spill] sm:$0xff] %v7470_v43  ;;  %2798 = vmatpush.msrb.mxu1 %v7485_v9  ;;  %v7488_v43 = vld [vmem:[#allocation15 + $0x298] sm:$0xff] }
 0x3fb   :  { %10422 = vst [vmem:[#allocation40_spill] sm:$0xff] %v7473_v62  ;;  %2838 = vmatpush.msrb.mxu3 %v7488_v43  ;;  %v7491_v62 = vld [vmem:[#allocation15 + $0x1f0] sm:$0xff] }
 0x3fc   :  { %10423 = vst [vmem:[#allocation142_spill] sm:$0xff] %v7476_v8  ;;  %2767 = vmatpush.msrb.mxu0 %v7491_v62  ;;  %v7494_v8 = vld [vmem:[#allocation15 + $0x1f8] sm:$0xff] }
 0x3fd   :  { %10424 = vst [vmem:[#allocation41_spill] sm:$0xff] %v7479_v17  ;;  %2807 = vmatpush.msrb.mxu2 %v7494_v8  ;;  %v7497_v17 = vld [vmem:[#allocation15 + $0x270] sm:$0xff] }
 0x3fe   :  { %10425 = vst [vmem:[#allocation54_spill] sm:$0xff] %v7482_v36  ;;  %2799 = vmatpush.msrb.mxu1 %v7497_v17  ;;  %v7500_v36 = vld [vmem:[#allocation15 + $0x278] sm:$0xff] }
 0x3ff   :  { %10426 = vst [vmem:[#allocation143_spill] sm:$0xff] %v7485_v9  ;;  %2839 = vmatpush.msrb.mxu3 %v7500_v36  ;;  %v7503_v9 = vld [vmem:[#allocation15 + $0x1d0] sm:$0xff] }
 0x400   :  { %10427 = vst [vmem:[#allocation55_spill] sm:$0xff] %v7488_v43  ;;  %2768 = vmatpush.msrb.mxu0 %v7503_v9  ;;  %v7506_v43 = vld [vmem:[#allocation15 + $0x1d8] sm:$0xff] }
 0x401   :  { %10428 = vst [vmem:[#allocation157_spill] sm:$0xff] %v7491_v62  ;;  %2808 = vmatpush.msrb.mxu2 %v7506_v43  ;;  %v7509_v62 = vld [vmem:[#allocation15 + $0x250] sm:$0xff] }
 0x402   :  { %10429 = vst [vmem:[#allocation56_spill] sm:$0xff] %v7494_v8  ;;  %2800 = vmatpush.msrb.mxu1 %v7509_v62  ;;  %v7512_v8 = vld [vmem:[#allocation15 + $0x258] sm:$0xff] }
 0x403   :  { %10430 = vst [vmem:[#allocation26_spill] sm:$0xff] %v7497_v17  ;;  %2840 = vmatpush.msrb.mxu3 %v7512_v8  ;;  %v7515_v17 = vld [vmem:[#allocation15 + $0x1b0] sm:$0xff] }
 0x404   :  { %10431 = vst [vmem:[#allocation158_spill] sm:$0xff] %v7500_v36  ;;  %2769 = vmatpush.msrb.mxu0 %v7515_v17  ;;  %v7518_v36 = vld [vmem:[#allocation15 + $0x1b8] sm:$0xff] }
 0x405   :  { %10432 = vst [vmem:[#allocation57_spill] sm:$0xff] %v7503_v9  ;;  %2809 = vmatpush.msrb.mxu2 %v7518_v36  ;;  %v7521_v9 = vld [vmem:[#allocation15 + $0x230] sm:$0xff] }
 0x406   :  { %10433 = vst [vmem:[#allocation39_spill] sm:$0xff] %v7506_v43  ;;  %2801 = vmatpush.msrb.mxu1 %v7521_v9  ;;  %v7524_v43 = vld [vmem:[#allocation15 + $0x238] sm:$0xff] }
 0x407   :  { %10434 = vst [vmem:[#allocation25_spill] sm:$0xff] %v7509_v62  ;;  %2841 = vmatpush.msrb.mxu3 %v7524_v43  ;;  %v7527_v62 = vld [vmem:[#allocation15 + $0x190] sm:$0xff] }
 0x408   :  { %10435 = vst [vmem:[#allocation92_spill] sm:$0xff] %v7512_v8  ;;  %2770 = vmatpush.msrb.mxu0 %v7527_v62  ;;  %v7530_v8 = vld [vmem:[#allocation15 + $0x198] sm:$0xff] }
 0x409   :  { %10436 = vst [vmem:[#allocation93_spill] sm:$0xff] %v7515_v17  ;;  %2810 = vmatpush.msrb.mxu2 %v7530_v8  ;;  %v7533_v17 = vld [vmem:[#allocation15 + $0x210] sm:$0xff] }
 0x40a   :  { %10437 = vst [vmem:[#allocation94_spill] sm:$0xff] %v7518_v36  ;;  %2802 = vmatpush.msrb.mxu1 %v7533_v17  ;;  %v7536_v36 = vld [vmem:[#allocation15 + $0x218] sm:$0xff] }
 0x40b   :  { %10438 = vst [vmem:[#allocation95_spill] sm:$0xff] %v7521_v9  ;;  %2842 = vmatpush.msrb.mxu3 %v7536_v36  ;;  %v7539_v9 = vld [vmem:[#allocation15 + $0x170] sm:$0xff] }
 0x40c   :  { %10439 = vst [vmem:[#allocation96_spill] sm:$0xff] %v7524_v43  ;;  %2771 = vmatpush.msrb.mxu0 %v7539_v9  ;;  %v7542_v43 = vld [vmem:[#allocation15 + $0x178] sm:$0xff] }
 0x40d   :  { %10440 = vst [vmem:[#allocation101_spill] sm:$0xff] %v7527_v62  ;;  %2811 = vmatpush.msrb.mxu2 %v7542_v43  ;;  %v7545_v62 = vld [vmem:[#allocation15 + $0x150] sm:$0xff] }
 0x40e   :  { %10441 = vst [vmem:[#allocation102_spill] sm:$0xff] %v7530_v8  ;;  %2772 = vmatpush.msrb.mxu0 %v7545_v62  ;;  %v7548_v8 = vld [vmem:[#allocation15 + $0x158] sm:$0xff] }
 0x40f   :  { %10442 = vst [vmem:[#allocation103_spill] sm:$0xff] %v7533_v17  ;;  %2812 = vmatpush.msrb.mxu2 %v7548_v8  ;;  %v7551_v17 = vld [vmem:[#allocation15 + $0x130] sm:$0xff] }
 0x410   :  { %10443 = vst [vmem:[#allocation104_spill] sm:$0xff] %v7536_v36  ;;  %2773 = vmatpush.msrb.mxu0 %v7551_v17  ;;  %v7554_v36 = vld [vmem:[#allocation15 + $0x138] sm:$0xff] }
 0x411   :  { %10444 = vst [vmem:[#allocation105_spill] sm:$0xff] %v7539_v9  ;;  %2813 = vmatpush.msrb.mxu2 %v7554_v36  ;;  %v7557_v9 = vld [vmem:[#allocation15 + $0x110] sm:$0xff] }
 0x412   :  { %10445 = vst [vmem:[#allocation217_spill] sm:$0xff] %v7542_v43  ;;  %2774 = vmatpush.msrb.mxu0 %v7557_v9  ;;  %v7560_v43 = vld [vmem:[#allocation15 + $0x118] sm:$0xff] }
 0x413   :  { %10446 = vst [vmem:[#allocation218_spill] sm:$0xff] %v7545_v62  ;;  %2814 = vmatpush.msrb.mxu2 %v7560_v43  ;;  %v7563_v62 = vld [vmem:[#allocation15 + $0xf0] sm:$0xff] }
 0x414   :  { %10447 = vst [vmem:[#allocation219_spill] sm:$0xff] %v7548_v8  ;;  %2775 = vmatpush.msrb.mxu0 %v7563_v62  ;;  %v7566_v8 = vld [vmem:[#allocation15 + $0xf8] sm:$0xff] }
 0x415   :  { %10448 = vst [vmem:[#allocation220_spill] sm:$0xff] %v7551_v17  ;;  %2815 = vmatpush.msrb.mxu2 %v7566_v8  ;;  %v7569_v17 = vld [vmem:[#allocation15 + $0xd0] sm:$0xff] }
 0x416   :  { %10449 = vst [vmem:[#allocation221_spill] sm:$0xff] %v7554_v36  ;;  %2776 = vmatpush.msrb.mxu0 %v7569_v17  ;;  %v7572_v36 = vld [vmem:[#allocation15 + $0xd8] sm:$0xff] }
 0x417   :  { %10450 = vst [vmem:[#allocation222_spill] sm:$0xff] %v7557_v9  ;;  %2816 = vmatpush.msrb.mxu2 %v7572_v36  ;;  %v7575_v9 = vld [vmem:[#allocation15 + $0xb0] sm:$0xff] }
 0x418   :  { %10451 = vst [vmem:[#allocation223_spill] sm:$0xff] %v7560_v43  ;;  %2777 = vmatpush.msrb.mxu0 %v7575_v9  ;;  %v7578_v43 = vld [vmem:[#allocation15 + $0xb8] sm:$0xff] }
 0x419   :  { %10452 = vst [vmem:[#allocation224_spill] sm:$0xff] %v7563_v62  ;;  %2817 = vmatpush.msrb.mxu2 %v7578_v43  ;;  %v7581_v62 = vld [vmem:[#allocation15 + $0x90] sm:$0xff] }
 0x41a   :  { %10453 = vst [vmem:[#allocation225_spill] sm:$0xff] %v7566_v8  ;;  %2778 = vmatpush.msrb.mxu0 %v7581_v62  ;;  %v7584_v8 = vld [vmem:[#allocation15 + $0x98] sm:$0xff] }
 0x41b   :  { %10454 = vst [vmem:[#allocation226_spill] sm:$0xff] %v7569_v17  ;;  %2818 = vmatpush.msrb.mxu2 %v7584_v8  ;;  %v7587_v17 = vld [vmem:[#allocation15 + $0x70] sm:$0xff] }
 0x41c   :  { %10455 = vst [vmem:[#allocation227_spill] sm:$0xff] %v7572_v36  ;;  %2779 = vmatpush.msrb.mxu0 %v7587_v17  ;;  %v7590_v36 = vld [vmem:[#allocation15 + $0x78] sm:$0xff] }
 0x41d   :  { %10456 = vst [vmem:[#allocation228_spill] sm:$0xff] %v7575_v9  ;;  %2819 = vmatpush.msrb.mxu2 %v7590_v36  ;;  %v7593_v9 = vld [vmem:[#allocation15 + $0x50] sm:$0xff] }
 0x41e   :  { %10457 = vst [vmem:[#allocation229_spill] sm:$0xff] %v7578_v43  ;;  %2780 = vmatpush.msrb.mxu0 %v7593_v9  ;;  %v7596_v43 = vld [vmem:[#allocation15 + $0x58] sm:$0xff] }
 0x41f   :  { %10458 = vst [vmem:[#allocation230_spill] sm:$0xff] %v7581_v62  ;;  %2820 = vmatpush.msrb.mxu2 %v7596_v43 }
 0x420   :  { %10459 = vst [vmem:[#allocation231_spill] sm:$0xff] %v7584_v8  ;;  %2781 = vmatpush.msrb.mxu0 %v6785_v44  ;;  %v2437_v8 = vpop.f32.mrf.mxu1 }
 0x421   :  { %10460 = vst [vmem:[#allocation232_spill] sm:$0xff] %v7587_v17  ;;  %2821 = vmatpush.msrb.mxu2 %v6787_v11  ;;  %v2417_v17 = vpop.f32.mrf.mxu0 }
 0x422   :  { %10461 = vst [vmem:[#allocation233_spill] sm:$0xff] %v7590_v36  ;;  %2782 = vmatpush.msrb.mxu0 %v6794_v35  ;;  %v2418_v36 = vadd.f32 %v2417_v17, %v7054_v21  ;;  %v2457_v30 = vpop.f32.mrf.mxu2 }
 0x423   :  { %10462 = vst [vmem:[#allocation234_spill] sm:$0xff] %v7593_v9  ;;  %2822 = vmatpush.msrb.mxu2 %v6796_v25  ;;  %v2477_v9 = vpop.f32.mrf.mxu3  ;;  %v2458_v22 = vadd.f32 %v2457_v30, %v7057_v59 }
 0x424   :  { %10463 = vst [vmem:[#allocation235_spill] sm:$0xff] %v7596_v43  ;;  %v2438_v62 = vadd.f32 %v2437_v8, %v2418_v36 }
 0x425   :  { %v2478_v43 = vadd.f32 %v2477_v9, %v2458_v22  ;;  %v10465_v22 = vld [vmem:[#allocation80_spill] sm:$0xff] }
 0x426   :  { %v2560_v38 = vmul.f32 0.5, %v2438_v62  ;;  %v10464_v62 = vld [vmem:[#allocation79_spill] sm:$0xff] }
 0x427   :  { %v2564_v42 = vmul.f32 0.5, %v2478_v43  ;;  %v1507_v36 = vadd.f32 %v10464_v62, %v10320_v57  ;;  %v10468_v62 = vld [vmem:[#allocation162_spill] sm:$0xff] }
 0x428   :  { %4408 = vtanh.f32 %v2560_v38  ;;  %v2517_v11 = vpop.f32.mrf.mxu1 }
 0x429   :  { %v2497_v2 = vpop.f32.mrf.mxu0  ;;  %4410 = vtanh.f32 %v2564_v42  ;;  %v1548_v9 = vadd.f32 %v10465_v22, %v1507_v36  ;;  %v10471_v36 = vld [vmem:[#allocation58_spill] sm:$0xff]  ;;  %v10472_v22 = vld [vmem:[#allocation163_spill] sm:$0xff] }
 0x42a   :  { %v2498_v44 = vadd.f32 %v2497_v2, %v7059_v49 }
 0x42b   :  { %v2537_v5 = vpop.f32.mrf.mxu2  ;;  %v2557_v8 = vpop.f32.mrf.mxu3 }
 0x42c   :  { %v2518_v35 = vadd.f32 %v2517_v11, %v2498_v44  ;;  %v2538_v17 = vadd.f32 %v2537_v5, %v7063_v7  ;;  %v10466_v11 = vld [vmem:[#allocation81_spill] sm:$0xff] }
 0x42e   :  { %v4409_v25 = vpop.eup %4408  ;;  %4412 = vtanh.f32 %v2518_v35  ;;  %v2558_v30 = vadd.f32 %v2557_v8, %v2538_v17  ;;  %v1589_v35 = vadd.f32 %v10466_v11, %v1548_v9  ;;  %v10470_v8 = vld [vmem:[#allocation43_spill] sm:$0xff] }
 0x42f   :  { %v2562_v21 = vmul.f32 0.5, %v4409_v25  ;;  %v4411_v38 = vpop.eup %4410  ;;  %v10473_v9 = vld [vmem:[#allocation59_spill] sm:$0xff] }
 0x430   :  { %v2566_v59 = vmul.f32 0.5, %v4411_v38  ;;  %v2569_v2 = vmul.f32 0.5, %v2558_v30  ;;  %v2622_v42 = vpop.f32.mrf.mxu1  ;;  %v1630_v25 = vadd.f32 %v10468_v62, %v1589_v35  ;;  %v1302_v38 = vadd.f32 %v10471_v36, %v10470_v8  ;;  %v10476_v35 = vld [vmem:[#allocation27_spill] sm:$0xff]  ;;  %v10477_v36 = vld [vmem:[#allocation178_spill] sm:$0xff] }
 0x431   :  { %v2563_v43 = vadd.f32 0.5, %v2562_v21  ;;  %v2666_v40 = vadd.f32 %v2622_v42, %v10467_v12 }
 0x432   :  { %v2567_v44 = vadd.f32 0.5, %v2566_v59  ;;  %4414 = vtanh.f32 %v2569_v2  ;;  %v1671_v2 = vadd.f32 %v10472_v22, %v1630_v25  ;;  %v1343_v11 = vadd.f32 %v10473_v9, %v1302_v38 }
 0x433   :  { %v2673_v21 = vmul.f32 0.5, %v2666_v40  ;;  %v2662_v8 = vpop.f32.mrf.mxu3 }
 0x434   :  { %v4413_v49 = vpop.eup %4412  ;;  %v2573_v5 = vmul.f32 %v2567_v44, %v7074_v15  ;;  %v10474_v15 = vld [vmem:[#allocation177_spill] sm:$0xff] }
 0x435   :  { %v2574_v7 = vmul.f32 %v4413_v49, %v2563_v43  ;;  %v1712_v49 = vadd.f32 %v10474_v15, %v1671_v2  ;;  %v10475_v43 = vld [vmem:[#allocation60_spill] sm:$0xff]  ;;  %v7753_v15 = vld [vmem:[#allocation12 + $0x90] sm:$0xff] }
 0x436   :  { %v1384_v12 = vadd.f32 %v10475_v43, %v1343_v11  ;;  %v7757_v43 = vld [vmem:[#allocation12 + $0x60] sm:$0xff] }
 0x437   :  { %v7614_v17 = vadd.f32 %v2574_v7, %v2573_v5 }
 0x438   :  { %v4415_v30 = vpop.eup %4414 }
 0x439   :  { %10469 = vst [vmem:[#allocation79_spill] sm:$0xff] %v7614_v17  ;;  %4416 = vtanh.f32 %v7614_v17  ;;  %v2571_v59 = vmul.f32 0.5, %v4415_v30  ;;  %v1753_v17 = vadd.f32 %v10477_v36, %v1712_v49  ;;  %v10478_v30 = vld [vmem:[#allocation61_spill] sm:$0xff]  ;;  %v10486_v49 = vld [vmem:[#allocation120_spill] sm:$0xff] }
 0x43a   :  { %4418 = vtanh.f32 %v2673_v21  ;;  %v1425_v57 = vadd.f32 %v10478_v30, %v1384_v12  ;;  %v10479_v21 = vld [vmem:[#allocation78_spill] sm:$0xff]  ;;  %v10487_v12 = vld [vmem:[#allocation125_spill] sm:$0xff] }
 0x43b   :  { %v2572_v44 = vadd.f32 0.5, %v2571_v59  ;;  %v2668_v25 = vadd.f32 %v2662_v8, %v1753_v17  ;;  %v7773_v8 = vld [vmem:[#allocation12 + $0x20] sm:$0xff]  ;;  %v10491_v36 = vld [vmem:[#allocation133_spill] sm:$0xff]  ;;  %v10492_v30 = vld [vmem:[#allocation134_spill] sm:$0xff] }
 0x43c   :  { %v1466_v59 = vadd.f32 %v10479_v21, %v1425_v57  ;;  %v7785_v21 = vld [vmem:[#allocation12 + $0x10] sm:$0xff] }
 0x43d   :  { %v2602_v7 = vpop.f32.mrf.mxu0  ;;  %v2678_v11 = vmul.f32 0.5, %v2668_v25  ;;  %v7781_v25 = vld [vmem:[#allocation12] sm:$0xff] }
 0x43e   :  { %v2665_v5 = vadd.f32 %v2602_v7, %v10476_v35  ;;  %v10488_v7 = vld [vmem:[#allocation126_spill] sm:$0xff]  ;;  %v10489_v35 = vld [vmem:[#allocation129_spill] sm:$0xff] }
 0x43f   :  { %v4417_v42 = vpop.eup %4416 }
 0x440   :  { %v2577_v62 = vmul.f32 %v4417_v42, %v2572_v44  ;;  %v2669_v40 = vmul.f32 0.5, %v2665_v5  ;;  %v4419_v38 = vpop.eup %4418  ;;  %v7761_v44 = vld [vmem:[#allocation12 + $0x70] sm:$0xff]  ;;  %v7765_v42 = vld [vmem:[#allocation12 + $0x40] sm:$0xff] }
 0x441   :  { %v2675_v9 = vmul.f32 0.5, %v4419_v38  ;;  %v7769_v5 = vld [vmem:[#allocation12 + $0x50] sm:$0xff] }
 0x442   :  { %2579 = vst [vmem:[#allocation18 + $0x8] sm:$0xff] %v2577_v62  ;;  %2723 = vmatmul.f32.vlgmr.msra.gmra.mxu1 %v2577_v62  ;;  %2763 = vmatmul.f32.vlgmr.msra.gmra.mxu3 %v2577_v62  ;;  %4420 = vtanh.f32 %v2669_v40  ;;  %v7777_v40 = vld [vmem:[#allocation12 + $0x30] sm:$0xff] }
 0x443   :  { %2892 = vmatpush.msra.mxu1 %v7085_v23  ;;  %2932 = vmatpush.msra.mxu3 %v7088_v50  ;;  %v2676_v57 = vadd.f32 0.5, %v2675_v9  ;;  %v10493_v38 = vld [vmem:[#allocation137_spill] sm:$0xff]  ;;  %v10497_v9 = vld [vmem:[#allocation147_spill] sm:$0xff] }
 0x444   :  { %v2642_v22 = vpop.f32.mrf.mxu2 }
 0x445   :  { %2893 = vmatpush.msra.mxu1 %v7091_v6  ;;  %2933 = vmatpush.msra.mxu3 %v7094_v31  ;;  %v2667_v2 = vadd.f32 %v2642_v22, %v1466_v59  ;;  %v2682_v31 = vmul.f32 %v2676_v57, %v7128_v48  ;;  %v7672_v48 = vld [vmem:[#allocation12 + $0x1d0] sm:$0xff]  ;;  %v10494_v59 = vld [vmem:[#allocation138_spill] sm:$0xff]  ;;  %v10501_v57 = vld [vmem:[#allocation155_spill] sm:$0xff] }
 0x446   :  { %v10495_v22 = vld [vmem:[#allocation141_spill] sm:$0xff] }
 0x447   :  { %2894 = vmatpush.msra.mxu1 %v7097_v19  ;;  %2934 = vmatpush.msra.mxu3 %v7100_v13  ;;  %4422 = vtanh.f32 %v2667_v2  ;;  %v10496_v2 = vld [vmem:[#allocation144_spill] sm:$0xff] }
 0x448   :  { %v4421_v17 = vpop.eup %4420  ;;  %4424 = vtanh.f32 %v2678_v11  ;;  %v10498_v11 = vld [vmem:[#allocation148_spill] sm:$0xff] }
 0x449   :  { %2895 = vmatpush.msra.mxu1 %v7103_v26  ;;  %2935 = vmatpush.msra.mxu3 %v7106_v58  ;;  %v2671_v23 = vmul.f32 0.5, %v4421_v17  ;;  %v10499_v17 = vld [vmem:[#allocation151_spill] sm:$0xff] }
 0x44a   :  { %2803 = vmatmul.f32.vlgmr.msrb.gmra.mxu1 %v2577_v62  ;;  %2843 = vmatmul.f32.vlgmr.msrb.gmra.mxu3 %v2577_v62  ;;  %v10490_v62 = vld [vmem:[#allocation130_spill] sm:$0xff] }
 0x44b   :  { %2896 = vmatpush.msra.mxu1 %v7109_v28  ;;  %2936 = vmatpush.msra.mxu3 %v7112_v61  ;;  %v2672_v50 = vadd.f32 0.5, %v2671_v23  ;;  %v10500_v23 = vld [vmem:[#allocation152_spill] sm:$0xff] }
 0x44d   :  { %2897 = vmatpush.msra.mxu1 %v7115_v45  ;;  %2937 = vmatpush.msra.mxu3 %v7118_v10  ;;  %v4423_v6 = vpop.eup %4422  ;;  %v7661_v10 = vld [vmem:[#allocation12 + $0x1e0] sm:$0xff] }
 0x44e   :  { %v2683_v19 = vmul.f32 %v4423_v6, %v2672_v50  ;;  %v4425_v13 = vpop.eup %4424  ;;  %v10502_v50 = vld [vmem:[#allocation156_spill] sm:$0xff]  ;;  %v10503_v6 = vld [vmem:[#allocation161_spill] sm:$0xff] }
 0x44f   :  { %2898 = vmatpush.msra.mxu1 %v7122_v41  ;;  %2938 = vmatpush.msra.mxu3 %v7125_v53  ;;  %v2680_v58 = vmul.f32 0.5, %v4425_v13  ;;  %v7664_v41 = vld [vmem:[#allocation12 + $0x1f0] sm:$0xff]  ;;  %v7669_v53 = vld [vmem:[#allocation12 + $0x1c0] sm:$0xff]  ;;  %v10506_v13 = vld [vmem:[#allocation168_spill] sm:$0xff] }
 0x450   :  { %v7642_v26 = vadd.f32 %v2683_v19, %v2682_v31  ;;  %v10504_v31 = vld [vmem:[#allocation164_spill] sm:$0xff]  ;;  %v10505_v19 = vld [vmem:[#allocation167_spill] sm:$0xff] }
 0x451   :  { %2899 = vmatpush.msra.mxu1 %v7130_v1  ;;  %2939 = vmatpush.msra.mxu3 %v7133_v55  ;;  %v2681_v28 = vadd.f32 0.5, %v2680_v58  ;;  %v7677_v1 = vld [vmem:[#allocation12 + $0x1a0] sm:$0xff]  ;;  %v7680_v55 = vld [vmem:[#allocation12 + $0x1b0] sm:$0xff] }
 0x452   :  { %4426 = vtanh.f32 %v7642_v26  ;;  %v10507_v58 = vld [vmem:[#allocation171_spill] sm:$0xff] }
 0x453   :  { %2900 = vmatpush.msra.mxu1 %v7137_v54  ;;  %2940 = vmatpush.msra.mxu3 %v7140_v39  ;;  %v7685_v54 = vld [vmem:[#allocation12 + $0x180] sm:$0xff]  ;;  %v7688_v39 = vld [vmem:[#allocation12 + $0x190] sm:$0xff] }
 0x455   :  { %2901 = vmatpush.msra.mxu1 %v7143_v4  ;;  %2941 = vmatpush.msra.mxu3 %v7146_v33  ;;  %v7693_v4 = vld [vmem:[#allocation12 + $0x160] sm:$0xff]  ;;  %v7697_v33 = vld [vmem:[#allocation12 + $0x170] sm:$0xff] }
 0x457   :  { %2902 = vmatpush.msra.mxu1 %v7149_v34  ;;  %2942 = vmatpush.msra.mxu3 %v7152_v60  ;;  %v7701_v34 = vld [vmem:[#allocation12 + $0x140] sm:$0xff]  ;;  %v7705_v60 = vld [vmem:[#allocation12 + $0x150] sm:$0xff] }
 0x458   :  { %v4427_v61 = vpop.eup %4426 }
 0x459   :  { %2903 = vmatpush.msra.mxu1 %v7157_v46  ;;  %2943 = vmatpush.msra.mxu3 %v7160_v51  ;;  %v7655_v45 = vmul.f32 %v4427_v61, %v2681_v28  ;;  %v7709_v46 = vld [vmem:[#allocation12 + $0x120] sm:$0xff]  ;;  %v7713_v51 = vld [vmem:[#allocation12 + $0x130] sm:$0xff]  ;;  %v10508_v28 = vld [vmem:[#allocation172_spill] sm:$0xff] }
 0x45a   :  { %v10509_v61 = vld [vmem:[#allocation175_spill] sm:$0xff] }
 0x45b   :  { %2904 = vmatpush.msra.mxu1 %v7167_v63  ;;  %2944 = vmatpush.msra.mxu3 %v7170_v3  ;;  %v7717_v63 = vld [vmem:[#allocation12 + $0x100] sm:$0xff]  ;;  %v7721_v3 = vld [vmem:[#allocation12 + $0x110] sm:$0xff] }
 0x45c   :  { %2703 = vmatmul.f32.vlgmr.msra.gmra.mxu0 %v7655_v45  ;;  %2743 = vmatmul.f32.vlgmr.msra.gmra.mxu2 %v7655_v45 }
 0x45d   :  { %2872 = vmatpush.msra.mxu0 %v7661_v10  ;;  %2912 = vmatpush.msra.mxu2 %v7664_v41 }
 0x45e   :  { %2905 = vmatpush.msra.mxu1 %v7175_v37  ;;  %2945 = vmatpush.msra.mxu3 %v7178_v32  ;;  %v7725_v37 = vld [vmem:[#allocation12 + $0xe0] sm:$0xff]  ;;  %v7729_v32 = vld [vmem:[#allocation12 + $0xf0] sm:$0xff] }
 0x45f   :  { %2873 = vmatpush.msra.mxu0 %v7669_v53  ;;  %2913 = vmatpush.msra.mxu2 %v7672_v48 }
 0x460   :  { %2906 = vmatpush.msra.mxu1 %v7183_v27  ;;  %2946 = vmatpush.msra.mxu3 %v7186_v47  ;;  %v10480_v27 = vld [vmem:[#allocation114_spill] sm:$0xff]  ;;  %v7733_v47 = vld [vmem:[#allocation12 + $0xc0] sm:$0xff] }
 0x461   :  { %2874 = vmatpush.msra.mxu0 %v7677_v1  ;;  %2914 = vmatpush.msra.mxu2 %v7680_v55 }
 0x462   :  { %2907 = vmatpush.msra.mxu1 %v7191_v24  ;;  %2947 = vmatpush.msra.mxu3 %v7194_v0  ;;  %v10481_v24 = vld [vmem:[#allocation115_spill] sm:$0xff]  ;;  %v7737_v0 = vld [vmem:[#allocation12 + $0xd0] sm:$0xff] }
 0x463   :  { %2875 = vmatpush.msra.mxu0 %v7685_v54  ;;  %2915 = vmatpush.msra.mxu2 %v7688_v39 }
 0x464   :  { %2783 = vmatmul.f32.vlgmr.msrb.gmra.mxu0 %v7655_v45  ;;  %2823 = vmatmul.f32.vlgmr.msrb.gmra.mxu2 %v7655_v45 }
 0x465   :  { %2876 = vmatpush.msra.mxu0 %v7693_v4  ;;  %2908 = vmatmul.f32.vlgmr.msra.gmra.mxu1 %v7655_v45 }
 0x466   :  { %2916 = vmatpush.msra.mxu2 %v7697_v33  ;;  %2948 = vmatmul.f32.vlgmr.msra.gmra.mxu3 %v7655_v45 }
 0x467   :  { %2877 = vmatpush.msra.mxu0 %v7701_v34  ;;  %2994 = vmatpush.msrb.mxu1 %v7204_v56  ;;  %v10482_v56 = vld [vmem:[#allocation116_spill] sm:$0xff] }
 0x468   :  { %2917 = vmatpush.msra.mxu2 %v7705_v60  ;;  %3034 = vmatpush.msrb.mxu3 %v7208_v14  ;;  %v7741_v14 = vld [vmem:[#allocation12 + $0xa0] sm:$0xff] }
 0x469   :  { %2878 = vmatpush.msra.mxu0 %v7709_v46  ;;  %2995 = vmatpush.msrb.mxu1 %v7212_v52  ;;  %v10483_v52 = vld [vmem:[#allocation117_spill] sm:$0xff] }
 0x46a   :  { %2918 = vmatpush.msra.mxu2 %v7713_v51  ;;  %3035 = vmatpush.msrb.mxu3 %v7216_v29  ;;  %v7745_v29 = vld [vmem:[#allocation12 + $0xb0] sm:$0xff] }
 0x46b   :  { %2879 = vmatpush.msra.mxu0 %v7717_v63  ;;  %2996 = vmatpush.msrb.mxu1 %v7220_v16  ;;  %v10484_v16 = vld [vmem:[#allocation118_spill] sm:$0xff] }
 0x46c   :  { %2919 = vmatpush.msra.mxu2 %v7721_v3  ;;  %3036 = vmatpush.msrb.mxu3 %v7224_v18  ;;  %v7749_v18 = vld [vmem:[#allocation12 + $0x80] sm:$0xff] }
 0x46d   :  { %2880 = vmatpush.msra.mxu0 %v7725_v37  ;;  %2997 = vmatpush.msrb.mxu1 %v7228_v20  ;;  %v10485_v20 = vld [vmem:[#allocation119_spill] sm:$0xff] }
 0x46e   :  { %2920 = vmatpush.msra.mxu2 %v7729_v32  ;;  %3037 = vmatpush.msrb.mxu3 %v10480_v27  ;;  %v10511_v27 = vld [vmem:[#allocation124_spill] sm:$0xff] }
 0x46f   :  { %2881 = vmatpush.msra.mxu0 %v7733_v47  ;;  %2998 = vmatpush.msrb.mxu1 %v10481_v24  ;;  %v10512_v24 = vld [vmem:[#allocation176_spill] sm:$0xff] }
 0x470   :  { %2921 = vmatpush.msra.mxu2 %v7737_v0  ;;  %3038 = vmatpush.msrb.mxu3 %v10482_v56  ;;  %v10513_v56 = vld [vmem:[#allocation127_spill] sm:$0xff] }
 0x471   :  { %2882 = vmatpush.msra.mxu0 %v7741_v14  ;;  %2999 = vmatpush.msrb.mxu1 %v10483_v52  ;;  %v10514_v52 = vld [vmem:[#allocation181_spill] sm:$0xff] }
 0x472   :  { %2922 = vmatpush.msra.mxu2 %v7745_v29  ;;  %3039 = vmatpush.msrb.mxu3 %v10484_v16  ;;  %v10515_v16 = vld [vmem:[#allocation128_spill] sm:$0xff] }
 0x473   :  { %2883 = vmatpush.msra.mxu0 %v7749_v18  ;;  %3000 = vmatpush.msrb.mxu1 %v10485_v20  ;;  %v10516_v20 = vld [vmem:[#allocation184_spill] sm:$0xff] }
 0x474   :  { %2923 = vmatpush.msra.mxu2 %v7753_v15  ;;  %3040 = vmatpush.msrb.mxu3 %v10486_v49  ;;  %v10517_v49 = vld [vmem:[#allocation131_spill] sm:$0xff] }
 0x475   :  { %2884 = vmatpush.msra.mxu0 %v7757_v43  ;;  %3001 = vmatpush.msrb.mxu1 %v10487_v12  ;;  %v10518_v12 = vld [vmem:[#allocation187_spill] sm:$0xff] }
 0x476   :  { %2924 = vmatpush.msra.mxu2 %v7761_v44  ;;  %3041 = vmatpush.msrb.mxu3 %v10488_v7  ;;  %v10519_v7 = vld [vmem:[#allocation132_spill] sm:$0xff] }
 0x477   :  { %2885 = vmatpush.msra.mxu0 %v7765_v42  ;;  %3002 = vmatpush.msrb.mxu1 %v10489_v35  ;;  %v10520_v35 = vld [vmem:[#allocation188_spill] sm:$0xff] }
 0x478   :  { %2925 = vmatpush.msra.mxu2 %v7769_v5  ;;  %3042 = vmatpush.msrb.mxu3 %v10490_v62  ;;  %v10521_v62 = vld [vmem:[#allocation135_spill] sm:$0xff] }
 0x479   :  { %2886 = vmatpush.msra.mxu0 %v7773_v8  ;;  %3003 = vmatpush.msrb.mxu1 %v10491_v36  ;;  %v10522_v36 = vld [vmem:[#allocation191_spill] sm:$0xff] }
 0x47a   :  { %2926 = vmatpush.msra.mxu2 %v7777_v40  ;;  %3043 = vmatpush.msrb.mxu3 %v10492_v30  ;;  %v10523_v30 = vld [vmem:[#allocation136_spill] sm:$0xff] }
 0x47b   :  { %2887 = vmatpush.msra.mxu0 %v7781_v25  ;;  %3004 = vmatpush.msrb.mxu1 %v10493_v38  ;;  %v10524_v38 = vld [vmem:[#allocation192_spill] sm:$0xff] }
 0x47c   :  { %2927 = vmatpush.msra.mxu2 %v7785_v21  ;;  %2888 = vmatmul.f32.vlgmr.msra.gmra.mxu0 %v7655_v45 }
 0x47d   :  { %2928 = vmatmul.f32.vlgmr.msra.gmra.mxu2 %v7655_v45  ;;  %3044 = vmatpush.msrb.mxu3 %v10494_v59  ;;  %v10510_v45 = vld [vmem:[#allocation123_spill] sm:$0xff] }
 0x47e   :  { %3005 = vmatpush.msrb.mxu1 %v10495_v22  ;;  %2974 = vmatpush.msrb.mxu0 %v10496_v2  ;;  %v10525_v59 = vld [vmem:[#allocation139_spill] sm:$0xff]  ;;  %v10526_v22 = vld [vmem:[#allocation140_spill] sm:$0xff]  ;;  %v10527_v2 = vld [vmem:[#allocation145_spill] sm:$0xff] }
 0x47f   :  { %3045 = vmatpush.msrb.mxu3 %v10497_v9  ;;  %3014 = vmatpush.msrb.mxu2 %v10498_v11  ;;  %v10528_v9 = vld [vmem:[#allocation146_spill] sm:$0xff]  ;;  %v10529_v11 = vld [vmem:[#allocation149_spill] sm:$0xff] }
 0x480   :  { %3006 = vmatpush.msrb.mxu1 %v10499_v17  ;;  %2975 = vmatpush.msrb.mxu0 %v10500_v23  ;;  %v10530_v17 = vld [vmem:[#allocation150_spill] sm:$0xff]  ;;  %v10531_v23 = vld [vmem:[#allocation153_spill] sm:$0xff] }
 0x481   :  { %3046 = vmatpush.msrb.mxu3 %v10501_v57  ;;  %3015 = vmatpush.msrb.mxu2 %v10502_v50  ;;  %v10532_v57 = vld [vmem:[#allocation154_spill] sm:$0xff]  ;;  %v10533_v50 = vld [vmem:[#allocation159_spill] sm:$0xff] }
 0x482   :  { %3007 = vmatpush.msrb.mxu1 %v10503_v6  ;;  %2976 = vmatpush.msrb.mxu0 %v10504_v31  ;;  %v10534_v6 = vld [vmem:[#allocation160_spill] sm:$0xff]  ;;  %v10535_v31 = vld [vmem:[#allocation165_spill] sm:$0xff] }
 0x483   :  { %3047 = vmatpush.msrb.mxu3 %v10505_v19  ;;  %3016 = vmatpush.msrb.mxu2 %v10506_v13  ;;  %v10536_v19 = vld [vmem:[#allocation166_spill] sm:$0xff]  ;;  %v10537_v13 = vld [vmem:[#allocation169_spill] sm:$0xff] }
 0x484   :  { %3008 = vmatpush.msrb.mxu1 %v10507_v58  ;;  %2977 = vmatpush.msrb.mxu0 %v10508_v28  ;;  %v10538_v58 = vld [vmem:[#allocation170_spill] sm:$0xff]  ;;  %v10539_v28 = vld [vmem:[#allocation173_spill] sm:$0xff] }
 0x485   :  { %3048 = vmatpush.msrb.mxu3 %v10509_v61  ;;  %3017 = vmatpush.msrb.mxu2 %v10510_v45  ;;  %v10540_v61 = vld [vmem:[#allocation174_spill] sm:$0xff]  ;;  %v10541_v45 = vld [vmem:[#allocation179_spill] sm:$0xff] }
 0x486   :  { %3009 = vmatpush.msrb.mxu1 %v10511_v27  ;;  %2978 = vmatpush.msrb.mxu0 %v10512_v24  ;;  %v10542_v27 = vld [vmem:[#allocation180_spill] sm:$0xff]  ;;  %v10543_v24 = vld [vmem:[#allocation185_spill] sm:$0xff] }
 0x487   :  { %3049 = vmatpush.msrb.mxu3 %v10513_v56  ;;  %3018 = vmatpush.msrb.mxu2 %v10514_v52  ;;  %v10544_v56 = vld [vmem:[#allocation186_spill] sm:$0xff]  ;;  %v10545_v52 = vld [vmem:[#allocation189_spill] sm:$0xff] }
 0x488   :  { %3074 = vmatpush.msra.mxu1 %v10515_v16  ;;  %2979 = vmatpush.msrb.mxu0 %v10517_v49  ;;  %v10546_v16 = vld [vmem:[#allocation190_spill] sm:$0xff] }
 0x489   :  { %3114 = vmatpush.msra.mxu3 %v10516_v20  ;;  %3019 = vmatpush.msrb.mxu2 %v10518_v12  ;;  %v10547_v20 = vld [vmem:[#allocation193_spill] sm:$0xff]  ;;  %v10548_v49 = vld [vmem:[#allocation194_spill] sm:$0xff]  ;;  %v10549_v12 = vld [vmem:[#allocation199_spill] sm:$0xff] }
 0x48a   :  { %3075 = vmatpush.msra.mxu1 %v10519_v7  ;;  %2980 = vmatpush.msrb.mxu0 %v10521_v62  ;;  %v10550_v7 = vld [vmem:[#allocation200_spill] sm:$0xff]  ;;  %v10552_v62 = vld [vmem:[#allocation75_spill] sm:$0xff] }
 0x48b   :  { %3115 = vmatpush.msra.mxu3 %v10520_v35  ;;  %3020 = vmatpush.msrb.mxu2 %v10522_v36  ;;  %v10551_v35 = vld [vmem:[#allocation205_spill] sm:$0xff]  ;;  %v10553_v36 = vld [vmem:[#allocation76_spill] sm:$0xff] }
 0x48c   :  { %3076 = vmatpush.msra.mxu1 %v10523_v30  ;;  %2981 = vmatpush.msrb.mxu0 %v10525_v59  ;;  %v10554_v30 = vld [vmem:[#allocation77_spill] sm:$0xff]  ;;  %v10556_v59 = vld [vmem:[#allocation142_spill] sm:$0xff] }
 0x48d   :  { %3116 = vmatpush.msra.mxu3 %v10524_v38  ;;  %3021 = vmatpush.msrb.mxu2 %v10526_v22  ;;  %v10555_v38 = vld [vmem:[#allocation40_spill] sm:$0xff]  ;;  %v10557_v22 = vld [vmem:[#allocation41_spill] sm:$0xff] }
 0x48e   :  { %3077 = vmatpush.msra.mxu1 %v10527_v2  ;;  %2982 = vmatpush.msrb.mxu0 %v10529_v11  ;;  %v10558_v2 = vld [vmem:[#allocation54_spill] sm:$0xff]  ;;  %v10560_v11 = vld [vmem:[#allocation55_spill] sm:$0xff] }
 0x48f   :  { %3117 = vmatpush.msra.mxu3 %v10528_v9  ;;  %3022 = vmatpush.msrb.mxu2 %v10530_v17  ;;  %v10559_v9 = vld [vmem:[#allocation143_spill] sm:$0xff]  ;;  %v10561_v17 = vld [vmem:[#allocation157_spill] sm:$0xff] }
 0x490   :  { %3078 = vmatpush.msra.mxu1 %v10531_v23  ;;  %2983 = vmatpush.msrb.mxu0 %v10533_v50  ;;  %v10562_v23 = vld [vmem:[#allocation56_spill] sm:$0xff]  ;;  %v10564_v50 = vld [vmem:[#allocation158_spill] sm:$0xff] }
 0x491   :  { %3118 = vmatpush.msra.mxu3 %v10532_v57  ;;  %3023 = vmatpush.msrb.mxu2 %v10534_v6  ;;  %v10563_v57 = vld [vmem:[#allocation26_spill] sm:$0xff]  ;;  %v10565_v6 = vld [vmem:[#allocation57_spill] sm:$0xff] }
 0x492   :  { %3079 = vmatpush.msra.mxu1 %v10535_v31  ;;  %2984 = vmatpush.msrb.mxu0 %v10537_v13  ;;  %v10566_v31 = vld [vmem:[#allocation39_spill] sm:$0xff]  ;;  %v10568_v13 = vld [vmem:[#allocation92_spill] sm:$0xff] }
 0x493   :  { %3119 = vmatpush.msra.mxu3 %v10536_v19  ;;  %3024 = vmatpush.msrb.mxu2 %v10538_v58  ;;  %v10567_v19 = vld [vmem:[#allocation25_spill] sm:$0xff] }
 0x494   :  { %3080 = vmatpush.msra.mxu1 %v10539_v28  ;;  %2985 = vmatpush.msrb.mxu0 %v10541_v45  ;;  %v10569_v58 = vld [vmem:[#allocation93_spill] sm:$0xff]  ;;  %v10570_v28 = vld [vmem:[#allocation94_spill] sm:$0xff]  ;;  %v10572_v45 = vld [vmem:[#allocation96_spill] sm:$0xff] }
 0x495   :  { %3120 = vmatpush.msra.mxu3 %v10540_v61  ;;  %3025 = vmatpush.msrb.mxu2 %v10542_v27  ;;  %v10571_v61 = vld [vmem:[#allocation95_spill] sm:$0xff]  ;;  %v10573_v27 = vld [vmem:[#allocation101_spill] sm:$0xff] }
 0x496   :  { %3081 = vmatpush.msra.mxu1 %v10543_v24  ;;  %2986 = vmatpush.msrb.mxu0 %v10545_v52  ;;  %v10574_v24 = vld [vmem:[#allocation102_spill] sm:$0xff]  ;;  %v10576_v52 = vld [vmem:[#allocation104_spill] sm:$0xff] }
 0x497   :  { %3121 = vmatpush.msra.mxu3 %v10544_v56  ;;  %3026 = vmatpush.msrb.mxu2 %v10546_v16  ;;  %v10575_v56 = vld [vmem:[#allocation103_spill] sm:$0xff]  ;;  %v10577_v16 = vld [vmem:[#allocation105_spill] sm:$0xff] }
 0x498   :  { %3082 = vmatpush.msra.mxu1 %v10547_v20  ;;  %2987 = vmatpush.msrb.mxu0 %v10549_v12  ;;  %v10578_v20 = vld [vmem:[#allocation217_spill] sm:$0xff]  ;;  %v10580_v12 = vld [vmem:[#allocation219_spill] sm:$0xff] }
 0x499   :  { %3122 = vmatpush.msra.mxu3 %v10548_v49  ;;  %3027 = vmatpush.msrb.mxu2 %v10550_v7  ;;  %v10579_v49 = vld [vmem:[#allocation218_spill] sm:$0xff]  ;;  %v10581_v7 = vld [vmem:[#allocation220_spill] sm:$0xff] }
 0x49a   :  { %3083 = vmatpush.msra.mxu1 %v10551_v35  ;;  %2988 = vmatpush.msrb.mxu0 %v10553_v36  ;;  %v10582_v35 = vld [vmem:[#allocation221_spill] sm:$0xff]  ;;  %v10584_v36 = vld [vmem:[#allocation223_spill] sm:$0xff] }
 0x49b   :  { %3123 = vmatpush.msra.mxu3 %v10552_v62  ;;  %3028 = vmatpush.msrb.mxu2 %v10554_v30  ;;  %v10583_v62 = vld [vmem:[#allocation222_spill] sm:$0xff]  ;;  %v10585_v30 = vld [vmem:[#allocation224_spill] sm:$0xff] }
 0x49c   :  { %3084 = vmatpush.msra.mxu1 %v10555_v38  ;;  %2989 = vmatpush.msrb.mxu0 %v10557_v22  ;;  %v10586_v38 = vld [vmem:[#allocation225_spill] sm:$0xff]  ;;  %v10588_v22 = vld [vmem:[#allocation227_spill] sm:$0xff] }
 0x49d   :  { %3124 = vmatpush.msra.mxu3 %v10556_v59  ;;  %3029 = vmatpush.msrb.mxu2 %v10558_v2  ;;  %v10587_v59 = vld [vmem:[#allocation226_spill] sm:$0xff]  ;;  %v10589_v2 = vld [vmem:[#allocation228_spill] sm:$0xff] }
 0x49e   :  { %3085 = vmatpush.msra.mxu1 %v10559_v9  ;;  %3054 = vmatpush.msra.mxu0 %v10561_v17  ;;  %v10590_v9 = vld [vmem:[#allocation229_spill] sm:$0xff]  ;;  %v10592_v17 = vld [vmem:[#allocation231_spill] sm:$0xff] }
 0x49f   :  { %3125 = vmatpush.msra.mxu3 %v10560_v11  ;;  %3094 = vmatpush.msra.mxu2 %v10562_v23  ;;  %v10591_v11 = vld [vmem:[#allocation230_spill] sm:$0xff]  ;;  %v10593_v23 = vld [vmem:[#allocation232_spill] sm:$0xff] }
 0x4a0   :  { %3086 = vmatpush.msra.mxu1 %v10563_v57  ;;  %3055 = vmatpush.msra.mxu0 %v10565_v6  ;;  %v10594_v57 = vld [vmem:[#allocation233_spill] sm:$0xff]  ;;  %v10596_v6 = vld [vmem:[#allocation235_spill] sm:$0xff] }
 0x4a1   :  { %3126 = vmatpush.msra.mxu3 %v10564_v50  ;;  %3095 = vmatpush.msra.mxu2 %v10566_v31  ;;  %v10595_v50 = vld [vmem:[#allocation234_spill] sm:$0xff] }
 0x4a2   :  { %3087 = vmatpush.msra.mxu1 %v10567_v19  ;;  %3056 = vmatpush.msra.mxu0 %v10569_v58  ;;  %v7893_v31 = vld [vmem:[#allocation15 + $0x30] sm:$0xff]  ;;  %v7896_v19 = vld [vmem:[#allocation15 + $0x38] sm:$0xff] }
 0x4a3   :  { %3127 = vmatpush.msra.mxu3 %v10568_v13  ;;  %3096 = vmatpush.msra.mxu2 %v10570_v28  ;;  %v7899_v13 = vld [vmem:[#allocation15 + $0x10] sm:$0xff]  ;;  %v7902_v58 = vld [vmem:[#allocation15 + $0x18] sm:$0xff] }
 0x4a4   :  { %3088 = vmatpush.msra.mxu1 %v10571_v61  ;;  %3057 = vmatpush.msra.mxu0 %v10573_v27 }
 0x4a5   :  { %3128 = vmatpush.msra.mxu3 %v10572_v45  ;;  %3097 = vmatpush.msra.mxu2 %v10574_v24  ;;  %v10597_v45 = vld [vmem:[#allocation106_spill] sm:$0xff] }
 0x4a6   :  { %3089 = vmatpush.msra.mxu1 %v10575_v56  ;;  %3058 = vmatpush.msra.mxu0 %v10577_v16 }
 0x4a7   :  { %3129 = vmatpush.msra.mxu3 %v10576_v52  ;;  %3098 = vmatpush.msra.mxu2 %v10578_v20  ;;  %v10598_v20 = vld [vmem:[#allocation107_spill] sm:$0xff] }
 0x4a8   :  { %3059 = vmatpush.msra.mxu0 %v10579_v49 }
 0x4a9   :  { %3099 = vmatpush.msra.mxu2 %v10580_v12 }
 0x4aa   :  { %3060 = vmatpush.msra.mxu0 %v10581_v7 }
 0x4ab   :  { %3100 = vmatpush.msra.mxu2 %v10582_v35  ;;  %v10599_v35 = vld [vmem:[#allocation108_spill] sm:$0xff] }
 0x4ac   :  { %3061 = vmatpush.msra.mxu0 %v10583_v62 }
 0x4ad   :  { %3101 = vmatpush.msra.mxu2 %v10584_v36 }
 0x4ae   :  { %3062 = vmatpush.msra.mxu0 %v10585_v30 }
 0x4af   :  { %3102 = vmatpush.msra.mxu2 %v10586_v38 }
 0x4b0   :  { %3063 = vmatpush.msra.mxu0 %v10587_v59 }
 0x4b1   :  { %3103 = vmatpush.msra.mxu2 %v10588_v22 }
 0x4b2   :  { %3064 = vmatpush.msra.mxu0 %v10589_v2  ;;  %v10600_v2 = vld [vmem:[#allocation113_spill] sm:$0xff] }
 0x4b3   :  { %3104 = vmatpush.msra.mxu2 %v10590_v9 }
 0x4b4   :  { %3065 = vmatpush.msra.mxu0 %v10591_v11 }
 0x4b5   :  { %3105 = vmatpush.msra.mxu2 %v10592_v17  ;;  %v10601_v17 = vld [vmem:[#allocation208_spill] sm:$0xff] }
 0x4b6   :  { %3066 = vmatpush.msra.mxu0 %v10593_v23  ;;  %v10602_v23 = vld [vmem:[#allocation83_spill] sm:$0xff] }
 0x4b7   :  { %3106 = vmatpush.msra.mxu2 %v10594_v57  ;;  %v1510_v57 = vadd.f32 %v10602_v23, %v10601_v17  ;;  %v10607_v23 = vld [vmem:[#allocation182_spill] sm:$0xff] }
 0x4b8   :  { %3067 = vmatpush.msra.mxu0 %v10595_v50 }
 0x4b9   :  { %3107 = vmatpush.msra.mxu2 %v10596_v6 }
 0x4ba   :  { %3068 = vmatpush.msra.mxu0 %v7893_v31 }
 0x4bb   :  { %3108 = vmatpush.msra.mxu2 %v7896_v19 }
 0x4bc   :  { %3069 = vmatpush.msra.mxu0 %v7899_v13 }
 0x4bd   :  { %3109 = vmatpush.msra.mxu2 %v7902_v58 }
 0x4bf   :  { %v2724_v28 = vpop.f32.mrf.mxu1 }
 0x4c5   :  { %v2764_v52 = vpop.f32.mrf.mxu3 }
 0x4c7   :  { %v2804_v36 = vpop.f32.mrf.mxu1 }
 0x4cd   :  { %v2844_v11 = vpop.f32.mrf.mxu3 }
 0x4d9   :  { %v2704_v61 = vpop.f32.mrf.mxu0 }
 0x4da   :  { %v2705_v27 = vadd.f32 %v2704_v61, %v10597_v45  ;;  %v10603_v61 = vld [vmem:[#allocation84_spill] sm:$0xff] }
 0x4dc   :  { %v2725_v24 = vadd.f32 %v2724_v28, %v2705_v27  ;;  %v1551_v27 = vadd.f32 %v10603_v61, %v1510_v57 }
 0x4de   :  { %v2847_v56 = vmul.f32 0.5, %v2725_v24 }
 0x4df   :  { %v2744_v16 = vpop.f32.mrf.mxu2 }
 0x4e0   :  { %v2745_v49 = vadd.f32 %v2744_v16, %v10598_v20  ;;  %4428 = vtanh.f32 %v2847_v56 }
 0x4e1   :  { %v2784_v12 = vpop.f32.mrf.mxu0 }
 0x4e2   :  { %v2765_v7 = vadd.f32 %v2764_v52, %v2745_v49  ;;  %v2785_v62 = vadd.f32 %v2784_v12, %v10599_v35  ;;  %v2909_v16 = vpop.f32.mrf.mxu1 }
 0x4e4   :  { %v2851_v30 = vmul.f32 0.5, %v2765_v7  ;;  %v2805_v38 = vadd.f32 %v2804_v36, %v2785_v62  ;;  %v10604_v7 = vld [vmem:[#allocation85_spill] sm:$0xff]  ;;  %v10605_v36 = vld [vmem:[#allocation79_spill] sm:$0xff] }
 0x4e5   :  { %v1592_v62 = vadd.f32 %v10604_v7, %v1551_v27  ;;  %v10612_v27 = vld [vmem:[#allocation63_spill] sm:$0xff] }
 0x4e6   :  { %4430 = vtanh.f32 %v2851_v30  ;;  %v4429_v22 = vpop.eup %4428 }
 0x4e7   :  { %v2824_v59 = vpop.f32.mrf.mxu2  ;;  %4432 = vtanh.f32 %v2805_v38  ;;  %v2849_v6 = vmul.f32 0.5, %v4429_v22  ;;  %v10608_v22 = vld [vmem:[#allocation45_spill] sm:$0xff] }
 0x4e8   :  { %v2825_v9 = vadd.f32 %v2824_v59, %v10600_v2  ;;  %v10606_v59 = vld [vmem:[#allocation44_spill] sm:$0xff] }
 0x4e9   :  { %v2850_v49 = vadd.f32 0.5, %v2849_v6  ;;  %v2953_v2 = vadd.f32 %v2909_v16, %v10606_v59  ;;  %v10611_v6 = vld [vmem:[#allocation183_spill] sm:$0xff] }
 0x4ea   :  { %v2845_v50 = vadd.f32 %v2844_v11, %v2825_v9  ;;  %v1633_v9 = vadd.f32 %v10607_v23, %v1592_v62  ;;  %v10609_v11 = vld [vmem:[#allocation62_spill] sm:$0xff]  ;;  %v10616_v23 = vld [vmem:[#allocation196_spill] sm:$0xff] }
 0x4eb   :  { %v1305_v17 = vadd.f32 %v10609_v11, %v10608_v22 }
 0x4ec   :  { %v4431_v28 = vpop.eup %4430  ;;  %v2856_v24 = vmul.f32 0.5, %v2845_v50  ;;  %v1674_v61 = vadd.f32 %v10611_v6, %v1633_v9  ;;  %v10618_v6 = vld [vmem:[#allocation82_spill] sm:$0xff] }
 0x4ed   :  { %v2853_v56 = vmul.f32 0.5, %v4431_v28  ;;  %v4433_v52 = vpop.eup %4432  ;;  %v2960_v28 = vmul.f32 0.5, %v2953_v2 }
 0x4ee   :  { %4434 = vtanh.f32 %v2856_v24  ;;  %v2861_v38 = vmul.f32 %v4433_v52, %v2850_v49  ;;  %v10614_v49 = vld [vmem:[#allocation64_spill] sm:$0xff] }
 0x4ef   :  { %v2854_v12 = vadd.f32 0.5, %v2853_v56  ;;  %v1346_v56 = vadd.f32 %v10612_v27, %v1305_v17 }
 0x4f1   :  { %v2860_v30 = vmul.f32 %v2854_v12, %v10605_v36  ;;  %v10613_v12 = vld [vmem:[#allocation195_spill] sm:$0xff]  ;;  %v1387_v16 = vadd.f32 %v10614_v49, %v1346_v56  ;;  %v10615_v36 = vld [vmem:[#allocation28_spill] sm:$0xff] }
 0x4f2   :  { %v1715_v52 = vadd.f32 %v10613_v12, %v1674_v61  ;;  %v7929_v61 = vld [vmem:[#allocation12 + $0x1e8] sm:$0xff] }
 0x4f3   :  { %v7918_v57 = vadd.f32 %v2861_v38, %v2860_v30  ;;  %v2949_v38 = vpop.f32.mrf.mxu3  ;;  %v7935_v12 = vld [vmem:[#allocation12 + $0x1c8] sm:$0xff] }
 0x4f4   :  { %v4435_v50 = vpop.eup %4434  ;;  %v1756_v22 = vadd.f32 %v10616_v23, %v1715_v52 }
 0x4f5   :  { %10610 = vst [vmem:[#allocation80_spill] sm:$0xff] %v7918_v57  ;;  %4436 = vtanh.f32 %v7918_v57  ;;  %v2858_v24 = vmul.f32 0.5, %v4435_v50  ;;  %v10617_v57 = vld [vmem:[#allocation65_spill] sm:$0xff] }
 0x4f6   :  { %4438 = vtanh.f32 %v2960_v28  ;;  %v1428_v9 = vadd.f32 %v10617_v57, %v1387_v16  ;;  %v2955_v50 = vadd.f32 %v2949_v38, %v1756_v22  ;;  %v7938_v57 = vld [vmem:[#allocation12 + $0x1d8] sm:$0xff]  ;;  %v7941_v16 = vld [vmem:[#allocation12 + $0x1a8] sm:$0xff] }
 0x4f7   :  { %v2859_v62 = vadd.f32 0.5, %v2858_v24  ;;  %v7932_v24 = vld [vmem:[#allocation12 + $0x1f8] sm:$0xff]  ;;  %v7953_v22 = vld [vmem:[#allocation12 + $0x168] sm:$0xff] }
 0x4f8   :  { %v1469_v28 = vadd.f32 %v10618_v6, %v1428_v9  ;;  %v2965_v49 = vmul.f32 0.5, %v2955_v50  ;;  %v7959_v50 = vld [vmem:[#allocation12 + $0x148] sm:$0xff] }
 0x4f9   :  { %v2889_v7 = vpop.f32.mrf.mxu0 }
 0x4fa   :  { %v2952_v59 = vadd.f32 %v2889_v7, %v10615_v36  ;;  %v7944_v7 = vld [vmem:[#allocation12 + $0x1b8] sm:$0xff] }
 0x4fb   :  { %v4437_v30 = vpop.eup %4436 }
 0x4fc   :  { %v2864_v11 = vmul.f32 %v4437_v30, %v2859_v62  ;;  %v2956_v2 = vmul.f32 0.5, %v2952_v59  ;;  %v4439_v17 = vpop.eup %4438  ;;  %v7947_v59 = vld [vmem:[#allocation12 + $0x188] sm:$0xff]  ;;  %v7950_v30 = vld [vmem:[#allocation12 + $0x198] sm:$0xff] }
 0x4fd   :  { %v2962_v52 = vmul.f32 0.5, %v4439_v17  ;;  %v7962_v17 = vld [vmem:[#allocation12 + $0x158] sm:$0xff] }
 0x4fe   :  { %2866 = vst [vmem:[#allocation18 + $0x10] sm:$0xff] %v2864_v11  ;;  %4440 = vtanh.f32 %v2956_v2  ;;  %3010 = vmatmul.f32.vlgmr.msrb.gmra.mxu1 %v2864_v11  ;;  %3050 = vmatmul.f32.vlgmr.msrb.gmra.mxu3 %v2864_v11  ;;  %v7956_v2 = vld [vmem:[#allocation12 + $0x178] sm:$0xff] }
 0x4ff   :  { %3179 = vmatpush.msrb.mxu1 %v7929_v61  ;;  %3219 = vmatpush.msrb.mxu3 %v7932_v24  ;;  %v2963_v38 = vadd.f32 0.5, %v2962_v52 }
 0x500   :  { %v2929_v27 = vpop.f32.mrf.mxu2 }
 0x501   :  { %v2954_v56 = vadd.f32 %v2929_v27, %v1469_v28  ;;  %3180 = vmatpush.msrb.mxu1 %v7935_v12  ;;  %3220 = vmatpush.msrb.mxu3 %v7938_v57  ;;  %v7966_v28 = vld [vmem:[#allocation12 + $0x128] sm:$0xff]  ;;  %v7969_v27 = vld [vmem:[#allocation12 + $0x138] sm:$0xff] }
 0x503   :  { %4442 = vtanh.f32 %v2954_v56  ;;  %3181 = vmatpush.msrb.mxu1 %v7941_v16  ;;  %3221 = vmatpush.msrb.mxu3 %v7944_v7 }
 0x504   :  { %v4441_v62 = vpop.eup %4440  ;;  %4444 = vtanh.f32 %v2965_v49  ;;  %v7974_v49 = vld [vmem:[#allocation12 + $0x108] sm:$0xff] }
 0x505   :  { %v2958_v36 = vmul.f32 0.5, %v4441_v62  ;;  %3182 = vmatpush.msrb.mxu1 %v7947_v59  ;;  %3222 = vmatpush.msrb.mxu3 %v7950_v30  ;;  %v7977_v62 = vld [vmem:[#allocation12 + $0x118] sm:$0xff] }
 0x506   :  { %3090 = vmatmul.f32.vlgmr.msra.gmra.mxu1 %v2864_v11  ;;  %3130 = vmatmul.f32.vlgmr.msra.gmra.mxu3 %v2864_v11  ;;  %v2969_v11 = vmul.f32 %v2963_v38, %v7642_v26  ;;  %10619 = vst [vmem:[#allocation81_spill] sm:$0xff] %v7977_v62  ;;  %v7984_v38 = vld [vmem:[#allocation12 + $0xf8] sm:$0xff] }
 0x507   :  { %v2959_v23 = vadd.f32 0.5, %v2958_v36  ;;  %3183 = vmatpush.msrb.mxu1 %v7953_v22  ;;  %3223 = vmatpush.msrb.mxu3 %v7956_v2  ;;  %v7981_v36 = vld [vmem:[#allocation12 + $0xe8] sm:$0xff]  ;;  %10621 = vst [vmem:[#allocation162_spill] sm:$0xff] %v7984_v38 }
 0x508   :  { %10620 = vst [vmem:[#allocation42_spill] sm:$0xff] %v7981_v36 }
 0x509   :  { %v4443_v9 = vpop.eup %4442  ;;  %3184 = vmatpush.msrb.mxu1 %v7959_v50  ;;  %3224 = vmatpush.msrb.mxu3 %v7962_v17 }
 0x50a   :  { %v2970_v6 = vmul.f32 %v4443_v9, %v2959_v23  ;;  %v4445_v56 = vpop.eup %4444  ;;  %v7987_v23 = vld [vmem:[#allocation12 + $0xc8] sm:$0xff]  ;;  %v7990_v9 = vld [vmem:[#allocation12 + $0xd8] sm:$0xff] }
 0x50b   :  { %3185 = vmatpush.msrb.mxu1 %v7966_v28  ;;  %3225 = vmatpush.msrb.mxu3 %v7969_v27  ;;  %v2967_v26 = vmul.f32 0.5, %v4445_v56  ;;  %10622 = vst [vmem:[#allocation43_spill] sm:$0xff] %v7987_v23  ;;  %v7996_v56 = vld [vmem:[#allocation12 + $0xb8] sm:$0xff] }
 0x50c   :  { %v7972_v52 = vadd.f32 %v2970_v6, %v2969_v11  ;;  %v7993_v6 = vld [vmem:[#allocation12 + $0xa8] sm:$0xff] }
 0x50d   :  { %3186 = vmatpush.msrb.mxu1 %v7974_v49  ;;  %3226 = vmatpush.msrb.mxu3 %v7977_v62  ;;  %v2968_v11 = vadd.f32 0.5, %v2967_v26  ;;  %v8011_v26 = vld [vmem:[#allocation12 + $0x68] sm:$0xff] }
 0x50e   :  { %4446 = vtanh.f32 %v7972_v52 }
 0x50f   :  { %3187 = vmatpush.msrb.mxu1 %v7981_v36  ;;  %3227 = vmatpush.msrb.mxu3 %v7984_v38  ;;  %v8001_v38 = vld [vmem:[#allocation12 + $0x88] sm:$0xff] }
 0x511   :  { %3188 = vmatpush.msrb.mxu1 %v7987_v23  ;;  %3228 = vmatpush.msrb.mxu3 %v7990_v9  ;;  %v8004_v23 = vld [vmem:[#allocation12 + $0x98] sm:$0xff] }
 0x512   :  { %10623 = vst [vmem:[#allocation58_spill] sm:$0xff] %v8004_v23 }
 0x513   :  { %3189 = vmatpush.msrb.mxu1 %v7993_v6  ;;  %3229 = vmatpush.msrb.mxu3 %v7996_v56 }
 0x514   :  { %v4447_v36 = vpop.eup %4446 }
 0x515   :  { %v7999_v62 = vmul.f32 %v4447_v36, %v2968_v11  ;;  %3190 = vmatpush.msrb.mxu1 %v8001_v38  ;;  %3230 = vmatpush.msrb.mxu3 %v8004_v23  ;;  %v8014_v36 = vld [vmem:[#allocation12 + $0x78] sm:$0xff]  ;;  %v8019_v11 = vld [vmem:[#allocation12 + $0x48] sm:$0xff] }
 0x516   :  { %v8022_v23 = vld [vmem:[#allocation12 + $0x58] sm:$0xff] }
 0x517   :  { %2990 = vmatmul.f32.vlgmr.msrb.gmra.mxu0 %v7999_v62  ;;  %3030 = vmatmul.f32.vlgmr.msrb.gmra.mxu2 %v7999_v62 }
 0x518   :  { %3159 = vmatpush.msrb.mxu0 %v7661_v10  ;;  %3199 = vmatpush.msrb.mxu2 %v7664_v41  ;;  %v8027_v10 = vld [vmem:[#allocation12 + $0x28] sm:$0xff]  ;;  %v8030_v41 = vld [vmem:[#allocation12 + $0x38] sm:$0xff] }
 0x519   :  { %3191 = vmatpush.msrb.mxu1 %v8011_v26  ;;  %3231 = vmatpush.msrb.mxu3 %v8014_v36 }
 0x51a   :  { %3160 = vmatpush.msrb.mxu0 %v7669_v53  ;;  %3200 = vmatpush.msrb.mxu2 %v7672_v48  ;;  %v8035_v53 = vld [vmem:[#allocation12 + $0x8] sm:$0xff]  ;;  %v8038_v48 = vld [vmem:[#allocation12 + $0x18] sm:$0xff] }
 0x51b   :  { %3192 = vmatpush.msrb.mxu1 %v8019_v11  ;;  %3232 = vmatpush.msrb.mxu3 %v8022_v23 }
 0x51c   :  { %3161 = vmatpush.msrb.mxu0 %v7677_v1  ;;  %3201 = vmatpush.msrb.mxu2 %v7680_v55  ;;  %v8048_v1 = vld [vmem:[#allocation15 + $0x3e0] sm:$0xff]  ;;  %v8052_v55 = vld [vmem:[#allocation15 + $0x3e8] sm:$0xff] }
 0x51d   :  { %3193 = vmatpush.msrb.mxu1 %v8027_v10  ;;  %3233 = vmatpush.msrb.mxu3 %v8030_v41 }
 0x51e   :  { %3162 = vmatpush.msrb.mxu0 %v7685_v54  ;;  %3202 = vmatpush.msrb.mxu2 %v7688_v39  ;;  %v8056_v54 = vld [vmem:[#allocation15 + $0x3c0] sm:$0xff]  ;;  %v8060_v39 = vld [vmem:[#allocation15 + $0x3c8] sm:$0xff] }
 0x51f   :  { %3194 = vmatpush.msrb.mxu1 %v8035_v53  ;;  %3234 = vmatpush.msrb.mxu3 %v8038_v48 }
 0x520   :  { %3070 = vmatmul.f32.vlgmr.msra.gmra.mxu0 %v7999_v62  ;;  %3110 = vmatmul.f32.vlgmr.msra.gmra.mxu2 %v7999_v62 }
 0x521   :  { %3163 = vmatpush.msrb.mxu0 %v7693_v4  ;;  %3195 = vmatmul.f32.vlgmr.msrb.gmra.mxu1 %v7999_v62  ;;  %v8064_v4 = vld [vmem:[#allocation15 + $0x3a0] sm:$0xff] }
 0x522   :  { %3203 = vmatpush.msrb.mxu2 %v7697_v33  ;;  %3235 = vmatmul.f32.vlgmr.msrb.gmra.mxu3 %v7999_v62  ;;  %v8068_v33 = vld [vmem:[#allocation15 + $0x3a8] sm:$0xff] }
 0x523   :  { %3164 = vmatpush.msrb.mxu0 %v7701_v34  ;;  %3281 = vmatpush.msra.mxu1 %v8048_v1  ;;  %v8072_v34 = vld [vmem:[#allocation15 + $0x380] sm:$0xff] }
 0x524   :  { %3204 = vmatpush.msrb.mxu2 %v7705_v60  ;;  %3321 = vmatpush.msra.mxu3 %v8052_v55  ;;  %v8076_v60 = vld [vmem:[#allocation15 + $0x388] sm:$0xff] }
 0x525   :  { %3165 = vmatpush.msrb.mxu0 %v7709_v46  ;;  %3282 = vmatpush.msra.mxu1 %v8056_v54  ;;  %v8080_v46 = vld [vmem:[#allocation15 + $0x360] sm:$0xff] }
 0x526   :  { %3205 = vmatpush.msrb.mxu2 %v7713_v51  ;;  %3322 = vmatpush.msra.mxu3 %v8060_v39  ;;  %v8084_v51 = vld [vmem:[#allocation15 + $0x368] sm:$0xff] }
 0x527   :  { %3166 = vmatpush.msrb.mxu0 %v7717_v63  ;;  %3283 = vmatpush.msra.mxu1 %v8064_v4  ;;  %v8088_v63 = vld [vmem:[#allocation15 + $0x340] sm:$0xff] }
 0x528   :  { %3206 = vmatpush.msrb.mxu2 %v7721_v3  ;;  %3323 = vmatpush.msra.mxu3 %v8068_v33  ;;  %v8092_v3 = vld [vmem:[#allocation15 + $0x348] sm:$0xff] }
 0x529   :  { %3167 = vmatpush.msrb.mxu0 %v7725_v37  ;;  %3284 = vmatpush.msra.mxu1 %v8072_v34  ;;  %v8096_v37 = vld [vmem:[#allocation15 + $0x320] sm:$0xff] }
 0x52a   :  { %3207 = vmatpush.msrb.mxu2 %v7729_v32  ;;  %3324 = vmatpush.msra.mxu3 %v8076_v60  ;;  %10624 = vst [vmem:[#allocation163_spill] sm:$0xff] %v8096_v37  ;;  %v8100_v32 = vld [vmem:[#allocation15 + $0x328] sm:$0xff] }
 0x52b   :  { %3168 = vmatpush.msrb.mxu0 %v7733_v47  ;;  %3285 = vmatpush.msra.mxu1 %v8080_v46  ;;  %10625 = vst [vmem:[#allocation59_spill] sm:$0xff] %v8100_v32  ;;  %v8104_v47 = vld [vmem:[#allocation15 + $0x300] sm:$0xff] }
 0x52c   :  { %3208 = vmatpush.msrb.mxu2 %v7737_v0  ;;  %3325 = vmatpush.msra.mxu3 %v8084_v51  ;;  %10626 = vst [vmem:[#allocation177_spill] sm:$0xff] %v8104_v47  ;;  %v8108_v0 = vld [vmem:[#allocation15 + $0x308] sm:$0xff] }
 0x52d   :  { %3169 = vmatpush.msrb.mxu0 %v7741_v14  ;;  %3286 = vmatpush.msra.mxu1 %v8088_v63  ;;  %10627 = vst [vmem:[#allocation60_spill] sm:$0xff] %v8108_v0  ;;  %v8112_v14 = vld [vmem:[#allocation15 + $0x2e0] sm:$0xff] }
 0x52e   :  { %3209 = vmatpush.msrb.mxu2 %v7745_v29  ;;  %3326 = vmatpush.msra.mxu3 %v8092_v3  ;;  %10628 = vst [vmem:[#allocation27_spill] sm:$0xff] %v8112_v14  ;;  %v8116_v29 = vld [vmem:[#allocation15 + $0x2e8] sm:$0xff] }
 0x52f   :  { %3170 = vmatpush.msrb.mxu0 %v7749_v18  ;;  %3287 = vmatpush.msra.mxu1 %v8096_v37  ;;  %10629 = vst [vmem:[#allocation178_spill] sm:$0xff] %v8116_v29  ;;  %v8120_v18 = vld [vmem:[#allocation15 + $0x2c0] sm:$0xff] }
 0x530   :  { %3210 = vmatpush.msrb.mxu2 %v7753_v15  ;;  %3327 = vmatpush.msra.mxu3 %v8100_v32  ;;  %10630 = vst [vmem:[#allocation61_spill] sm:$0xff] %v8120_v18  ;;  %v8124_v15 = vld [vmem:[#allocation15 + $0x2c8] sm:$0xff]  ;;  %v10742_v32 = vld [vmem:[#allocation46_spill] sm:$0xff] }
 0x531   :  { %3171 = vmatpush.msrb.mxu0 %v7757_v43  ;;  %3288 = vmatpush.msra.mxu1 %v8104_v47  ;;  %10631 = vst [vmem:[#allocation78_spill] sm:$0xff] %v8124_v15  ;;  %v8128_v43 = vld [vmem:[#allocation15 + $0x2a0] sm:$0xff] }
 0x532   :  { %3211 = vmatpush.msrb.mxu2 %v7761_v44  ;;  %3328 = vmatpush.msra.mxu3 %v8108_v0  ;;  %10632 = vst [vmem:[#allocation114_spill] sm:$0xff] %v8128_v43  ;;  %v8134_v44 = vld [vmem:[#allocation15 + $0x2a8] sm:$0xff] }
 0x533   :  { %3172 = vmatpush.msrb.mxu0 %v7765_v42  ;;  %3289 = vmatpush.msra.mxu1 %v8112_v14  ;;  %10633 = vst [vmem:[#allocation115_spill] sm:$0xff] %v8134_v44  ;;  %v8137_v42 = vld [vmem:[#allocation15 + $0x280] sm:$0xff]  ;;  %v10736_v14 = vld [vmem:[#allocation113_spill] sm:$0xff] }
 0x534   :  { %3212 = vmatpush.msrb.mxu2 %v7769_v5  ;;  %3329 = vmatpush.msra.mxu3 %v8116_v29  ;;  %10634 = vst [vmem:[#allocation116_spill] sm:$0xff] %v8137_v42  ;;  %v8140_v5 = vld [vmem:[#allocation15 + $0x1e0] sm:$0xff] }
 0x535   :  { %3173 = vmatpush.msrb.mxu0 %v7773_v8  ;;  %3290 = vmatpush.msra.mxu1 %v8120_v18  ;;  %10635 = vst [vmem:[#allocation117_spill] sm:$0xff] %v8140_v5  ;;  %v8143_v8 = vld [vmem:[#allocation15 + $0x288] sm:$0xff] }
 0x536   :  { %3213 = vmatpush.msrb.mxu2 %v7777_v40  ;;  %3330 = vmatpush.msra.mxu3 %v8124_v15  ;;  %10636 = vst [vmem:[#allocation118_spill] sm:$0xff] %v8143_v8  ;;  %v8146_v40 = vld [vmem:[#allocation15 + $0x1e8] sm:$0xff] }
 0x537   :  { %3174 = vmatpush.msrb.mxu0 %v7781_v25  ;;  %3291 = vmatpush.msra.mxu1 %v8128_v43  ;;  %10637 = vst [vmem:[#allocation119_spill] sm:$0xff] %v8146_v40  ;;  %v8149_v25 = vld [vmem:[#allocation15 + $0x260] sm:$0xff] }
 0x538   :  { %3214 = vmatpush.msrb.mxu2 %v7785_v21  ;;  %3175 = vmatmul.f32.vlgmr.msrb.gmra.mxu0 %v7999_v62  ;;  %10638 = vst [vmem:[#allocation120_spill] sm:$0xff] %v8149_v25  ;;  %v8152_v21 = vld [vmem:[#allocation15 + $0x1c0] sm:$0xff] }
 0x539   :  { %3215 = vmatmul.f32.vlgmr.msrb.gmra.mxu2 %v7999_v62  ;;  %3331 = vmatpush.msra.mxu3 %v8134_v44  ;;  %10639 = vst [vmem:[#allocation125_spill] sm:$0xff] %v8152_v21  ;;  %v8155_v62 = vld [vmem:[#allocation15 + $0x268] sm:$0xff] }
 0x53a   :  { %3292 = vmatpush.msra.mxu1 %v8137_v42  ;;  %3261 = vmatpush.msra.mxu0 %v8140_v5  ;;  %10640 = vst [vmem:[#allocation126_spill] sm:$0xff] %v8155_v62  ;;  %v8158_v5 = vld [vmem:[#allocation15 + $0x1c8] sm:$0xff] }
 0x53b   :  { %3332 = vmatpush.msra.mxu3 %v8143_v8  ;;  %3301 = vmatpush.msra.mxu2 %v8146_v40  ;;  %10641 = vst [vmem:[#allocation129_spill] sm:$0xff] %v8158_v5  ;;  %v8161_v8 = vld [vmem:[#allocation15 + $0x240] sm:$0xff] }
 0x53c   :  { %3293 = vmatpush.msra.mxu1 %v8149_v25  ;;  %3262 = vmatpush.msra.mxu0 %v8152_v21  ;;  %10642 = vst [vmem:[#allocation130_spill] sm:$0xff] %v8161_v8  ;;  %v8164_v40 = vld [vmem:[#allocation15 + $0x1a0] sm:$0xff]  ;;  %v8167_v25 = vld [vmem:[#allocation15 + $0x248] sm:$0xff] }
 0x53d   :  { %3333 = vmatpush.msra.mxu3 %v8155_v62  ;;  %3302 = vmatpush.msra.mxu2 %v8158_v5  ;;  %10643 = vst [vmem:[#allocation133_spill] sm:$0xff] %v8164_v40  ;;  %v8170_v21 = vld [vmem:[#allocation15 + $0x1a8] sm:$0xff]  ;;  %v8173_v62 = vld [vmem:[#allocation15 + $0x220] sm:$0xff] }
 0x53e   :  { %3294 = vmatpush.msra.mxu1 %v8161_v8  ;;  %3263 = vmatpush.msra.mxu0 %v8164_v40  ;;  %10644 = vst [vmem:[#allocation134_spill] sm:$0xff] %v8167_v25  ;;  %v8176_v5 = vld [vmem:[#allocation15 + $0x180] sm:$0xff]  ;;  %v8179_v8 = vld [vmem:[#allocation15 + $0x228] sm:$0xff] }
 0x53f   :  { %3334 = vmatpush.msra.mxu3 %v8167_v25  ;;  %10645 = vst [vmem:[#allocation137_spill] sm:$0xff] %v8170_v21  ;;  %3303 = vmatpush.msra.mxu2 %v8170_v21  ;;  %v8182_v40 = vld [vmem:[#allocation15 + $0x188] sm:$0xff]  ;;  %v8185_v25 = vld [vmem:[#allocation15 + $0x200] sm:$0xff] }
 0x540   :  { %10646 = vst [vmem:[#allocation138_spill] sm:$0xff] %v8173_v62  ;;  %3295 = vmatpush.msra.mxu1 %v8173_v62  ;;  %3264 = vmatpush.msra.mxu0 %v8176_v5  ;;  %v8188_v21 = vld [vmem:[#allocation15 + $0x160] sm:$0xff]  ;;  %v8191_v62 = vld [vmem:[#allocation15 + $0x208] sm:$0xff] }
 0x541   :  { %10647 = vst [vmem:[#allocation141_spill] sm:$0xff] %v8176_v5  ;;  %3335 = vmatpush.msra.mxu3 %v8179_v8  ;;  %3304 = vmatpush.msra.mxu2 %v8182_v40  ;;  %v8194_v5 = vld [vmem:[#allocation15 + $0x168] sm:$0xff] }
 0x542   :  { %10648 = vst [vmem:[#allocation144_spill] sm:$0xff] %v8179_v8  ;;  %3296 = vmatpush.msra.mxu1 %v8185_v25  ;;  %3265 = vmatpush.msra.mxu0 %v8188_v21  ;;  %v8197_v8 = vld [vmem:[#allocation15 + $0x3f0] sm:$0xff]  ;;  %v10741_v47 = vld [vmem:[#allocation80_spill] sm:$0xff] }
 0x543   :  { %10649 = vst [vmem:[#allocation147_spill] sm:$0xff] %v8182_v40  ;;  %3336 = vmatpush.msra.mxu3 %v8191_v62  ;;  %3305 = vmatpush.msra.mxu2 %v8194_v5  ;;  %v8200_v40 = vld [vmem:[#allocation15 + $0x3f8] sm:$0xff] }
 0x544   :  { %10650 = vst [vmem:[#allocation148_spill] sm:$0xff] %v8185_v25  ;;  %3361 = vmatpush.msrb.mxu1 %v8197_v8  ;;  %v8203_v25 = vld [vmem:[#allocation15 + $0x140] sm:$0xff] }
 0x545   :  { %10651 = vst [vmem:[#allocation151_spill] sm:$0xff] %v8188_v21  ;;  %3401 = vmatpush.msrb.mxu3 %v8200_v40  ;;  %3266 = vmatpush.msra.mxu0 %v8203_v25  ;;  %v8206_v21 = vld [vmem:[#allocation15 + $0x148] sm:$0xff] }
 0x546   :  { %10652 = vst [vmem:[#allocation152_spill] sm:$0xff] %v8191_v62  ;;  %3306 = vmatpush.msra.mxu2 %v8206_v21  ;;  %v8209_v62 = vld [vmem:[#allocation15 + $0x3d0] sm:$0xff] }
 0x547   :  { %10653 = vst [vmem:[#allocation155_spill] sm:$0xff] %v8194_v5  ;;  %3362 = vmatpush.msrb.mxu1 %v8209_v62  ;;  %v8212_v5 = vld [vmem:[#allocation15 + $0x3d8] sm:$0xff] }
 0x548   :  { %10654 = vst [vmem:[#allocation156_spill] sm:$0xff] %v8197_v8  ;;  %3402 = vmatpush.msrb.mxu3 %v8212_v5  ;;  %v8215_v8 = vld [vmem:[#allocation15 + $0x120] sm:$0xff] }
 0x549   :  { %10655 = vst [vmem:[#allocation161_spill] sm:$0xff] %v8200_v40  ;;  %3267 = vmatpush.msra.mxu0 %v8215_v8  ;;  %v8218_v40 = vld [vmem:[#allocation15 + $0x128] sm:$0xff] }
 0x54a   :  { %10656 = vst [vmem:[#allocation164_spill] sm:$0xff] %v8203_v25  ;;  %3307 = vmatpush.msra.mxu2 %v8218_v40  ;;  %v8221_v25 = vld [vmem:[#allocation15 + $0x3b0] sm:$0xff] }
 0x54b   :  { %10657 = vst [vmem:[#allocation167_spill] sm:$0xff] %v8206_v21  ;;  %3363 = vmatpush.msrb.mxu1 %v8221_v25  ;;  %v8224_v21 = vld [vmem:[#allocation15 + $0x3b8] sm:$0xff] }
 0x54c   :  { %10658 = vst [vmem:[#allocation168_spill] sm:$0xff] %v8209_v62  ;;  %3403 = vmatpush.msrb.mxu3 %v8224_v21  ;;  %v8227_v62 = vld [vmem:[#allocation15 + $0x100] sm:$0xff] }
 0x54d   :  { %10659 = vst [vmem:[#allocation171_spill] sm:$0xff] %v8212_v5  ;;  %3268 = vmatpush.msra.mxu0 %v8227_v62  ;;  %v8230_v5 = vld [vmem:[#allocation15 + $0x108] sm:$0xff] }
 0x54e   :  { %10660 = vst [vmem:[#allocation172_spill] sm:$0xff] %v8215_v8  ;;  %3308 = vmatpush.msra.mxu2 %v8230_v5  ;;  %v8233_v8 = vld [vmem:[#allocation15 + $0x390] sm:$0xff] }
 0x54f   :  { %10661 = vst [vmem:[#allocation175_spill] sm:$0xff] %v8218_v40  ;;  %3364 = vmatpush.msrb.mxu1 %v8233_v8  ;;  %v8236_v40 = vld [vmem:[#allocation15 + $0x398] sm:$0xff] }
 0x550   :  { %10662 = vst [vmem:[#allocation123_spill] sm:$0xff] %v8221_v25  ;;  %3404 = vmatpush.msrb.mxu3 %v8236_v40  ;;  %v8239_v25 = vld [vmem:[#allocation15 + $0xe0] sm:$0xff] }
 0x551   :  { %10663 = vst [vmem:[#allocation124_spill] sm:$0xff] %v8224_v21  ;;  %3269 = vmatpush.msra.mxu0 %v8239_v25  ;;  %v8242_v21 = vld [vmem:[#allocation15 + $0xe8] sm:$0xff] }
 0x552   :  { %10664 = vst [vmem:[#allocation176_spill] sm:$0xff] %v8227_v62  ;;  %3309 = vmatpush.msra.mxu2 %v8242_v21  ;;  %v8245_v62 = vld [vmem:[#allocation15 + $0x370] sm:$0xff] }
 0x553   :  { %10665 = vst [vmem:[#allocation127_spill] sm:$0xff] %v8230_v5  ;;  %3365 = vmatpush.msrb.mxu1 %v8245_v62  ;;  %v8248_v5 = vld [vmem:[#allocation15 + $0x378] sm:$0xff] }
 0x554   :  { %10666 = vst [vmem:[#allocation181_spill] sm:$0xff] %v8233_v8  ;;  %3405 = vmatpush.msrb.mxu3 %v8248_v5  ;;  %v8251_v8 = vld [vmem:[#allocation15 + $0xc0] sm:$0xff] }
 0x555   :  { %10667 = vst [vmem:[#allocation128_spill] sm:$0xff] %v8236_v40  ;;  %3270 = vmatpush.msra.mxu0 %v8251_v8  ;;  %v8254_v40 = vld [vmem:[#allocation15 + $0xc8] sm:$0xff] }
 0x556   :  { %10668 = vst [vmem:[#allocation184_spill] sm:$0xff] %v8239_v25  ;;  %3310 = vmatpush.msra.mxu2 %v8254_v40  ;;  %v8257_v25 = vld [vmem:[#allocation15 + $0x350] sm:$0xff] }
 0x557   :  { %10669 = vst [vmem:[#allocation131_spill] sm:$0xff] %v8242_v21  ;;  %3366 = vmatpush.msrb.mxu1 %v8257_v25  ;;  %v8260_v21 = vld [vmem:[#allocation15 + $0x358] sm:$0xff] }
 0x558   :  { %10670 = vst [vmem:[#allocation187_spill] sm:$0xff] %v8245_v62  ;;  %3406 = vmatpush.msrb.mxu3 %v8260_v21  ;;  %v8263_v62 = vld [vmem:[#allocation15 + $0xa0] sm:$0xff] }
 0x559   :  { %10671 = vst [vmem:[#allocation132_spill] sm:$0xff] %v8248_v5  ;;  %3271 = vmatpush.msra.mxu0 %v8263_v62  ;;  %v8266_v5 = vld [vmem:[#allocation15 + $0xa8] sm:$0xff] }
 0x55a   :  { %10672 = vst [vmem:[#allocation188_spill] sm:$0xff] %v8251_v8  ;;  %3311 = vmatpush.msra.mxu2 %v8266_v5  ;;  %v8269_v8 = vld [vmem:[#allocation15 + $0x330] sm:$0xff] }
 0x55b   :  { %10673 = vst [vmem:[#allocation135_spill] sm:$0xff] %v8254_v40  ;;  %3367 = vmatpush.msrb.mxu1 %v8269_v8  ;;  %v8272_v40 = vld [vmem:[#allocation15 + $0x338] sm:$0xff] }
 0x55c   :  { %10674 = vst [vmem:[#allocation191_spill] sm:$0xff] %v8257_v25  ;;  %3407 = vmatpush.msrb.mxu3 %v8272_v40  ;;  %v8275_v25 = vld [vmem:[#allocation15 + $0x80] sm:$0xff] }
 0x55d   :  { %10675 = vst [vmem:[#allocation136_spill] sm:$0xff] %v8260_v21  ;;  %3272 = vmatpush.msra.mxu0 %v8275_v25  ;;  %v8278_v21 = vld [vmem:[#allocation15 + $0x88] sm:$0xff] }
 0x55e   :  { %10676 = vst [vmem:[#allocation192_spill] sm:$0xff] %v8263_v62  ;;  %3312 = vmatpush.msra.mxu2 %v8278_v21  ;;  %v8281_v62 = vld [vmem:[#allocation15 + $0x310] sm:$0xff] }
 0x55f   :  { %10677 = vst [vmem:[#allocation139_spill] sm:$0xff] %v8266_v5  ;;  %3368 = vmatpush.msrb.mxu1 %v8281_v62  ;;  %v8284_v5 = vld [vmem:[#allocation15 + $0x318] sm:$0xff] }
 0x560   :  { %10678 = vst [vmem:[#allocation140_spill] sm:$0xff] %v8269_v8  ;;  %3408 = vmatpush.msrb.mxu3 %v8284_v5  ;;  %v8287_v8 = vld [vmem:[#allocation15 + $0x60] sm:$0xff] }
 0x561   :  { %10679 = vst [vmem:[#allocation145_spill] sm:$0xff] %v8272_v40  ;;  %3273 = vmatpush.msra.mxu0 %v8287_v8  ;;  %v8290_v40 = vld [vmem:[#allocation15 + $0x68] sm:$0xff] }
 0x562   :  { %10680 = vst [vmem:[#allocation146_spill] sm:$0xff] %v8275_v25  ;;  %3313 = vmatpush.msra.mxu2 %v8290_v40  ;;  %v8293_v25 = vld [vmem:[#allocation15 + $0x2f0] sm:$0xff] }
 0x563   :  { %10681 = vst [vmem:[#allocation149_spill] sm:$0xff] %v8278_v21  ;;  %3369 = vmatpush.msrb.mxu1 %v8293_v25  ;;  %v8296_v21 = vld [vmem:[#allocation15 + $0x2f8] sm:$0xff] }
 0x564   :  { %10682 = vst [vmem:[#allocation150_spill] sm:$0xff] %v8281_v62  ;;  %3409 = vmatpush.msrb.mxu3 %v8296_v21  ;;  %v8299_v62 = vld [vmem:[#allocation15 + $0x40] sm:$0xff] }
 0x565   :  { %10683 = vst [vmem:[#allocation153_spill] sm:$0xff] %v8284_v5  ;;  %3274 = vmatpush.msra.mxu0 %v8299_v62  ;;  %v8302_v5 = vld [vmem:[#allocation15 + $0x48] sm:$0xff] }
 0x566   :  { %10684 = vst [vmem:[#allocation154_spill] sm:$0xff] %v8287_v8  ;;  %3314 = vmatpush.msra.mxu2 %v8302_v5  ;;  %v8305_v8 = vld [vmem:[#allocation15 + $0x2d0] sm:$0xff] }
 0x567   :  { %10685 = vst [vmem:[#allocation159_spill] sm:$0xff] %v8290_v40  ;;  %3370 = vmatpush.msrb.mxu1 %v8305_v8  ;;  %v8308_v40 = vld [vmem:[#allocation15 + $0x2d8] sm:$0xff] }
 0x568   :  { %10686 = vst [vmem:[#allocation160_spill] sm:$0xff] %v8293_v25  ;;  %3410 = vmatpush.msrb.mxu3 %v8308_v40  ;;  %v8311_v25 = vld [vmem:[#allocation15 + $0x20] sm:$0xff] }
 0x569   :  { %10687 = vst [vmem:[#allocation165_spill] sm:$0xff] %v8296_v21  ;;  %3275 = vmatpush.msra.mxu0 %v8311_v25  ;;  %v8314_v21 = vld [vmem:[#allocation15 + $0x28] sm:$0xff] }
 0x56a   :  { %10688 = vst [vmem:[#allocation166_spill] sm:$0xff] %v8299_v62  ;;  %3315 = vmatpush.msra.mxu2 %v8314_v21  ;;  %v8317_v62 = vld [vmem:[#allocation15 + $0x2b0] sm:$0xff] }
 0x56b   :  { %10689 = vst [vmem:[#allocation169_spill] sm:$0xff] %v8302_v5  ;;  %3371 = vmatpush.msrb.mxu1 %v8317_v62  ;;  %v8320_v5 = vld [vmem:[#allocation15 + $0x2b8] sm:$0xff] }
 0x56c   :  { %10690 = vst [vmem:[#allocation170_spill] sm:$0xff] %v8305_v8  ;;  %3411 = vmatpush.msrb.mxu3 %v8320_v5  ;;  %v8323_v8 = vld [vmem:[#allocation15] sm:$0xff] }
 0x56d   :  { %10691 = vst [vmem:[#allocation173_spill] sm:$0xff] %v8308_v40  ;;  %3276 = vmatpush.msra.mxu0 %v8323_v8  ;;  %v8326_v40 = vld [vmem:[#allocation15 + $0x8] sm:$0xff] }
 0x56e   :  { %10692 = vst [vmem:[#allocation174_spill] sm:$0xff] %v8311_v25  ;;  %3316 = vmatpush.msra.mxu2 %v8326_v40  ;;  %v8329_v25 = vld [vmem:[#allocation15 + $0x290] sm:$0xff] }
 0x56f   :  { %10693 = vst [vmem:[#allocation179_spill] sm:$0xff] %v8314_v21  ;;  %3372 = vmatpush.msrb.mxu1 %v8329_v25  ;;  %v8332_v21 = vld [vmem:[#allocation15 + $0x298] sm:$0xff] }
 0x570   :  { %10694 = vst [vmem:[#allocation180_spill] sm:$0xff] %v8317_v62  ;;  %3412 = vmatpush.msrb.mxu3 %v8332_v21  ;;  %v8335_v62 = vld [vmem:[#allocation15 + $0x1f0] sm:$0xff] }
 0x571   :  { %10695 = vst [vmem:[#allocation185_spill] sm:$0xff] %v8320_v5  ;;  %3341 = vmatpush.msrb.mxu0 %v8335_v62  ;;  %v8338_v5 = vld [vmem:[#allocation15 + $0x1f8] sm:$0xff] }
 0x572   :  { %10696 = vst [vmem:[#allocation186_spill] sm:$0xff] %v8323_v8  ;;  %3381 = vmatpush.msrb.mxu2 %v8338_v5  ;;  %v8341_v8 = vld [vmem:[#allocation15 + $0x270] sm:$0xff] }
 0x573   :  { %10697 = vst [vmem:[#allocation189_spill] sm:$0xff] %v8326_v40  ;;  %3373 = vmatpush.msrb.mxu1 %v8341_v8  ;;  %v8344_v40 = vld [vmem:[#allocation15 + $0x278] sm:$0xff] }
 0x574   :  { %10698 = vst [vmem:[#allocation190_spill] sm:$0xff] %v8329_v25  ;;  %3413 = vmatpush.msrb.mxu3 %v8344_v40  ;;  %v8347_v25 = vld [vmem:[#allocation15 + $0x1d0] sm:$0xff] }
 0x575   :  { %10699 = vst [vmem:[#allocation193_spill] sm:$0xff] %v8332_v21  ;;  %3342 = vmatpush.msrb.mxu0 %v8347_v25  ;;  %v8350_v21 = vld [vmem:[#allocation15 + $0x1d8] sm:$0xff] }
 0x576   :  { %10700 = vst [vmem:[#allocation194_spill] sm:$0xff] %v8335_v62  ;;  %3382 = vmatpush.msrb.mxu2 %v8350_v21  ;;  %v8353_v62 = vld [vmem:[#allocation15 + $0x250] sm:$0xff] }
 0x577   :  { %10701 = vst [vmem:[#allocation199_spill] sm:$0xff] %v8338_v5  ;;  %3374 = vmatpush.msrb.mxu1 %v8353_v62  ;;  %v8356_v5 = vld [vmem:[#allocation15 + $0x258] sm:$0xff] }
 0x578   :  { %10702 = vst [vmem:[#allocation200_spill] sm:$0xff] %v8341_v8  ;;  %3414 = vmatpush.msrb.mxu3 %v8356_v5  ;;  %v8359_v8 = vld [vmem:[#allocation15 + $0x1b0] sm:$0xff] }
 0x579   :  { %10703 = vst [vmem:[#allocation205_spill] sm:$0xff] %v8344_v40  ;;  %3343 = vmatpush.msrb.mxu0 %v8359_v8  ;;  %v8362_v40 = vld [vmem:[#allocation15 + $0x1b8] sm:$0xff] }
 0x57a   :  { %10704 = vst [vmem:[#allocation75_spill] sm:$0xff] %v8347_v25  ;;  %3383 = vmatpush.msrb.mxu2 %v8362_v40  ;;  %v8365_v25 = vld [vmem:[#allocation15 + $0x230] sm:$0xff] }
 0x57b   :  { %10705 = vst [vmem:[#allocation76_spill] sm:$0xff] %v8350_v21  ;;  %3375 = vmatpush.msrb.mxu1 %v8365_v25  ;;  %v8368_v21 = vld [vmem:[#allocation15 + $0x238] sm:$0xff] }
 0x57c   :  { %10706 = vst [vmem:[#allocation77_spill] sm:$0xff] %v8353_v62  ;;  %3415 = vmatpush.msrb.mxu3 %v8368_v21  ;;  %v8371_v62 = vld [vmem:[#allocation15 + $0x190] sm:$0xff] }
 0x57d   :  { %10707 = vst [vmem:[#allocation40_spill] sm:$0xff] %v8356_v5  ;;  %3344 = vmatpush.msrb.mxu0 %v8371_v62  ;;  %v8374_v5 = vld [vmem:[#allocation15 + $0x198] sm:$0xff] }
 0x57e   :  { %10708 = vst [vmem:[#allocation142_spill] sm:$0xff] %v8359_v8  ;;  %3384 = vmatpush.msrb.mxu2 %v8374_v5  ;;  %v8377_v8 = vld [vmem:[#allocation15 + $0x210] sm:$0xff] }
 0x57f   :  { %10709 = vst [vmem:[#allocation41_spill] sm:$0xff] %v8362_v40  ;;  %3376 = vmatpush.msrb.mxu1 %v8377_v8  ;;  %v8380_v40 = vld [vmem:[#allocation15 + $0x218] sm:$0xff] }
 0x580   :  { %10710 = vst [vmem:[#allocation54_spill] sm:$0xff] %v8365_v25  ;;  %3416 = vmatpush.msrb.mxu3 %v8380_v40  ;;  %v8383_v25 = vld [vmem:[#allocation15 + $0x170] sm:$0xff] }
 0x581   :  { %10711 = vst [vmem:[#allocation143_spill] sm:$0xff] %v8368_v21  ;;  %3345 = vmatpush.msrb.mxu0 %v8383_v25  ;;  %v8386_v21 = vld [vmem:[#allocation15 + $0x178] sm:$0xff] }
 0x582   :  { %10712 = vst [vmem:[#allocation55_spill] sm:$0xff] %v8371_v62  ;;  %3385 = vmatpush.msrb.mxu2 %v8386_v21  ;;  %v8389_v62 = vld [vmem:[#allocation15 + $0x150] sm:$0xff] }
 0x583   :  { %10713 = vst [vmem:[#allocation157_spill] sm:$0xff] %v8374_v5  ;;  %3346 = vmatpush.msrb.mxu0 %v8389_v62  ;;  %v8392_v5 = vld [vmem:[#allocation15 + $0x158] sm:$0xff] }
 0x584   :  { %10714 = vst [vmem:[#allocation56_spill] sm:$0xff] %v8377_v8  ;;  %3386 = vmatpush.msrb.mxu2 %v8392_v5  ;;  %v8395_v8 = vld [vmem:[#allocation15 + $0x130] sm:$0xff] }
 0x585   :  { %10715 = vst [vmem:[#allocation26_spill] sm:$0xff] %v8380_v40  ;;  %3347 = vmatpush.msrb.mxu0 %v8395_v8  ;;  %v8398_v40 = vld [vmem:[#allocation15 + $0x138] sm:$0xff] }
 0x586   :  { %10716 = vst [vmem:[#allocation158_spill] sm:$0xff] %v8383_v25  ;;  %3387 = vmatpush.msrb.mxu2 %v8398_v40  ;;  %v8401_v25 = vld [vmem:[#allocation15 + $0x110] sm:$0xff] }
 0x587   :  { %10717 = vst [vmem:[#allocation57_spill] sm:$0xff] %v8386_v21  ;;  %3348 = vmatpush.msrb.mxu0 %v8401_v25  ;;  %v8404_v21 = vld [vmem:[#allocation15 + $0x118] sm:$0xff] }
 0x588   :  { %10718 = vst [vmem:[#allocation39_spill] sm:$0xff] %v8389_v62  ;;  %3388 = vmatpush.msrb.mxu2 %v8404_v21  ;;  %v8407_v62 = vld [vmem:[#allocation15 + $0xf0] sm:$0xff] }
 0x589   :  { %10719 = vst [vmem:[#allocation25_spill] sm:$0xff] %v8392_v5  ;;  %3349 = vmatpush.msrb.mxu0 %v8407_v62  ;;  %v8410_v5 = vld [vmem:[#allocation15 + $0xf8] sm:$0xff] }
 0x58a   :  { %10720 = vst [vmem:[#allocation92_spill] sm:$0xff] %v8395_v8  ;;  %3389 = vmatpush.msrb.mxu2 %v8410_v5  ;;  %v8413_v8 = vld [vmem:[#allocation15 + $0xd0] sm:$0xff] }
 0x58b   :  { %10721 = vst [vmem:[#allocation93_spill] sm:$0xff] %v8398_v40  ;;  %3350 = vmatpush.msrb.mxu0 %v8413_v8  ;;  %v8416_v40 = vld [vmem:[#allocation15 + $0xd8] sm:$0xff] }
 0x58c   :  { %10722 = vst [vmem:[#allocation94_spill] sm:$0xff] %v8401_v25  ;;  %3390 = vmatpush.msrb.mxu2 %v8416_v40  ;;  %v8419_v25 = vld [vmem:[#allocation15 + $0xb0] sm:$0xff] }
 0x58d   :  { %10723 = vst [vmem:[#allocation95_spill] sm:$0xff] %v8404_v21  ;;  %3351 = vmatpush.msrb.mxu0 %v8419_v25  ;;  %v8422_v21 = vld [vmem:[#allocation15 + $0xb8] sm:$0xff] }
 0x58e   :  { %10724 = vst [vmem:[#allocation96_spill] sm:$0xff] %v8407_v62  ;;  %3391 = vmatpush.msrb.mxu2 %v8422_v21  ;;  %v8425_v62 = vld [vmem:[#allocation15 + $0x90] sm:$0xff] }
 0x58f   :  { %10725 = vst [vmem:[#allocation101_spill] sm:$0xff] %v8410_v5  ;;  %3352 = vmatpush.msrb.mxu0 %v8425_v62  ;;  %v8428_v5 = vld [vmem:[#allocation15 + $0x98] sm:$0xff] }
 0x590   :  { %10726 = vst [vmem:[#allocation102_spill] sm:$0xff] %v8413_v8  ;;  %3392 = vmatpush.msrb.mxu2 %v8428_v5  ;;  %v8431_v8 = vld [vmem:[#allocation15 + $0x70] sm:$0xff] }
 0x591   :  { %10727 = vst [vmem:[#allocation103_spill] sm:$0xff] %v8416_v40  ;;  %3353 = vmatpush.msrb.mxu0 %v8431_v8  ;;  %v8434_v40 = vld [vmem:[#allocation15 + $0x78] sm:$0xff] }
 0x592   :  { %10728 = vst [vmem:[#allocation104_spill] sm:$0xff] %v8419_v25  ;;  %3393 = vmatpush.msrb.mxu2 %v8434_v40  ;;  %v8437_v25 = vld [vmem:[#allocation15 + $0x50] sm:$0xff] }
 0x593   :  { %10729 = vst [vmem:[#allocation105_spill] sm:$0xff] %v8422_v21  ;;  %3354 = vmatpush.msrb.mxu0 %v8437_v25  ;;  %v8440_v21 = vld [vmem:[#allocation15 + $0x58] sm:$0xff] }
 0x594   :  { %10730 = vst [vmem:[#allocation217_spill] sm:$0xff] %v8425_v62  ;;  %3394 = vmatpush.msrb.mxu2 %v8440_v21 }
 0x595   :  { %10731 = vst [vmem:[#allocation218_spill] sm:$0xff] %v8428_v5  ;;  %3355 = vmatpush.msrb.mxu0 %v7893_v31  ;;  %v3011_v5 = vpop.f32.mrf.mxu1 }
 0x596   :  { %10732 = vst [vmem:[#allocation219_spill] sm:$0xff] %v8431_v8  ;;  %3395 = vmatpush.msrb.mxu2 %v7896_v19  ;;  %v2991_v8 = vpop.f32.mrf.mxu0 }
 0x597   :  { %10733 = vst [vmem:[#allocation220_spill] sm:$0xff] %v8434_v40  ;;  %3356 = vmatpush.msrb.mxu0 %v7899_v13  ;;  %v2992_v40 = vadd.f32 %v2991_v8, %v10597_v45 }
 0x598   :  { %10734 = vst [vmem:[#allocation221_spill] sm:$0xff] %v8437_v25  ;;  %3396 = vmatpush.msrb.mxu2 %v7902_v58  ;;  %v3051_v25 = vpop.f32.mrf.mxu3 }
 0x599   :  { %10735 = vst [vmem:[#allocation222_spill] sm:$0xff] %v8440_v21  ;;  %v3012_v62 = vadd.f32 %v3011_v5, %v2992_v40  ;;  %v10737_v40 = vld [vmem:[#allocation208_spill] sm:$0xff] }
 0x59a   :  { %v3031_v44 = vpop.f32.mrf.mxu2 }
 0x59b   :  { %v3134_v42 = vmul.f32 0.5, %v3012_v62  ;;  %v3032_v43 = vadd.f32 %v3031_v44, %v10598_v20  ;;  %v10738_v62 = vld [vmem:[#allocation87_spill] sm:$0xff] }
 0x59c   :  { %v1513_v45 = vadd.f32 %v10738_v62, %v10737_v40  ;;  %v10743_v62 = vld [vmem:[#allocation197_spill] sm:$0xff] }
 0x59d   :  { %4448 = vtanh.f32 %v3134_v42  ;;  %v3052_v21 = vadd.f32 %v3051_v25, %v3032_v43  ;;  %v3091_v19 = vpop.f32.mrf.mxu1  ;;  %v10739_v43 = vld [vmem:[#allocation88_spill] sm:$0xff] }
 0x59e   :  { %v3071_v15 = vpop.f32.mrf.mxu0  ;;  %v1554_v25 = vadd.f32 %v10739_v43, %v1513_v45  ;;  %v10746_v45 = vld [vmem:[#allocation66_spill] sm:$0xff] }
 0x59f   :  { %v3072_v31 = vadd.f32 %v3071_v15, %v10599_v35  ;;  %v3138_v18 = vmul.f32 0.5, %v3052_v21  ;;  %v10747_v43 = vld [vmem:[#allocation198_spill] sm:$0xff] }
 0x5a0   :  { %v3131_v5 = vpop.f32.mrf.mxu3 }
 0x5a1   :  { %v3092_v13 = vadd.f32 %v3091_v19, %v3072_v31  ;;  %4450 = vtanh.f32 %v3138_v18  ;;  %v10740_v19 = vld [vmem:[#allocation89_spill] sm:$0xff] }
 0x5a3   :  { %v4449_v58 = vpop.eup %4448  ;;  %4452 = vtanh.f32 %v3092_v13  ;;  %v3111_v29 = vpop.f32.mrf.mxu2  ;;  %v1595_v13 = vadd.f32 %v10740_v19, %v1554_v25  ;;  %v10748_v25 = vld [vmem:[#allocation67_spill] sm:$0xff] }
 0x5a4   :  { %v3112_v8 = vadd.f32 %v3111_v29, %v10736_v14  ;;  %v3136_v0 = vmul.f32 0.5, %v4449_v58 }
 0x5a5   :  { %v3196_v18 = vpop.f32.mrf.mxu1  ;;  %v1636_v58 = vadd.f32 %v10743_v62, %v1595_v13  ;;  %v10751_v13 = vld [vmem:[#allocation29_spill] sm:$0xff] }
 0x5a6   :  { %v3132_v44 = vadd.f32 %v3131_v5, %v3112_v8  ;;  %v3137_v21 = vadd.f32 0.5, %v3136_v0  ;;  %v3240_v37 = vadd.f32 %v3196_v18, %v10742_v32  ;;  %v10745_v5 = vld [vmem:[#allocation47_spill] sm:$0xff] }
 0x5a7   :  { %v4451_v42 = vpop.eup %4450 }
 0x5a8   :  { %v3140_v20 = vmul.f32 0.5, %v4451_v42  ;;  %v3143_v15 = vmul.f32 0.5, %v3132_v44  ;;  %v1308_v42 = vadd.f32 %v10746_v45, %v10745_v5  ;;  %v3236_v5 = vpop.f32.mrf.mxu3  ;;  %v10752_v45 = vld [vmem:[#allocation202_spill] sm:$0xff] }
 0x5a9   :  { %v4453_v35 = vpop.eup %4452 }
 0x5aa   :  { %v3141_v31 = vadd.f32 0.5, %v3140_v20  ;;  %4454 = vtanh.f32 %v3143_v15  ;;  %v3148_v14 = vmul.f32 %v4453_v35, %v3137_v21  ;;  %v3247_v20 = vmul.f32 0.5, %v3240_v37  ;;  %v10750_v21 = vld [vmem:[#allocation68_spill] sm:$0xff] }
 0x5ab   :  { %v1677_v15 = vadd.f32 %v10747_v43, %v1636_v58  ;;  %v1349_v19 = vadd.f32 %v10748_v25, %v1308_v42 }
 0x5ac   :  { %v3147_v29 = vmul.f32 %v3141_v31, %v10741_v47  ;;  %v10749_v47 = vld [vmem:[#allocation201_spill] sm:$0xff] }
 0x5ad   :  { %v1718_v35 = vadd.f32 %v10749_v47, %v1677_v15  ;;  %v1390_v32 = vadd.f32 %v10750_v21, %v1349_v19  ;;  %v8553_v47 = vld [vmem:[#allocation12 + $0x120] sm:$0xff] }
 0x5ae   :  { %v8458_v8 = vadd.f32 %v3148_v14, %v3147_v29  ;;  %v8561_v21 = vld [vmem:[#allocation12 + $0x100] sm:$0xff] }
 0x5b0   :  { %10744 = vst [vmem:[#allocation223_spill] sm:$0xff] %v8458_v8  ;;  %v4455_v44 = vpop.eup %4454  ;;  %4456 = vtanh.f32 %v8458_v8  ;;  %v1759_v8 = vadd.f32 %v10752_v45, %v1718_v35  ;;  %v8557_v35 = vld [vmem:[#allocation12 + $0x130] sm:$0xff] }
 0x5b1   :  { %v3145_v0 = vmul.f32 0.5, %v4455_v44  ;;  %4458 = vtanh.f32 %v3247_v20  ;;  %v10753_v44 = vld [vmem:[#allocation69_spill] sm:$0xff]  ;;  %v10754_v20 = vld [vmem:[#allocation86_spill] sm:$0xff] }
 0x5b2   :  { %v1431_v40 = vadd.f32 %v10753_v44, %v1390_v32  ;;  %v3242_v58 = vadd.f32 %v3236_v5, %v1759_v8  ;;  %v8597_v32 = vld [vmem:[#allocation12 + $0x90] sm:$0xff]  ;;  %v8617_v5 = vld [vmem:[#allocation12 + $0x20] sm:$0xff]  ;;  %v10767_v44 = vld [vmem:[#allocation78_spill] sm:$0xff] }
 0x5b3   :  { %v3146_v31 = vadd.f32 0.5, %v3145_v0  ;;  %v10766_v45 = vld [vmem:[#allocation61_spill] sm:$0xff] }
 0x5b4   :  { %v1472_v0 = vadd.f32 %v10754_v20, %v1431_v40  ;;  %v3252_v19 = vmul.f32 0.5, %v3242_v58  ;;  %v8625_v58 = vld [vmem:[#allocation12] sm:$0xff]  ;;  %v8629_v20 = vld [vmem:[#allocation12 + $0x10] sm:$0xff] }
 0x5b5   :  { %v3176_v14 = vpop.f32.mrf.mxu0 }
 0x5b6   :  { %v4457_v18 = vpop.eup %4456  ;;  %v3239_v29 = vadd.f32 %v3176_v14, %v10751_v13  ;;  %v8605_v14 = vld [vmem:[#allocation12 + $0x70] sm:$0xff]  ;;  %v10764_v13 = vld [vmem:[#allocation27_spill] sm:$0xff] }
 0x5b7   :  { %v3151_v62 = vmul.f32 %v4457_v18, %v3146_v31  ;;  %v4459_v42 = vpop.eup %4458  ;;  %v8601_v31 = vld [vmem:[#allocation12 + $0x60] sm:$0xff] }
 0x5b8   :  { %v3243_v37 = vmul.f32 0.5, %v3239_v29  ;;  %v3249_v25 = vmul.f32 0.5, %v4459_v42  ;;  %v8609_v18 = vld [vmem:[#allocation12 + $0x40] sm:$0xff]  ;;  %v8613_v29 = vld [vmem:[#allocation12 + $0x50] sm:$0xff]  ;;  %v10768_v42 = vld [vmem:[#allocation114_spill] sm:$0xff] }
 0x5b9   :  { %3153 = vst [vmem:[#allocation18 + $0x18] sm:$0xff] %v3151_v62  ;;  %3297 = vmatmul.f32.vlgmr.msra.gmra.mxu1 %v3151_v62  ;;  %3337 = vmatmul.f32.vlgmr.msra.gmra.mxu3 %v3151_v62 }
 0x5ba   :  { %4460 = vtanh.f32 %v3243_v37  ;;  %3466 = vmatpush.msra.mxu1 %v7929_v61  ;;  %3506 = vmatpush.msra.mxu3 %v7932_v24  ;;  %v3250_v24 = vadd.f32 0.5, %v3249_v25  ;;  %v8621_v37 = vld [vmem:[#allocation12 + $0x30] sm:$0xff]  ;;  %v10772_v25 = vld [vmem:[#allocation118_spill] sm:$0xff] }
 0x5bc   :  { %v3216_v43 = vpop.f32.mrf.mxu2  ;;  %3467 = vmatpush.msra.mxu1 %v7935_v12  ;;  %3507 = vmatpush.msra.mxu3 %v7938_v57 }
 0x5bd   :  { %v3241_v15 = vadd.f32 %v3216_v43, %v1472_v0  ;;  %v10769_v0 = vld [vmem:[#allocation115_spill] sm:$0xff]  ;;  %v10770_v43 = vld [vmem:[#allocation116_spill] sm:$0xff] }
 0x5be   :  { %3468 = vmatpush.msra.mxu1 %v7941_v16  ;;  %3508 = vmatpush.msra.mxu3 %v7944_v7  ;;  %v3256_v16 = vmul.f32 %v3250_v24, %v7972_v52  ;;  %v10758_v52 = vld [vmem:[#allocation43_spill] sm:$0xff]  ;;  %v10776_v24 = vld [vmem:[#allocation126_spill] sm:$0xff] }
 0x5bf   :  { %4462 = vtanh.f32 %v3241_v15  ;;  %v10771_v15 = vld [vmem:[#allocation117_spill] sm:$0xff] }
 0x5c0   :  { %v4461_v8 = vpop.eup %4460  ;;  %3469 = vmatpush.msra.mxu1 %v7947_v59  ;;  %3509 = vmatpush.msra.mxu3 %v7950_v30  ;;  %4464 = vtanh.f32 %v3252_v19  ;;  %v10773_v19 = vld [vmem:[#allocation119_spill] sm:$0xff] }
 0x5c1   :  { %v3245_v61 = vmul.f32 0.5, %v4461_v8  ;;  %3377 = vmatmul.f32.vlgmr.msrb.gmra.mxu1 %v3151_v62  ;;  %3417 = vmatmul.f32.vlgmr.msrb.gmra.mxu3 %v3151_v62  ;;  %v10765_v62 = vld [vmem:[#allocation178_spill] sm:$0xff]  ;;  %v10774_v8 = vld [vmem:[#allocation120_spill] sm:$0xff] }
 0x5c2   :  { %3470 = vmatpush.msra.mxu1 %v7953_v22  ;;  %3510 = vmatpush.msra.mxu3 %v7956_v2  ;;  %v10755_v22 = vld [vmem:[#allocation81_spill] sm:$0xff]  ;;  %v10756_v2 = vld [vmem:[#allocation42_spill] sm:$0xff] }
 0x5c3   :  { %v3246_v12 = vadd.f32 0.5, %v3245_v61  ;;  %v10775_v61 = vld [vmem:[#allocation125_spill] sm:$0xff] }
 0x5c4   :  { %3471 = vmatpush.msra.mxu1 %v7959_v50  ;;  %3511 = vmatpush.msra.mxu3 %v7962_v17  ;;  %v10757_v50 = vld [vmem:[#allocation162_spill] sm:$0xff] }
 0x5c5   :  { %v4463_v57 = vpop.eup %4462 }
 0x5c6   :  { %v3257_v7 = vmul.f32 %v4463_v57, %v3246_v12  ;;  %3472 = vmatpush.msra.mxu1 %v7966_v28  ;;  %3512 = vmatpush.msra.mxu3 %v7969_v27  ;;  %v4465_v59 = vpop.eup %4464  ;;  %v10777_v12 = vld [vmem:[#allocation129_spill] sm:$0xff]  ;;  %v10778_v57 = vld [vmem:[#allocation130_spill] sm:$0xff] }
 0x5c7   :  { %v3254_v17 = vmul.f32 0.5, %v4465_v59  ;;  %v10781_v59 = vld [vmem:[#allocation137_spill] sm:$0xff] }
 0x5c8   :  { %v8486_v30 = vadd.f32 %v3257_v7, %v3256_v16  ;;  %3473 = vmatpush.msra.mxu1 %v7974_v49  ;;  %3513 = vmatpush.msra.mxu3 %v10755_v22  ;;  %v10759_v49 = vld [vmem:[#allocation58_spill] sm:$0xff]  ;;  %v10779_v16 = vld [vmem:[#allocation133_spill] sm:$0xff] }
 0x5c9   :  { %v3255_v28 = vadd.f32 0.5, %v3254_v17  ;;  %v10780_v7 = vld [vmem:[#allocation134_spill] sm:$0xff]  ;;  %v10785_v17 = vld [vmem:[#allocation147_spill] sm:$0xff] }
 0x5ca   :  { %4466 = vtanh.f32 %v8486_v30  ;;  %3474 = vmatpush.msra.mxu1 %v10756_v2  ;;  %3514 = vmatpush.msra.mxu3 %v10757_v50  ;;  %v10782_v22 = vld [vmem:[#allocation138_spill] sm:$0xff]  ;;  %v10783_v2 = vld [vmem:[#allocation141_spill] sm:$0xff]  ;;  %v10784_v50 = vld [vmem:[#allocation144_spill] sm:$0xff] }
 0x5cc   :  { %3475 = vmatpush.msra.mxu1 %v10758_v52  ;;  %3515 = vmatpush.msra.mxu3 %v7990_v9  ;;  %v8505_v9 = vld [vmem:[#allocation12 + $0x1e0] sm:$0xff]  ;;  %v10786_v52 = vld [vmem:[#allocation148_spill] sm:$0xff] }
 0x5ce   :  { %3476 = vmatpush.msra.mxu1 %v7993_v6  ;;  %3516 = vmatpush.msra.mxu3 %v7996_v56  ;;  %v8508_v6 = vld [vmem:[#allocation12 + $0x1f0] sm:$0xff] }
 0x5cf   :  { %v8516_v56 = vld [vmem:[#allocation12 + $0x1d0] sm:$0xff] }
 0x5d0   :  { %v4467_v27 = vpop.eup %4466  ;;  %3477 = vmatpush.msra.mxu1 %v8001_v38  ;;  %3517 = vmatpush.msra.mxu3 %v10759_v49  ;;  %v8513_v38 = vld [vmem:[#allocation12 + $0x1c0] sm:$0xff] }
 0x5d1   :  { %v8499_v40 = vmul.f32 %v4467_v27, %v3255_v28  ;;  %v10787_v28 = vld [vmem:[#allocation151_spill] sm:$0xff]  ;;  %v10788_v27 = vld [vmem:[#allocation152_spill] sm:$0xff] }
 0x5d2   :  { %3478 = vmatpush.msra.mxu1 %v8011_v26  ;;  %3518 = vmatpush.msra.mxu3 %v8014_v36  ;;  %v8521_v26 = vld [vmem:[#allocation12 + $0x1a0] sm:$0xff]  ;;  %v8524_v36 = vld [vmem:[#allocation12 + $0x1b0] sm:$0xff] }
 0x5d3   :  { %3277 = vmatmul.f32.vlgmr.msra.gmra.mxu0 %v8499_v40  ;;  %3317 = vmatmul.f32.vlgmr.msra.gmra.mxu2 %v8499_v40  ;;  %v10789_v49 = vld [vmem:[#allocation155_spill] sm:$0xff] }
 0x5d4   :  { %3446 = vmatpush.msra.mxu0 %v8505_v9  ;;  %3486 = vmatpush.msra.mxu2 %v8508_v6 }
 0x5d5   :  { %3479 = vmatpush.msra.mxu1 %v8019_v11  ;;  %3519 = vmatpush.msra.mxu3 %v8022_v23  ;;  %v8529_v23 = vld [vmem:[#allocation12 + $0x180] sm:$0xff]  ;;  %v8532_v11 = vld [vmem:[#allocation12 + $0x190] sm:$0xff] }
 0x5d6   :  { %3447 = vmatpush.msra.mxu0 %v8513_v38  ;;  %3487 = vmatpush.msra.mxu2 %v8516_v56 }
 0x5d7   :  { %3480 = vmatpush.msra.mxu1 %v8027_v10  ;;  %3520 = vmatpush.msra.mxu3 %v8030_v41  ;;  %v8537_v10 = vld [vmem:[#allocation12 + $0x160] sm:$0xff]  ;;  %v8541_v41 = vld [vmem:[#allocation12 + $0x170] sm:$0xff] }
 0x5d8   :  { %3448 = vmatpush.msra.mxu0 %v8521_v26  ;;  %3488 = vmatpush.msra.mxu2 %v8524_v36 }
 0x5d9   :  { %3481 = vmatpush.msra.mxu1 %v8035_v53  ;;  %3521 = vmatpush.msra.mxu3 %v8038_v48  ;;  %v8545_v53 = vld [vmem:[#allocation12 + $0x140] sm:$0xff]  ;;  %v8549_v48 = vld [vmem:[#allocation12 + $0x150] sm:$0xff] }
 0x5da   :  { %3449 = vmatpush.msra.mxu0 %v8529_v23  ;;  %3489 = vmatpush.msra.mxu2 %v8532_v11 }
 0x5db   :  { %3357 = vmatmul.f32.vlgmr.msrb.gmra.mxu0 %v8499_v40  ;;  %3397 = vmatmul.f32.vlgmr.msrb.gmra.mxu2 %v8499_v40 }
 0x5dc   :  { %3450 = vmatpush.msra.mxu0 %v8537_v10  ;;  %3482 = vmatmul.f32.vlgmr.msra.gmra.mxu1 %v8499_v40 }
 0x5dd   :  { %3490 = vmatpush.msra.mxu2 %v8541_v41  ;;  %3522 = vmatmul.f32.vlgmr.msra.gmra.mxu3 %v8499_v40 }
 0x5de   :  { %3451 = vmatpush.msra.mxu0 %v8545_v53  ;;  %3568 = vmatpush.msrb.mxu1 %v8048_v1  ;;  %v8565_v1 = vld [vmem:[#allocation12 + $0x110] sm:$0xff] }
 0x5df   :  { %3491 = vmatpush.msra.mxu2 %v8549_v48  ;;  %3608 = vmatpush.msrb.mxu3 %v8052_v55  ;;  %v8569_v55 = vld [vmem:[#allocation12 + $0xe0] sm:$0xff] }
 0x5e0   :  { %3452 = vmatpush.msra.mxu0 %v8553_v47  ;;  %3569 = vmatpush.msrb.mxu1 %v8056_v54  ;;  %v8573_v54 = vld [vmem:[#allocation12 + $0xf0] sm:$0xff] }
 0x5e1   :  { %3492 = vmatpush.msra.mxu2 %v8557_v35  ;;  %3609 = vmatpush.msrb.mxu3 %v8060_v39  ;;  %v8577_v39 = vld [vmem:[#allocation12 + $0xc0] sm:$0xff] }
 0x5e2   :  { %3453 = vmatpush.msra.mxu0 %v8561_v21  ;;  %3570 = vmatpush.msrb.mxu1 %v8064_v4  ;;  %v8581_v4 = vld [vmem:[#allocation12 + $0xd0] sm:$0xff] }
 0x5e3   :  { %3493 = vmatpush.msra.mxu2 %v8565_v1  ;;  %3610 = vmatpush.msrb.mxu3 %v8068_v33  ;;  %v8585_v33 = vld [vmem:[#allocation12 + $0xa0] sm:$0xff] }
 0x5e4   :  { %3454 = vmatpush.msra.mxu0 %v8569_v55  ;;  %3571 = vmatpush.msrb.mxu1 %v8072_v34  ;;  %v8589_v34 = vld [vmem:[#allocation12 + $0xb0] sm:$0xff] }
 0x5e5   :  { %3494 = vmatpush.msra.mxu2 %v8573_v54  ;;  %3611 = vmatpush.msrb.mxu3 %v8076_v60  ;;  %v8593_v60 = vld [vmem:[#allocation12 + $0x80] sm:$0xff] }
 0x5e6   :  { %3455 = vmatpush.msra.mxu0 %v8577_v39  ;;  %3572 = vmatpush.msrb.mxu1 %v8080_v46  ;;  %v10760_v46 = vld [vmem:[#allocation163_spill] sm:$0xff] }
 0x5e7   :  { %3495 = vmatpush.msra.mxu2 %v8581_v4  ;;  %3612 = vmatpush.msrb.mxu3 %v8084_v51  ;;  %v10761_v51 = vld [vmem:[#allocation59_spill] sm:$0xff] }
 0x5e8   :  { %3456 = vmatpush.msra.mxu0 %v8585_v33  ;;  %3573 = vmatpush.msrb.mxu1 %v8088_v63  ;;  %v10762_v63 = vld [vmem:[#allocation177_spill] sm:$0xff] }
 0x5e9   :  { %3496 = vmatpush.msra.mxu2 %v8589_v34  ;;  %3613 = vmatpush.msrb.mxu3 %v8092_v3  ;;  %v10763_v3 = vld [vmem:[#allocation60_spill] sm:$0xff] }
 0x5ea   :  { %3457 = vmatpush.msra.mxu0 %v8593_v60  ;;  %3574 = vmatpush.msrb.mxu1 %v10760_v46  ;;  %v10791_v46 = vld [vmem:[#allocation161_spill] sm:$0xff] }
 0x5eb   :  { %3497 = vmatpush.msra.mxu2 %v8597_v32  ;;  %3614 = vmatpush.msrb.mxu3 %v10761_v51  ;;  %v10792_v51 = vld [vmem:[#allocation164_spill] sm:$0xff] }
 0x5ec   :  { %3458 = vmatpush.msra.mxu0 %v8601_v31  ;;  %3575 = vmatpush.msrb.mxu1 %v10762_v63  ;;  %v10793_v63 = vld [vmem:[#allocation167_spill] sm:$0xff] }
 0x5ed   :  { %3498 = vmatpush.msra.mxu2 %v8605_v14  ;;  %3615 = vmatpush.msrb.mxu3 %v10763_v3  ;;  %v10794_v3 = vld [vmem:[#allocation168_spill] sm:$0xff] }
 0x5ee   :  { %3459 = vmatpush.msra.mxu0 %v8609_v18  ;;  %3576 = vmatpush.msrb.mxu1 %v10764_v13  ;;  %v10795_v13 = vld [vmem:[#allocation171_spill] sm:$0xff] }
 0x5ef   :  { %3499 = vmatpush.msra.mxu2 %v8613_v29  ;;  %3616 = vmatpush.msrb.mxu3 %v10765_v62  ;;  %v10796_v62 = vld [vmem:[#allocation172_spill] sm:$0xff] }
 0x5f0   :  { %3460 = vmatpush.msra.mxu0 %v8617_v5  ;;  %3577 = vmatpush.msrb.mxu1 %v10766_v45  ;;  %v10797_v45 = vld [vmem:[#allocation175_spill] sm:$0xff] }
 0x5f1   :  { %3500 = vmatpush.msra.mxu2 %v8621_v37  ;;  %3617 = vmatpush.msrb.mxu3 %v10767_v44  ;;  %v10798_v44 = vld [vmem:[#allocation123_spill] sm:$0xff] }
 0x5f2   :  { %3461 = vmatpush.msra.mxu0 %v8625_v58  ;;  %3578 = vmatpush.msrb.mxu1 %v10768_v42  ;;  %v10799_v42 = vld [vmem:[#allocation124_spill] sm:$0xff] }
 0x5f3   :  { %3501 = vmatpush.msra.mxu2 %v8629_v20  ;;  %3462 = vmatmul.f32.vlgmr.msra.gmra.mxu0 %v8499_v40 }
 0x5f4   :  { %3502 = vmatmul.f32.vlgmr.msra.gmra.mxu2 %v8499_v40  ;;  %3618 = vmatpush.msrb.mxu3 %v10769_v0  ;;  %v10790_v40 = vld [vmem:[#allocation156_spill] sm:$0xff] }
 0x5f5   :  { %3579 = vmatpush.msrb.mxu1 %v10770_v43  ;;  %3548 = vmatpush.msrb.mxu0 %v10771_v15  ;;  %v10800_v0 = vld [vmem:[#allocation176_spill] sm:$0xff]  ;;  %v10801_v43 = vld [vmem:[#allocation127_spill] sm:$0xff]  ;;  %v10802_v15 = vld [vmem:[#allocation181_spill] sm:$0xff] }
 0x5f6   :  { %3619 = vmatpush.msrb.mxu3 %v10772_v25  ;;  %3588 = vmatpush.msrb.mxu2 %v10773_v19  ;;  %v10803_v25 = vld [vmem:[#allocation128_spill] sm:$0xff] }
 0x5f7   :  { %3580 = vmatpush.msrb.mxu1 %v10774_v8  ;;  %3549 = vmatpush.msrb.mxu0 %v10775_v61  ;;  %v10804_v19 = vld [vmem:[#allocation184_spill] sm:$0xff]  ;;  %v10805_v8 = vld [vmem:[#allocation131_spill] sm:$0xff] }
 0x5f8   :  { %3620 = vmatpush.msrb.mxu3 %v10776_v24  ;;  %3589 = vmatpush.msrb.mxu2 %v10777_v12  ;;  %v10806_v61 = vld [vmem:[#allocation187_spill] sm:$0xff]  ;;  %v10807_v24 = vld [vmem:[#allocation132_spill] sm:$0xff] }
 0x5f9   :  { %3581 = vmatpush.msrb.mxu1 %v10778_v57  ;;  %3550 = vmatpush.msrb.mxu0 %v10779_v16  ;;  %v10808_v12 = vld [vmem:[#allocation188_spill] sm:$0xff]  ;;  %v10809_v57 = vld [vmem:[#allocation135_spill] sm:$0xff] }
 0x5fa   :  { %3621 = vmatpush.msrb.mxu3 %v10780_v7  ;;  %3590 = vmatpush.msrb.mxu2 %v10781_v59  ;;  %v10810_v16 = vld [vmem:[#allocation191_spill] sm:$0xff]  ;;  %v10811_v7 = vld [vmem:[#allocation136_spill] sm:$0xff] }
 0x5fb   :  { %3582 = vmatpush.msrb.mxu1 %v10782_v22  ;;  %3551 = vmatpush.msrb.mxu0 %v10783_v2  ;;  %v10812_v59 = vld [vmem:[#allocation192_spill] sm:$0xff]  ;;  %v10813_v22 = vld [vmem:[#allocation139_spill] sm:$0xff] }
 0x5fc   :  { %3622 = vmatpush.msrb.mxu3 %v10784_v50  ;;  %3591 = vmatpush.msrb.mxu2 %v10785_v17  ;;  %v10814_v2 = vld [vmem:[#allocation140_spill] sm:$0xff]  ;;  %v10815_v50 = vld [vmem:[#allocation145_spill] sm:$0xff]  ;;  %v10816_v17 = vld [vmem:[#allocation146_spill] sm:$0xff] }
 0x5fd   :  { %3583 = vmatpush.msrb.mxu1 %v10786_v52  ;;  %3552 = vmatpush.msrb.mxu0 %v10787_v28  ;;  %v10817_v52 = vld [vmem:[#allocation149_spill] sm:$0xff]  ;;  %v10818_v28 = vld [vmem:[#allocation150_spill] sm:$0xff] }
 0x5fe   :  { %3623 = vmatpush.msrb.mxu3 %v10788_v27  ;;  %3592 = vmatpush.msrb.mxu2 %v10789_v49  ;;  %v10819_v27 = vld [vmem:[#allocation153_spill] sm:$0xff]  ;;  %v10820_v49 = vld [vmem:[#allocation154_spill] sm:$0xff] }
 0x5ff   :  { %3648 = vmatpush.msra.mxu1 %v10790_v40  ;;  %3553 = vmatpush.msrb.mxu0 %v10792_v51  ;;  %v10821_v40 = vld [vmem:[#allocation159_spill] sm:$0xff]  ;;  %v10823_v51 = vld [vmem:[#allocation165_spill] sm:$0xff] }
 0x600   :  { %3688 = vmatpush.msra.mxu3 %v10791_v46  ;;  %3593 = vmatpush.msrb.mxu2 %v10793_v63  ;;  %v10822_v46 = vld [vmem:[#allocation160_spill] sm:$0xff]  ;;  %v10824_v63 = vld [vmem:[#allocation166_spill] sm:$0xff] }
 0x601   :  { %3649 = vmatpush.msra.mxu1 %v10794_v3  ;;  %3554 = vmatpush.msrb.mxu0 %v10796_v62  ;;  %v10825_v3 = vld [vmem:[#allocation169_spill] sm:$0xff] }
 0x602   :  { %3689 = vmatpush.msra.mxu3 %v10795_v13  ;;  %3594 = vmatpush.msrb.mxu2 %v10797_v45  ;;  %v10826_v13 = vld [vmem:[#allocation170_spill] sm:$0xff]  ;;  %v10827_v62 = vld [vmem:[#allocation173_spill] sm:$0xff] }
 0x603   :  { %3650 = vmatpush.msra.mxu1 %v10798_v44  ;;  %3555 = vmatpush.msrb.mxu0 %v10800_v0  ;;  %v10828_v45 = vld [vmem:[#allocation174_spill] sm:$0xff]  ;;  %v10829_v44 = vld [vmem:[#allocation179_spill] sm:$0xff]  ;;  %v10831_v0 = vld [vmem:[#allocation185_spill] sm:$0xff] }
 0x604   :  { %3690 = vmatpush.msra.mxu3 %v10799_v42  ;;  %3595 = vmatpush.msrb.mxu2 %v10801_v43  ;;  %v10830_v42 = vld [vmem:[#allocation180_spill] sm:$0xff]  ;;  %v10832_v43 = vld [vmem:[#allocation186_spill] sm:$0xff] }
 0x605   :  { %3651 = vmatpush.msra.mxu1 %v10802_v15  ;;  %3556 = vmatpush.msrb.mxu0 %v10804_v19  ;;  %v10833_v15 = vld [vmem:[#allocation189_spill] sm:$0xff] }
 0x606   :  { %3691 = vmatpush.msra.mxu3 %v10803_v25  ;;  %3596 = vmatpush.msrb.mxu2 %v10805_v8  ;;  %v10834_v25 = vld [vmem:[#allocation190_spill] sm:$0xff]  ;;  %v10835_v19 = vld [vmem:[#allocation193_spill] sm:$0xff] }
 0x607   :  { %3652 = vmatpush.msra.mxu1 %v10806_v61  ;;  %3557 = vmatpush.msrb.mxu0 %v10808_v12  ;;  %v10836_v8 = vld [vmem:[#allocation194_spill] sm:$0xff]  ;;  %v10837_v61 = vld [vmem:[#allocation199_spill] sm:$0xff]  ;;  %v10839_v12 = vld [vmem:[#allocation205_spill] sm:$0xff] }
 0x608   :  { %3692 = vmatpush.msra.mxu3 %v10807_v24  ;;  %3597 = vmatpush.msrb.mxu2 %v10809_v57  ;;  %v10838_v24 = vld [vmem:[#allocation200_spill] sm:$0xff]  ;;  %v10840_v57 = vld [vmem:[#allocation75_spill] sm:$0xff] }
 0x609   :  { %3653 = vmatpush.msra.mxu1 %v10810_v16  ;;  %3558 = vmatpush.msrb.mxu0 %v10812_v59  ;;  %v10841_v16 = vld [vmem:[#allocation76_spill] sm:$0xff] }
 0x60a   :  { %3693 = vmatpush.msra.mxu3 %v10811_v7  ;;  %3598 = vmatpush.msrb.mxu2 %v10813_v22  ;;  %v10842_v7 = vld [vmem:[#allocation77_spill] sm:$0xff]  ;;  %v10843_v59 = vld [vmem:[#allocation40_spill] sm:$0xff]  ;;  %v10844_v22 = vld [vmem:[#allocation142_spill] sm:$0xff] }
 0x60b   :  { %3654 = vmatpush.msra.mxu1 %v10814_v2  ;;  %3559 = vmatpush.msrb.mxu0 %v10816_v17  ;;  %v10845_v2 = vld [vmem:[#allocation41_spill] sm:$0xff]  ;;  %v10847_v17 = vld [vmem:[#allocation143_spill] sm:$0xff] }
 0x60c   :  { %3694 = vmatpush.msra.mxu3 %v10815_v50  ;;  %3599 = vmatpush.msrb.mxu2 %v10817_v52  ;;  %v10846_v50 = vld [vmem:[#allocation54_spill] sm:$0xff]  ;;  %v10848_v52 = vld [vmem:[#allocation55_spill] sm:$0xff] }
 0x60d   :  { %3655 = vmatpush.msra.mxu1 %v10818_v28  ;;  %3560 = vmatpush.msrb.mxu0 %v10820_v49  ;;  %v10849_v28 = vld [vmem:[#allocation157_spill] sm:$0xff]  ;;  %v10851_v49 = vld [vmem:[#allocation26_spill] sm:$0xff] }
 0x60e   :  { %3695 = vmatpush.msra.mxu3 %v10819_v27  ;;  %3600 = vmatpush.msrb.mxu2 %v10821_v40  ;;  %v10850_v27 = vld [vmem:[#allocation56_spill] sm:$0xff]  ;;  %v10852_v40 = vld [vmem:[#allocation158_spill] sm:$0xff] }
 0x60f   :  { %3656 = vmatpush.msra.mxu1 %v10822_v46  ;;  %3561 = vmatpush.msrb.mxu0 %v10824_v63  ;;  %v10853_v46 = vld [vmem:[#allocation57_spill] sm:$0xff] }
 0x610   :  { %3696 = vmatpush.msra.mxu3 %v10823_v51  ;;  %3601 = vmatpush.msrb.mxu2 %v10825_v3  ;;  %v10854_v51 = vld [vmem:[#allocation39_spill] sm:$0xff]  ;;  %v10855_v63 = vld [vmem:[#allocation25_spill] sm:$0xff]  ;;  %v10856_v3 = vld [vmem:[#allocation92_spill] sm:$0xff] }
 0x611   :  { %3657 = vmatpush.msra.mxu1 %v10826_v13  ;;  %3562 = vmatpush.msrb.mxu0 %v10828_v45  ;;  %v10857_v13 = vld [vmem:[#allocation93_spill] sm:$0xff]  ;;  %v10859_v45 = vld [vmem:[#allocation95_spill] sm:$0xff] }
 0x612   :  { %3697 = vmatpush.msra.mxu3 %v10827_v62  ;;  %3602 = vmatpush.msrb.mxu2 %v10829_v44  ;;  %v10858_v62 = vld [vmem:[#allocation94_spill] sm:$0xff]  ;;  %v10860_v44 = vld [vmem:[#allocation96_spill] sm:$0xff] }
 0x613   :  { %3658 = vmatpush.msra.mxu1 %v10830_v42  ;;  %3563 = vmatpush.msrb.mxu0 %v10832_v43  ;;  %v10861_v42 = vld [vmem:[#allocation101_spill] sm:$0xff]  ;;  %v10863_v43 = vld [vmem:[#allocation103_spill] sm:$0xff] }
 0x614   :  { %3698 = vmatpush.msra.mxu3 %v10831_v0  ;;  %3603 = vmatpush.msrb.mxu2 %v10833_v15  ;;  %v10862_v0 = vld [vmem:[#allocation102_spill] sm:$0xff]  ;;  %v10864_v15 = vld [vmem:[#allocation104_spill] sm:$0xff] }
 0x615   :  { %3659 = vmatpush.msra.mxu1 %v10834_v25  ;;  %3628 = vmatpush.msra.mxu0 %v10836_v8  ;;  %v10865_v25 = vld [vmem:[#allocation105_spill] sm:$0xff]  ;;  %v10867_v8 = vld [vmem:[#allocation218_spill] sm:$0xff] }
 0x616   :  { %3699 = vmatpush.msra.mxu3 %v10835_v19  ;;  %3668 = vmatpush.msra.mxu2 %v10837_v61  ;;  %v10866_v19 = vld [vmem:[#allocation217_spill] sm:$0xff]  ;;  %v10868_v61 = vld [vmem:[#allocation219_spill] sm:$0xff] }
 0x617   :  { %3660 = vmatpush.msra.mxu1 %v10838_v24  ;;  %3629 = vmatpush.msra.mxu0 %v10840_v57  ;;  %v10869_v24 = vld [vmem:[#allocation220_spill] sm:$0xff]  ;;  %v10871_v57 = vld [vmem:[#allocation222_spill] sm:$0xff] }
 0x618   :  { %3700 = vmatpush.msra.mxu3 %v10839_v12  ;;  %3669 = vmatpush.msra.mxu2 %v10841_v16  ;;  %v10870_v12 = vld [vmem:[#allocation221_spill] sm:$0xff] }
 0x619   :  { %3661 = vmatpush.msra.mxu1 %v10842_v7  ;;  %3630 = vmatpush.msra.mxu0 %v10844_v22  ;;  %v8737_v16 = vld [vmem:[#allocation15 + $0x30] sm:$0xff]  ;;  %v8740_v7 = vld [vmem:[#allocation15 + $0x38] sm:$0xff] }
 0x61a   :  { %3701 = vmatpush.msra.mxu3 %v10843_v59  ;;  %3670 = vmatpush.msra.mxu2 %v10845_v2  ;;  %v8743_v59 = vld [vmem:[#allocation15 + $0x10] sm:$0xff]  ;;  %v8746_v22 = vld [vmem:[#allocation15 + $0x18] sm:$0xff] }
 0x61b   :  { %3662 = vmatpush.msra.mxu1 %v10846_v50  ;;  %3631 = vmatpush.msra.mxu0 %v10848_v52 }
 0x61c   :  { %3702 = vmatpush.msra.mxu3 %v10847_v17  ;;  %3671 = vmatpush.msra.mxu2 %v10849_v28  ;;  %v10872_v17 = vld [vmem:[#allocation106_spill] sm:$0xff] }
 0x61d   :  { %3663 = vmatpush.msra.mxu1 %v10850_v27  ;;  %3632 = vmatpush.msra.mxu0 %v10852_v40 }
 0x61e   :  { %3703 = vmatpush.msra.mxu3 %v10851_v49  ;;  %3672 = vmatpush.msra.mxu2 %v10853_v46  ;;  %v10873_v46 = vld [vmem:[#allocation107_spill] sm:$0xff] }
 0x61f   :  { %3633 = vmatpush.msra.mxu0 %v10854_v51 }
 0x620   :  { %3673 = vmatpush.msra.mxu2 %v10855_v63 }
 0x621   :  { %3634 = vmatpush.msra.mxu0 %v10856_v3 }
 0x622   :  { %3674 = vmatpush.msra.mxu2 %v10857_v13  ;;  %v10874_v13 = vld [vmem:[#allocation108_spill] sm:$0xff] }
 0x623   :  { %3635 = vmatpush.msra.mxu0 %v10858_v62 }
 0x624   :  { %3675 = vmatpush.msra.mxu2 %v10859_v45 }
 0x625   :  { %3636 = vmatpush.msra.mxu0 %v10860_v44 }
 0x626   :  { %3676 = vmatpush.msra.mxu2 %v10861_v42 }
 0x627   :  { %3637 = vmatpush.msra.mxu0 %v10862_v0 }
 0x628   :  { %3677 = vmatpush.msra.mxu2 %v10863_v43 }
 0x629   :  { %3638 = vmatpush.msra.mxu0 %v10864_v15  ;;  %v10875_v15 = vld [vmem:[#allocation113_spill] sm:$0xff] }
 0x62a   :  { %3678 = vmatpush.msra.mxu2 %v10865_v25 }
 0x62b   :  { %3639 = vmatpush.msra.mxu0 %v10866_v19 }
 0x62c   :  { %3679 = vmatpush.msra.mxu2 %v10867_v8  ;;  %v10876_v8 = vld [vmem:[#allocation208_spill] sm:$0xff] }
 0x62d   :  { %3640 = vmatpush.msra.mxu0 %v10868_v61  ;;  %v10877_v61 = vld [vmem:[#allocation91_spill] sm:$0xff] }
 0x62e   :  { %3680 = vmatpush.msra.mxu2 %v10869_v24  ;;  %v1516_v24 = vadd.f32 %v10877_v61, %v10876_v8  ;;  %v10882_v61 = vld [vmem:[#allocation203_spill] sm:$0xff] }
 0x62f   :  { %3641 = vmatpush.msra.mxu0 %v10870_v12 }
 0x630   :  { %3681 = vmatpush.msra.mxu2 %v10871_v57 }
 0x631   :  { %3642 = vmatpush.msra.mxu0 %v8737_v16 }
 0x632   :  { %3682 = vmatpush.msra.mxu2 %v8740_v7 }
 0x633   :  { %3643 = vmatpush.msra.mxu0 %v8743_v59 }
 0x634   :  { %3683 = vmatpush.msra.mxu2 %v8746_v22 }
 0x636   :  { %v3298_v2 = vpop.f32.mrf.mxu1 }
 0x63c   :  { %v3338_v49 = vpop.f32.mrf.mxu3 }
 0x63e   :  { %v3378_v45 = vpop.f32.mrf.mxu1 }
 0x644   :  { %v3418_v19 = vpop.f32.mrf.mxu3 }
 0x650   :  { %v3278_v50 = vpop.f32.mrf.mxu0 }
 0x651   :  { %v3279_v52 = vadd.f32 %v3278_v50, %v10872_v17  ;;  %v10878_v50 = vld [vmem:[#allocation97_spill] sm:$0xff] }
 0x653   :  { %v3299_v28 = vadd.f32 %v3298_v2, %v3279_v52  ;;  %v1557_v52 = vadd.f32 %v10878_v50, %v1516_v24 }
 0x655   :  { %v3421_v27 = vmul.f32 0.5, %v3299_v28 }
 0x656   :  { %v3318_v40 = vpop.f32.mrf.mxu2 }
 0x657   :  { %v3319_v51 = vadd.f32 %v3318_v40, %v10873_v46  ;;  %4468 = vtanh.f32 %v3421_v27 }
 0x658   :  { %v3358_v63 = vpop.f32.mrf.mxu0 }
 0x659   :  { %v3339_v3 = vadd.f32 %v3338_v49, %v3319_v51  ;;  %v3359_v62 = vadd.f32 %v3358_v63, %v10874_v13  ;;  %v3483_v40 = vpop.f32.mrf.mxu1 }
 0x65b   :  { %v3425_v44 = vmul.f32 0.5, %v3339_v3  ;;  %v3379_v42 = vadd.f32 %v3378_v45, %v3359_v62  ;;  %v10879_v3 = vld [vmem:[#allocation98_spill] sm:$0xff]  ;;  %v10880_v45 = vld [vmem:[#allocation223_spill] sm:$0xff] }
 0x65c   :  { %v1598_v62 = vadd.f32 %v10879_v3, %v1557_v52  ;;  %v10887_v52 = vld [vmem:[#allocation71_spill] sm:$0xff] }
 0x65d   :  { %4470 = vtanh.f32 %v3425_v44  ;;  %v4469_v43 = vpop.eup %4468 }
 0x65e   :  { %v3398_v0 = vpop.f32.mrf.mxu2  ;;  %4472 = vtanh.f32 %v3379_v42  ;;  %v3423_v57 = vmul.f32 0.5, %v4469_v43  ;;  %v10883_v43 = vld [vmem:[#allocation49_spill] sm:$0xff] }
 0x65f   :  { %v3399_v25 = vadd.f32 %v3398_v0, %v10875_v15  ;;  %v10881_v0 = vld [vmem:[#allocation48_spill] sm:$0xff] }
 0x660   :  { %v3424_v51 = vadd.f32 0.5, %v3423_v57  ;;  %v3527_v15 = vadd.f32 %v3483_v40, %v10881_v0  ;;  %v10886_v57 = vld [vmem:[#allocation204_spill] sm:$0xff] }
 0x661   :  { %v3419_v12 = vadd.f32 %v3418_v19, %v3399_v25  ;;  %v1639_v25 = vadd.f32 %v10882_v61, %v1598_v62  ;;  %v10884_v19 = vld [vmem:[#allocation70_spill] sm:$0xff]  ;;  %v10891_v61 = vld [vmem:[#allocation207_spill] sm:$0xff] }
 0x662   :  { %v1311_v8 = vadd.f32 %v10884_v19, %v10883_v43 }
 0x663   :  { %v4471_v2 = vpop.eup %4470  ;;  %v3430_v28 = vmul.f32 0.5, %v3419_v12  ;;  %v1680_v50 = vadd.f32 %v10886_v57, %v1639_v25  ;;  %v10893_v57 = vld [vmem:[#allocation90_spill] sm:$0xff] }
 0x664   :  { %v3427_v27 = vmul.f32 0.5, %v4471_v2  ;;  %v4473_v49 = vpop.eup %4472  ;;  %v3534_v2 = vmul.f32 0.5, %v3527_v15 }
 0x665   :  { %4474 = vtanh.f32 %v3430_v28  ;;  %v3435_v42 = vmul.f32 %v4473_v49, %v3424_v51  ;;  %v10889_v51 = vld [vmem:[#allocation32_spill] sm:$0xff] }
 0x666   :  { %v3428_v63 = vadd.f32 0.5, %v3427_v27  ;;  %v1352_v27 = vadd.f32 %v10887_v52, %v1311_v8 }
 0x668   :  { %v3434_v44 = vmul.f32 %v3428_v63, %v10880_v45  ;;  %v10888_v63 = vld [vmem:[#allocation206_spill] sm:$0xff]  ;;  %v1393_v40 = vadd.f32 %v10889_v51, %v1352_v27 }
 0x669   :  { %v1721_v49 = vadd.f32 %v10888_v63, %v1680_v50  ;;  %v10890_v45 = vld [vmem:[#allocation30_spill] sm:$0xff]  ;;  %v8773_v50 = vld [vmem:[#allocation12 + $0x1e8] sm:$0xff] }
 0x66a   :  { %v8762_v24 = vadd.f32 %v3435_v42, %v3434_v44  ;;  %v3523_v42 = vpop.f32.mrf.mxu3  ;;  %v8779_v63 = vld [vmem:[#allocation12 + $0x1c8] sm:$0xff] }
 0x66b   :  { %v4475_v12 = vpop.eup %4474  ;;  %v1762_v43 = vadd.f32 %v10891_v61, %v1721_v49 }
 0x66c   :  { %10885 = vst [vmem:[#allocation224_spill] sm:$0xff] %v8762_v24  ;;  %4476 = vtanh.f32 %v8762_v24  ;;  %v3432_v28 = vmul.f32 0.5, %v4475_v12  ;;  %v10892_v24 = vld [vmem:[#allocation33_spill] sm:$0xff] }
 0x66d   :  { %4478 = vtanh.f32 %v3534_v2  ;;  %v1434_v25 = vadd.f32 %v10892_v24, %v1393_v40  ;;  %v3529_v12 = vadd.f32 %v3523_v42, %v1762_v43  ;;  %v8782_v24 = vld [vmem:[#allocation12 + $0x1d8] sm:$0xff]  ;;  %v8785_v40 = vld [vmem:[#allocation12 + $0x1a8] sm:$0xff] }
 0x66e   :  { %v3433_v62 = vadd.f32 0.5, %v3432_v28  ;;  %v8776_v28 = vld [vmem:[#allocation12 + $0x1f8] sm:$0xff]  ;;  %v8797_v43 = vld [vmem:[#allocation12 + $0x168] sm:$0xff] }
 0x66f   :  { %v1475_v2 = vadd.f32 %v10893_v57, %v1434_v25  ;;  %v3539_v51 = vmul.f32 0.5, %v3529_v12  ;;  %v8803_v12 = vld [vmem:[#allocation12 + $0x148] sm:$0xff] }
 0x670   :  { %v3463_v3 = vpop.f32.mrf.mxu0 }
 0x671   :  { %v3526_v0 = vadd.f32 %v3463_v3, %v10890_v45  ;;  %v8788_v3 = vld [vmem:[#allocation12 + $0x1b8] sm:$0xff] }
 0x672   :  { %v4477_v44 = vpop.eup %4476 }
 0x673   :  { %v3438_v19 = vmul.f32 %v4477_v44, %v3433_v62  ;;  %v3530_v15 = vmul.f32 0.5, %v3526_v0  ;;  %v4479_v8 = vpop.eup %4478  ;;  %v8791_v0 = vld [vmem:[#allocation12 + $0x188] sm:$0xff]  ;;  %v8794_v44 = vld [vmem:[#allocation12 + $0x198] sm:$0xff] }
 0x674   :  { %v3536_v49 = vmul.f32 0.5, %v4479_v8  ;;  %v8806_v8 = vld [vmem:[#allocation12 + $0x158] sm:$0xff] }
 0x675   :  { %3440 = vst [vmem:[#allocation18 + $0x20] sm:$0xff] %v3438_v19  ;;  %4480 = vtanh.f32 %v3530_v15  ;;  %3584 = vmatmul.f32.vlgmr.msrb.gmra.mxu1 %v3438_v19  ;;  %3624 = vmatmul.f32.vlgmr.msrb.gmra.mxu3 %v3438_v19  ;;  %v8800_v15 = vld [vmem:[#allocation12 + $0x178] sm:$0xff] }
 0x676   :  { %3753 = vmatpush.msrb.mxu1 %v8773_v50  ;;  %3793 = vmatpush.msrb.mxu3 %v8776_v28  ;;  %v3537_v42 = vadd.f32 0.5, %v3536_v49 }
 0x677   :  { %v3503_v52 = vpop.f32.mrf.mxu2 }
 0x678   :  { %v3528_v27 = vadd.f32 %v3503_v52, %v1475_v2  ;;  %3754 = vmatpush.msrb.mxu1 %v8779_v63  ;;  %3794 = vmatpush.msrb.mxu3 %v8782_v24  ;;  %v8810_v2 = vld [vmem:[#allocation12 + $0x128] sm:$0xff]  ;;  %v8813_v52 = vld [vmem:[#allocation12 + $0x138] sm:$0xff] }
 0x67a   :  { %4482 = vtanh.f32 %v3528_v27  ;;  %3755 = vmatpush.msrb.mxu1 %v8785_v40  ;;  %3795 = vmatpush.msrb.mxu3 %v8788_v3 }
 0x67b   :  { %v4481_v62 = vpop.eup %4480  ;;  %4484 = vtanh.f32 %v3539_v51  ;;  %v8818_v51 = vld [vmem:[#allocation12 + $0x108] sm:$0xff] }
 0x67c   :  { %v3532_v45 = vmul.f32 0.5, %v4481_v62  ;;  %3756 = vmatpush.msrb.mxu1 %v8791_v0  ;;  %3796 = vmatpush.msrb.mxu3 %v8794_v44  ;;  %v8821_v62 = vld [vmem:[#allocation12 + $0x118] sm:$0xff] }
 0x67d   :  { %3664 = vmatmul.f32.vlgmr.msra.gmra.mxu1 %v3438_v19  ;;  %3704 = vmatmul.f32.vlgmr.msra.gmra.mxu3 %v3438_v19  ;;  %v3543_v19 = vmul.f32 %v3537_v42, %v8486_v30  ;;  %10894 = vst [vmem:[#allocation225_spill] sm:$0xff] %v8821_v62  ;;  %v8828_v42 = vld [vmem:[#allocation12 + $0xf8] sm:$0xff] }
 0x67e   :  { %v3533_v61 = vadd.f32 0.5, %v3532_v45  ;;  %3757 = vmatpush.msrb.mxu1 %v8797_v43  ;;  %3797 = vmatpush.msrb.mxu3 %v8800_v15  ;;  %v8825_v45 = vld [vmem:[#allocation12 + $0xe8] sm:$0xff]  ;;  %10896 = vst [vmem:[#allocation227_spill] sm:$0xff] %v8828_v42 }
 0x67f   :  { %10895 = vst [vmem:[#allocation226_spill] sm:$0xff] %v8825_v45 }
 0x680   :  { %v4483_v25 = vpop.eup %4482  ;;  %3758 = vmatpush.msrb.mxu1 %v8803_v12  ;;  %3798 = vmatpush.msrb.mxu3 %v8806_v8 }
 0x681   :  { %v3544_v57 = vmul.f32 %v4483_v25, %v3533_v61  ;;  %v4485_v27 = vpop.eup %4484  ;;  %v8831_v61 = vld [vmem:[#allocation12 + $0xc8] sm:$0xff]  ;;  %v8834_v25 = vld [vmem:[#allocation12 + $0xd8] sm:$0xff] }
 0x682   :  { %3759 = vmatpush.msrb.mxu1 %v8810_v2  ;;  %3799 = vmatpush.msrb.mxu3 %v8813_v52  ;;  %v3541_v30 = vmul.f32 0.5, %v4485_v27  ;;  %10897 = vst [vmem:[#allocation228_spill] sm:$0xff] %v8831_v61  ;;  %v8840_v27 = vld [vmem:[#allocation12 + $0xb8] sm:$0xff] }
 0x683   :  { %v8816_v49 = vadd.f32 %v3544_v57, %v3543_v19  ;;  %v8837_v57 = vld [vmem:[#allocation12 + $0xa8] sm:$0xff] }
 0x684   :  { %3760 = vmatpush.msrb.mxu1 %v8818_v51  ;;  %3800 = vmatpush.msrb.mxu3 %v8821_v62  ;;  %v3542_v19 = vadd.f32 0.5, %v3541_v30  ;;  %v8855_v30 = vld [vmem:[#allocation12 + $0x68] sm:$0xff] }
 0x685   :  { %4486 = vtanh.f32 %v8816_v49 }
 0x686   :  { %3761 = vmatpush.msrb.mxu1 %v8825_v45  ;;  %3801 = vmatpush.msrb.mxu3 %v8828_v42  ;;  %v8845_v42 = vld [vmem:[#allocation12 + $0x88] sm:$0xff] }
 0x688   :  { %3762 = vmatpush.msrb.mxu1 %v8831_v61  ;;  %3802 = vmatpush.msrb.mxu3 %v8834_v25  ;;  %v8848_v61 = vld [vmem:[#allocation12 + $0x98] sm:$0xff] }
 0x689   :  { %10898 = vst [vmem:[#allocation229_spill] sm:$0xff] %v8848_v61 }
 0x68a   :  { %3763 = vmatpush.msrb.mxu1 %v8837_v57  ;;  %3803 = vmatpush.msrb.mxu3 %v8840_v27 }
 0x68b   :  { %v4487_v45 = vpop.eup %4486 }
 0x68c   :  { %v8843_v62 = vmul.f32 %v4487_v45, %v3542_v19  ;;  %3764 = vmatpush.msrb.mxu1 %v8845_v42  ;;  %3804 = vmatpush.msrb.mxu3 %v8848_v61  ;;  %v8858_v45 = vld [vmem:[#allocation12 + $0x78] sm:$0xff]  ;;  %v8863_v19 = vld [vmem:[#allocation12 + $0x48] sm:$0xff] }
 0x68d   :  { %v8866_v61 = vld [vmem:[#allocation12 + $0x58] sm:$0xff] }
 0x68e   :  { %3564 = vmatmul.f32.vlgmr.msrb.gmra.mxu0 %v8843_v62  ;;  %3604 = vmatmul.f32.vlgmr.msrb.gmra.mxu2 %v8843_v62 }
 0x68f   :  { %3733 = vmatpush.msrb.mxu0 %v8505_v9  ;;  %3773 = vmatpush.msrb.mxu2 %v8508_v6  ;;  %v8871_v9 = vld [vmem:[#allocation12 + $0x28] sm:$0xff]  ;;  %v8874_v6 = vld [vmem:[#allocation12 + $0x38] sm:$0xff] }
 0x690   :  { %3765 = vmatpush.msrb.mxu1 %v8855_v30  ;;  %3805 = vmatpush.msrb.mxu3 %v8858_v45 }
 0x691   :  { %3734 = vmatpush.msrb.mxu0 %v8513_v38  ;;  %3774 = vmatpush.msrb.mxu2 %v8516_v56  ;;  %v8879_v38 = vld [vmem:[#allocation12 + $0x8] sm:$0xff]  ;;  %v8882_v56 = vld [vmem:[#allocation12 + $0x18] sm:$0xff] }
 0x692   :  { %3766 = vmatpush.msrb.mxu1 %v8863_v19  ;;  %3806 = vmatpush.msrb.mxu3 %v8866_v61 }
 0x693   :  { %3735 = vmatpush.msrb.mxu0 %v8521_v26  ;;  %3775 = vmatpush.msrb.mxu2 %v8524_v36  ;;  %v8892_v26 = vld [vmem:[#allocation15 + $0x3e0] sm:$0xff]  ;;  %v8896_v36 = vld [vmem:[#allocation15 + $0x3e8] sm:$0xff] }
 0x694   :  { %3767 = vmatpush.msrb.mxu1 %v8871_v9  ;;  %3807 = vmatpush.msrb.mxu3 %v8874_v6 }
 0x695   :  { %3736 = vmatpush.msrb.mxu0 %v8529_v23  ;;  %3776 = vmatpush.msrb.mxu2 %v8532_v11  ;;  %v8900_v23 = vld [vmem:[#allocation15 + $0x3c0] sm:$0xff]  ;;  %v8904_v11 = vld [vmem:[#allocation15 + $0x3c8] sm:$0xff] }
 0x696   :  { %3768 = vmatpush.msrb.mxu1 %v8879_v38  ;;  %3808 = vmatpush.msrb.mxu3 %v8882_v56 }
 0x697   :  { %3644 = vmatmul.f32.vlgmr.msra.gmra.mxu0 %v8843_v62  ;;  %3684 = vmatmul.f32.vlgmr.msra.gmra.mxu2 %v8843_v62 }
 0x698   :  { %3737 = vmatpush.msrb.mxu0 %v8537_v10  ;;  %3769 = vmatmul.f32.vlgmr.msrb.gmra.mxu1 %v8843_v62  ;;  %v8908_v10 = vld [vmem:[#allocation15 + $0x3a0] sm:$0xff] }
 0x699   :  { %3777 = vmatpush.msrb.mxu2 %v8541_v41  ;;  %3809 = vmatmul.f32.vlgmr.msrb.gmra.mxu3 %v8843_v62  ;;  %v8912_v41 = vld [vmem:[#allocation15 + $0x3a8] sm:$0xff] }
 0x69a   :  { %3738 = vmatpush.msrb.mxu0 %v8545_v53  ;;  %3855 = vmatpush.msra.mxu1 %v8892_v26  ;;  %v8916_v53 = vld [vmem:[#allocation15 + $0x380] sm:$0xff] }
 0x69b   :  { %3778 = vmatpush.msrb.mxu2 %v8549_v48  ;;  %3895 = vmatpush.msra.mxu3 %v8896_v36  ;;  %v8920_v48 = vld [vmem:[#allocation15 + $0x388] sm:$0xff] }
 0x69c   :  { %3739 = vmatpush.msrb.mxu0 %v8553_v47  ;;  %3856 = vmatpush.msra.mxu1 %v8900_v23  ;;  %v8924_v47 = vld [vmem:[#allocation15 + $0x360] sm:$0xff] }
 0x69d   :  { %3779 = vmatpush.msrb.mxu2 %v8557_v35  ;;  %3896 = vmatpush.msra.mxu3 %v8904_v11  ;;  %v8928_v35 = vld [vmem:[#allocation15 + $0x368] sm:$0xff] }
 0x69e   :  { %3740 = vmatpush.msrb.mxu0 %v8561_v21  ;;  %3857 = vmatpush.msra.mxu1 %v8908_v10  ;;  %v8932_v21 = vld [vmem:[#allocation15 + $0x340] sm:$0xff] }
 0x69f   :  { %3780 = vmatpush.msrb.mxu2 %v8565_v1  ;;  %3897 = vmatpush.msra.mxu3 %v8912_v41  ;;  %v8936_v1 = vld [vmem:[#allocation15 + $0x348] sm:$0xff] }
 0x6a0   :  { %3741 = vmatpush.msrb.mxu0 %v8569_v55  ;;  %3858 = vmatpush.msra.mxu1 %v8916_v53  ;;  %v8940_v55 = vld [vmem:[#allocation15 + $0x320] sm:$0xff] }
 0x6a1   :  { %3781 = vmatpush.msrb.mxu2 %v8573_v54  ;;  %3898 = vmatpush.msra.mxu3 %v8920_v48  ;;  %10899 = vst [vmem:[#allocation230_spill] sm:$0xff] %v8940_v55  ;;  %v8944_v54 = vld [vmem:[#allocation15 + $0x328] sm:$0xff] }
 0x6a2   :  { %3742 = vmatpush.msrb.mxu0 %v8577_v39  ;;  %3859 = vmatpush.msra.mxu1 %v8924_v47  ;;  %10900 = vst [vmem:[#allocation231_spill] sm:$0xff] %v8944_v54  ;;  %v8948_v39 = vld [vmem:[#allocation15 + $0x300] sm:$0xff] }
 0x6a3   :  { %3782 = vmatpush.msrb.mxu2 %v8581_v4  ;;  %3899 = vmatpush.msra.mxu3 %v8928_v35  ;;  %10901 = vst [vmem:[#allocation232_spill] sm:$0xff] %v8948_v39  ;;  %v8952_v4 = vld [vmem:[#allocation15 + $0x308] sm:$0xff] }
 0x6a4   :  { %3743 = vmatpush.msrb.mxu0 %v8585_v33  ;;  %3860 = vmatpush.msra.mxu1 %v8932_v21  ;;  %10902 = vst [vmem:[#allocation233_spill] sm:$0xff] %v8952_v4  ;;  %v8956_v33 = vld [vmem:[#allocation15 + $0x2e0] sm:$0xff] }
 0x6a5   :  { %3783 = vmatpush.msrb.mxu2 %v8589_v34  ;;  %3900 = vmatpush.msra.mxu3 %v8936_v1  ;;  %10903 = vst [vmem:[#allocation234_spill] sm:$0xff] %v8956_v33  ;;  %v8960_v34 = vld [vmem:[#allocation15 + $0x2e8] sm:$0xff] }
 0x6a6   :  { %3744 = vmatpush.msrb.mxu0 %v8593_v60  ;;  %3861 = vmatpush.msra.mxu1 %v8940_v55  ;;  %10904 = vst [vmem:[#allocation235_spill] sm:$0xff] %v8960_v34  ;;  %v8964_v60 = vld [vmem:[#allocation15 + $0x2c0] sm:$0xff] }
 0x6a7   :  { %3784 = vmatpush.msrb.mxu2 %v8597_v32  ;;  %3901 = vmatpush.msra.mxu3 %v8944_v54  ;;  %10905 = vst [vmem:[#allocation83_spill] sm:$0xff] %v8964_v60  ;;  %v8968_v32 = vld [vmem:[#allocation15 + $0x2c8] sm:$0xff]  ;;  %v11017_v54 = vld [vmem:[#allocation50_spill] sm:$0xff] }
 0x6a8   :  { %3745 = vmatpush.msrb.mxu0 %v8601_v31  ;;  %3862 = vmatpush.msra.mxu1 %v8948_v39  ;;  %10906 = vst [vmem:[#allocation84_spill] sm:$0xff] %v8968_v32  ;;  %v8972_v31 = vld [vmem:[#allocation15 + $0x2a0] sm:$0xff] }
 0x6a9   :  { %3785 = vmatpush.msrb.mxu2 %v8605_v14  ;;  %3902 = vmatpush.msra.mxu3 %v8952_v4  ;;  %10907 = vst [vmem:[#allocation85_spill] sm:$0xff] %v8972_v31  ;;  %v8978_v14 = vld [vmem:[#allocation15 + $0x2a8] sm:$0xff] }
 0x6aa   :  { %3746 = vmatpush.msrb.mxu0 %v8609_v18  ;;  %3863 = vmatpush.msra.mxu1 %v8956_v33  ;;  %10908 = vst [vmem:[#allocation79_spill] sm:$0xff] %v8978_v14  ;;  %v8981_v18 = vld [vmem:[#allocation15 + $0x280] sm:$0xff]  ;;  %v11011_v33 = vld [vmem:[#allocation113_spill] sm:$0xff] }
 0x6ab   :  { %3786 = vmatpush.msrb.mxu2 %v8613_v29  ;;  %3903 = vmatpush.msra.mxu3 %v8960_v34  ;;  %10909 = vst [vmem:[#allocation44_spill] sm:$0xff] %v8981_v18  ;;  %v8984_v29 = vld [vmem:[#allocation15 + $0x1e0] sm:$0xff] }
 0x6ac   :  { %3747 = vmatpush.msrb.mxu0 %v8617_v5  ;;  %3864 = vmatpush.msra.mxu1 %v8964_v60  ;;  %10910 = vst [vmem:[#allocation182_spill] sm:$0xff] %v8984_v29  ;;  %v8987_v5 = vld [vmem:[#allocation15 + $0x288] sm:$0xff] }
 0x6ad   :  { %3787 = vmatpush.msrb.mxu2 %v8621_v37  ;;  %3904 = vmatpush.msra.mxu3 %v8968_v32  ;;  %10911 = vst [vmem:[#allocation45_spill] sm:$0xff] %v8987_v5  ;;  %v8990_v37 = vld [vmem:[#allocation15 + $0x1e8] sm:$0xff] }
 0x6ae   :  { %3748 = vmatpush.msrb.mxu0 %v8625_v58  ;;  %3865 = vmatpush.msra.mxu1 %v8972_v31  ;;  %10912 = vst [vmem:[#allocation62_spill] sm:$0xff] %v8990_v37  ;;  %v8993_v58 = vld [vmem:[#allocation15 + $0x260] sm:$0xff] }
 0x6af   :  { %3788 = vmatpush.msrb.mxu2 %v8629_v20  ;;  %3749 = vmatmul.f32.vlgmr.msrb.gmra.mxu0 %v8843_v62  ;;  %10913 = vst [vmem:[#allocation183_spill] sm:$0xff] %v8993_v58  ;;  %v8996_v20 = vld [vmem:[#allocation15 + $0x1c0] sm:$0xff] }
 0x6b0   :  { %3789 = vmatmul.f32.vlgmr.msrb.gmra.mxu2 %v8843_v62  ;;  %3905 = vmatpush.msra.mxu3 %v8978_v14  ;;  %10914 = vst [vmem:[#allocation63_spill] sm:$0xff] %v8996_v20  ;;  %v8999_v62 = vld [vmem:[#allocation15 + $0x268] sm:$0xff] }
 0x6b1   :  { %3866 = vmatpush.msra.mxu1 %v8981_v18  ;;  %3835 = vmatpush.msra.mxu0 %v8984_v29  ;;  %10915 = vst [vmem:[#allocation195_spill] sm:$0xff] %v8999_v62  ;;  %v9002_v29 = vld [vmem:[#allocation15 + $0x1c8] sm:$0xff] }
 0x6b2   :  { %3906 = vmatpush.msra.mxu3 %v8987_v5  ;;  %3875 = vmatpush.msra.mxu2 %v8990_v37  ;;  %10916 = vst [vmem:[#allocation64_spill] sm:$0xff] %v9002_v29  ;;  %v9005_v5 = vld [vmem:[#allocation15 + $0x240] sm:$0xff] }
 0x6b3   :  { %3867 = vmatpush.msra.mxu1 %v8993_v58  ;;  %3836 = vmatpush.msra.mxu0 %v8996_v20  ;;  %10917 = vst [vmem:[#allocation28_spill] sm:$0xff] %v9005_v5  ;;  %v9008_v37 = vld [vmem:[#allocation15 + $0x1a0] sm:$0xff]  ;;  %v9011_v58 = vld [vmem:[#allocation15 + $0x248] sm:$0xff] }
 0x6b4   :  { %3907 = vmatpush.msra.mxu3 %v8999_v62  ;;  %3876 = vmatpush.msra.mxu2 %v9002_v29  ;;  %10918 = vst [vmem:[#allocation196_spill] sm:$0xff] %v9008_v37  ;;  %v9014_v20 = vld [vmem:[#allocation15 + $0x1a8] sm:$0xff]  ;;  %v9017_v62 = vld [vmem:[#allocation15 + $0x220] sm:$0xff] }
 0x6b5   :  { %3868 = vmatpush.msra.mxu1 %v9005_v5  ;;  %3837 = vmatpush.msra.mxu0 %v9008_v37  ;;  %10919 = vst [vmem:[#allocation65_spill] sm:$0xff] %v9011_v58  ;;  %v9020_v29 = vld [vmem:[#allocation15 + $0x180] sm:$0xff]  ;;  %v9023_v5 = vld [vmem:[#allocation15 + $0x228] sm:$0xff] }
 0x6b6   :  { %3908 = vmatpush.msra.mxu3 %v9011_v58  ;;  %10920 = vst [vmem:[#allocation82_spill] sm:$0xff] %v9014_v20  ;;  %3877 = vmatpush.msra.mxu2 %v9014_v20  ;;  %v9026_v37 = vld [vmem:[#allocation15 + $0x188] sm:$0xff]  ;;  %v9029_v58 = vld [vmem:[#allocation15 + $0x200] sm:$0xff] }
 0x6b7   :  { %10921 = vst [vmem:[#allocation87_spill] sm:$0xff] %v9017_v62  ;;  %3869 = vmatpush.msra.mxu1 %v9017_v62  ;;  %3838 = vmatpush.msra.mxu0 %v9020_v29  ;;  %v9032_v20 = vld [vmem:[#allocation15 + $0x160] sm:$0xff]  ;;  %v9035_v62 = vld [vmem:[#allocation15 + $0x208] sm:$0xff] }
 0x6b8   :  { %10922 = vst [vmem:[#allocation88_spill] sm:$0xff] %v9020_v29  ;;  %3909 = vmatpush.msra.mxu3 %v9023_v5  ;;  %3878 = vmatpush.msra.mxu2 %v9026_v37  ;;  %v9038_v29 = vld [vmem:[#allocation15 + $0x168] sm:$0xff] }
 0x6b9   :  { %10923 = vst [vmem:[#allocation89_spill] sm:$0xff] %v9023_v5  ;;  %3870 = vmatpush.msra.mxu1 %v9029_v58  ;;  %3839 = vmatpush.msra.mxu0 %v9032_v20  ;;  %v9041_v5 = vld [vmem:[#allocation15 + $0x3f0] sm:$0xff]  ;;  %v11016_v39 = vld [vmem:[#allocation224_spill] sm:$0xff] }
 0x6ba   :  { %10924 = vst [vmem:[#allocation80_spill] sm:$0xff] %v9026_v37  ;;  %3910 = vmatpush.msra.mxu3 %v9035_v62  ;;  %3879 = vmatpush.msra.mxu2 %v9038_v29  ;;  %v9044_v37 = vld [vmem:[#allocation15 + $0x3f8] sm:$0xff] }
 0x6bb   :  { %10925 = vst [vmem:[#allocation46_spill] sm:$0xff] %v9029_v58  ;;  %3935 = vmatpush.msrb.mxu1 %v9041_v5  ;;  %v9047_v58 = vld [vmem:[#allocation15 + $0x140] sm:$0xff] }
 0x6bc   :  { %10926 = vst [vmem:[#allocation197_spill] sm:$0xff] %v9032_v20  ;;  %3975 = vmatpush.msrb.mxu3 %v9044_v37  ;;  %3840 = vmatpush.msra.mxu0 %v9047_v58  ;;  %v9050_v20 = vld [vmem:[#allocation15 + $0x148] sm:$0xff] }
 0x6bd   :  { %10927 = vst [vmem:[#allocation47_spill] sm:$0xff] %v9035_v62  ;;  %3880 = vmatpush.msra.mxu2 %v9050_v20  ;;  %v9053_v62 = vld [vmem:[#allocation15 + $0x3d0] sm:$0xff] }
 0x6be   :  { %10928 = vst [vmem:[#allocation66_spill] sm:$0xff] %v9038_v29  ;;  %3936 = vmatpush.msrb.mxu1 %v9053_v62  ;;  %v9056_v29 = vld [vmem:[#allocation15 + $0x3d8] sm:$0xff] }
 0x6bf   :  { %10929 = vst [vmem:[#allocation198_spill] sm:$0xff] %v9041_v5  ;;  %3976 = vmatpush.msrb.mxu3 %v9056_v29  ;;  %v9059_v5 = vld [vmem:[#allocation15 + $0x120] sm:$0xff] }
 0x6c0   :  { %10930 = vst [vmem:[#allocation67_spill] sm:$0xff] %v9044_v37  ;;  %3841 = vmatpush.msra.mxu0 %v9059_v5  ;;  %v9062_v37 = vld [vmem:[#allocation15 + $0x128] sm:$0xff] }
 0x6c1   :  { %10931 = vst [vmem:[#allocation201_spill] sm:$0xff] %v9047_v58  ;;  %3881 = vmatpush.msra.mxu2 %v9062_v37  ;;  %v9065_v58 = vld [vmem:[#allocation15 + $0x3b0] sm:$0xff] }
 0x6c2   :  { %10932 = vst [vmem:[#allocation68_spill] sm:$0xff] %v9050_v20  ;;  %3937 = vmatpush.msrb.mxu1 %v9065_v58  ;;  %v9068_v20 = vld [vmem:[#allocation15 + $0x3b8] sm:$0xff] }
 0x6c3   :  { %10933 = vst [vmem:[#allocation29_spill] sm:$0xff] %v9053_v62  ;;  %3977 = vmatpush.msrb.mxu3 %v9068_v20  ;;  %v9071_v62 = vld [vmem:[#allocation15 + $0x100] sm:$0xff] }
 0x6c4   :  { %10934 = vst [vmem:[#allocation202_spill] sm:$0xff] %v9056_v29  ;;  %3842 = vmatpush.msra.mxu0 %v9071_v62  ;;  %v9074_v29 = vld [vmem:[#allocation15 + $0x108] sm:$0xff] }
 0x6c5   :  { %10935 = vst [vmem:[#allocation69_spill] sm:$0xff] %v9059_v5  ;;  %3882 = vmatpush.msra.mxu2 %v9074_v29  ;;  %v9077_v5 = vld [vmem:[#allocation15 + $0x390] sm:$0xff] }
 0x6c6   :  { %10936 = vst [vmem:[#allocation86_spill] sm:$0xff] %v9062_v37  ;;  %3938 = vmatpush.msrb.mxu1 %v9077_v5  ;;  %v9080_v37 = vld [vmem:[#allocation15 + $0x398] sm:$0xff] }
 0x6c7   :  { %10937 = vst [vmem:[#allocation81_spill] sm:$0xff] %v9065_v58  ;;  %3978 = vmatpush.msrb.mxu3 %v9080_v37  ;;  %v9083_v58 = vld [vmem:[#allocation15 + $0xe0] sm:$0xff] }
 0x6c8   :  { %10938 = vst [vmem:[#allocation42_spill] sm:$0xff] %v9068_v20  ;;  %3843 = vmatpush.msra.mxu0 %v9083_v58  ;;  %v9086_v20 = vld [vmem:[#allocation15 + $0xe8] sm:$0xff] }
 0x6c9   :  { %10939 = vst [vmem:[#allocation162_spill] sm:$0xff] %v9071_v62  ;;  %3883 = vmatpush.msra.mxu2 %v9086_v20  ;;  %v9089_v62 = vld [vmem:[#allocation15 + $0x370] sm:$0xff] }
 0x6ca   :  { %10940 = vst [vmem:[#allocation43_spill] sm:$0xff] %v9074_v29  ;;  %3939 = vmatpush.msrb.mxu1 %v9089_v62  ;;  %v9092_v29 = vld [vmem:[#allocation15 + $0x378] sm:$0xff] }
 0x6cb   :  { %10941 = vst [vmem:[#allocation58_spill] sm:$0xff] %v9077_v5  ;;  %3979 = vmatpush.msrb.mxu3 %v9092_v29  ;;  %v9095_v5 = vld [vmem:[#allocation15 + $0xc0] sm:$0xff] }
 0x6cc   :  { %10942 = vst [vmem:[#allocation163_spill] sm:$0xff] %v9080_v37  ;;  %3844 = vmatpush.msra.mxu0 %v9095_v5  ;;  %v9098_v37 = vld [vmem:[#allocation15 + $0xc8] sm:$0xff] }
 0x6cd   :  { %10943 = vst [vmem:[#allocation59_spill] sm:$0xff] %v9083_v58  ;;  %3884 = vmatpush.msra.mxu2 %v9098_v37  ;;  %v9101_v58 = vld [vmem:[#allocation15 + $0x350] sm:$0xff] }
 0x6ce   :  { %10944 = vst [vmem:[#allocation177_spill] sm:$0xff] %v9086_v20  ;;  %3940 = vmatpush.msrb.mxu1 %v9101_v58  ;;  %v9104_v20 = vld [vmem:[#allocation15 + $0x358] sm:$0xff] }
 0x6cf   :  { %10945 = vst [vmem:[#allocation60_spill] sm:$0xff] %v9089_v62  ;;  %3980 = vmatpush.msrb.mxu3 %v9104_v20  ;;  %v9107_v62 = vld [vmem:[#allocation15 + $0xa0] sm:$0xff] }
 0x6d0   :  { %10946 = vst [vmem:[#allocation27_spill] sm:$0xff] %v9092_v29  ;;  %3845 = vmatpush.msra.mxu0 %v9107_v62  ;;  %v9110_v29 = vld [vmem:[#allocation15 + $0xa8] sm:$0xff] }
 0x6d1   :  { %10947 = vst [vmem:[#allocation178_spill] sm:$0xff] %v9095_v5  ;;  %3885 = vmatpush.msra.mxu2 %v9110_v29  ;;  %v9113_v5 = vld [vmem:[#allocation15 + $0x330] sm:$0xff] }
 0x6d2   :  { %10948 = vst [vmem:[#allocation61_spill] sm:$0xff] %v9098_v37  ;;  %3941 = vmatpush.msrb.mxu1 %v9113_v5  ;;  %v9116_v37 = vld [vmem:[#allocation15 + $0x338] sm:$0xff] }
 0x6d3   :  { %10949 = vst [vmem:[#allocation78_spill] sm:$0xff] %v9101_v58  ;;  %3981 = vmatpush.msrb.mxu3 %v9116_v37  ;;  %v9119_v58 = vld [vmem:[#allocation15 + $0x80] sm:$0xff] }
 0x6d4   :  { %10950 = vst [vmem:[#allocation114_spill] sm:$0xff] %v9104_v20  ;;  %3846 = vmatpush.msra.mxu0 %v9119_v58  ;;  %v9122_v20 = vld [vmem:[#allocation15 + $0x88] sm:$0xff] }
 0x6d5   :  { %10951 = vst [vmem:[#allocation115_spill] sm:$0xff] %v9107_v62  ;;  %3886 = vmatpush.msra.mxu2 %v9122_v20  ;;  %v9125_v62 = vld [vmem:[#allocation15 + $0x310] sm:$0xff] }
 0x6d6   :  { %10952 = vst [vmem:[#allocation116_spill] sm:$0xff] %v9110_v29  ;;  %3942 = vmatpush.msrb.mxu1 %v9125_v62  ;;  %v9128_v29 = vld [vmem:[#allocation15 + $0x318] sm:$0xff] }
 0x6d7   :  { %10953 = vst [vmem:[#allocation117_spill] sm:$0xff] %v9113_v5  ;;  %3982 = vmatpush.msrb.mxu3 %v9128_v29  ;;  %v9131_v5 = vld [vmem:[#allocation15 + $0x60] sm:$0xff] }
 0x6d8   :  { %10954 = vst [vmem:[#allocation118_spill] sm:$0xff] %v9116_v37  ;;  %3847 = vmatpush.msra.mxu0 %v9131_v5  ;;  %v9134_v37 = vld [vmem:[#allocation15 + $0x68] sm:$0xff] }
 0x6d9   :  { %10955 = vst [vmem:[#allocation119_spill] sm:$0xff] %v9119_v58  ;;  %3887 = vmatpush.msra.mxu2 %v9134_v37  ;;  %v9137_v58 = vld [vmem:[#allocation15 + $0x2f0] sm:$0xff] }
 0x6da   :  { %10956 = vst [vmem:[#allocation120_spill] sm:$0xff] %v9122_v20  ;;  %3943 = vmatpush.msrb.mxu1 %v9137_v58  ;;  %v9140_v20 = vld [vmem:[#allocation15 + $0x2f8] sm:$0xff] }
 0x6db   :  { %10957 = vst [vmem:[#allocation125_spill] sm:$0xff] %v9125_v62  ;;  %3983 = vmatpush.msrb.mxu3 %v9140_v20  ;;  %v9143_v62 = vld [vmem:[#allocation15 + $0x40] sm:$0xff] }
 0x6dc   :  { %10958 = vst [vmem:[#allocation126_spill] sm:$0xff] %v9128_v29  ;;  %3848 = vmatpush.msra.mxu0 %v9143_v62  ;;  %v9146_v29 = vld [vmem:[#allocation15 + $0x48] sm:$0xff] }
 0x6dd   :  { %10959 = vst [vmem:[#allocation129_spill] sm:$0xff] %v9131_v5  ;;  %3888 = vmatpush.msra.mxu2 %v9146_v29  ;;  %v9149_v5 = vld [vmem:[#allocation15 + $0x2d0] sm:$0xff] }
 0x6de   :  { %10960 = vst [vmem:[#allocation130_spill] sm:$0xff] %v9134_v37  ;;  %3944 = vmatpush.msrb.mxu1 %v9149_v5  ;;  %v9152_v37 = vld [vmem:[#allocation15 + $0x2d8] sm:$0xff] }
 0x6df   :  { %10961 = vst [vmem:[#allocation133_spill] sm:$0xff] %v9137_v58  ;;  %3984 = vmatpush.msrb.mxu3 %v9152_v37  ;;  %v9155_v58 = vld [vmem:[#allocation15 + $0x20] sm:$0xff] }
 0x6e0   :  { %10962 = vst [vmem:[#allocation134_spill] sm:$0xff] %v9140_v20  ;;  %3849 = vmatpush.msra.mxu0 %v9155_v58  ;;  %v9158_v20 = vld [vmem:[#allocation15 + $0x28] sm:$0xff] }
 0x6e1   :  { %10963 = vst [vmem:[#allocation137_spill] sm:$0xff] %v9143_v62  ;;  %3889 = vmatpush.msra.mxu2 %v9158_v20  ;;  %v9161_v62 = vld [vmem:[#allocation15 + $0x2b0] sm:$0xff] }
 0x6e2   :  { %10964 = vst [vmem:[#allocation138_spill] sm:$0xff] %v9146_v29  ;;  %3945 = vmatpush.msrb.mxu1 %v9161_v62  ;;  %v9164_v29 = vld [vmem:[#allocation15 + $0x2b8] sm:$0xff] }
 0x6e3   :  { %10965 = vst [vmem:[#allocation141_spill] sm:$0xff] %v9149_v5  ;;  %3985 = vmatpush.msrb.mxu3 %v9164_v29  ;;  %v9167_v5 = vld [vmem:[#allocation15] sm:$0xff] }
 0x6e4   :  { %10966 = vst [vmem:[#allocation144_spill] sm:$0xff] %v9152_v37  ;;  %3850 = vmatpush.msra.mxu0 %v9167_v5  ;;  %v9170_v37 = vld [vmem:[#allocation15 + $0x8] sm:$0xff] }
 0x6e5   :  { %10967 = vst [vmem:[#allocation147_spill] sm:$0xff] %v9155_v58  ;;  %3890 = vmatpush.msra.mxu2 %v9170_v37  ;;  %v9173_v58 = vld [vmem:[#allocation15 + $0x290] sm:$0xff] }
 0x6e6   :  { %10968 = vst [vmem:[#allocation148_spill] sm:$0xff] %v9158_v20  ;;  %3946 = vmatpush.msrb.mxu1 %v9173_v58  ;;  %v9176_v20 = vld [vmem:[#allocation15 + $0x298] sm:$0xff] }
 0x6e7   :  { %10969 = vst [vmem:[#allocation151_spill] sm:$0xff] %v9161_v62  ;;  %3986 = vmatpush.msrb.mxu3 %v9176_v20  ;;  %v9179_v62 = vld [vmem:[#allocation15 + $0x1f0] sm:$0xff] }
 0x6e8   :  { %10970 = vst [vmem:[#allocation152_spill] sm:$0xff] %v9164_v29  ;;  %3915 = vmatpush.msrb.mxu0 %v9179_v62  ;;  %v9182_v29 = vld [vmem:[#allocation15 + $0x1f8] sm:$0xff] }
 0x6e9   :  { %10971 = vst [vmem:[#allocation155_spill] sm:$0xff] %v9167_v5  ;;  %3955 = vmatpush.msrb.mxu2 %v9182_v29  ;;  %v9185_v5 = vld [vmem:[#allocation15 + $0x270] sm:$0xff] }
 0x6ea   :  { %10972 = vst [vmem:[#allocation156_spill] sm:$0xff] %v9170_v37  ;;  %3947 = vmatpush.msrb.mxu1 %v9185_v5  ;;  %v9188_v37 = vld [vmem:[#allocation15 + $0x278] sm:$0xff] }
 0x6eb   :  { %10973 = vst [vmem:[#allocation161_spill] sm:$0xff] %v9173_v58  ;;  %3987 = vmatpush.msrb.mxu3 %v9188_v37  ;;  %v9191_v58 = vld [vmem:[#allocation15 + $0x1d0] sm:$0xff] }
 0x6ec   :  { %10974 = vst [vmem:[#allocation164_spill] sm:$0xff] %v9176_v20  ;;  %3916 = vmatpush.msrb.mxu0 %v9191_v58  ;;  %v9194_v20 = vld [vmem:[#allocation15 + $0x1d8] sm:$0xff] }
 0x6ed   :  { %10975 = vst [vmem:[#allocation167_spill] sm:$0xff] %v9179_v62  ;;  %3956 = vmatpush.msrb.mxu2 %v9194_v20  ;;  %v9197_v62 = vld [vmem:[#allocation15 + $0x250] sm:$0xff] }
 0x6ee   :  { %10976 = vst [vmem:[#allocation168_spill] sm:$0xff] %v9182_v29  ;;  %3948 = vmatpush.msrb.mxu1 %v9197_v62  ;;  %v9200_v29 = vld [vmem:[#allocation15 + $0x258] sm:$0xff] }
 0x6ef   :  { %10977 = vst [vmem:[#allocation171_spill] sm:$0xff] %v9185_v5  ;;  %3988 = vmatpush.msrb.mxu3 %v9200_v29  ;;  %v9203_v5 = vld [vmem:[#allocation15 + $0x1b0] sm:$0xff] }
 0x6f0   :  { %10978 = vst [vmem:[#allocation172_spill] sm:$0xff] %v9188_v37  ;;  %3917 = vmatpush.msrb.mxu0 %v9203_v5  ;;  %v9206_v37 = vld [vmem:[#allocation15 + $0x1b8] sm:$0xff] }
 0x6f1   :  { %10979 = vst [vmem:[#allocation175_spill] sm:$0xff] %v9191_v58  ;;  %3957 = vmatpush.msrb.mxu2 %v9206_v37  ;;  %v9209_v58 = vld [vmem:[#allocation15 + $0x230] sm:$0xff] }
 0x6f2   :  { %10980 = vst [vmem:[#allocation123_spill] sm:$0xff] %v9194_v20  ;;  %3949 = vmatpush.msrb.mxu1 %v9209_v58  ;;  %v9212_v20 = vld [vmem:[#allocation15 + $0x238] sm:$0xff] }
 0x6f3   :  { %10981 = vst [vmem:[#allocation124_spill] sm:$0xff] %v9197_v62  ;;  %3989 = vmatpush.msrb.mxu3 %v9212_v20  ;;  %v9215_v62 = vld [vmem:[#allocation15 + $0x190] sm:$0xff] }
 0x6f4   :  { %10982 = vst [vmem:[#allocation176_spill] sm:$0xff] %v9200_v29  ;;  %3918 = vmatpush.msrb.mxu0 %v9215_v62  ;;  %v9218_v29 = vld [vmem:[#allocation15 + $0x198] sm:$0xff] }
 0x6f5   :  { %10983 = vst [vmem:[#allocation127_spill] sm:$0xff] %v9203_v5  ;;  %3958 = vmatpush.msrb.mxu2 %v9218_v29  ;;  %v9221_v5 = vld [vmem:[#allocation15 + $0x210] sm:$0xff] }
 0x6f6   :  { %10984 = vst [vmem:[#allocation181_spill] sm:$0xff] %v9206_v37  ;;  %3950 = vmatpush.msrb.mxu1 %v9221_v5  ;;  %v9224_v37 = vld [vmem:[#allocation15 + $0x218] sm:$0xff] }
 0x6f7   :  { %10985 = vst [vmem:[#allocation128_spill] sm:$0xff] %v9209_v58  ;;  %3990 = vmatpush.msrb.mxu3 %v9224_v37  ;;  %v9227_v58 = vld [vmem:[#allocation15 + $0x170] sm:$0xff] }
 0x6f8   :  { %10986 = vst [vmem:[#allocation184_spill] sm:$0xff] %v9212_v20  ;;  %3919 = vmatpush.msrb.mxu0 %v9227_v58  ;;  %v9230_v20 = vld [vmem:[#allocation15 + $0x178] sm:$0xff] }
 0x6f9   :  { %10987 = vst [vmem:[#allocation131_spill] sm:$0xff] %v9215_v62  ;;  %3959 = vmatpush.msrb.mxu2 %v9230_v20  ;;  %v9233_v62 = vld [vmem:[#allocation15 + $0x150] sm:$0xff] }
 0x6fa   :  { %10988 = vst [vmem:[#allocation187_spill] sm:$0xff] %v9218_v29  ;;  %3920 = vmatpush.msrb.mxu0 %v9233_v62  ;;  %v9236_v29 = vld [vmem:[#allocation15 + $0x158] sm:$0xff] }
 0x6fb   :  { %10989 = vst [vmem:[#allocation132_spill] sm:$0xff] %v9221_v5  ;;  %3960 = vmatpush.msrb.mxu2 %v9236_v29  ;;  %v9239_v5 = vld [vmem:[#allocation15 + $0x130] sm:$0xff] }
 0x6fc   :  { %10990 = vst [vmem:[#allocation188_spill] sm:$0xff] %v9224_v37  ;;  %3921 = vmatpush.msrb.mxu0 %v9239_v5  ;;  %v9242_v37 = vld [vmem:[#allocation15 + $0x138] sm:$0xff] }
 0x6fd   :  { %10991 = vst [vmem:[#allocation135_spill] sm:$0xff] %v9227_v58  ;;  %3961 = vmatpush.msrb.mxu2 %v9242_v37  ;;  %v9245_v58 = vld [vmem:[#allocation15 + $0x110] sm:$0xff] }
 0x6fe   :  { %10992 = vst [vmem:[#allocation191_spill] sm:$0xff] %v9230_v20  ;;  %3922 = vmatpush.msrb.mxu0 %v9245_v58  ;;  %v9248_v20 = vld [vmem:[#allocation15 + $0x118] sm:$0xff] }
 0x6ff   :  { %10993 = vst [vmem:[#allocation136_spill] sm:$0xff] %v9233_v62  ;;  %3962 = vmatpush.msrb.mxu2 %v9248_v20  ;;  %v9251_v62 = vld [vmem:[#allocation15 + $0xf0] sm:$0xff] }
 0x700   :  { %10994 = vst [vmem:[#allocation192_spill] sm:$0xff] %v9236_v29  ;;  %3923 = vmatpush.msrb.mxu0 %v9251_v62  ;;  %v9254_v29 = vld [vmem:[#allocation15 + $0xf8] sm:$0xff] }
 0x701   :  { %10995 = vst [vmem:[#allocation139_spill] sm:$0xff] %v9239_v5  ;;  %3963 = vmatpush.msrb.mxu2 %v9254_v29  ;;  %v9257_v5 = vld [vmem:[#allocation15 + $0xd0] sm:$0xff] }
 0x702   :  { %10996 = vst [vmem:[#allocation140_spill] sm:$0xff] %v9242_v37  ;;  %3924 = vmatpush.msrb.mxu0 %v9257_v5  ;;  %v9260_v37 = vld [vmem:[#allocation15 + $0xd8] sm:$0xff] }
 0x703   :  { %10997 = vst [vmem:[#allocation145_spill] sm:$0xff] %v9245_v58  ;;  %3964 = vmatpush.msrb.mxu2 %v9260_v37  ;;  %v9263_v58 = vld [vmem:[#allocation15 + $0xb0] sm:$0xff] }
 0x704   :  { %10998 = vst [vmem:[#allocation146_spill] sm:$0xff] %v9248_v20  ;;  %3925 = vmatpush.msrb.mxu0 %v9263_v58  ;;  %v9266_v20 = vld [vmem:[#allocation15 + $0xb8] sm:$0xff] }
 0x705   :  { %10999 = vst [vmem:[#allocation149_spill] sm:$0xff] %v9251_v62  ;;  %3965 = vmatpush.msrb.mxu2 %v9266_v20  ;;  %v9269_v62 = vld [vmem:[#allocation15 + $0x90] sm:$0xff] }
 0x706   :  { %11000 = vst [vmem:[#allocation150_spill] sm:$0xff] %v9254_v29  ;;  %3926 = vmatpush.msrb.mxu0 %v9269_v62  ;;  %v9272_v29 = vld [vmem:[#allocation15 + $0x98] sm:$0xff] }
 0x707   :  { %11001 = vst [vmem:[#allocation153_spill] sm:$0xff] %v9257_v5  ;;  %3966 = vmatpush.msrb.mxu2 %v9272_v29  ;;  %v9275_v5 = vld [vmem:[#allocation15 + $0x70] sm:$0xff] }
 0x708   :  { %11002 = vst [vmem:[#allocation154_spill] sm:$0xff] %v9260_v37  ;;  %3927 = vmatpush.msrb.mxu0 %v9275_v5  ;;  %v9278_v37 = vld [vmem:[#allocation15 + $0x78] sm:$0xff] }
 0x709   :  { %11003 = vst [vmem:[#allocation159_spill] sm:$0xff] %v9263_v58  ;;  %3967 = vmatpush.msrb.mxu2 %v9278_v37  ;;  %v9281_v58 = vld [vmem:[#allocation15 + $0x50] sm:$0xff] }
 0x70a   :  { %11004 = vst [vmem:[#allocation160_spill] sm:$0xff] %v9266_v20  ;;  %3928 = vmatpush.msrb.mxu0 %v9281_v58  ;;  %v9284_v20 = vld [vmem:[#allocation15 + $0x58] sm:$0xff] }
 0x70b   :  { %11005 = vst [vmem:[#allocation165_spill] sm:$0xff] %v9269_v62  ;;  %3968 = vmatpush.msrb.mxu2 %v9284_v20 }
 0x70c   :  { %11006 = vst [vmem:[#allocation166_spill] sm:$0xff] %v9272_v29  ;;  %3929 = vmatpush.msrb.mxu0 %v8737_v16  ;;  %v3585_v29 = vpop.f32.mrf.mxu1 }
 0x70d   :  { %11007 = vst [vmem:[#allocation169_spill] sm:$0xff] %v9275_v5  ;;  %3969 = vmatpush.msrb.mxu2 %v8740_v7  ;;  %v3565_v5 = vpop.f32.mrf.mxu0 }
 0x70e   :  { %11008 = vst [vmem:[#allocation170_spill] sm:$0xff] %v9278_v37  ;;  %3930 = vmatpush.msrb.mxu0 %v8743_v59  ;;  %v3566_v37 = vadd.f32 %v3565_v5, %v10872_v17 }
 0x70f   :  { %11009 = vst [vmem:[#allocation173_spill] sm:$0xff] %v9281_v58  ;;  %3970 = vmatpush.msrb.mxu2 %v8746_v22  ;;  %v3625_v58 = vpop.f32.mrf.mxu3 }
 0x710   :  { %11010 = vst [vmem:[#allocation174_spill] sm:$0xff] %v9284_v20  ;;  %v3586_v62 = vadd.f32 %v3585_v29, %v3566_v37  ;;  %v11012_v37 = vld [vmem:[#allocation208_spill] sm:$0xff] }
 0x711   :  { %v3605_v14 = vpop.f32.mrf.mxu2 }
 0x712   :  { %v3708_v18 = vmul.f32 0.5, %v3586_v62  ;;  %v3606_v31 = vadd.f32 %v3605_v14, %v10873_v46  ;;  %v11013_v62 = vld [vmem:[#allocation100_spill] sm:$0xff] }
 0x713   :  { %v1519_v17 = vadd.f32 %v11013_v62, %v11012_v37  ;;  %v11018_v62 = vld [vmem:[#allocation209_spill] sm:$0xff] }
 0x714   :  { %4488 = vtanh.f32 %v3708_v18  ;;  %v3626_v20 = vadd.f32 %v3625_v58, %v3606_v31  ;;  %v3665_v7 = vpop.f32.mrf.mxu1  ;;  %v11014_v31 = vld [vmem:[#allocation109_spill] sm:$0xff] }
 0x715   :  { %v3645_v32 = vpop.f32.mrf.mxu0  ;;  %v1560_v58 = vadd.f32 %v11014_v31, %v1519_v17  ;;  %v11021_v17 = vld [vmem:[#allocation72_spill] sm:$0xff]  ;;  %v11022_v31 = vld [vmem:[#allocation210_spill] sm:$0xff] }
 0x716   :  { %v3646_v16 = vadd.f32 %v3645_v32, %v10874_v13  ;;  %v3712_v60 = vmul.f32 0.5, %v3626_v20 }
 0x717   :  { %v3705_v29 = vpop.f32.mrf.mxu3 }
 0x718   :  { %v3666_v59 = vadd.f32 %v3665_v7, %v3646_v16  ;;  %4490 = vtanh.f32 %v3712_v60  ;;  %v11015_v7 = vld [vmem:[#allocation110_spill] sm:$0xff] }
 0x71a   :  { %v4489_v22 = vpop.eup %4488  ;;  %4492 = vtanh.f32 %v3666_v59  ;;  %v3685_v34 = vpop.f32.mrf.mxu2  ;;  %v1601_v59 = vadd.f32 %v11015_v7, %v1560_v58  ;;  %v11023_v58 = vld [vmem:[#allocation73_spill] sm:$0xff] }
 0x71b   :  { %v3686_v5 = vadd.f32 %v3685_v34, %v11011_v33  ;;  %v3710_v4 = vmul.f32 0.5, %v4489_v22 }
 0x71c   :  { %v3770_v60 = vpop.f32.mrf.mxu1  ;;  %v1642_v22 = vadd.f32 %v11018_v62, %v1601_v59  ;;  %v11026_v59 = vld [vmem:[#allocation31_spill] sm:$0xff] }
 0x71d   :  { %v3706_v14 = vadd.f32 %v3705_v29, %v3686_v5  ;;  %v3711_v20 = vadd.f32 0.5, %v3710_v4  ;;  %v3814_v55 = vadd.f32 %v3770_v60, %v11017_v54  ;;  %v11020_v29 = vld [vmem:[#allocation51_spill] sm:$0xff] }
 0x71e   :  { %v4491_v18 = vpop.eup %4490 }
 0x71f   :  { %v3714_v46 = vmul.f32 0.5, %v4491_v18  ;;  %v3717_v32 = vmul.f32 0.5, %v3706_v14  ;;  %v1314_v18 = vadd.f32 %v11021_v17, %v11020_v29  ;;  %v3810_v29 = vpop.f32.mrf.mxu3  ;;  %v11027_v17 = vld [vmem:[#allocation212_spill] sm:$0xff] }
 0x720   :  { %v4493_v13 = vpop.eup %4492 }
 0x721   :  { %v3715_v16 = vadd.f32 0.5, %v3714_v46  ;;  %4494 = vtanh.f32 %v3717_v32  ;;  %v3722_v33 = vmul.f32 %v4493_v13, %v3711_v20  ;;  %v3821_v46 = vmul.f32 0.5, %v3814_v55  ;;  %v11025_v20 = vld [vmem:[#allocation34_spill] sm:$0xff] }
 0x722   :  { %v1683_v32 = vadd.f32 %v11022_v31, %v1642_v22  ;;  %v1355_v7 = vadd.f32 %v11023_v58, %v1314_v18 }
 0x723   :  { %v3721_v34 = vmul.f32 %v3715_v16, %v11016_v39  ;;  %v11024_v39 = vld [vmem:[#allocation211_spill] sm:$0xff] }
 0x724   :  { %v1724_v13 = vadd.f32 %v11024_v39, %v1683_v32  ;;  %v1396_v54 = vadd.f32 %v11025_v20, %v1355_v7  ;;  %v5174_v39 = vld [vmem:[#allocation12 + $0x180] sm:$0xff] }
 0x725   :  { %v9302_v5 = vadd.f32 %v3722_v33, %v3721_v34  ;;  %v5182_v20 = vld [vmem:[#allocation12 + $0x100] sm:$0xff] }
 0x727   :  { %11019 = vst [vmem:[#allocation179_spill] sm:$0xff] %v9302_v5  ;;  %v4495_v14 = vpop.eup %4494  ;;  %4496 = vtanh.f32 %v9302_v5  ;;  %v1765_v5 = vadd.f32 %v11027_v17, %v1724_v13  ;;  %v5181_v13 = vld [vmem:[#allocation12 + $0x130] sm:$0xff]  ;;  %v11041_v17 = vld [vmem:[#allocation83_spill] sm:$0xff] }
 0x728   :  { %v3719_v4 = vmul.f32 0.5, %v4495_v14  ;;  %4498 = vtanh.f32 %v3821_v46  ;;  %v11028_v14 = vld [vmem:[#allocation35_spill] sm:$0xff] }
 0x729   :  { %v1437_v37 = vadd.f32 %v11028_v14, %v1396_v54  ;;  %v3816_v22 = vadd.f32 %v3810_v29, %v1765_v5  ;;  %v11029_v46 = vld [vmem:[#allocation99_spill] sm:$0xff]  ;;  %v5183_v54 = vld [vmem:[#allocation12 + $0x110] sm:$0xff]  ;;  %v11042_v14 = vld [vmem:[#allocation84_spill] sm:$0xff] }
 0x72a   :  { %v3720_v16 = vadd.f32 0.5, %v3719_v4  ;;  %v5196_v29 = vld [vmem:[#allocation12 + $0x20] sm:$0xff] }
 0x72b   :  { %v1478_v4 = vadd.f32 %v11029_v46, %v1437_v37  ;;  %v3826_v7 = vmul.f32 0.5, %v3816_v22  ;;  %v5198_v22 = vld [vmem:[#allocation12] sm:$0xff]  ;;  %v5199_v46 = vld [vmem:[#allocation12 + $0x10] sm:$0xff] }
 0x72c   :  { %v3750_v33 = vpop.f32.mrf.mxu0 }
 0x72d   :  { %v4497_v60 = vpop.eup %4496  ;;  %v3813_v34 = vadd.f32 %v3750_v33, %v11026_v59  ;;  %v11036_v33 = vld [vmem:[#allocation231_spill] sm:$0xff]  ;;  %v11038_v59 = vld [vmem:[#allocation233_spill] sm:$0xff] }
 0x72e   :  { %v3725_v62 = vmul.f32 %v4497_v60, %v3720_v16  ;;  %v4499_v18 = vpop.eup %4498  ;;  %v11035_v16 = vld [vmem:[#allocation230_spill] sm:$0xff]  ;;  %v11037_v60 = vld [vmem:[#allocation232_spill] sm:$0xff] }
 0x72f   :  { %v3817_v55 = vmul.f32 0.5, %v3813_v34  ;;  %v3823_v58 = vmul.f32 0.5, %v4499_v18  ;;  %v11039_v34 = vld [vmem:[#allocation234_spill] sm:$0xff]  ;;  %v11043_v18 = vld [vmem:[#allocation85_spill] sm:$0xff] }
 0x730   :  { %3727 = vst [vmem:[#allocation18 + $0x28] sm:$0xff] %v3725_v62  ;;  %3871 = vmatmul.f32.vlgmr.msra.gmra.mxu1 %v3725_v62  ;;  %3911 = vmatmul.f32.vlgmr.msra.gmra.mxu3 %v3725_v62 }
 0x731   :  { %4500 = vtanh.f32 %v3817_v55  ;;  %4040 = vmatpush.msra.mxu1 %v8773_v50  ;;  %4080 = vmatpush.msra.mxu3 %v8776_v28  ;;  %v3824_v28 = vadd.f32 0.5, %v3823_v58  ;;  %v5197_v55 = vld [vmem:[#allocation12 + $0x30] sm:$0xff] }
 0x732   :  { %v11047_v58 = vld [vmem:[#allocation45_spill] sm:$0xff] }
 0x733   :  { %v3790_v31 = vpop.f32.mrf.mxu2  ;;  %4041 = vmatpush.msra.mxu1 %v8779_v63  ;;  %4081 = vmatpush.msra.mxu3 %v8782_v24 }
 0x734   :  { %v3815_v32 = vadd.f32 %v3790_v31, %v1478_v4  ;;  %v11044_v4 = vld [vmem:[#allocation79_spill] sm:$0xff]  ;;  %v11045_v31 = vld [vmem:[#allocation44_spill] sm:$0xff] }
 0x735   :  { %4042 = vmatpush.msra.mxu1 %v8785_v40  ;;  %4082 = vmatpush.msra.mxu3 %v8788_v3  ;;  %v3830_v40 = vmul.f32 %v3824_v28, %v8816_v49  ;;  %v11033_v49 = vld [vmem:[#allocation228_spill] sm:$0xff]  ;;  %v11051_v28 = vld [vmem:[#allocation195_spill] sm:$0xff] }
 0x736   :  { %4502 = vtanh.f32 %v3815_v32  ;;  %v11046_v32 = vld [vmem:[#allocation182_spill] sm:$0xff] }
 0x737   :  { %v4501_v5 = vpop.eup %4500  ;;  %4043 = vmatpush.msra.mxu1 %v8791_v0  ;;  %4083 = vmatpush.msra.mxu3 %v8794_v44  ;;  %4504 = vtanh.f32 %v3826_v7  ;;  %v11048_v7 = vld [vmem:[#allocation62_spill] sm:$0xff] }
 0x738   :  { %v3819_v50 = vmul.f32 0.5, %v4501_v5  ;;  %3951 = vmatmul.f32.vlgmr.msrb.gmra.mxu1 %v3725_v62  ;;  %3991 = vmatmul.f32.vlgmr.msrb.gmra.mxu3 %v3725_v62  ;;  %v11040_v62 = vld [vmem:[#allocation235_spill] sm:$0xff] }
 0x739   :  { %4044 = vmatpush.msra.mxu1 %v8797_v43  ;;  %4084 = vmatpush.msra.mxu3 %v8800_v15  ;;  %v11030_v43 = vld [vmem:[#allocation225_spill] sm:$0xff]  ;;  %v11031_v15 = vld [vmem:[#allocation226_spill] sm:$0xff]  ;;  %v11049_v5 = vld [vmem:[#allocation183_spill] sm:$0xff] }
 0x73a   :  { %v3820_v63 = vadd.f32 0.5, %v3819_v50  ;;  %v11050_v50 = vld [vmem:[#allocation63_spill] sm:$0xff] }
 0x73b   :  { %4045 = vmatpush.msra.mxu1 %v8803_v12  ;;  %4085 = vmatpush.msra.mxu3 %v8806_v8  ;;  %v11032_v12 = vld [vmem:[#allocation227_spill] sm:$0xff] }
 0x73c   :  { %v4503_v24 = vpop.eup %4502 }
 0x73d   :  { %v3831_v3 = vmul.f32 %v4503_v24, %v3820_v63  ;;  %4046 = vmatpush.msra.mxu1 %v8810_v2  ;;  %4086 = vmatpush.msra.mxu3 %v8813_v52  ;;  %v4505_v0 = vpop.eup %4504  ;;  %v11052_v63 = vld [vmem:[#allocation64_spill] sm:$0xff] }
 0x73e   :  { %v3828_v8 = vmul.f32 0.5, %v4505_v0  ;;  %v11053_v24 = vld [vmem:[#allocation28_spill] sm:$0xff]  ;;  %v11056_v0 = vld [vmem:[#allocation82_spill] sm:$0xff] }
 0x73f   :  { %v9330_v44 = vadd.f32 %v3831_v3, %v3830_v40  ;;  %4047 = vmatpush.msra.mxu1 %v8818_v51  ;;  %4087 = vmatpush.msra.mxu3 %v11030_v43  ;;  %v11034_v51 = vld [vmem:[#allocation229_spill] sm:$0xff]  ;;  %v11054_v40 = vld [vmem:[#allocation196_spill] sm:$0xff]  ;;  %v11057_v43 = vld [vmem:[#allocation87_spill] sm:$0xff] }
 0x740   :  { %v3829_v2 = vadd.f32 0.5, %v3828_v8  ;;  %v11055_v3 = vld [vmem:[#allocation65_spill] sm:$0xff]  ;;  %v11060_v8 = vld [vmem:[#allocation80_spill] sm:$0xff] }
 0x741   :  { %4506 = vtanh.f32 %v9330_v44  ;;  %4048 = vmatpush.msra.mxu1 %v11031_v15  ;;  %4088 = vmatpush.msra.mxu3 %v11032_v12  ;;  %v11058_v15 = vld [vmem:[#allocation88_spill] sm:$0xff]  ;;  %v11059_v12 = vld [vmem:[#allocation89_spill] sm:$0xff] }
 0x743   :  { %4049 = vmatpush.msra.mxu1 %v11033_v49  ;;  %4089 = vmatpush.msra.mxu3 %v8834_v25  ;;  %v5168_v25 = vld [vmem:[#allocation12 + $0x1e0] sm:$0xff]  ;;  %v11061_v49 = vld [vmem:[#allocation46_spill] sm:$0xff] }
 0x745   :  { %4050 = vmatpush.msra.mxu1 %v8837_v57  ;;  %4090 = vmatpush.msra.mxu3 %v8840_v27  ;;  %v5169_v57 = vld [vmem:[#allocation12 + $0x1f0] sm:$0xff] }
 0x746   :  { %v5171_v27 = vld [vmem:[#allocation12 + $0x1d0] sm:$0xff] }
 0x747   :  { %v4507_v52 = vpop.eup %4506  ;;  %4051 = vmatpush.msra.mxu1 %v8845_v42  ;;  %4091 = vmatpush.msra.mxu3 %v11034_v51  ;;  %v5170_v42 = vld [vmem:[#allocation12 + $0x1c0] sm:$0xff]  ;;  %v11064_v51 = vld [vmem:[#allocation66_spill] sm:$0xff] }
 0x748   :  { %v9343_v37 = vmul.f32 %v4507_v52, %v3829_v2  ;;  %v11062_v2 = vld [vmem:[#allocation197_spill] sm:$0xff]  ;;  %v11063_v52 = vld [vmem:[#allocation47_spill] sm:$0xff] }
 0x749   :  { %4052 = vmatpush.msra.mxu1 %v8855_v30  ;;  %4092 = vmatpush.msra.mxu3 %v8858_v45  ;;  %v5172_v30 = vld [vmem:[#allocation12 + $0x1a0] sm:$0xff]  ;;  %v5173_v45 = vld [vmem:[#allocation12 + $0x1b0] sm:$0xff] }
 0x74a   :  { %3851 = vmatmul.f32.vlgmr.msra.gmra.mxu0 %v9343_v37  ;;  %3891 = vmatmul.f32.vlgmr.msra.gmra.mxu2 %v9343_v37 }
 0x74b   :  { %4020 = vmatpush.msra.mxu0 %v5168_v25  ;;  %4060 = vmatpush.msra.mxu2 %v5169_v57  ;;  %v11066_v25 = vld [vmem:[#allocation67_spill] sm:$0xff]  ;;  %v11067_v57 = vld [vmem:[#allocation201_spill] sm:$0xff] }
 0x74c   :  { %4053 = vmatpush.msra.mxu1 %v8863_v19  ;;  %4093 = vmatpush.msra.mxu3 %v8866_v61  ;;  %v5175_v19 = vld [vmem:[#allocation12 + $0x190] sm:$0xff]  ;;  %v5176_v61 = vld [vmem:[#allocation12 + $0x160] sm:$0xff] }
 0x74d   :  { %4021 = vmatpush.msra.mxu0 %v5170_v42  ;;  %4061 = vmatpush.msra.mxu2 %v5171_v27  ;;  %v11068_v42 = vld [vmem:[#allocation68_spill] sm:$0xff]  ;;  %v11069_v27 = vld [vmem:[#allocation29_spill] sm:$0xff] }
 0x74e   :  { %4054 = vmatpush.msra.mxu1 %v8871_v9  ;;  %4094 = vmatpush.msra.mxu3 %v8874_v6  ;;  %v5177_v9 = vld [vmem:[#allocation12 + $0x170] sm:$0xff]  ;;  %v5178_v6 = vld [vmem:[#allocation12 + $0x140] sm:$0xff] }
 0x74f   :  { %4022 = vmatpush.msra.mxu0 %v5172_v30  ;;  %4062 = vmatpush.msra.mxu2 %v5173_v45  ;;  %v11070_v30 = vld [vmem:[#allocation202_spill] sm:$0xff]  ;;  %v11071_v45 = vld [vmem:[#allocation69_spill] sm:$0xff] }
 0x750   :  { %4055 = vmatpush.msra.mxu1 %v8879_v38  ;;  %4095 = vmatpush.msra.mxu3 %v8882_v56  ;;  %v5179_v38 = vld [vmem:[#allocation12 + $0x150] sm:$0xff]  ;;  %v5180_v56 = vld [vmem:[#allocation12 + $0x120] sm:$0xff] }
 0x751   :  { %4023 = vmatpush.msra.mxu0 %v5174_v39  ;;  %4063 = vmatpush.msra.mxu2 %v5175_v19  ;;  %v11072_v39 = vld [vmem:[#allocation86_spill] sm:$0xff]  ;;  %v11073_v19 = vld [vmem:[#allocation81_spill] sm:$0xff] }
 0x752   :  { %3931 = vmatmul.f32.vlgmr.msrb.gmra.mxu0 %v9343_v37  ;;  %3971 = vmatmul.f32.vlgmr.msrb.gmra.mxu2 %v9343_v37 }
 0x753   :  { %4024 = vmatpush.msra.mxu0 %v5176_v61  ;;  %4056 = vmatmul.f32.vlgmr.msra.gmra.mxu1 %v9343_v37  ;;  %v11074_v61 = vld [vmem:[#allocation42_spill] sm:$0xff] }
 0x754   :  { %4064 = vmatpush.msra.mxu2 %v5177_v9  ;;  %4096 = vmatmul.f32.vlgmr.msra.gmra.mxu3 %v9343_v37  ;;  %v11075_v9 = vld [vmem:[#allocation162_spill] sm:$0xff] }
 0x755   :  { %4025 = vmatpush.msra.mxu0 %v5178_v6  ;;  %4142 = vmatpush.msrb.mxu1 %v8892_v26  ;;  %v5184_v26 = vld [vmem:[#allocation12 + $0xe0] sm:$0xff] }
 0x756   :  { %4065 = vmatpush.msra.mxu2 %v5179_v38  ;;  %4182 = vmatpush.msrb.mxu3 %v8896_v36  ;;  %v5185_v36 = vld [vmem:[#allocation12 + $0xf0] sm:$0xff]  ;;  %v11076_v6 = vld [vmem:[#allocation43_spill] sm:$0xff]  ;;  %v11077_v38 = vld [vmem:[#allocation58_spill] sm:$0xff] }
 0x757   :  { %4026 = vmatpush.msra.mxu0 %v5180_v56  ;;  %4143 = vmatpush.msrb.mxu1 %v8900_v23  ;;  %v5186_v23 = vld [vmem:[#allocation12 + $0xc0] sm:$0xff] }
 0x758   :  { %4066 = vmatpush.msra.mxu2 %v5181_v13  ;;  %4183 = vmatpush.msrb.mxu3 %v8904_v11  ;;  %v5187_v11 = vld [vmem:[#allocation12 + $0xd0] sm:$0xff]  ;;  %v11078_v56 = vld [vmem:[#allocation163_spill] sm:$0xff] }
 0x759   :  { %4027 = vmatpush.msra.mxu0 %v5182_v20  ;;  %4144 = vmatpush.msrb.mxu1 %v8908_v10  ;;  %v5188_v10 = vld [vmem:[#allocation12 + $0xa0] sm:$0xff]  ;;  %v11080_v20 = vld [vmem:[#allocation177_spill] sm:$0xff] }
 0x75a   :  { %4067 = vmatpush.msra.mxu2 %v5183_v54  ;;  %4184 = vmatpush.msrb.mxu3 %v8912_v41  ;;  %v5189_v41 = vld [vmem:[#allocation12 + $0xb0] sm:$0xff]  ;;  %v11079_v13 = vld [vmem:[#allocation59_spill] sm:$0xff]  ;;  %v11081_v54 = vld [vmem:[#allocation60_spill] sm:$0xff] }
 0x75b   :  { %4028 = vmatpush.msra.mxu0 %v5184_v26  ;;  %4145 = vmatpush.msrb.mxu1 %v8916_v53  ;;  %v5190_v53 = vld [vmem:[#allocation12 + $0x80] sm:$0xff] }
 0x75c   :  { %4068 = vmatpush.msra.mxu2 %v5185_v36  ;;  %4185 = vmatpush.msrb.mxu3 %v8920_v48  ;;  %v5191_v48 = vld [vmem:[#allocation12 + $0x90] sm:$0xff]  ;;  %v11082_v26 = vld [vmem:[#allocation27_spill] sm:$0xff]  ;;  %v11083_v36 = vld [vmem:[#allocation178_spill] sm:$0xff] }
 0x75d   :  { %4029 = vmatpush.msra.mxu0 %v5186_v23  ;;  %4146 = vmatpush.msrb.mxu1 %v8924_v47  ;;  %v5192_v47 = vld [vmem:[#allocation12 + $0x60] sm:$0xff]  ;;  %v11084_v23 = vld [vmem:[#allocation61_spill] sm:$0xff] }
 0x75e   :  { %4069 = vmatpush.msra.mxu2 %v5187_v11  ;;  %4186 = vmatpush.msrb.mxu3 %v8928_v35  ;;  %v5193_v35 = vld [vmem:[#allocation12 + $0x70] sm:$0xff]  ;;  %v11085_v11 = vld [vmem:[#allocation78_spill] sm:$0xff] }
 0x75f   :  { %4030 = vmatpush.msra.mxu0 %v5188_v10  ;;  %4147 = vmatpush.msrb.mxu1 %v8932_v21  ;;  %v5194_v21 = vld [vmem:[#allocation12 + $0x40] sm:$0xff]  ;;  %v11086_v10 = vld [vmem:[#allocation114_spill] sm:$0xff] }
 0x760   :  { %4070 = vmatpush.msra.mxu2 %v5189_v41  ;;  %4187 = vmatpush.msrb.mxu3 %v8936_v1  ;;  %v5195_v1 = vld [vmem:[#allocation12 + $0x50] sm:$0xff]  ;;  %v11087_v41 = vld [vmem:[#allocation115_spill] sm:$0xff] }
 0x761   :  { %4031 = vmatpush.msra.mxu0 %v5190_v53  ;;  %4148 = vmatpush.msrb.mxu1 %v11035_v16  ;;  %v11088_v53 = vld [vmem:[#allocation116_spill] sm:$0xff]  ;;  %v11089_v16 = vld [vmem:[#allocation117_spill] sm:$0xff] }
 0x762   :  { %4071 = vmatpush.msra.mxu2 %v5191_v48  ;;  %4188 = vmatpush.msrb.mxu3 %v11036_v33  ;;  %v11090_v48 = vld [vmem:[#allocation118_spill] sm:$0xff]  ;;  %v11091_v33 = vld [vmem:[#allocation119_spill] sm:$0xff] }
 0x763   :  { %4032 = vmatpush.msra.mxu0 %v5192_v47  ;;  %4149 = vmatpush.msrb.mxu1 %v11037_v60  ;;  %v11092_v47 = vld [vmem:[#allocation120_spill] sm:$0xff]  ;;  %v11093_v60 = vld [vmem:[#allocation125_spill] sm:$0xff] }
 0x764   :  { %4072 = vmatpush.msra.mxu2 %v5193_v35  ;;  %4189 = vmatpush.msrb.mxu3 %v11038_v59  ;;  %v11094_v35 = vld [vmem:[#allocation126_spill] sm:$0xff]  ;;  %v11095_v59 = vld [vmem:[#allocation129_spill] sm:$0xff] }
 0x765   :  { %4033 = vmatpush.msra.mxu0 %v5194_v21  ;;  %4150 = vmatpush.msrb.mxu1 %v11039_v34  ;;  %v11096_v21 = vld [vmem:[#allocation130_spill] sm:$0xff]  ;;  %v11097_v34 = vld [vmem:[#allocation133_spill] sm:$0xff] }
 0x766   :  { %4073 = vmatpush.msra.mxu2 %v5195_v1  ;;  %4190 = vmatpush.msrb.mxu3 %v11040_v62  ;;  %v11098_v1 = vld [vmem:[#allocation134_spill] sm:$0xff]  ;;  %v11099_v62 = vld [vmem:[#allocation137_spill] sm:$0xff] }
 0x767   :  { %4034 = vmatpush.msra.mxu0 %v5196_v29  ;;  %4151 = vmatpush.msrb.mxu1 %v11041_v17  ;;  %v11100_v29 = vld [vmem:[#allocation138_spill] sm:$0xff]  ;;  %v11101_v17 = vld [vmem:[#allocation141_spill] sm:$0xff] }
 0x768   :  { %4074 = vmatpush.msra.mxu2 %v5197_v55  ;;  %4191 = vmatpush.msrb.mxu3 %v11042_v14  ;;  %v11102_v55 = vld [vmem:[#allocation144_spill] sm:$0xff]  ;;  %v11103_v14 = vld [vmem:[#allocation147_spill] sm:$0xff] }
 0x769   :  { %4035 = vmatpush.msra.mxu0 %v5198_v22  ;;  %4152 = vmatpush.msrb.mxu1 %v11043_v18  ;;  %v11104_v22 = vld [vmem:[#allocation148_spill] sm:$0xff]  ;;  %v11105_v18 = vld [vmem:[#allocation151_spill] sm:$0xff] }
 0x76a   :  { %4075 = vmatpush.msra.mxu2 %v5199_v46  ;;  %4036 = vmatmul.f32.vlgmr.msra.gmra.mxu0 %v9343_v37  ;;  %v11106_v46 = vld [vmem:[#allocation152_spill] sm:$0xff] }
 0x76b   :  { %4076 = vmatmul.f32.vlgmr.msra.gmra.mxu2 %v9343_v37  ;;  %4192 = vmatpush.msrb.mxu3 %v11044_v4  ;;  %v11065_v37 = vld [vmem:[#allocation198_spill] sm:$0xff]  ;;  %v11107_v4 = vld [vmem:[#allocation155_spill] sm:$0xff] }
 0x76c   :  { %4153 = vmatpush.msrb.mxu1 %v11045_v31  ;;  %4122 = vmatpush.msrb.mxu0 %v11046_v32  ;;  %v11108_v31 = vld [vmem:[#allocation156_spill] sm:$0xff]  ;;  %v11109_v32 = vld [vmem:[#allocation161_spill] sm:$0xff] }
 0x76d   :  { %4193 = vmatpush.msrb.mxu3 %v11047_v58  ;;  %4162 = vmatpush.msrb.mxu2 %v11048_v7  ;;  %v11110_v58 = vld [vmem:[#allocation164_spill] sm:$0xff]  ;;  %v11111_v7 = vld [vmem:[#allocation167_spill] sm:$0xff] }
 0x76e   :  { %4154 = vmatpush.msrb.mxu1 %v11049_v5  ;;  %4123 = vmatpush.msrb.mxu0 %v11050_v50  ;;  %v11112_v5 = vld [vmem:[#allocation168_spill] sm:$0xff]  ;;  %v11113_v50 = vld [vmem:[#allocation171_spill] sm:$0xff] }
 0x76f   :  { %4194 = vmatpush.msrb.mxu3 %v11051_v28  ;;  %4163 = vmatpush.msrb.mxu2 %v11052_v63  ;;  %v11114_v28 = vld [vmem:[#allocation172_spill] sm:$0xff]  ;;  %v11115_v63 = vld [vmem:[#allocation175_spill] sm:$0xff] }
 0x770   :  { %4155 = vmatpush.msrb.mxu1 %v11053_v24  ;;  %4124 = vmatpush.msrb.mxu0 %v11054_v40  ;;  %v11116_v24 = vld [vmem:[#allocation123_spill] sm:$0xff]  ;;  %v11117_v40 = vld [vmem:[#allocation124_spill] sm:$0xff] }
 0x771   :  { %4195 = vmatpush.msrb.mxu3 %v11055_v3  ;;  %4164 = vmatpush.msrb.mxu2 %v11056_v0  ;;  %v11118_v3 = vld [vmem:[#allocation176_spill] sm:$0xff]  ;;  %v11119_v0 = vld [vmem:[#allocation127_spill] sm:$0xff] }
 0x772   :  { %4156 = vmatpush.msrb.mxu1 %v11057_v43  ;;  %4125 = vmatpush.msrb.mxu0 %v11058_v15  ;;  %v11120_v43 = vld [vmem:[#allocation181_spill] sm:$0xff]  ;;  %v11121_v15 = vld [vmem:[#allocation128_spill] sm:$0xff] }
 0x773   :  { %4196 = vmatpush.msrb.mxu3 %v11059_v12  ;;  %4165 = vmatpush.msrb.mxu2 %v11060_v8  ;;  %v11122_v12 = vld [vmem:[#allocation184_spill] sm:$0xff]  ;;  %v11123_v8 = vld [vmem:[#allocation131_spill] sm:$0xff] }
 0x774   :  { %4157 = vmatpush.msrb.mxu1 %v11061_v49  ;;  %4126 = vmatpush.msrb.mxu0 %v11062_v2  ;;  %v11124_v49 = vld [vmem:[#allocation187_spill] sm:$0xff]  ;;  %v11125_v2 = vld [vmem:[#allocation132_spill] sm:$0xff] }
 0x775   :  { %4197 = vmatpush.msrb.mxu3 %v11063_v52  ;;  %4166 = vmatpush.msrb.mxu2 %v11064_v51  ;;  %v11126_v52 = vld [vmem:[#allocation188_spill] sm:$0xff]  ;;  %v11127_v51 = vld [vmem:[#allocation135_spill] sm:$0xff] }
 0x776   :  { %4222 = vmatpush.msra.mxu1 %v11065_v37  ;;  %4127 = vmatpush.msrb.mxu0 %v11067_v57  ;;  %v11128_v37 = vld [vmem:[#allocation191_spill] sm:$0xff]  ;;  %v11130_v57 = vld [vmem:[#allocation192_spill] sm:$0xff] }
 0x777   :  { %4262 = vmatpush.msra.mxu3 %v11066_v25  ;;  %4167 = vmatpush.msrb.mxu2 %v11068_v42  ;;  %v11129_v25 = vld [vmem:[#allocation136_spill] sm:$0xff]  ;;  %v11131_v42 = vld [vmem:[#allocation139_spill] sm:$0xff] }
 0x778   :  { %4223 = vmatpush.msra.mxu1 %v11069_v27  ;;  %4128 = vmatpush.msrb.mxu0 %v11071_v45  ;;  %v11132_v27 = vld [vmem:[#allocation140_spill] sm:$0xff]  ;;  %v11134_v45 = vld [vmem:[#allocation146_spill] sm:$0xff] }
 0x779   :  { %4263 = vmatpush.msra.mxu3 %v11070_v30  ;;  %4168 = vmatpush.msrb.mxu2 %v11072_v39  ;;  %v11133_v30 = vld [vmem:[#allocation145_spill] sm:$0xff] }
 0x77a   :  { %4224 = vmatpush.msra.mxu1 %v11073_v19  ;;  %4129 = vmatpush.msrb.mxu0 %v11075_v9  ;;  %v11135_v39 = vld [vmem:[#allocation149_spill] sm:$0xff]  ;;  %v11136_v19 = vld [vmem:[#allocation150_spill] sm:$0xff] }
 0x77b   :  { %4264 = vmatpush.msra.mxu3 %v11074_v61  ;;  %4169 = vmatpush.msrb.mxu2 %v11076_v6  ;;  %v11137_v61 = vld [vmem:[#allocation153_spill] sm:$0xff]  ;;  %v11138_v9 = vld [vmem:[#allocation154_spill] sm:$0xff]  ;;  %v11139_v6 = vld [vmem:[#allocation159_spill] sm:$0xff] }
 0x77c   :  { %4225 = vmatpush.msra.mxu1 %v11077_v38  ;;  %4130 = vmatpush.msrb.mxu0 %v11079_v13  ;;  %v11140_v38 = vld [vmem:[#allocation160_spill] sm:$0xff]  ;;  %v11142_v13 = vld [vmem:[#allocation166_spill] sm:$0xff] }
 0x77d   :  { %4265 = vmatpush.msra.mxu3 %v11078_v56  ;;  %4170 = vmatpush.msrb.mxu2 %v11080_v20  ;;  %v11141_v56 = vld [vmem:[#allocation165_spill] sm:$0xff] }
 0x77e   :  { %4226 = vmatpush.msra.mxu1 %v11081_v54  ;;  %4131 = vmatpush.msrb.mxu0 %v11083_v36  ;;  %v11143_v20 = vld [vmem:[#allocation169_spill] sm:$0xff]  ;;  %v11144_v54 = vld [vmem:[#allocation170_spill] sm:$0xff] }
 0x77f   :  { %4266 = vmatpush.msra.mxu3 %v11082_v26  ;;  %4171 = vmatpush.msrb.mxu2 %v11084_v23  ;;  %v11145_v26 = vld [vmem:[#allocation173_spill] sm:$0xff]  ;;  %v11146_v36 = vld [vmem:[#allocation174_spill] sm:$0xff] }
 0x780   :  { %4227 = vmatpush.msra.mxu1 %v11085_v11  ;;  %4132 = vmatpush.msrb.mxu0 %v11087_v41  ;;  %v5200_v23 = vld [vmem:[#allocation15 + $0x30] sm:$0xff]  ;;  %v5201_v11 = vld [vmem:[#allocation15 + $0x38] sm:$0xff] }
 0x781   :  { %4267 = vmatpush.msra.mxu3 %v11086_v10  ;;  %4172 = vmatpush.msrb.mxu2 %v11088_v53  ;;  %v5202_v10 = vld [vmem:[#allocation15 + $0x10] sm:$0xff]  ;;  %v5203_v41 = vld [vmem:[#allocation15 + $0x18] sm:$0xff] }
 0x782   :  { %4228 = vmatpush.msra.mxu1 %v11089_v16  ;;  %4133 = vmatpush.msrb.mxu0 %v11091_v33 }
 0x783   :  { %4268 = vmatpush.msra.mxu3 %v11090_v48  ;;  %4173 = vmatpush.msrb.mxu2 %v11092_v47  ;;  %v11147_v48 = vld [vmem:[#allocation106_spill] sm:$0xff] }
 0x784   :  { %4229 = vmatpush.msra.mxu1 %v11093_v60  ;;  %4134 = vmatpush.msrb.mxu0 %v11095_v59 }
 0x785   :  { %4269 = vmatpush.msra.mxu3 %v11094_v35  ;;  %4174 = vmatpush.msrb.mxu2 %v11096_v21  ;;  %v11148_v21 = vld [vmem:[#allocation107_spill] sm:$0xff] }
 0x786   :  { %4230 = vmatpush.msra.mxu1 %v11097_v34  ;;  %4135 = vmatpush.msrb.mxu0 %v11099_v62 }
 0x787   :  { %4270 = vmatpush.msra.mxu3 %v11098_v1  ;;  %4175 = vmatpush.msrb.mxu2 %v11100_v29  ;;  %v11149_v29 = vld [vmem:[#allocation108_spill] sm:$0xff] }
 0x788   :  { %4231 = vmatpush.msra.mxu1 %v11101_v17  ;;  %4136 = vmatpush.msrb.mxu0 %v11103_v14 }
 0x789   :  { %4271 = vmatpush.msra.mxu3 %v11102_v55  ;;  %4176 = vmatpush.msrb.mxu2 %v11104_v22 }
 0x78a   :  { %4232 = vmatpush.msra.mxu1 %v11105_v18  ;;  %4137 = vmatpush.msrb.mxu0 %v11107_v4  ;;  %v11150_v4 = vld [vmem:[#allocation113_spill] sm:$0xff] }
 0x78b   :  { %4272 = vmatpush.msra.mxu3 %v11106_v46  ;;  %4177 = vmatpush.msrb.mxu2 %v11108_v31 }
 0x78c   :  { %4233 = vmatpush.msra.mxu1 %v11109_v32  ;;  %4202 = vmatpush.msra.mxu0 %v11111_v7  ;;  %v11152_v7 = vld [vmem:[#allocation112_spill] sm:$0xff] }
 0x78d   :  { %4273 = vmatpush.msra.mxu3 %v11110_v58  ;;  %4242 = vmatpush.msra.mxu2 %v11112_v5  ;;  %v11151_v58 = vld [vmem:[#allocation208_spill] sm:$0xff] }
 0x78e   :  { %4234 = vmatpush.msra.mxu1 %v11113_v50  ;;  %4203 = vmatpush.msra.mxu0 %v11115_v63  ;;  %v1522_v5 = vadd.f32 %v11152_v7, %v11151_v58 }
 0x78f   :  { %4274 = vmatpush.msra.mxu3 %v11114_v28  ;;  %4243 = vmatpush.msra.mxu2 %v11116_v24  ;;  %v11153_v24 = vld [vmem:[#allocation121_spill] sm:$0xff] }
 0x790   :  { %4235 = vmatpush.msra.mxu1 %v11117_v40  ;;  %4204 = vmatpush.msra.mxu0 %v11119_v0  ;;  %v1563_v40 = vadd.f32 %v11153_v24, %v1522_v5 }
 0x791   :  { %4275 = vmatpush.msra.mxu3 %v11118_v3  ;;  %4244 = vmatpush.msra.mxu2 %v11120_v43 }
 0x792   :  { %4236 = vmatpush.msra.mxu1 %v11121_v15  ;;  %4205 = vmatpush.msra.mxu0 %v11123_v8 }
 0x793   :  { %4276 = vmatpush.msra.mxu3 %v11122_v12  ;;  %4245 = vmatpush.msra.mxu2 %v11124_v49  ;;  %v11154_v49 = vld [vmem:[#allocation122_spill] sm:$0xff] }
 0x794   :  { %4237 = vmatpush.msra.mxu1 %v11125_v2  ;;  %4206 = vmatpush.msra.mxu0 %v11127_v51  ;;  %v1604_v2 = vadd.f32 %v11154_v49, %v1563_v40 }
 0x795   :  { %4277 = vmatpush.msra.mxu3 %v11126_v52  ;;  %4246 = vmatpush.msra.mxu2 %v11128_v37  ;;  %v11155_v52 = vld [vmem:[#allocation179_spill] sm:$0xff] }
 0x796   :  { %4207 = vmatpush.msra.mxu0 %v11129_v25  ;;  %v11156_v25 = vld [vmem:[#allocation52_spill] sm:$0xff] }
 0x797   :  { %4247 = vmatpush.msra.mxu2 %v11130_v57 }
 0x798   :  { %4208 = vmatpush.msra.mxu0 %v11131_v42  ;;  %v11157_v42 = vld [vmem:[#allocation213_spill] sm:$0xff] }
 0x799   :  { %4248 = vmatpush.msra.mxu2 %v11132_v27  ;;  %v1645_v27 = vadd.f32 %v11157_v42, %v1604_v2 }
 0x79a   :  { %4209 = vmatpush.msra.mxu0 %v11133_v30  ;;  %v11158_v30 = vld [vmem:[#allocation53_spill] sm:$0xff] }
 0x79b   :  { %4249 = vmatpush.msra.mxu2 %v11134_v45  ;;  %v11159_v45 = vld [vmem:[#allocation36_spill] sm:$0xff] }
 0x79c   :  { %4210 = vmatpush.msra.mxu0 %v11135_v39  ;;  %v1317_v39 = vadd.f32 %v11159_v45, %v11158_v30 }
 0x79d   :  { %4250 = vmatpush.msra.mxu2 %v11136_v19 }
 0x79e   :  { %4211 = vmatpush.msra.mxu0 %v11137_v61 }
 0x79f   :  { %4251 = vmatpush.msra.mxu2 %v11138_v9 }
 0x7a0   :  { %4212 = vmatpush.msra.mxu0 %v11139_v6  ;;  %v11160_v6 = vld [vmem:[#allocation214_spill] sm:$0xff] }
 0x7a1   :  { %4252 = vmatpush.msra.mxu2 %v11140_v38  ;;  %v1686_v38 = vadd.f32 %v11160_v6, %v1645_v27 }
 0x7a2   :  { %4213 = vmatpush.msra.mxu0 %v11141_v56 }
 0x7a3   :  { %4253 = vmatpush.msra.mxu2 %v11142_v13  ;;  %v11161_v13 = vld [vmem:[#allocation74_spill] sm:$0xff] }
 0x7a4   :  { %4214 = vmatpush.msra.mxu0 %v11143_v20  ;;  %v1358_v20 = vadd.f32 %v11161_v13, %v1317_v39 }
 0x7a5   :  { %4254 = vmatpush.msra.mxu2 %v11144_v54  ;;  %v11162_v54 = vld [vmem:[#allocation215_spill] sm:$0xff] }
 0x7a6   :  { %4215 = vmatpush.msra.mxu0 %v11145_v26  ;;  %v1727_v26 = vadd.f32 %v11162_v54, %v1686_v38 }
 0x7a7   :  { %4255 = vmatpush.msra.mxu2 %v11146_v36  ;;  %v11163_v36 = vld [vmem:[#allocation37_spill] sm:$0xff] }
 0x7a8   :  { %4216 = vmatpush.msra.mxu0 %v5200_v23  ;;  %v1399_v23 = vadd.f32 %v11163_v36, %v1358_v20 }
 0x7a9   :  { %4256 = vmatpush.msra.mxu2 %v5201_v11 }
 0x7aa   :  { %4217 = vmatpush.msra.mxu0 %v5202_v10 }
 0x7ab   :  { %4257 = vmatpush.msra.mxu2 %v5203_v41  ;;  %v11164_v41 = vld [vmem:[#allocation24_spill] sm:$0xff] }
 0x7ad   :  { %v3872_v53 = vpop.f32.mrf.mxu1 }
 0x7b3   :  { %v3912_v35 = vpop.f32.mrf.mxu3 }
 0x7b5   :  { %v3952_v55 = vpop.f32.mrf.mxu1 }
 0x7bb   :  { %v3992_v32 = vpop.f32.mrf.mxu3 }
 0x7c7   :  { %v3852_v16 = vpop.f32.mrf.mxu0 }
 0x7c8   :  { %v3853_v33 = vadd.f32 %v3852_v16, %v11147_v48 }
 0x7ca   :  { %v3873_v47 = vadd.f32 %v3872_v53, %v3853_v33 }
 0x7cc   :  { %v3995_v60 = vmul.f32 0.5, %v3873_v47  ;;  %v11165_v47 = vld [vmem:[#allocation216_spill] sm:$0xff] }
 0x7cd   :  { %v3892_v59 = vpop.f32.mrf.mxu2 }
 0x7ce   :  { %v3893_v34 = vadd.f32 %v3892_v59, %v11148_v21  ;;  %4508 = vtanh.f32 %v3995_v60  ;;  %v1768_v60 = vadd.f32 %v11165_v47, %v1727_v26 }
 0x7cf   :  { %v3932_v1 = vpop.f32.mrf.mxu0 }
 0x7d0   :  { %v3913_v62 = vadd.f32 %v3912_v35, %v3893_v34  ;;  %v3933_v17 = vadd.f32 %v3932_v1, %v11149_v29  ;;  %v4057_v15 = vpop.f32.mrf.mxu1  ;;  %v11166_v34 = vld [vmem:[#allocation38_spill] sm:$0xff] }
 0x7d1   :  { %v4101_v57 = vadd.f32 %v4057_v15, %v11156_v25  ;;  %v1440_v1 = vadd.f32 %v11166_v34, %v1399_v23 }
 0x7d2   :  { %v3999_v14 = vmul.f32 0.5, %v3913_v62  ;;  %v3953_v22 = vadd.f32 %v3952_v55, %v3933_v17  ;;  %v11167_v55 = vld [vmem:[#allocation111_spill] sm:$0xff] }
 0x7d3   :  { %v4108_v9 = vmul.f32 0.5, %v4101_v57 }
 0x7d4   :  { %4510 = vtanh.f32 %v3999_v14  ;;  %v4509_v46 = vpop.eup %4508  ;;  %v1481_v14 = vadd.f32 %v11167_v55, %v1440_v1 }
 0x7d5   :  { %v3972_v18 = vpop.f32.mrf.mxu2  ;;  %4512 = vtanh.f32 %v3953_v22  ;;  %v3997_v28 = vmul.f32 0.5, %v4509_v46 }
 0x7d6   :  { %v3973_v31 = vadd.f32 %v3972_v18, %v11150_v4 }
 0x7d7   :  { %v3998_v12 = vadd.f32 0.5, %v3997_v28  ;;  %v4097_v33 = vpop.f32.mrf.mxu3 }
 0x7d8   :  { %v3993_v50 = vadd.f32 %v3992_v32, %v3973_v31  ;;  %v4103_v62 = vadd.f32 %v4097_v33, %v1768_v60 }
 0x7da   :  { %v4511_v63 = vpop.eup %4510  ;;  %v4004_v3 = vmul.f32 0.5, %v3993_v50  ;;  %v4113_v31 = vmul.f32 0.5, %v4103_v62 }
 0x7db   :  { %v4001_v0 = vmul.f32 0.5, %v4511_v63  ;;  %v4513_v43 = vpop.eup %4512 }
 0x7dc   :  { %4514 = vtanh.f32 %v4004_v3  ;;  %v4009_v37 = vmul.f32 %v4513_v43, %v3998_v12 }
 0x7dd   :  { %v4002_v8 = vadd.f32 0.5, %v4001_v0 }
 0x7df   :  { %v4008_v51 = vmul.f32 %v4002_v8, %v11155_v52 }
 0x7e1   :  { %v9498_v19 = vadd.f32 %v4009_v37, %v4008_v51 }
 0x7e2   :  { %v4515_v61 = vpop.eup %4514 }
 0x7e3   :  { %4516 = vtanh.f32 %v9498_v19  ;;  %v4006_v56 = vmul.f32 0.5, %v4515_v61 }
 0x7e4   :  { %4518 = vtanh.f32 %v4108_v9 }
 0x7e5   :  { %v4007_v10 = vadd.f32 0.5, %v4006_v56 }
 0x7e7   :  { %v4037_v11 = vpop.f32.mrf.mxu0 }
 0x7e8   :  { %v4100_v53 = vadd.f32 %v4037_v11, %v11164_v41 }
 0x7e9   :  { %v4517_v16 = vpop.eup %4516 }
 0x7ea   :  { %v4012_v35 = vmul.f32 %v4517_v16, %v4007_v10  ;;  %v4104_v59 = vmul.f32 0.5, %v4100_v53  ;;  %v4519_v17 = vpop.eup %4518 }
 0x7eb   :  { %v4110_v46 = vmul.f32 0.5, %v4519_v17 }
 0x7ec   :  { %4014 = vst [vmem:[#allocation18 + $0x30] sm:$0xff] %v4012_v35  ;;  %4520 = vtanh.f32 %v4104_v59  ;;  %4158 = vmatmul.f32.vlgmr.msrb.gmra.mxu1 %v4012_v35  ;;  %4198 = vmatmul.f32.vlgmr.msrb.gmra.mxu3 %v4012_v35 }
 0x7ed   :  { %v4111_v7 = vadd.f32 0.5, %v4110_v46 }
 0x7ee   :  { %v4077_v22 = vpop.f32.mrf.mxu2 }
 0x7ef   :  { %v4102_v18 = vadd.f32 %v4077_v22, %v1481_v14  ;;  %v4117_v28 = vmul.f32 %v4111_v7, %v9330_v44 }
 0x7f1   :  { %4522 = vtanh.f32 %v4102_v18 }
 0x7f2   :  { %v4521_v32 = vpop.eup %4520  ;;  %4524 = vtanh.f32 %v4113_v31 }
 0x7f3   :  { %v4106_v58 = vmul.f32 0.5, %v4521_v32 }
 0x7f4   :  { %4238 = vmatmul.f32.vlgmr.msra.gmra.mxu1 %v4012_v35  ;;  %4278 = vmatmul.f32.vlgmr.msra.gmra.mxu3 %v4012_v35 }
 0x7f5   :  { %v4107_v5 = vadd.f32 0.5, %v4106_v58 }
 0x7f7   :  { %v4523_v50 = vpop.eup %4522 }
 0x7f8   :  { %v4118_v63 = vmul.f32 %v4523_v50, %v4107_v5  ;;  %v4525_v24 = vpop.eup %4524 }
 0x7f9   :  { %v4115_v3 = vmul.f32 0.5, %v4525_v24 }
 0x7fa   :  { %v4119_v40 = vadd.f32 %v4118_v63, %v4117_v28 }
 0x7fb   :  { %v4116_v0 = vadd.f32 0.5, %v4115_v3 }
 0x7fc   :  { %4526 = vtanh.f32 %v4119_v40 }
 0x802   :  { %v4527_v43 = vpop.eup %4526 }
 0x803   :  { %v4121_v15 = vmul.f32 %v4527_v43, %v4116_v0 }
 0x805   :  { %4138 = vmatmul.f32.vlgmr.msrb.gmra.mxu0 %v4121_v15  ;;  %4178 = vmatmul.f32.vlgmr.msrb.gmra.mxu2 %v4121_v15 }
 0x80d   :  { %4218 = vmatmul.f32.vlgmr.msra.gmra.mxu0 %v4121_v15  ;;  %4258 = vmatmul.f32.vlgmr.msra.gmra.mxu2 %v4121_v15 }
 0x869   :  { %v4159_v12 = vpop.f32.mrf.mxu1 }
 0x86f   :  { %v4199_v51 = vpop.f32.mrf.mxu3 }
 0x871   :  { %v4239_v27 = vpop.f32.mrf.mxu1 }
 0x877   :  { %v4279_v9 = vpop.f32.mrf.mxu3 }
 0x882   :  { %v4139_v8 = vpop.f32.mrf.mxu0 }
 0x883   :  { %v4140_v49 = vadd.f32 %v4139_v8, %v11147_v48 }
 0x885   :  { %v4160_v2 = vadd.f32 %v4159_v12, %v4140_v49 }
 0x887   :  { %v4282_v52 = vmul.f32 0.5, %v4160_v2 }
 0x888   :  { %v4179_v44 = vpop.f32.mrf.mxu2 }
 0x889   :  { %v4180_v37 = vadd.f32 %v4179_v44, %v11148_v21  ;;  %4528 = vtanh.f32 %v4282_v52 }
 0x88a   :  { %v4219_v25 = vpop.f32.mrf.mxu0 }
 0x88b   :  { %v4200_v57 = vadd.f32 %v4199_v51, %v4180_v37  ;;  %v4220_v42 = vadd.f32 %v4219_v25, %v11149_v29 }
 0x88d   :  { %v4286_v30 = vmul.f32 0.5, %v4200_v57  ;;  %v4240_v45 = vadd.f32 %v4239_v27, %v4220_v42 }
 0x88f   :  { %4530 = vtanh.f32 %v4286_v30  ;;  %v4529_v61 = vpop.eup %4528 }
 0x890   :  { %v4259_v39 = vpop.f32.mrf.mxu2  ;;  %4532 = vtanh.f32 %v4240_v45  ;;  %v4284_v38 = vmul.f32 0.5, %v4529_v61 }
 0x891   :  { %v4260_v48 = vadd.f32 %v4259_v39, %v11150_v4 }
 0x892   :  { %v4285_v54 = vadd.f32 0.5, %v4284_v38 }
 0x893   :  { %v4280_v6 = vadd.f32 %v4279_v9, %v4260_v48 }
 0x895   :  { %v4531_v56 = vpop.eup %4530  ;;  %v4291_v13 = vmul.f32 0.5, %v4280_v6 }
 0x896   :  { %v4288_v21 = vmul.f32 0.5, %v4531_v56  ;;  %v4533_v20 = vpop.eup %4532 }
 0x897   :  { %4534 = vtanh.f32 %v4291_v13  ;;  %v4296_v36 = vmul.f32 %v4533_v20, %v4285_v54 }
 0x898   :  { %v4289_v26 = vadd.f32 0.5, %v4288_v21 }
 0x89a   :  { %v4295_v29 = vmul.f32 %v4289_v26, %v9498_v19 }
 0x89c   :  { %v4297_v23 = vadd.f32 %v4296_v36, %v4295_v29 }
 0x89d   :  { %v4535_v11 = vpop.eup %4534 }
 0x89e   :  { %4536 = vtanh.f32 %v4297_v23  ;;  %v4293_v10 = vmul.f32 0.5, %v4535_v11 }
 0x8a0   :  { %v4294_v4 = vadd.f32 0.5, %v4293_v10 }
 0x8a4   :  { %v4537_v41 = vpop.eup %4536 }
 0x8a5   :  { %v4299_v53 = vmul.f32 %v4537_v41, %v4294_v4 }
 0x8a7   :  { %4301 = vst [vmem:[#allocation18 + $0x38] sm:$0xff] %v4299_v53 }
 0x8a8   :  { %4318 = dma.vmem_to_hbm [thread:$0]  %s4311_s26, 1024, %s4313_s29, [#allocation9], %s5394_s30, %s5394_s30, %s5395_s7  }
 0x8a9   :  { %5380 = dma.done.wait [#allocation9], 1024  }
 0x8aa   :  { %5381 = vsyncadd [#allocation9], 4294966272 }
 0x8ab   :  { %4323 = vsyncpa [#allocation8], 1 }
 0x8ac   :  { %4324 = vsyncpa [#allocation11], 1 }
 0x8ad   :  { %4325 = vsyncpa [#allocation14], 1 }
 0x8ae   :  { %4326 = vsyncpa [#allocation17], 1 }
 0x8af   :  { %4327 = vsyncpa [#allocation9], 1 }

</bundles_post_ra>
